<compile_context>
chip_gen: v7x
topology: tpu7x:2x2x1
jax: 0.10.0
libtpu: 0.0.40
codegen_flags: <defaults>
</compile_context>

<pallas_src>
import numpy as np
import jax
import jax.numpy as jnp
from jax.experimental import pallas as pl
from jax.experimental.pallas import tpu as pltpu


# ---------------------------------------------------------------------------
# Constant 0/1 selection matrices (geometry only: pool windows, conv tap shifts,
# NCHW flatten order).  Built once with numpy, baked as jit constants.
# ---------------------------------------------------------------------------

def _pool_selectors(in_h, in_w):
    """(4, in_h*in_w, (in_h//2)*(in_w//2)); max_i (x @ sel[i]) == MaxPool2d(2,2)."""
    oh, ow = in_h // 2, in_w // 2
    s = np.zeros((4, in_h * in_w, oh * ow), np.float32)
    for dh in range(2):
        for dw in range(2):
            i = dh * 2 + dw
            for qh in range(oh):
                for qw in range(ow):
                    s[i, (2 * qh + dh) * in_w + (2 * qw + dw), qh * ow + qw] = 1.0
    return s


def _conv_tap_selectors(in_h, in_w, k):
    """(k*k, in_h*in_w, oh*ow); x @ sel[kh*k+kw] shifts/crops x by tap (kh, kw)."""
    oh, ow = in_h - k + 1, in_w - k + 1
    g = np.zeros((k * k, in_h * in_w, oh * ow), np.float32)
    for kh in range(k):
        for kw in range(k):
            t = kh * k + kw
            for qh in range(oh):
                for qw in range(ow):
                    g[t, (qh + kh) * in_w + (qw + kw), qh * ow + qw] = 1.0
    return g


def _flatten_selectors(c, s):
    """flat(1, c*s) = ones(1,c) @ ((x(c,s) @ E) * M) == row-major (c*s + q) flatten."""
    e = np.zeros((s, c * s), np.float32)
    m = np.zeros((c, c * s), np.float32)
    for ci in range(c):
        for si in range(s):
            e[si, ci * s + si] = 1.0
            m[ci, ci * s + si] = 1.0
    return e, m


_S1 = _pool_selectors(28, 28)                  # (4, 784, 196)   pool after conv1
_G2 = _conv_tap_selectors(14, 14, 5)           # (25, 196, 100)  conv2 tap shifts
_S2 = _pool_selectors(10, 10)                  # (4, 100, 25)    pool after conv2
_EFLAT, _MFLAT = _flatten_selectors(16, 25)    # (25, 400), (16, 400)


# ---------------------------------------------------------------------------
# Fused Pallas kernel: one grid step == one image, everything stays in VMEM.
# ---------------------------------------------------------------------------

def _lenet_kernel(p1_ref, w1_ref, b1_ref, s1_ref,
                  g2_ref, w2_ref, b2_ref, s2_ref,
                  ef_ref, mf_ref,
                  wfc1_ref, bfc1_ref, wfc2_ref, bfc2_ref, wfc3_ref, bfc3_ref,
                  out_ref):
    f32 = jnp.float32
    dot = lambda a, b: jnp.dot(a, b, preferred_element_type=f32)

    # conv1 (im2col patches already in VMEM) + bias + ReLU -> (8, 784), lane-dense
    a1 = jnp.maximum(dot(w1_ref[...], p1_ref[0]) + b1_ref[...], 0.0)

    # 2x2 max-pool via 0/1 selection matmuls -> (8, 196)
    pooled1 = jnp.maximum(
        jnp.maximum(dot(a1, s1_ref[0]), dot(a1, s1_ref[1])),
        jnp.maximum(dot(a1, s1_ref[2]), dot(a1, s1_ref[3])))

    # conv2: accumulate the 25 kernel taps, all operands VMEM-resident -> (16, 100)
    acc2 = jnp.zeros((16, 100), f32)
    for t in range(25):
        shifted = dot(pooled1, g2_ref[t])        # (8, 100) spatially shifted slab
        acc2 = acc2 + dot(w2_ref[t], shifted)    # (16, 100)
    a2 = jnp.maximum(acc2 + b2_ref[...], 0.0)

    # second 2x2 max-pool -> (16, 25)
    pooled2 = jnp.maximum(
        jnp.maximum(dot(a2, s2_ref[0]), dot(a2, s2_ref[1])),
        jnp.maximum(dot(a2, s2_ref[2]), dot(a2, s2_ref[3])))

    # NCHW flatten (c*25 + q order == torch .view(-1, 400)), via selection matmuls
    expanded = dot(pooled2, ef_ref[...]) * mf_ref[...]       # (16, 400)
    flat = dot(jnp.ones((1, 16), f32), expanded)             # (1, 400)

    # FC stack (row-vector form)
    h1 = jnp.maximum(dot(flat, wfc1_ref[...]) + bfc1_ref[...], 0.0)   # (1, 120)
    h2 = jnp.maximum(dot(h1, wfc2_ref[...]) + bfc2_ref[...], 0.0)     # (1, 84)
    out_ref[0] = dot(h2, wfc3_ref[...]) + bfc3_ref[...]               # (1, 10)


def _fixed(shape):
    zeros = (0,) * len(shape)
    return pl.BlockSpec(shape, lambda b, _z=zeros: _z)


def net_forward(x_nchw, params):
    """Forward pass of the PyTorch `Net` for NCHW float32 input (N, 3, 32, 32)."""
    f32 = jnp.float32
    N = x_nchw.shape[0]
    x = x_nchw.astype(f32)

    # ---- wrapper-side layout plumbing / one-time weight prep (tiny, fused by XLA) ----
    # conv1 im2col: rows ordered c*25 + kh*5 + kw (matches conv1_w.reshape(6, 75)),
    # columns ordered oh*28 + ow.  Contraction dim padded 75 -> 80 with zero rows.
    slabs = [x[:, :, kh:kh + 28, kw:kw + 28] for kh in range(5) for kw in range(5)]
    p1 = jnp.stack(slabs, axis=2).reshape(N, 75, 784)
    p1 = jnp.pad(p1, ((0, 0), (0, 5), (0, 0)))                                  # (N, 80, 784)

    w1 = jnp.pad(params["conv1_w"].astype(f32).reshape(6, 75), ((0, 2), (0, 5)))  # (8, 80)
    b1 = jnp.pad(params["conv1_b"].astype(f32), (0, 2)).reshape(8, 1)

    w2 = jnp.transpose(params["conv2_w"].astype(f32), (2, 3, 0, 1)).reshape(25, 16, 6)
    w2 = jnp.pad(w2, ((0, 0), (0, 0), (0, 2)))                                  # (25, 16, 8)
    b2 = params["conv2_b"].astype(f32).reshape(16, 1)

    wfc1 = params["fc1_w"].astype(f32).T                                        # (400, 120)
    wfc2 = params["fc2_w"].astype(f32).T                                        # (120, 84)
    wfc3 = params["fc3_w"].astype(f32).T                                        # (84, 10)
    bfc1 = params["fc1_b"].astype(f32).reshape(1, 120)
    bfc2 = params["fc2_b"].astype(f32).reshape(1, 84)
    bfc3 = params["fc3_b"].astype(f32).reshape(1, 10)

    s1, g2, s2 = jnp.asarray(_S1), jnp.asarray(_G2), jnp.asarray(_S2)
    ef, mf = jnp.asarray(_EFLAT), jnp.asarray(_MFLAT)

    operands = (p1, w1, b1, s1, g2, w2, b2, s2, ef, mf,
                wfc1, bfc1, wfc2, bfc2, wfc3, bfc3)
    in_specs = [pl.BlockSpec((1, 80, 784), lambda b: (b, 0, 0))]
    in_specs += [_fixed(op.shape) for op in operands[1:]]

    out = pl.pallas_call(
        _lenet_kernel,
        out_shape=jax.ShapeDtypeStruct((N, 1, 10), f32),
        grid=(N,),
        in_specs=in_specs,
        out_specs=pl.BlockSpec((1, 1, 10), lambda b: (b, 0, 0)),
        compiler_params=pltpu.CompilerParams(
            dimension_semantics=("parallel",),          # batch sharded over TCs on v7x
            vmem_limit_bytes=32 * 1024 * 1024,
        ),
    )(*operands)
    return out.reshape(N, 10)


# ---------------------------------------------------------------------------
# Pure-JAX (non-Pallas) reference for an in-script sanity check.
# ---------------------------------------------------------------------------

def net_forward_reference(x, params):
    hp = jax.lax.Precision.HIGHEST

    def conv(h, w, b):
        y = jax.lax.conv_general_dilated(h, w, (1, 1), "VALID",
                                         dimension_numbers=("NCHW", "OIHW", "NCHW"),
                                         precision=hp)
        return y + b[None, :, None, None]

    def pool(h):
        return jax.lax.reduce_window(h, -jnp.inf, jax.lax.max,
                                     (1, 1, 2, 2), (1, 1, 2, 2), "VALID")

    h = pool(jax.nn.relu(conv(x, params["conv1_w"], params["conv1_b"])))
    h = pool(jax.nn.relu(conv(h, params["conv2_w"], params["conv2_b"])))
    h = h.reshape(h.shape[0], 16 * 5 * 5)
    h = jax.nn.relu(jnp.dot(h, params["fc1_w"].T, precision=hp) + params["fc1_b"])
    h = jax.nn.relu(jnp.dot(h, params["fc2_w"].T, precision=hp) + params["fc2_b"])
    return jnp.dot(h, params["fc3_w"].T, precision=hp) + params["fc3_b"]


# ---------------------------------------------------------------------------
# Deterministic parameter init (PyTorch-default-style uniform, no checkpoint)
# ---------------------------------------------------------------------------

def init_params(key):
    def uni(k, shape, fan_in):
        bound = 1.0 / float(fan_in) ** 0.5
        return jax.random.uniform(k, shape, jnp.float32, -bound, bound)

    ks = jax.random.split(key, 10)
    return {
        "conv1_w": uni(ks[0], (6, 3, 5, 5), 3 * 5 * 5),
        "conv1_b": uni(ks[1], (6,), 3 * 5 * 5),
        "conv2_w": uni(ks[2], (16, 6, 5, 5), 6 * 5 * 5),
        "conv2_b": uni(ks[3], (16,), 6 * 5 * 5),
        "fc1_w": uni(ks[4], (120, 400), 400),
        "fc1_b": uni(ks[5], (120,), 400),
        "fc2_w": uni(ks[6], (84, 120), 120),
        "fc2_b": uni(ks[7], (84,), 120),
        "fc3_w": uni(ks[8], (10, 84), 84),
        "fc3_b": uni(ks[9], (10,), 84),
    }


if __name__ == "__main__":
    key = jax.random.PRNGKey(0)
    k_params, k_x = jax.random.split(key)
    params = init_params(k_params)
    # fc1 expects 16*5*5 features -> 32x32 spatial input (CIFAR-like), small batch.
    x = jax.random.normal(k_x, (2, 3, 32, 32), dtype=jnp.float32)

    out = jax.block_until_ready(jax.jit(net_forward)(x, params))
    assert out.shape == (2, 10) and out.dtype == jnp.float32

    ref = jax.block_until_ready(jax.jit(net_forward_reference)(x, params))
    max_err = float(jnp.max(jnp.abs(out - ref)))
    assert max_err < 5e-2, f"kernel disagrees with reference: max|diff|={max_err}"

    print("KERNEL_OK")
</pallas_src>

<mosaic_0001>
module attributes {stable_mosaic.version = 11 : i64} {
  func.func @_lenet_kernel(%arg0: i32, %arg1: memref<1x80x784xf32, #tpu.memory_space<vmem>>, %arg2: memref<8x80xf32, #tpu.memory_space<vmem>>, %arg3: memref<8x1xf32, #tpu.memory_space<vmem>>, %arg4: memref<4x784x196xf32, #tpu.memory_space<vmem>>, %arg5: memref<25x196x100xf32, #tpu.memory_space<vmem>>, %arg6: memref<25x16x8xf32, #tpu.memory_space<vmem>>, %arg7: memref<16x1xf32, #tpu.memory_space<vmem>>, %arg8: memref<4x100x25xf32, #tpu.memory_space<vmem>>, %arg9: memref<25x400xf32, #tpu.memory_space<vmem>>, %arg10: memref<16x400xf32, #tpu.memory_space<vmem>>, %arg11: memref<400x120xf32, #tpu.memory_space<vmem>>, %arg12: memref<1x120xf32, #tpu.memory_space<vmem>>, %arg13: memref<120x84xf32, #tpu.memory_space<vmem>>, %arg14: memref<1x84xf32, #tpu.memory_space<vmem>>, %arg15: memref<84x10xf32, #tpu.memory_space<vmem>>, %arg16: memref<1x10xf32, #tpu.memory_space<vmem>>, %arg17: memref<1x1x10xf32, #tpu.memory_space<vmem>>) attributes {dimension_semantics = [#tpu.dimension_semantics<parallel>], iteration_bounds = array<i64: 2>, scalar_prefetch = 0 : i64, scratch_operands = 0 : i64, tpu.core_type = #tpu.core_type<tc>, window_params = [{transform_indices = @transform_0, window_bounds = array<i64: 1, 80, 784>}, {pipeline_mode = #tpu.pipeline_mode<synchronous>, transform_indices = @transform_1, window_bounds = array<i64: 8, 80>}, {pipeline_mode = #tpu.pipeline_mode<synchronous>, transform_indices = @transform_2, window_bounds = array<i64: 8, 1>}, {pipeline_mode = #tpu.pipeline_mode<synchronous>, transform_indices = @transform_3, window_bounds = array<i64: 4, 784, 196>}, {pipeline_mode = #tpu.pipeline_mode<synchronous>, transform_indices = @transform_4, window_bounds = array<i64: 25, 196, 100>}, {pipeline_mode = #tpu.pipeline_mode<synchronous>, transform_indices = @transform_5, window_bounds = array<i64: 25, 16, 8>}, {pipeline_mode = #tpu.pipeline_mode<synchronous>, transform_indices = @transform_6, window_bounds = array<i64: 16, 1>}, {pipeline_mode = #tpu.pipeline_mode<synchronous>, transform_indices = @transform_7, window_bounds = array<i64: 4, 100, 25>}, {pipeline_mode = #tpu.pipeline_mode<synchronous>, transform_indices = @transform_8, window_bounds = array<i64: 25, 400>}, {pipeline_mode = #tpu.pipeline_mode<synchronous>, transform_indices = @transform_9, window_bounds = array<i64: 16, 400>}, {pipeline_mode = #tpu.pipeline_mode<synchronous>, transform_indices = @transform_10, window_bounds = array<i64: 400, 120>}, {pipeline_mode = #tpu.pipeline_mode<synchronous>, transform_indices = @transform_11, window_bounds = array<i64: 1, 120>}, {pipeline_mode = #tpu.pipeline_mode<synchronous>, transform_indices = @transform_12, window_bounds = array<i64: 120, 84>}, {pipeline_mode = #tpu.pipeline_mode<synchronous>, transform_indices = @transform_13, window_bounds = array<i64: 1, 84>}, {pipeline_mode = #tpu.pipeline_mode<synchronous>, transform_indices = @transform_14, window_bounds = array<i64: 84, 10>}, {pipeline_mode = #tpu.pipeline_mode<synchronous>, transform_indices = @transform_15, window_bounds = array<i64: 1, 10>}, {transform_indices = @transform_16, window_bounds = array<i64: 1, 1, 10>}]} {
    %c0 = arith.constant 0 : index
    %c0_0 = arith.constant 0 : index
    %0 = vector.load %arg2[%c0, %c0_0] : memref<8x80xf32, #tpu.memory_space<vmem>>, vector<8x80xf32>
    %c0_1 = arith.constant 0 : index
    %c0_2 = arith.constant 0 : index
    %c0_3 = arith.constant 0 : index
    %1 = vector.load %arg1[%c0_1, %c0_2, %c0_3] : memref<1x80x784xf32, #tpu.memory_space<vmem>>, vector<1x80x784xf32>
    %2 = vector.shape_cast %1 : vector<1x80x784xf32> to vector<80x784xf32>
    %cst = arith.constant dense<0.000000e+00> : vector<8x784xf32>
    %3 = tpu.matmul %0, %2, %cst {dimension_numbers = #tpu.dot_dimension_numbers<[1], [0], [0], [1], [0, 0, 1, 1], [], []>} : vector<8x80xf32>, vector<80x784xf32>, vector<8x784xf32> -> vector<8x784xf32>
    %c0_4 = arith.constant 0 : index
    %c0_5 = arith.constant 0 : index
    %4 = vector.load %arg3[%c0_4, %c0_5] : memref<8x1xf32, #tpu.memory_space<vmem>>, vector<8x1xf32>
    %5 = vector.broadcast %4 : vector<8x1xf32> to vector<8x784xf32>
    %6 = arith.addf %3, %5 : vector<8x784xf32>
    %cst_6 = arith.constant 0.000000e+00 : f32
    %7 = vector.broadcast %cst_6 : f32 to vector<8x784xf32>
    %8 = arith.maximumf %6, %7 : vector<8x784xf32>
    %c0_7 = arith.constant 0 : index
    %c0_8 = arith.constant 0 : index
    %c0_9 = arith.constant 0 : index
    %9 = vector.load %arg4[%c0_7, %c0_8, %c0_9] : memref<4x784x196xf32, #tpu.memory_space<vmem>>, vector<1x784x196xf32>
    %10 = vector.shape_cast %9 : vector<1x784x196xf32> to vector<784x196xf32>
    %cst_10 = arith.constant dense<0.000000e+00> : vector<8x196xf32>
    %11 = tpu.matmul %8, %10, %cst_10 {dimension_numbers = #tpu.dot_dimension_numbers<[1], [0], [0], [1], [0, 0, 1, 1], [], []>} : vector<8x784xf32>, vector<784x196xf32>, vector<8x196xf32> -> vector<8x196xf32>
    %c1 = arith.constant 1 : index
    %c0_11 = arith.constant 0 : index
    %c0_12 = arith.constant 0 : index
    %12 = vector.load %arg4[%c1, %c0_11, %c0_12] : memref<4x784x196xf32, #tpu.memory_space<vmem>>, vector<1x784x196xf32>
    %13 = vector.shape_cast %12 : vector<1x784x196xf32> to vector<784x196xf32>
    %cst_13 = arith.constant dense<0.000000e+00> : vector<8x196xf32>
    %14 = tpu.matmul %8, %13, %cst_13 {dimension_numbers = #tpu.dot_dimension_numbers<[1], [0], [0], [1], [0, 0, 1, 1], [], []>} : vector<8x784xf32>, vector<784x196xf32>, vector<8x196xf32> -> vector<8x196xf32>
    %15 = arith.maximumf %11, %14 : vector<8x196xf32>
    %c2 = arith.constant 2 : index
    %c0_14 = arith.constant 0 : index
    %c0_15 = arith.constant 0 : index
    %16 = vector.load %arg4[%c2, %c0_14, %c0_15] : memref<4x784x196xf32, #tpu.memory_space<vmem>>, vector<1x784x196xf32>
    %17 = vector.shape_cast %16 : vector<1x784x196xf32> to vector<784x196xf32>
    %cst_16 = arith.constant dense<0.000000e+00> : vector<8x196xf32>
    %18 = tpu.matmul %8, %17, %cst_16 {dimension_numbers = #tpu.dot_dimension_numbers<[1], [0], [0], [1], [0, 0, 1, 1], [], []>} : vector<8x784xf32>, vector<784x196xf32>, vector<8x196xf32> -> vector<8x196xf32>
    %c3 = arith.constant 3 : index
    %c0_17 = arith.constant 0 : index
    %c0_18 = arith.constant 0 : index
    %19 = vector.load %arg4[%c3, %c0_17, %c0_18] : memref<4x784x196xf32, #tpu.memory_space<vmem>>, vector<1x784x196xf32>
    %20 = vector.shape_cast %19 : vector<1x784x196xf32> to vector<784x196xf32>
    %cst_19 = arith.constant dense<0.000000e+00> : vector<8x196xf32>
    %21 = tpu.matmul %8, %20, %cst_19 {dimension_numbers = #tpu.dot_dimension_numbers<[1], [0], [0], [1], [0, 0, 1, 1], [], []>} : vector<8x784xf32>, vector<784x196xf32>, vector<8x196xf32> -> vector<8x196xf32>
    %22 = arith.maximumf %18, %21 : vector<8x196xf32>
    %23 = arith.maximumf %15, %22 : vector<8x196xf32>
    %cst_20 = arith.constant 0.000000e+00 : f32
    %24 = vector.broadcast %cst_20 : f32 to vector<16x100xf32>
    %c0_21 = arith.constant 0 : index
    %c0_22 = arith.constant 0 : index
    %c0_23 = arith.constant 0 : index
    %25 = vector.load %arg5[%c0_21, %c0_22, %c0_23] : memref<25x196x100xf32, #tpu.memory_space<vmem>>, vector<1x196x100xf32>
    %26 = vector.shape_cast %25 : vector<1x196x100xf32> to vector<196x100xf32>
    %cst_24 = arith.constant dense<0.000000e+00> : vector<8x100xf32>
    %27 = tpu.matmul %23, %26, %cst_24 {dimension_numbers = #tpu.dot_dimension_numbers<[1], [0], [0], [1], [0, 0, 1, 1], [], []>} : vector<8x196xf32>, vector<196x100xf32>, vector<8x100xf32> -> vector<8x100xf32>
    %c0_25 = arith.constant 0 : index
    %c0_26 = arith.constant 0 : index
    %c0_27 = arith.constant 0 : index
    %28 = vector.load %arg6[%c0_25, %c0_26, %c0_27] : memref<25x16x8xf32, #tpu.memory_space<vmem>>, vector<1x16x8xf32>
    %29 = vector.shape_cast %28 : vector<1x16x8xf32> to vector<16x8xf32>
    %cst_28 = arith.constant dense<0.000000e+00> : vector<16x100xf32>
    %30 = tpu.matmul %29, %27, %cst_28 {dimension_numbers = #tpu.dot_dimension_numbers<[1], [0], [0], [1], [0, 0, 1, 1], [], []>} : vector<16x8xf32>, vector<8x100xf32>, vector<16x100xf32> -> vector<16x100xf32>
    %31 = arith.addf %24, %30 : vector<16x100xf32>
    %c1_29 = arith.constant 1 : index
    %c0_30 = arith.constant 0 : index
    %c0_31 = arith.constant 0 : index
    %32 = vector.load %arg5[%c1_29, %c0_30, %c0_31] : memref<25x196x100xf32, #tpu.memory_space<vmem>>, vector<1x196x100xf32>
    %33 = vector.shape_cast %32 : vector<1x196x100xf32> to vector<196x100xf32>
    %cst_32 = arith.constant dense<0.000000e+00> : vector<8x100xf32>
    %34 = tpu.matmul %23, %33, %cst_32 {dimension_numbers = #tpu.dot_dimension_numbers<[1], [0], [0], [1], [0, 0, 1, 1], [], []>} : vector<8x196xf32>, vector<196x100xf32>, vector<8x100xf32> -> vector<8x100xf32>
    %c1_33 = arith.constant 1 : index
    %c0_34 = arith.constant 0 : index
    %c0_35 = arith.constant 0 : index
    %35 = vector.load %arg6[%c1_33, %c0_34, %c0_35] : memref<25x16x8xf32, #tpu.memory_space<vmem>>, vector<1x16x8xf32>
    %36 = vector.shape_cast %35 : vector<1x16x8xf32> to vector<16x8xf32>
    %cst_36 = arith.constant dense<0.000000e+00> : vector<16x100xf32>
    %37 = tpu.matmul %36, %34, %cst_36 {dimension_numbers = #tpu.dot_dimension_numbers<[1], [0], [0], [1], [0, 0, 1, 1], [], []>} : vector<16x8xf32>, vector<8x100xf32>, vector<16x100xf32> -> vector<16x100xf32>
    %38 = arith.addf %31, %37 : vector<16x100xf32>
    %c2_37 = arith.constant 2 : index
    %c0_38 = arith.constant 0 : index
    %c0_39 = arith.constant 0 : index
    %39 = vector.load %arg5[%c2_37, %c0_38, %c0_39] : memref<25x196x100xf32, #tpu.memory_space<vmem>>, vector<1x196x100xf32>
    %40 = vector.shape_cast %39 : vector<1x196x100xf32> to vector<196x100xf32>
    %cst_40 = arith.constant dense<0.000000e+00> : vector<8x100xf32>
    %41 = tpu.matmul %23, %40, %cst_40 {dimension_numbers = #tpu.dot_dimension_numbers<[1], [0], [0], [1], [0, 0, 1, 1], [], []>} : vector<8x196xf32>, vector<196x100xf32>, vector<8x100xf32> -> vector<8x100xf32>
    %c2_41 = arith.constant 2 : index
    %c0_42 = arith.constant 0 : index
    %c0_43 = arith.constant 0 : index
    %42 = vector.load %arg6[%c2_41, %c0_42, %c0_43] : memref<25x16x8xf32, #tpu.memory_space<vmem>>, vector<1x16x8xf32>
    %43 = vector.shape_cast %42 : vector<1x16x8xf32> to vector<16x8xf32>
    %cst_44 = arith.constant dense<0.000000e+00> : vector<16x100xf32>
    %44 = tpu.matmul %43, %41, %cst_44 {dimension_numbers = #tpu.dot_dimension_numbers<[1], [0], [0], [1], [0, 0, 1, 1], [], []>} : vector<16x8xf32>, vector<8x100xf32>, vector<16x100xf32> -> vector<16x100xf32>
    %45 = arith.addf %38, %44 : vector<16x100xf32>
    %c3_45 = arith.constant 3 : index
    %c0_46 = arith.constant 0 : index
    %c0_47 = arith.constant 0 : index
    %46 = vector.load %arg5[%c3_45, %c0_46, %c0_47] : memref<25x196x100xf32, #tpu.memory_space<vmem>>, vector<1x196x100xf32>
    %47 = vector.shape_cast %46 : vector<1x196x100xf32> to vector<196x100xf32>
    %cst_48 = arith.constant dense<0.000000e+00> : vector<8x100xf32>
    %48 = tpu.matmul %23, %47, %cst_48 {dimension_numbers = #tpu.dot_dimension_numbers<[1], [0], [0], [1], [0, 0, 1, 1], [], []>} : vector<8x196xf32>, vector<196x100xf32>, vector<8x100xf32> -> vector<8x100xf32>
    %c3_49 = arith.constant 3 : index
    %c0_50 = arith.constant 0 : index
    %c0_51 = arith.constant 0 : index
    %49 = vector.load %arg6[%c3_49, %c0_50, %c0_51] : memref<25x16x8xf32, #tpu.memory_space<vmem>>, vector<1x16x8xf32>
    %50 = vector.shape_cast %49 : vector<1x16x8xf32> to vector<16x8xf32>
    %cst_52 = arith.constant dense<0.000000e+00> : vector<16x100xf32>
    %51 = tpu.matmul %50, %48, %cst_52 {dimension_numbers = #tpu.dot_dimension_numbers<[1], [0], [0], [1], [0, 0, 1, 1], [], []>} : vector<16x8xf32>, vector<8x100xf32>, vector<16x100xf32> -> vector<16x100xf32>
    %52 = arith.addf %45, %51 : vector<16x100xf32>
    %c4 = arith.constant 4 : index
    %c0_53 = arith.constant 0 : index
    %c0_54 = arith.constant 0 : index
    %53 = vector.load %arg5[%c4, %c0_53, %c0_54] : memref<25x196x100xf32, #tpu.memory_space<vmem>>, vector<1x196x100xf32>
    %54 = vector.shape_cast %53 : vector<1x196x100xf32> to vector<196x100xf32>
    %cst_55 = arith.constant dense<0.000000e+00> : vector<8x100xf32>
    %55 = tpu.matmul %23, %54, %cst_55 {dimension_numbers = #tpu.dot_dimension_numbers<[1], [0], [0], [1], [0, 0, 1, 1], [], []>} : vector<8x196xf32>, vector<196x100xf32>, vector<8x100xf32> -> vector<8x100xf32>
    %c4_56 = arith.constant 4 : index
    %c0_57 = arith.constant 0 : index
    %c0_58 = arith.constant 0 : index
    %56 = vector.load %arg6[%c4_56, %c0_57, %c0_58] : memref<25x16x8xf32, #tpu.memory_space<vmem>>, vector<1x16x8xf32>
    %57 = vector.shape_cast %56 : vector<1x16x8xf32> to vector<16x8xf32>
    %cst_59 = arith.constant dense<0.000000e+00> : vector<16x100xf32>
    %58 = tpu.matmul %57, %55, %cst_59 {dimension_numbers = #tpu.dot_dimension_numbers<[1], [0], [0], [1], [0, 0, 1, 1], [], []>} : vector<16x8xf32>, vector<8x100xf32>, vector<16x100xf32> -> vector<16x100xf32>
    %59 = arith.addf %52, %58 : vector<16x100xf32>
    %c5 = arith.constant 5 : index
    %c0_60 = arith.constant 0 : index
    %c0_61 = arith.constant 0 : index
    %60 = vector.load %arg5[%c5, %c0_60, %c0_61] : memref<25x196x100xf32, #tpu.memory_space<vmem>>, vector<1x196x100xf32>
    %61 = vector.shape_cast %60 : vector<1x196x100xf32> to vector<196x100xf32>
    %cst_62 = arith.constant dense<0.000000e+00> : vector<8x100xf32>
    %62 = tpu.matmul %23, %61, %cst_62 {dimension_numbers = #tpu.dot_dimension_numbers<[1], [0], [0], [1], [0, 0, 1, 1], [], []>} : vector<8x196xf32>, vector<196x100xf32>, vector<8x100xf32> -> vector<8x100xf32>
    %c5_63 = arith.constant 5 : index
    %c0_64 = arith.constant 0 : index
    %c0_65 = arith.constant 0 : index
    %63 = vector.load %arg6[%c5_63, %c0_64, %c0_65] : memref<25x16x8xf32, #tpu.memory_space<vmem>>, vector<1x16x8xf32>
    %64 = vector.shape_cast %63 : vector<1x16x8xf32> to vector<16x8xf32>
    %cst_66 = arith.constant dense<0.000000e+00> : vector<16x100xf32>
    %65 = tpu.matmul %64, %62, %cst_66 {dimension_numbers = #tpu.dot_dimension_numbers<[1], [0], [0], [1], [0, 0, 1, 1], [], []>} : vector<16x8xf32>, vector<8x100xf32>, vector<16x100xf32> -> vector<16x100xf32>
    %66 = arith.addf %59, %65 : vector<16x100xf32>
    %c6 = arith.constant 6 : index
    %c0_67 = arith.constant 0 : index
    %c0_68 = arith.constant 0 : index
    %67 = vector.load %arg5[%c6, %c0_67, %c0_68] : memref<25x196x100xf32, #tpu.memory_space<vmem>>, vector<1x196x100xf32>
    %68 = vector.shape_cast %67 : vector<1x196x100xf32> to vector<196x100xf32>
    %cst_69 = arith.constant dense<0.000000e+00> : vector<8x100xf32>
    %69 = tpu.matmul %23, %68, %cst_69 {dimension_numbers = #tpu.dot_dimension_numbers<[1], [0], [0], [1], [0, 0, 1, 1], [], []>} : vector<8x196xf32>, vector<196x100xf32>, vector<8x100xf32> -> vector<8x100xf32>
    %c6_70 = arith.constant 6 : index
    %c0_71 = arith.constant 0 : index
    %c0_72 = arith.constant 0 : index
    %70 = vector.load %arg6[%c6_70, %c0_71, %c0_72] : memref<25x16x8xf32, #tpu.memory_space<vmem>>, vector<1x16x8xf32>
    %71 = vector.shape_cast %70 : vector<1x16x8xf32> to vector<16x8xf32>
    %cst_73 = arith.constant dense<0.000000e+00> : vector<16x100xf32>
    %72 = tpu.matmul %71, %69, %cst_73 {dimension_numbers = #tpu.dot_dimension_numbers<[1], [0], [0], [1], [0, 0, 1, 1], [], []>} : vector<16x8xf32>, vector<8x100xf32>, vector<16x100xf32> -> vector<16x100xf32>
    %73 = arith.addf %66, %72 : vector<16x100xf32>
    %c7 = arith.constant 7 : index
    %c0_74 = arith.constant 0 : index
    %c0_75 = arith.constant 0 : index
    %74 = vector.load %arg5[%c7, %c0_74, %c0_75] : memref<25x196x100xf32, #tpu.memory_space<vmem>>, vector<1x196x100xf32>
    %75 = vector.shape_cast %74 : vector<1x196x100xf32> to vector<196x100xf32>
    %cst_76 = arith.constant dense<0.000000e+00> : vector<8x100xf32>
    %76 = tpu.matmul %23, %75, %cst_76 {dimension_numbers = #tpu.dot_dimension_numbers<[1], [0], [0], [1], [0, 0, 1, 1], [], []>} : vector<8x196xf32>, vector<196x100xf32>, vector<8x100xf32> -> vector<8x100xf32>
    %c7_77 = arith.constant 7 : index
    %c0_78 = arith.constant 0 : index
    %c0_79 = arith.constant 0 : index
    %77 = vector.load %arg6[%c7_77, %c0_78, %c0_79] : memref<25x16x8xf32, #tpu.memory_space<vmem>>, vector<1x16x8xf32>
    %78 = vector.shape_cast %77 : vector<1x16x8xf32> to vector<16x8xf32>
    %cst_80 = arith.constant dense<0.000000e+00> : vector<16x100xf32>
    %79 = tpu.matmul %78, %76, %cst_80 {dimension_numbers = #tpu.dot_dimension_numbers<[1], [0], [0], [1], [0, 0, 1, 1], [], []>} : vector<16x8xf32>, vector<8x100xf32>, vector<16x100xf32> -> vector<16x100xf32>
    %80 = arith.addf %73, %79 : vector<16x100xf32>
    %c8 = arith.constant 8 : index
    %c0_81 = arith.constant 0 : index
    %c0_82 = arith.constant 0 : index
    %81 = vector.load %arg5[%c8, %c0_81, %c0_82] : memref<25x196x100xf32, #tpu.memory_space<vmem>>, vector<1x196x100xf32>
    %82 = vector.shape_cast %81 : vector<1x196x100xf32> to vector<196x100xf32>
    %cst_83 = arith.constant dense<0.000000e+00> : vector<8x100xf32>
    %83 = tpu.matmul %23, %82, %cst_83 {dimension_numbers = #tpu.dot_dimension_numbers<[1], [0], [0], [1], [0, 0, 1, 1], [], []>} : vector<8x196xf32>, vector<196x100xf32>, vector<8x100xf32> -> vector<8x100xf32>
    %c8_84 = arith.constant 8 : index
    %c0_85 = arith.constant 0 : index
    %c0_86 = arith.constant 0 : index
    %84 = vector.load %arg6[%c8_84, %c0_85, %c0_86] : memref<25x16x8xf32, #tpu.memory_space<vmem>>, vector<1x16x8xf32>
    %85 = vector.shape_cast %84 : vector<1x16x8xf32> to vector<16x8xf32>
    %cst_87 = arith.constant dense<0.000000e+00> : vector<16x100xf32>
    %86 = tpu.matmul %85, %83, %cst_87 {dimension_numbers = #tpu.dot_dimension_numbers<[1], [0], [0], [1], [0, 0, 1, 1], [], []>} : vector<16x8xf32>, vector<8x100xf32>, vector<16x100xf32> -> vector<16x100xf32>
    %87 = arith.addf %80, %86 : vector<16x100xf32>
    %c9 = arith.constant 9 : index
    %c0_88 = arith.constant 0 : index
    %c0_89 = arith.constant 0 : index
    %88 = vector.load %arg5[%c9, %c0_88, %c0_89] : memref<25x196x100xf32, #tpu.memory_space<vmem>>, vector<1x196x100xf32>
    %89 = vector.shape_cast %88 : vector<1x196x100xf32> to vector<196x100xf32>
    %cst_90 = arith.constant dense<0.000000e+00> : vector<8x100xf32>
    %90 = tpu.matmul %23, %89, %cst_90 {dimension_numbers = #tpu.dot_dimension_numbers<[1], [0], [0], [1], [0, 0, 1, 1], [], []>} : vector<8x196xf32>, vector<196x100xf32>, vector<8x100xf32> -> vector<8x100xf32>
    %c9_91 = arith.constant 9 : index
    %c0_92 = arith.constant 0 : index
    %c0_93 = arith.constant 0 : index
    %91 = vector.load %arg6[%c9_91, %c0_92, %c0_93] : memref<25x16x8xf32, #tpu.memory_space<vmem>>, vector<1x16x8xf32>
    %92 = vector.shape_cast %91 : vector<1x16x8xf32> to vector<16x8xf32>
    %cst_94 = arith.constant dense<0.000000e+00> : vector<16x100xf32>
    %93 = tpu.matmul %92, %90, %cst_94 {dimension_numbers = #tpu.dot_dimension_numbers<[1], [0], [0], [1], [0, 0, 1, 1], [], []>} : vector<16x8xf32>, vector<8x100xf32>, vector<16x100xf32> -> vector<16x100xf32>
    %94 = arith.addf %87, %93 : vector<16x100xf32>
    %c10 = arith.constant 10 : index
    %c0_95 = arith.constant 0 : index
    %c0_96 = arith.constant 0 : index
    %95 = vector.load %arg5[%c10, %c0_95, %c0_96] : memref<25x196x100xf32, #tpu.memory_space<vmem>>, vector<1x196x100xf32>
    %96 = vector.shape_cast %95 : vector<1x196x100xf32> to vector<196x100xf32>
    %cst_97 = arith.constant dense<0.000000e+00> : vector<8x100xf32>
    %97 = tpu.matmul %23, %96, %cst_97 {dimension_numbers = #tpu.dot_dimension_numbers<[1], [0], [0], [1], [0, 0, 1, 1], [], []>} : vector<8x196xf32>, vector<196x100xf32>, vector<8x100xf32> -> vector<8x100xf32>
    %c10_98 = arith.constant 10 : index
    %c0_99 = arith.constant 0 : index
    %c0_100 = arith.constant 0 : index
    %98 = vector.load %arg6[%c10_98, %c0_99, %c0_100] : memref<25x16x8xf32, #tpu.memory_space<vmem>>, vector<1x16x8xf32>
    %99 = vector.shape_cast %98 : vector<1x16x8xf32> to vector<16x8xf32>
    %cst_101 = arith.constant dense<0.000000e+00> : vector<16x100xf32>
    %100 = tpu.matmul %99, %97, %cst_101 {dimension_numbers = #tpu.dot_dimension_numbers<[1], [0], [0], [1], [0, 0, 1, 1], [], []>} : vector<16x8xf32>, vector<8x100xf32>, vector<16x100xf32> -> vector<16x100xf32>
    %101 = arith.addf %94, %100 : vector<16x100xf32>
    %c11 = arith.constant 11 : index
    %c0_102 = arith.constant 0 : index
    %c0_103 = arith.constant 0 : index
    %102 = vector.load %arg5[%c11, %c0_102, %c0_103] : memref<25x196x100xf32, #tpu.memory_space<vmem>>, vector<1x196x100xf32>
    %103 = vector.shape_cast %102 : vector<1x196x100xf32> to vector<196x100xf32>
    %cst_104 = arith.constant dense<0.000000e+00> : vector<8x100xf32>
    %104 = tpu.matmul %23, %103, %cst_104 {dimension_numbers = #tpu.dot_dimension_numbers<[1], [0], [0], [1], [0, 0, 1, 1], [], []>} : vector<8x196xf32>, vector<196x100xf32>, vector<8x100xf32> -> vector<8x100xf32>
    %c11_105 = arith.constant 11 : index
    %c0_106 = arith.constant 0 : index
    %c0_107 = arith.constant 0 : index
    %105 = vector.load %arg6[%c11_105, %c0_106, %c0_107] : memref<25x16x8xf32, #tpu.memory_space<vmem>>, vector<1x16x8xf32>
    %106 = vector.shape_cast %105 : vector<1x16x8xf32> to vector<16x8xf32>
    %cst_108 = arith.constant dense<0.000000e+00> : vector<16x100xf32>
    %107 = tpu.matmul %106, %104, %cst_108 {dimension_numbers = #tpu.dot_dimension_numbers<[1], [0], [0], [1], [0, 0, 1, 1], [], []>} : vector<16x8xf32>, vector<8x100xf32>, vector<16x100xf32> -> vector<16x100xf32>
    %108 = arith.addf %101, %107 : vector<16x100xf32>
    %c12 = arith.constant 12 : index
    %c0_109 = arith.constant 0 : index
    %c0_110 = arith.constant 0 : index
    %109 = vector.load %arg5[%c12, %c0_109, %c0_110] : memref<25x196x100xf32, #tpu.memory_space<vmem>>, vector<1x196x100xf32>
    %110 = vector.shape_cast %109 : vector<1x196x100xf32> to vector<196x100xf32>
    %cst_111 = arith.constant dense<0.000000e+00> : vector<8x100xf32>
    %111 = tpu.matmul %23, %110, %cst_111 {dimension_numbers = #tpu.dot_dimension_numbers<[1], [0], [0], [1], [0, 0, 1, 1], [], []>} : vector<8x196xf32>, vector<196x100xf32>, vector<8x100xf32> -> vector<8x100xf32>
    %c12_112 = arith.constant 12 : index
    %c0_113 = arith.constant 0 : index
    %c0_114 = arith.constant 0 : index
    %112 = vector.load %arg6[%c12_112, %c0_113, %c0_114] : memref<25x16x8xf32, #tpu.memory_space<vmem>>, vector<1x16x8xf32>
    %113 = vector.shape_cast %112 : vector<1x16x8xf32> to vector<16x8xf32>
    %cst_115 = arith.constant dense<0.000000e+00> : vector<16x100xf32>
    %114 = tpu.matmul %113, %111, %cst_115 {dimension_numbers = #tpu.dot_dimension_numbers<[1], [0], [0], [1], [0, 0, 1, 1], [], []>} : vector<16x8xf32>, vector<8x100xf32>, vector<16x100xf32> -> vector<16x100xf32>
    %115 = arith.addf %108, %114 : vector<16x100xf32>
    %c13 = arith.constant 13 : index
    %c0_116 = arith.constant 0 : index
    %c0_117 = arith.constant 0 : index
    %116 = vector.load %arg5[%c13, %c0_116, %c0_117] : memref<25x196x100xf32, #tpu.memory_space<vmem>>, vector<1x196x100xf32>
    %117 = vector.shape_cast %116 : vector<1x196x100xf32> to vector<196x100xf32>
    %cst_118 = arith.constant dense<0.000000e+00> : vector<8x100xf32>
    %118 = tpu.matmul %23, %117, %cst_118 {dimension_numbers = #tpu.dot_dimension_numbers<[1], [0], [0], [1], [0, 0, 1, 1], [], []>} : vector<8x196xf32>, vector<196x100xf32>, vector<8x100xf32> -> vector<8x100xf32>
    %c13_119 = arith.constant 13 : index
    %c0_120 = arith.constant 0 : index
    %c0_121 = arith.constant 0 : index
    %119 = vector.load %arg6[%c13_119, %c0_120, %c0_121] : memref<25x16x8xf32, #tpu.memory_space<vmem>>, vector<1x16x8xf32>
    %120 = vector.shape_cast %119 : vector<1x16x8xf32> to vector<16x8xf32>
    %cst_122 = arith.constant dense<0.000000e+00> : vector<16x100xf32>
    %121 = tpu.matmul %120, %118, %cst_122 {dimension_numbers = #tpu.dot_dimension_numbers<[1], [0], [0], [1], [0, 0, 1, 1], [], []>} : vector<16x8xf32>, vector<8x100xf32>, vector<16x100xf32> -> vector<16x100xf32>
    %122 = arith.addf %115, %121 : vector<16x100xf32>
    %c14 = arith.constant 14 : index
    %c0_123 = arith.constant 0 : index
    %c0_124 = arith.constant 0 : index
    %123 = vector.load %arg5[%c14, %c0_123, %c0_124] : memref<25x196x100xf32, #tpu.memory_space<vmem>>, vector<1x196x100xf32>
    %124 = vector.shape_cast %123 : vector<1x196x100xf32> to vector<196x100xf32>
    %cst_125 = arith.constant dense<0.000000e+00> : vector<8x100xf32>
    %125 = tpu.matmul %23, %124, %cst_125 {dimension_numbers = #tpu.dot_dimension_numbers<[1], [0], [0], [1], [0, 0, 1, 1], [], []>} : vector<8x196xf32>, vector<196x100xf32>, vector<8x100xf32> -> vector<8x100xf32>
    %c14_126 = arith.constant 14 : index
    %c0_127 = arith.constant 0 : index
    %c0_128 = arith.constant 0 : index
    %126 = vector.load %arg6[%c14_126, %c0_127, %c0_128] : memref<25x16x8xf32, #tpu.memory_space<vmem>>, vector<1x16x8xf32>
    %127 = vector.shape_cast %126 : vector<1x16x8xf32> to vector<16x8xf32>
    %cst_129 = arith.constant dense<0.000000e+00> : vector<16x100xf32>
    %128 = tpu.matmul %127, %125, %cst_129 {dimension_numbers = #tpu.dot_dimension_numbers<[1], [0], [0], [1], [0, 0, 1, 1], [], []>} : vector<16x8xf32>, vector<8x100xf32>, vector<16x100xf32> -> vector<16x100xf32>
    %129 = arith.addf %122, %128 : vector<16x100xf32>
    %c15 = arith.constant 15 : index
    %c0_130 = arith.constant 0 : index
    %c0_131 = arith.constant 0 : index
    %130 = vector.load %arg5[%c15, %c0_130, %c0_131] : memref<25x196x100xf32, #tpu.memory_space<vmem>>, vector<1x196x100xf32>
    %131 = vector.shape_cast %130 : vector<1x196x100xf32> to vector<196x100xf32>
    %cst_132 = arith.constant dense<0.000000e+00> : vector<8x100xf32>
    %132 = tpu.matmul %23, %131, %cst_132 {dimension_numbers = #tpu.dot_dimension_numbers<[1], [0], [0], [1], [0, 0, 1, 1], [], []>} : vector<8x196xf32>, vector<196x100xf32>, vector<8x100xf32> -> vector<8x100xf32>
    %c15_133 = arith.constant 15 : index
    %c0_134 = arith.constant 0 : index
    %c0_135 = arith.constant 0 : index
    %133 = vector.load %arg6[%c15_133, %c0_134, %c0_135] : memref<25x16x8xf32, #tpu.memory_space<vmem>>, vector<1x16x8xf32>
    %134 = vector.shape_cast %133 : vector<1x16x8xf32> to vector<16x8xf32>
    %cst_136 = arith.constant dense<0.000000e+00> : vector<16x100xf32>
    %135 = tpu.matmul %134, %132, %cst_136 {dimension_numbers = #tpu.dot_dimension_numbers<[1], [0], [0], [1], [0, 0, 1, 1], [], []>} : vector<16x8xf32>, vector<8x100xf32>, vector<16x100xf32> -> vector<16x100xf32>
    %136 = arith.addf %129, %135 : vector<16x100xf32>
    %c16 = arith.constant 16 : index
    %c0_137 = arith.constant 0 : index
    %c0_138 = arith.constant 0 : index
    %137 = vector.load %arg5[%c16, %c0_137, %c0_138] : memref<25x196x100xf32, #tpu.memory_space<vmem>>, vector<1x196x100xf32>
    %138 = vector.shape_cast %137 : vector<1x196x100xf32> to vector<196x100xf32>
    %cst_139 = arith.constant dense<0.000000e+00> : vector<8x100xf32>
    %139 = tpu.matmul %23, %138, %cst_139 {dimension_numbers = #tpu.dot_dimension_numbers<[1], [0], [0], [1], [0, 0, 1, 1], [], []>} : vector<8x196xf32>, vector<196x100xf32>, vector<8x100xf32> -> vector<8x100xf32>
    %c16_140 = arith.constant 16 : index
    %c0_141 = arith.constant 0 : index
    %c0_142 = arith.constant 0 : index
    %140 = vector.load %arg6[%c16_140, %c0_141, %c0_142] : memref<25x16x8xf32, #tpu.memory_space<vmem>>, vector<1x16x8xf32>
    %141 = vector.shape_cast %140 : vector<1x16x8xf32> to vector<16x8xf32>
    %cst_143 = arith.constant dense<0.000000e+00> : vector<16x100xf32>
    %142 = tpu.matmul %141, %139, %cst_143 {dimension_numbers = #tpu.dot_dimension_numbers<[1], [0], [0], [1], [0, 0, 1, 1], [], []>} : vector<16x8xf32>, vector<8x100xf32>, vector<16x100xf32> -> vector<16x100xf32>
    %143 = arith.addf %136, %142 : vector<16x100xf32>
    %c17 = arith.constant 17 : index
    %c0_144 = arith.constant 0 : index
    %c0_145 = arith.constant 0 : index
    %144 = vector.load %arg5[%c17, %c0_144, %c0_145] : memref<25x196x100xf32, #tpu.memory_space<vmem>>, vector<1x196x100xf32>
    %145 = vector.shape_cast %144 : vector<1x196x100xf32> to vector<196x100xf32>
    %cst_146 = arith.constant dense<0.000000e+00> : vector<8x100xf32>
    %146 = tpu.matmul %23, %145, %cst_146 {dimension_numbers = #tpu.dot_dimension_numbers<[1], [0], [0], [1], [0, 0, 1, 1], [], []>} : vector<8x196xf32>, vector<196x100xf32>, vector<8x100xf32> -> vector<8x100xf32>
    %c17_147 = arith.constant 17 : index
    %c0_148 = arith.constant 0 : index
    %c0_149 = arith.constant 0 : index
    %147 = vector.load %arg6[%c17_147, %c0_148, %c0_149] : memref<25x16x8xf32, #tpu.memory_space<vmem>>, vector<1x16x8xf32>
    %148 = vector.shape_cast %147 : vector<1x16x8xf32> to vector<16x8xf32>
    %cst_150 = arith.constant dense<0.000000e+00> : vector<16x100xf32>
    %149 = tpu.matmul %148, %146, %cst_150 {dimension_numbers = #tpu.dot_dimension_numbers<[1], [0], [0], [1], [0, 0, 1, 1], [], []>} : vector<16x8xf32>, vector<8x100xf32>, vector<16x100xf32> -> vector<16x100xf32>
    %150 = arith.addf %143, %149 : vector<16x100xf32>
    %c18 = arith.constant 18 : index
    %c0_151 = arith.constant 0 : index
    %c0_152 = arith.constant 0 : index
    %151 = vector.load %arg5[%c18, %c0_151, %c0_152] : memref<25x196x100xf32, #tpu.memory_space<vmem>>, vector<1x196x100xf32>
    %152 = vector.shape_cast %151 : vector<1x196x100xf32> to vector<196x100xf32>
    %cst_153 = arith.constant dense<0.000000e+00> : vector<8x100xf32>
    %153 = tpu.matmul %23, %152, %cst_153 {dimension_numbers = #tpu.dot_dimension_numbers<[1], [0], [0], [1], [0, 0, 1, 1], [], []>} : vector<8x196xf32>, vector<196x100xf32>, vector<8x100xf32> -> vector<8x100xf32>
    %c18_154 = arith.constant 18 : index
    %c0_155 = arith.constant 0 : index
    %c0_156 = arith.constant 0 : index
    %154 = vector.load %arg6[%c18_154, %c0_155, %c0_156] : memref<25x16x8xf32, #tpu.memory_space<vmem>>, vector<1x16x8xf32>
    %155 = vector.shape_cast %154 : vector<1x16x8xf32> to vector<16x8xf32>
    %cst_157 = arith.constant dense<0.000000e+00> : vector<16x100xf32>
    %156 = tpu.matmul %155, %153, %cst_157 {dimension_numbers = #tpu.dot_dimension_numbers<[1], [0], [0], [1], [0, 0, 1, 1], [], []>} : vector<16x8xf32>, vector<8x100xf32>, vector<16x100xf32> -> vector<16x100xf32>
    %157 = arith.addf %150, %156 : vector<16x100xf32>
    %c19 = arith.constant 19 : index
    %c0_158 = arith.constant 0 : index
    %c0_159 = arith.constant 0 : index
    %158 = vector.load %arg5[%c19, %c0_158, %c0_159] : memref<25x196x100xf32, #tpu.memory_space<vmem>>, vector<1x196x100xf32>
    %159 = vector.shape_cast %158 : vector<1x196x100xf32> to vector<196x100xf32>
    %cst_160 = arith.constant dense<0.000000e+00> : vector<8x100xf32>
    %160 = tpu.matmul %23, %159, %cst_160 {dimension_numbers = #tpu.dot_dimension_numbers<[1], [0], [0], [1], [0, 0, 1, 1], [], []>} : vector<8x196xf32>, vector<196x100xf32>, vector<8x100xf32> -> vector<8x100xf32>
    %c19_161 = arith.constant 19 : index
    %c0_162 = arith.constant 0 : index
    %c0_163 = arith.constant 0 : index
    %161 = vector.load %arg6[%c19_161, %c0_162, %c0_163] : memref<25x16x8xf32, #tpu.memory_space<vmem>>, vector<1x16x8xf32>
    %162 = vector.shape_cast %161 : vector<1x16x8xf32> to vector<16x8xf32>
    %cst_164 = arith.constant dense<0.000000e+00> : vector<16x100xf32>
    %163 = tpu.matmul %162, %160, %cst_164 {dimension_numbers = #tpu.dot_dimension_numbers<[1], [0], [0], [1], [0, 0, 1, 1], [], []>} : vector<16x8xf32>, vector<8x100xf32>, vector<16x100xf32> -> vector<16x100xf32>
    %164 = arith.addf %157, %163 : vector<16x100xf32>
    %c20 = arith.constant 20 : index
    %c0_165 = arith.constant 0 : index
    %c0_166 = arith.constant 0 : index
    %165 = vector.load %arg5[%c20, %c0_165, %c0_166] : memref<25x196x100xf32, #tpu.memory_space<vmem>>, vector<1x196x100xf32>
    %166 = vector.shape_cast %165 : vector<1x196x100xf32> to vector<196x100xf32>
    %cst_167 = arith.constant dense<0.000000e+00> : vector<8x100xf32>
    %167 = tpu.matmul %23, %166, %cst_167 {dimension_numbers = #tpu.dot_dimension_numbers<[1], [0], [0], [1], [0, 0, 1, 1], [], []>} : vector<8x196xf32>, vector<196x100xf32>, vector<8x100xf32> -> vector<8x100xf32>
    %c20_168 = arith.constant 20 : index
    %c0_169 = arith.constant 0 : index
    %c0_170 = arith.constant 0 : index
    %168 = vector.load %arg6[%c20_168, %c0_169, %c0_170] : memref<25x16x8xf32, #tpu.memory_space<vmem>>, vector<1x16x8xf32>
    %169 = vector.shape_cast %168 : vector<1x16x8xf32> to vector<16x8xf32>
    %cst_171 = arith.constant dense<0.000000e+00> : vector<16x100xf32>
    %170 = tpu.matmul %169, %167, %cst_171 {dimension_numbers = #tpu.dot_dimension_numbers<[1], [0], [0], [1], [0, 0, 1, 1], [], []>} : vector<16x8xf32>, vector<8x100xf32>, vector<16x100xf32> -> vector<16x100xf32>
    %171 = arith.addf %164, %170 : vector<16x100xf32>
    %c21 = arith.constant 21 : index
    %c0_172 = arith.constant 0 : index
    %c0_173 = arith.constant 0 : index
    %172 = vector.load %arg5[%c21, %c0_172, %c0_173] : memref<25x196x100xf32, #tpu.memory_space<vmem>>, vector<1x196x100xf32>
    %173 = vector.shape_cast %172 : vector<1x196x100xf32> to vector<196x100xf32>
    %cst_174 = arith.constant dense<0.000000e+00> : vector<8x100xf32>
    %174 = tpu.matmul %23, %173, %cst_174 {dimension_numbers = #tpu.dot_dimension_numbers<[1], [0], [0], [1], [0, 0, 1, 1], [], []>} : vector<8x196xf32>, vector<196x100xf32>, vector<8x100xf32> -> vector<8x100xf32>
    %c21_175 = arith.constant 21 : index
    %c0_176 = arith.constant 0 : index
    %c0_177 = arith.constant 0 : index
    %175 = vector.load %arg6[%c21_175, %c0_176, %c0_177] : memref<25x16x8xf32, #tpu.memory_space<vmem>>, vector<1x16x8xf32>
    %176 = vector.shape_cast %175 : vector<1x16x8xf32> to vector<16x8xf32>
    %cst_178 = arith.constant dense<0.000000e+00> : vector<16x100xf32>
    %177 = tpu.matmul %176, %174, %cst_178 {dimension_numbers = #tpu.dot_dimension_numbers<[1], [0], [0], [1], [0, 0, 1, 1], [], []>} : vector<16x8xf32>, vector<8x100xf32>, vector<16x100xf32> -> vector<16x100xf32>
    %178 = arith.addf %171, %177 : vector<16x100xf32>
    %c22 = arith.constant 22 : index
    %c0_179 = arith.constant 0 : index
    %c0_180 = arith.constant 0 : index
    %179 = vector.load %arg5[%c22, %c0_179, %c0_180] : memref<25x196x100xf32, #tpu.memory_space<vmem>>, vector<1x196x100xf32>
    %180 = vector.shape_cast %179 : vector<1x196x100xf32> to vector<196x100xf32>
    %cst_181 = arith.constant dense<0.000000e+00> : vector<8x100xf32>
    %181 = tpu.matmul %23, %180, %cst_181 {dimension_numbers = #tpu.dot_dimension_numbers<[1], [0], [0], [1], [0, 0, 1, 1], [], []>} : vector<8x196xf32>, vector<196x100xf32>, vector<8x100xf32> -> vector<8x100xf32>
    %c22_182 = arith.constant 22 : index
    %c0_183 = arith.constant 0 : index
    %c0_184 = arith.constant 0 : index
    %182 = vector.load %arg6[%c22_182, %c0_183, %c0_184] : memref<25x16x8xf32, #tpu.memory_space<vmem>>, vector<1x16x8xf32>
    %183 = vector.shape_cast %182 : vector<1x16x8xf32> to vector<16x8xf32>
    %cst_185 = arith.constant dense<0.000000e+00> : vector<16x100xf32>
    %184 = tpu.matmul %183, %181, %cst_185 {dimension_numbers = #tpu.dot_dimension_numbers<[1], [0], [0], [1], [0, 0, 1, 1], [], []>} : vector<16x8xf32>, vector<8x100xf32>, vector<16x100xf32> -> vector<16x100xf32>
    %185 = arith.addf %178, %184 : vector<16x100xf32>
    %c23 = arith.constant 23 : index
    %c0_186 = arith.constant 0 : index
    %c0_187 = arith.constant 0 : index
    %186 = vector.load %arg5[%c23, %c0_186, %c0_187] : memref<25x196x100xf32, #tpu.memory_space<vmem>>, vector<1x196x100xf32>
    %187 = vector.shape_cast %186 : vector<1x196x100xf32> to vector<196x100xf32>
    %cst_188 = arith.constant dense<0.000000e+00> : vector<8x100xf32>
    %188 = tpu.matmul %23, %187, %cst_188 {dimension_numbers = #tpu.dot_dimension_numbers<[1], [0], [0], [1], [0, 0, 1, 1], [], []>} : vector<8x196xf32>, vector<196x100xf32>, vector<8x100xf32> -> vector<8x100xf32>
    %c23_189 = arith.constant 23 : index
    %c0_190 = arith.constant 0 : index
    %c0_191 = arith.constant 0 : index
    %189 = vector.load %arg6[%c23_189, %c0_190, %c0_191] : memref<25x16x8xf32, #tpu.memory_space<vmem>>, vector<1x16x8xf32>
    %190 = vector.shape_cast %189 : vector<1x16x8xf32> to vector<16x8xf32>
    %cst_192 = arith.constant dense<0.000000e+00> : vector<16x100xf32>
    %191 = tpu.matmul %190, %188, %cst_192 {dimension_numbers = #tpu.dot_dimension_numbers<[1], [0], [0], [1], [0, 0, 1, 1], [], []>} : vector<16x8xf32>, vector<8x100xf32>, vector<16x100xf32> -> vector<16x100xf32>
    %192 = arith.addf %185, %191 : vector<16x100xf32>
    %c24 = arith.constant 24 : index
    %c0_193 = arith.constant 0 : index
    %c0_194 = arith.constant 0 : index
    %193 = vector.load %arg5[%c24, %c0_193, %c0_194] : memref<25x196x100xf32, #tpu.memory_space<vmem>>, vector<1x196x100xf32>
    %194 = vector.shape_cast %193 : vector<1x196x100xf32> to vector<196x100xf32>
    %cst_195 = arith.constant dense<0.000000e+00> : vector<8x100xf32>
    %195 = tpu.matmul %23, %194, %cst_195 {dimension_numbers = #tpu.dot_dimension_numbers<[1], [0], [0], [1], [0, 0, 1, 1], [], []>} : vector<8x196xf32>, vector<196x100xf32>, vector<8x100xf32> -> vector<8x100xf32>
    %c24_196 = arith.constant 24 : index
    %c0_197 = arith.constant 0 : index
    %c0_198 = arith.constant 0 : index
    %196 = vector.load %arg6[%c24_196, %c0_197, %c0_198] : memref<25x16x8xf32, #tpu.memory_space<vmem>>, vector<1x16x8xf32>
    %197 = vector.shape_cast %196 : vector<1x16x8xf32> to vector<16x8xf32>
    %cst_199 = arith.constant dense<0.000000e+00> : vector<16x100xf32>
    %198 = tpu.matmul %197, %195, %cst_199 {dimension_numbers = #tpu.dot_dimension_numbers<[1], [0], [0], [1], [0, 0, 1, 1], [], []>} : vector<16x8xf32>, vector<8x100xf32>, vector<16x100xf32> -> vector<16x100xf32>
    %199 = arith.addf %192, %198 : vector<16x100xf32>
    %c0_200 = arith.constant 0 : index
    %c0_201 = arith.constant 0 : index
    %200 = vector.load %arg7[%c0_200, %c0_201] : memref<16x1xf32, #tpu.memory_space<vmem>>, vector<16x1xf32>
    %201 = vector.broadcast %200 : vector<16x1xf32> to vector<16x100xf32>
    %202 = arith.addf %199, %201 : vector<16x100xf32>
    %cst_202 = arith.constant 0.000000e+00 : f32
    %203 = vector.broadcast %cst_202 : f32 to vector<16x100xf32>
    %204 = arith.maximumf %202, %203 : vector<16x100xf32>
    %c0_203 = arith.constant 0 : index
    %c0_204 = arith.constant 0 : index
    %c0_205 = arith.constant 0 : index
    %205 = vector.load %arg8[%c0_203, %c0_204, %c0_205] : memref<4x100x25xf32, #tpu.memory_space<vmem>>, vector<1x100x25xf32>
    %206 = vector.shape_cast %205 : vector<1x100x25xf32> to vector<100x25xf32>
    %cst_206 = arith.constant dense<0.000000e+00> : vector<16x25xf32>
    %207 = tpu.matmul %204, %206, %cst_206 {dimension_numbers = #tpu.dot_dimension_numbers<[1], [0], [0], [1], [0, 0, 1, 1], [], []>} : vector<16x100xf32>, vector<100x25xf32>, vector<16x25xf32> -> vector<16x25xf32>
    %c1_207 = arith.constant 1 : index
    %c0_208 = arith.constant 0 : index
    %c0_209 = arith.constant 0 : index
    %208 = vector.load %arg8[%c1_207, %c0_208, %c0_209] : memref<4x100x25xf32, #tpu.memory_space<vmem>>, vector<1x100x25xf32>
    %209 = vector.shape_cast %208 : vector<1x100x25xf32> to vector<100x25xf32>
    %cst_210 = arith.constant dense<0.000000e+00> : vector<16x25xf32>
    %210 = tpu.matmul %204, %209, %cst_210 {dimension_numbers = #tpu.dot_dimension_numbers<[1], [0], [0], [1], [0, 0, 1, 1], [], []>} : vector<16x100xf32>, vector<100x25xf32>, vector<16x25xf32> -> vector<16x25xf32>
    %211 = arith.maximumf %207, %210 : vector<16x25xf32>
    %c2_211 = arith.constant 2 : index
    %c0_212 = arith.constant 0 : index
    %c0_213 = arith.constant 0 : index
    %212 = vector.load %arg8[%c2_211, %c0_212, %c0_213] : memref<4x100x25xf32, #tpu.memory_space<vmem>>, vector<1x100x25xf32>
    %213 = vector.shape_cast %212 : vector<1x100x25xf32> to vector<100x25xf32>
    %cst_214 = arith.constant dense<0.000000e+00> : vector<16x25xf32>
    %214 = tpu.matmul %204, %213, %cst_214 {dimension_numbers = #tpu.dot_dimension_numbers<[1], [0], [0], [1], [0, 0, 1, 1], [], []>} : vector<16x100xf32>, vector<100x25xf32>, vector<16x25xf32> -> vector<16x25xf32>
    %c3_215 = arith.constant 3 : index
    %c0_216 = arith.constant 0 : index
    %c0_217 = arith.constant 0 : index
    %215 = vector.load %arg8[%c3_215, %c0_216, %c0_217] : memref<4x100x25xf32, #tpu.memory_space<vmem>>, vector<1x100x25xf32>
    %216 = vector.shape_cast %215 : vector<1x100x25xf32> to vector<100x25xf32>
    %cst_218 = arith.constant dense<0.000000e+00> : vector<16x25xf32>
    %217 = tpu.matmul %204, %216, %cst_218 {dimension_numbers = #tpu.dot_dimension_numbers<[1], [0], [0], [1], [0, 0, 1, 1], [], []>} : vector<16x100xf32>, vector<100x25xf32>, vector<16x25xf32> -> vector<16x25xf32>
    %218 = arith.maximumf %214, %217 : vector<16x25xf32>
    %219 = arith.maximumf %211, %218 : vector<16x25xf32>
    %c0_219 = arith.constant 0 : index
    %c0_220 = arith.constant 0 : index
    %220 = vector.load %arg9[%c0_219, %c0_220] : memref<25x400xf32, #tpu.memory_space<vmem>>, vector<25x400xf32>
    %cst_221 = arith.constant dense<0.000000e+00> : vector<16x400xf32>
    %221 = tpu.matmul %219, %220, %cst_221 {dimension_numbers = #tpu.dot_dimension_numbers<[1], [0], [0], [1], [0, 0, 1, 1], [], []>} : vector<16x25xf32>, vector<25x400xf32>, vector<16x400xf32> -> vector<16x400xf32>
    %c0_222 = arith.constant 0 : index
    %c0_223 = arith.constant 0 : index
    %222 = vector.load %arg10[%c0_222, %c0_223] : memref<16x400xf32, #tpu.memory_space<vmem>>, vector<16x400xf32>
    %223 = arith.mulf %221, %222 : vector<16x400xf32>
    %cst_224 = arith.constant 1.000000e+00 : f32
    %224 = vector.broadcast %cst_224 : f32 to vector<1x16xf32>
    %cst_225 = arith.constant dense<0.000000e+00> : vector<1x400xf32>
    %225 = tpu.matmul %224, %223, %cst_225 {dimension_numbers = #tpu.dot_dimension_numbers<[1], [0], [0], [1], [0, 0, 1, 1], [], []>} : vector<1x16xf32>, vector<16x400xf32>, vector<1x400xf32> -> vector<1x400xf32>
    %c0_226 = arith.constant 0 : index
    %c0_227 = arith.constant 0 : index
    %226 = vector.load %arg11[%c0_226, %c0_227] : memref<400x120xf32, #tpu.memory_space<vmem>>, vector<400x120xf32>
    %cst_228 = arith.constant dense<0.000000e+00> : vector<1x120xf32>
    %227 = tpu.matmul %225, %226, %cst_228 {dimension_numbers = #tpu.dot_dimension_numbers<[1], [0], [0], [1], [0, 0, 1, 1], [], []>} : vector<1x400xf32>, vector<400x120xf32>, vector<1x120xf32> -> vector<1x120xf32>
    %c0_229 = arith.constant 0 : index
    %c0_230 = arith.constant 0 : index
    %228 = vector.load %arg12[%c0_229, %c0_230] : memref<1x120xf32, #tpu.memory_space<vmem>>, vector<1x120xf32>
    %229 = arith.addf %227, %228 : vector<1x120xf32>
    %cst_231 = arith.constant 0.000000e+00 : f32
    %230 = vector.broadcast %cst_231 : f32 to vector<1x120xf32>
    %231 = arith.maximumf %229, %230 : vector<1x120xf32>
    %c0_232 = arith.constant 0 : index
    %c0_233 = arith.constant 0 : index
    %232 = vector.load %arg13[%c0_232, %c0_233] : memref<120x84xf32, #tpu.memory_space<vmem>>, vector<120x84xf32>
    %cst_234 = arith.constant dense<0.000000e+00> : vector<1x84xf32>
    %233 = tpu.matmul %231, %232, %cst_234 {dimension_numbers = #tpu.dot_dimension_numbers<[1], [0], [0], [1], [0, 0, 1, 1], [], []>} : vector<1x120xf32>, vector<120x84xf32>, vector<1x84xf32> -> vector<1x84xf32>
    %c0_235 = arith.constant 0 : index
    %c0_236 = arith.constant 0 : index
    %234 = vector.load %arg14[%c0_235, %c0_236] : memref<1x84xf32, #tpu.memory_space<vmem>>, vector<1x84xf32>
    %235 = arith.addf %233, %234 : vector<1x84xf32>
    %cst_237 = arith.constant 0.000000e+00 : f32
    %236 = vector.broadcast %cst_237 : f32 to vector<1x84xf32>
    %237 = arith.maximumf %235, %236 : vector<1x84xf32>
    %c0_238 = arith.constant 0 : index
    %c0_239 = arith.constant 0 : index
    %238 = vector.load %arg15[%c0_238, %c0_239] : memref<84x10xf32, #tpu.memory_space<vmem>>, vector<84x10xf32>
    %cst_240 = arith.constant dense<0.000000e+00> : vector<1x10xf32>
    %239 = tpu.matmul %237, %238, %cst_240 {dimension_numbers = #tpu.dot_dimension_numbers<[1], [0], [0], [1], [0, 0, 1, 1], [], []>} : vector<1x84xf32>, vector<84x10xf32>, vector<1x10xf32> -> vector<1x10xf32>
    %c0_241 = arith.constant 0 : index
    %c0_242 = arith.constant 0 : index
    %240 = vector.load %arg16[%c0_241, %c0_242] : memref<1x10xf32, #tpu.memory_space<vmem>>, vector<1x10xf32>
    %241 = arith.addf %239, %240 : vector<1x10xf32>
    %c0_243 = arith.constant 0 : index
    %c0_244 = arith.constant 0 : index
    %c0_245 = arith.constant 0 : index
    %242 = vector.load %arg17[%c0_243, %c0_244, %c0_245] : memref<1x1x10xf32, #tpu.memory_space<vmem>>, vector<1x1x10xf32>
    %243 = vector.shape_cast %242 : vector<1x1x10xf32> to vector<1x10xf32>
    %244 = vector.shape_cast %241 : vector<1x10xf32> to vector<1x1x10xf32>
    tpu.vector_store %arg17[%c0_243, %c0_244, %c0_245], %244 {strides = array<i32>} : memref<1x1x10xf32, #tpu.memory_space<vmem>>, vector<1x1x10xf32>,
    return
  }
  func.func @transform_0(%arg0: i32) -> (i32, i32, i32) {
    %c0_i32 = arith.constant 0 : i32
    %c0_i32_0 = arith.constant 0 : i32
    %c0_i32_1 = arith.constant 0 : i32
    return %arg0, %c0_i32, %c0_i32_0 : i32, i32, i32
  }
  func.func @transform_1(%arg0: i32) -> (i32, i32) {
    %c0_i32 = arith.constant 0 : i32
    %c0_i32_0 = arith.constant 0 : i32
    %c0_i32_1 = arith.constant 0 : i32
    return %c0_i32, %c0_i32_0 : i32, i32
  }
  func.func @transform_2(%arg0: i32) -> (i32, i32) {
    %c0_i32 = arith.constant 0 : i32
    %c0_i32_0 = arith.constant 0 : i32
    %c0_i32_1 = arith.constant 0 : i32
    return %c0_i32, %c0_i32_0 : i32, i32
  }
  func.func @transform_3(%arg0: i32) -> (i32, i32, i32) {
    %c0_i32 = arith.constant 0 : i32
    %c0_i32_0 = arith.constant 0 : i32
    %c0_i32_1 = arith.constant 0 : i32
    %c0_i32_2 = arith.constant 0 : i32
    return %c0_i32, %c0_i32_0, %c0_i32_1 : i32, i32, i32
  }
  func.func @transform_4(%arg0: i32) -> (i32, i32, i32) {
    %c0_i32 = arith.constant 0 : i32
    %c0_i32_0 = arith.constant 0 : i32
    %c0_i32_1 = arith.constant 0 : i32
    %c0_i32_2 = arith.constant 0 : i32
    return %c0_i32, %c0_i32_0, %c0_i32_1 : i32, i32, i32
  }
  func.func @transform_5(%arg0: i32) -> (i32, i32, i32) {
    %c0_i32 = arith.constant 0 : i32
    %c0_i32_0 = arith.constant 0 : i32
    %c0_i32_1 = arith.constant 0 : i32
    %c0_i32_2 = arith.constant 0 : i32
    return %c0_i32, %c0_i32_0, %c0_i32_1 : i32, i32, i32
  }
  func.func @transform_6(%arg0: i32) -> (i32, i32) {
    %c0_i32 = arith.constant 0 : i32
    %c0_i32_0 = arith.constant 0 : i32
    %c0_i32_1 = arith.constant 0 : i32
    return %c0_i32, %c0_i32_0 : i32, i32
  }
  func.func @transform_7(%arg0: i32) -> (i32, i32, i32) {
    %c0_i32 = arith.constant 0 : i32
    %c0_i32_0 = arith.constant 0 : i32
    %c0_i32_1 = arith.constant 0 : i32
    %c0_i32_2 = arith.constant 0 : i32
    return %c0_i32, %c0_i32_0, %c0_i32_1 : i32, i32, i32
  }
  func.func @transform_8(%arg0: i32) -> (i32, i32) {
    %c0_i32 = arith.constant 0 : i32
    %c0_i32_0 = arith.constant 0 : i32
    %c0_i32_1 = arith.constant 0 : i32
    return %c0_i32, %c0_i32_0 : i32, i32
  }
  func.func @transform_9(%arg0: i32) -> (i32, i32) {
    %c0_i32 = arith.constant 0 : i32
    %c0_i32_0 = arith.constant 0 : i32
    %c0_i32_1 = arith.constant 0 : i32
    return %c0_i32, %c0_i32_0 : i32, i32
  }
  func.func @transform_10(%arg0: i32) -> (i32, i32) {
    %c0_i32 = arith.constant 0 : i32
    %c0_i32_0 = arith.constant 0 : i32
    %c0_i32_1 = arith.constant 0 : i32
    return %c0_i32, %c0_i32_0 : i32, i32
  }
  func.func @transform_11(%arg0: i32) -> (i32, i32) {
    %c0_i32 = arith.constant 0 : i32
    %c0_i32_0 = arith.constant 0 : i32
    %c0_i32_1 = arith.constant 0 : i32
    return %c0_i32, %c0_i32_0 : i32, i32
  }
  func.func @transform_12(%arg0: i32) -> (i32, i32) {
    %c0_i32 = arith.constant 0 : i32
    %c0_i32_0 = arith.constant 0 : i32
    %c0_i32_1 = arith.constant 0 : i32
    return %c0_i32, %c0_i32_0 : i32, i32
  }
  func.func @transform_13(%arg0: i32) -> (i32, i32) {
    %c0_i32 = arith.constant 0 : i32
    %c0_i32_0 = arith.constant 0 : i32
    %c0_i32_1 = arith.constant 0 : i32
    return %c0_i32, %c0_i32_0 : i32, i32
  }
  func.func @transform_14(%arg0: i32) -> (i32, i32) {
    %c0_i32 = arith.constant 0 : i32
    %c0_i32_0 = arith.constant 0 : i32
    %c0_i32_1 = arith.constant 0 : i32
    return %c0_i32, %c0_i32_0 : i32, i32
  }
  func.func @transform_15(%arg0: i32) -> (i32, i32) {
    %c0_i32 = arith.constant 0 : i32
    %c0_i32_0 = arith.constant 0 : i32
    %c0_i32_1 = arith.constant 0 : i32
    return %c0_i32, %c0_i32_0 : i32, i32
  }
  func.func @transform_16(%arg0: i32) -> (i32, i32, i32) {
    %c0_i32 = arith.constant 0 : i32
    %c0_i32_0 = arith.constant 0 : i32
    %c0_i32_1 = arith.constant 0 : i32
    return %arg0, %c0_i32, %c0_i32_0 : i32, i32, i32
  }
}

</mosaic_0001>

<bundles_post_ra>
// kernel: net_forward.1
= control target key start
LH: loop header
LB: loop body
LE: loop exit
PB: predicated region body
PF: predicated region fallthrough
CT: control target
= control target key end

     0   :  { %s18559_s0 = inlined_call_operand.vmem [shape: f32[2,80,784], index: 0, kind: input, shape index: {}]   ;;  %s18560_s1 = inlined_call_operand.vmem [shape: f32[8,80], index: 1, kind: input, shape index: {}]   ;;  %s18561_s2 = inlined_call_operand.vmem [shape: f32[8,1], index: 2, kind: input, shape index: {}]   ;;  %s18562_s3 = inlined_call_operand.vmem [shape: f32[4,784,196], index: 3, kind: input, shape index: {}]   ;;  %s18563_s4 = inlined_call_operand.vmem [shape: f32[25,196,100], index: 4, kind: input, shape index: {}]   ;;  %s18564_s5 = inlined_call_operand.vmem [shape: f32[25,16,8], index: 5, kind: input, shape index: {}]   ;;  %s18565_s6 = inlined_call_operand.vmem [shape: f32[16,1], index: 6, kind: input, shape index: {}]   ;;  %s18566_s7 = inlined_call_operand.vmem [shape: f32[4,100,25], index: 7, kind: input, shape index: {}]   ;;  %s18567_s8 = inlined_call_operand.vmem [shape: f32[25,400], index: 8, kind: input, shape index: {}]   ;;  %s18568_s9 = inlined_call_operand.vmem [shape: f32[16,400], index: 9, kind: input, shape index: {}]   ;;  %s18569_s10 = inlined_call_operand.vmem [shape: f32[400,120], index: 10, kind: input, shape index: {}]   ;;  %s18570_s11 = inlined_call_operand.vmem [shape: f32[1,120], index: 11, kind: input, shape index: {}]   ;;  %s18571_s12 = inlined_call_operand.vmem [shape: f32[120,84], index: 12, kind: input, shape index: {}]   ;;  %s18572_s13 = inlined_call_operand.vmem [shape: f32[1,84], index: 13, kind: input, shape index: {}]   ;;  %s18573_s14 = inlined_call_operand.vmem [shape: f32[84,10], index: 14, kind: input, shape index: {}]   ;;  %s18574_s15 = inlined_call_operand.vmem [shape: f32[1,10], index: 15, kind: input, shape index: {}]   ;;  %s18575_s16 = inlined_call_operand.hbm [shape: f32[2,1,10], index: 16, kind: output, shape index: {}]  }
   0x1   :  { %18580 = sst [smem:[#allocation9_spill]] %s18559_s0 }
   0x2   :  { %18581 = sst [smem:[#allocation10_spill]] %s18560_s1 }
   0x3   :  { %18582 = sst [smem:[#allocation11_spill]] %s18561_s2 }
   0x4   :  { %21 = vsyncpa [#allocation3], 0 }
   0x5   :  { %23 = vsyncpa [#allocation3 + $0x1], 0  ;;  %s12842_s21 = smov 0   ;;  %s12844_s22 = smov 0  }
   0x6   :  { %s12846_s23 = smov 0   ;;  %s12848_s24 = smov 0  }
   0x7 LB: > { %18583 = sst [smem:[#allocation5_spill]] %s12744_s23  ;;  %s12863_s25 = sadd.s32 4294967295, %s12748_s24   ;;  %s12748_s24 = sphi %s12848_s24, %s18593_s24   ;;  %s12744_s23 = sphi %s12846_s23, %s18595_s23   ;;  %s12740_s22 = sphi %s12844_s22, %s18597_s22   ;;  %s12736_s21 = sphi %s12842_s21, %s18596_s21  }
   0x8   : > { %s8640_s26 = sadd.s32 4294967294, %s12748_s24   ;;  %s12867_s27 = sadd.s32 1, %s12748_s24  }
   0x9   : > { %18584 = sst [smem:[#allocation6_spill]] %s12867_s27  ;;  %s377_s28 = sadd.s32 1, %s12744_s23 }
   0xa   : > { %s374_s29 = ssub.s32 %s12748_s24, %s12867_s27  ;;  %p387_p0 = scmp.ne.s32.totalorder %s12744_s23, %s12740_s22 }
   0xb   : > { %p375_p1 = scmp.eq.s32.totalorder %s374_s29, 0  ;;  %p388_p2 = scmp.eq.s32.totalorder %s12863_s25, 1 }
   0xc   : > { %p393_p3 = scmp.ne.s32.totalorder %s12740_s22, %s12736_s21  ;;  %p394_p4 = scmp.eq.s32.totalorder %s8640_s26, 1 }
   0xd   : > { %s12878_s30 = scalar_select %p375_p1, %s12744_s23, %s377_s28  }
   0xe   : > { %p12880_p5 = por %p388_p2, %p387_p0  ;;  %p12884_p6 = por %p394_p4, %p393_p3 }
   0xf   : > { %18585 = sst [smem:[#allocation7_spill]] %s12878_s30  ;;  %p8643_p7 = scmp.ge.s32.totalorder %s12748_s24, 1 }
  0x10   : > { %s18587_s17 = scalar_select %p12884_p6, 1, 0 }
  0x11   : > { %p465_p8 = scmp.lt.s32.totalorder %s12748_s24, 3 }
  0x12   : > { %18588 = sst [smem:[#allocation8_spill]] %s18587_s17 }
  0x13   : > { %p466_p9 = pnand %p8643_p7, %p465_p8 }
  0x14   : > { %p514_p10 = scmp.lt.s32.totalorder (!%p466_p9), %s12863_s25, 1  ;;  %v12750_v0 = vmov (!%p466_p9), 0.0   ;;  %s18589_s2 = sld [smem:[#allocation11_spill]] (!%p466_p9)  ;;  %v12751_v2 = vmov (!%p466_p9), 0   ;;  %v7448_v3 = vld [vmem:[%s18565_s6] sm:$0xff] (!%p466_p9)  ;;  %vm596_vm0 = vcmask (!%p466_p9), 654336  }
  0x15   : > { %469 = sbr.rel (%p466_p9) target bundleno = 5676 (0x162c), region = 84  ;;  %664 = vmatprep.mubr.f32.mxu0 (!%p466_p9), %v12750_v0  ;;  %735 = vmatprep.mubr.f32.mxu1 (!%p466_p9), %v12750_v0  ;;  %s18590_s27 = sld [smem:[#allocation9_spill]] (!%p466_p9)  ;;  %vm12753_vm1 = vmmov (!%p466_p9), 0   ;;  %vm1086_vm2 = vcmask (!%p466_p9), 130048   ;;  %vm2852_vm3 = vcmask (!%p466_p9), 1043456   ;;  %vm2848_vm4 = vcmask (!%p466_p9), 556032  }
  0x16   : > { %12684 = vset.pattern.permute.xlu0 (!%p466_p9), %v12751_v2  ;;  %12685 = vset.pattern.permute.xlu1 (!%p466_p9), %v12751_v2  ;;  %s18591_s1 = sld [smem:[#allocation10_spill]] (!%p466_p9)  ;;  %vm3030_vm5 = vcmask (!%p466_p9), 64512   ;;  %vm7477_vm6 = vcmask (!%p466_p9), 818176   ;;  %vm7867_vm7 = vcmask (!%p466_p9), 1040384   ;;  %vm12754_vm8 = vmmov (!%p466_p9), 1   ;;  %s512_s29 = sand.u32 (!%p466_p9), 1, %s12740_s22  }
  0x17   : > { %vm12448_vm9 = vmpackc.low (!%p466_p9), %vm7867_vm7, %vm12754_vm8  ;;  %vm7860_vm10 = vcmask (!%p466_p9), 203776   ;;  %vm8406_vm11 = vcmask (!%p466_p9), 982016   ;;  %vm8493_vm12 = vcmask (!%p466_p9), 687104   ;;  %vm8570_vm13 = vcmask (!%p466_p9), 73728  }
  0x1a   : > { %v590_v1 = vld [vmem:[%s18589_s2] sm:$0xff] (!%p466_p9) }
  0x1b   : > { %593 = vperm.xlu0 (!%p466_p9), %12684, %v590_v1  }
  0x1c   : > { %s515_s20 = scalar_select %p514_p10, %s12863_s25, 1 }
  0x1e   : > { %s12638_s26 = smul.u32 560, %s515_s20 }
  0x1f   : > { %7452 = vperm.xlu0 %12684, %v7448_v3  }
  0x20   : > { %s12903_s17 = scalar_lea.vmem %s18590_s27, %s12638_s26  ;;  %s10054_s27 = sshll.u32 %s12863_s25, 4 }
  0x21   : > { %v521_v4 = vld [vmem:[%s12903_s17 + $0x8] sm:$0xff]  ;;  %v528_v5 = vld [vmem:[%s12903_s17 + $0x40] sm:$0xff]  ;;  %v523_v6 = vld [vmem:[%s12903_s17 + $0x18] sm:$0xff]  ;;  %s18517_s20 = scalar_lea.hbm %s18575_s16, %s10054_s27  ;;  %s8573_s26 = scalar_lea.sflag [#allocation3], %s512_s29 }
  0x22   : > { %v10588_v7 = vpack.c.bf16 %v528_v5, %v521_v4  ;;  %v530_v8 = vld [vmem:[%s12903_s17 + $0x50] sm:$0xff]  ;;  %v520_v9 = vld [vmem:[%s12903_s17] sm:$0xff]  ;;  %v527_v10 = vld [vmem:[%s12903_s17 + $0x38] sm:$0xff]  ;;  %s12756_s25 = smov [#allocation2]  }
  0x23   : > { %v10608_v11 = vpack.c.bf16 %v530_v8, %v523_v6  ;;  %v10590_v12 = vpack.c.bf16 %v527_v10, %v520_v9  ;;  %v522_v13 = vld [vmem:[%s12903_s17 + $0x10] sm:$0xff]  ;;  %v529_v14 = vld [vmem:[%s12903_s17 + $0x48] sm:$0xff]  ;;  %v535_v15 = vld [vmem:[%s12903_s17 + $0x78] sm:$0xff]  ;;  %s12690_s28 = sshll.u32 %s12756_s25, 4  ;;  %s12691_s28 = int_to_ptr.vmem [resolvable:$false] %s12690_s28 }
  0x24   : > { %10589 = vmatprep.subr.bf16.mxu0 %v10588_v7  ;;  %v10610_v16 = vpack.c.bf16 %v529_v14, %v522_v13  ;;  %v542_v17 = vld [vmem:[%s12903_s17 + $0xb0] sm:$0xff]  ;;  %v537_v18 = vld [vmem:[%s12903_s17 + $0x88] sm:$0xff]  ;;  %v544_v19 = vld [vmem:[%s12903_s17 + $0xc0] sm:$0xff] }
  0x25   : > { %10609 = vmatprep.subr.bf16.mxu1 %v10608_v11  ;;  %10591 = vmatpush1.bf16.msra.mxu0 %v10590_v12  ;;  %v10592_v20 = vpack.c.bf16 %v542_v17, %v535_v15  ;;  %v10612_v21 = vpack.c.bf16 %v544_v19, %v537_v18  ;;  %v534_v22 = vld [vmem:[%s12903_s17 + $0x70] sm:$0xff]  ;;  %v541_v23 = vld [vmem:[%s12903_s17 + $0xa8] sm:$0xff]  ;;  %v536_v24 = vld [vmem:[%s12903_s17 + $0x80] sm:$0xff]  ;;  %v12752_v17 = vmov 0.0|0.0  }
  0x26   : > { %10611 = vmatpush1.bf16.msra.mxu1 %v10610_v16  ;;  %v10594_v25 = vpack.c.bf16 %v541_v23, %v534_v22  ;;  %v543_v26 = vld [vmem:[%s12903_s17 + $0xb8] sm:$0xff]  ;;  %v549_v27 = vld [vmem:[%s12903_s17 + $0xe8] sm:$0xff]  ;;  %v556_v28 = vld [vmem:[%s12903_s17 + $0x120] sm:$0xff] }
  0x27   : > { %10593 = vmatprep.subr.bf16.mxu0 %v10592_v20  ;;  %10613 = vmatprep.subr.bf16.mxu1 %v10612_v21  ;;  %v10614_v29 = vpack.c.bf16 %v543_v26, %v536_v24  ;;  %v10596_v30 = vpack.c.bf16 %v556_v28, %v549_v27  ;;  %v551_v31 = vld [vmem:[%s12903_s17 + $0xf8] sm:$0xff]  ;;  %v558_v32 = vld [vmem:[%s12903_s17 + $0x130] sm:$0xff]  ;;  %v548_v33 = vld [vmem:[%s12903_s17 + $0xe0] sm:$0xff] }
  0x28   : > { %v10616_v34 = vpack.c.bf16 %v558_v32, %v551_v31  ;;  %v555_v35 = vld [vmem:[%s12903_s17 + $0x118] sm:$0xff]  ;;  %v550_v36 = vld [vmem:[%s12903_s17 + $0xf0] sm:$0xff]  ;;  %v557_v37 = vld [vmem:[%s12903_s17 + $0x128] sm:$0xff] }
  0x29   : > { %10595 = vmatpush1.bf16.msra.mxu0 %v10594_v25  ;;  %v10598_v38 = vpack.c.bf16 %v555_v35, %v548_v33  ;;  %v563_v39 = vld [vmem:[%s12903_s17 + $0x158] sm:$0xff]  ;;  %v570_v40 = vld [vmem:[%s12903_s17 + $0x190] sm:$0xff]  ;;  %v565_v41 = vld [vmem:[%s12903_s17 + $0x168] sm:$0xff]  ;;  %v10618_v42 = vpack.c.bf16 %v557_v37, %v550_v36 }
  0x2a   : > { %10615 = vmatpush1.bf16.msra.mxu1 %v10614_v29  ;;  %10597 = vmatprep.subr.bf16.mxu0 %v10596_v30  ;;  %v10600_v43 = vpack.c.bf16 %v570_v40, %v563_v39  ;;  %v572_v44 = vld [vmem:[%s12903_s17 + $0x1a0] sm:$0xff]  ;;  %v562_v45 = vld [vmem:[%s12903_s17 + $0x150] sm:$0xff]  ;;  %v569_v46 = vld [vmem:[%s12903_s17 + $0x188] sm:$0xff] }
  0x2b   : > { %10617 = vmatprep.subr.bf16.mxu1 %v10616_v34  ;;  %v10620_v47 = vpack.c.bf16 %v572_v44, %v565_v41  ;;  %v564_v48 = vld [vmem:[%s12903_s17 + $0x160] sm:$0xff]  ;;  %v571_v49 = vld [vmem:[%s12903_s17 + $0x198] sm:$0xff]  ;;  %v577_v50 = vld [vmem:[%s12903_s17 + $0x1c8] sm:$0xff]  ;;  %v10602_v54 = vpack.c.bf16 %v569_v46, %v562_v45 }
  0x2c   : > { %v584_v51 = vld [vmem:[%s12903_s17 + $0x200] sm:$0xff]  ;;  %v579_v52 = vld [vmem:[%s12903_s17 + $0x1d8] sm:$0xff]  ;;  %v586_v53 = vld [vmem:[%s12903_s17 + $0x210] sm:$0xff]  ;;  %v10622_v55 = vpack.c.bf16 %v571_v49, %v564_v48 }
  0x2d   : > { %10599 = vmatpush1.bf16.msra.mxu0 %v10598_v38  ;;  %v10604_v56 = vpack.c.bf16 %v584_v51, %v577_v50  ;;  %v576_v57 = vld [vmem:[%s12903_s17 + $0x1c0] sm:$0xff]  ;;  %v583_v58 = vld [vmem:[%s12903_s17 + $0x1f8] sm:$0xff]  ;;  %v578_v59 = vld [vmem:[%s12903_s17 + $0x1d0] sm:$0xff]  ;;  %v10624_v60 = vpack.c.bf16 %v586_v53, %v579_v52 }
  0x2e   : > { %10619 = vmatpush1.bf16.msra.mxu1 %v10618_v42  ;;  %10601 = vmatprep.subr.bf16.mxu0 %v10600_v43  ;;  %v585_v61 = vld [vmem:[%s12903_s17 + $0x208] sm:$0xff]  ;;  %v532_v63 = vld [vmem:[%s12903_s17 + $0x60] sm:$0xff]  ;;  %v10606_v1 = vpack.c.bf16 %v583_v58, %v576_v57  ;;  %v531_v5 = vld [vmem:[%s12903_s17 + $0x58] sm:$0xff] }
  0x2f   : > { %10621 = vmatprep.subr.bf16.mxu1 %v10620_v47  ;;  %v525_v62 = vld [vmem:[%s12903_s17 + $0x28] sm:$0xff]  ;;  %v10626_v2 = vpack.c.bf16 %v585_v61, %v578_v59  ;;  %v524_v4 = vld [vmem:[%s12903_s17 + $0x20] sm:$0xff]  ;;  %v526_v6 = vld [vmem:[%s12903_s17 + $0x30] sm:$0xff] }
  0x30   : > { %v10628_v3 = vpack.c.bf16 %v532_v63, %v525_v62  ;;  %v533_v7 = vld [vmem:[%s12903_s17 + $0x68] sm:$0xff]  ;;  %v539_v8 = vld [vmem:[%s12903_s17 + $0x98] sm:$0xff]  ;;  %v546_v9 = vld [vmem:[%s12903_s17 + $0xd0] sm:$0xff]  ;;  %v10630_v11 = vpack.c.bf16 %v531_v5, %v524_v4 }
  0x31   : > { %10603 = vmatpush1.bf16.msra.mxu0 %v10602_v54  ;;  %v12956_v10 = vld [vmem:[%s18591_s1] sm:$0xff]  ;;  %v10649_v12 = vpack.c.bf16 %v533_v7, %v526_v6  ;;  %v10632_v13 = vpack.c.bf16 %v546_v9, %v539_v8  ;;  %v538_v14 = vld [vmem:[%s12903_s17 + $0x90] sm:$0xff]  ;;  %v545_v15 = vld [vmem:[%s12903_s17 + $0xc8] sm:$0xff]  ;;  %s12692_s1 = scalar_lea.vmem %s12691_s28, 32 }
  0x32   : > { %10623 = vmatpush1.bf16.msra.mxu1 %v10622_v55  ;;  %10605 = vmatprep.subr.bf16.mxu0 %v10604_v56  ;;  %v540_v16 = vld [vmem:[%s12903_s17 + $0xa0] sm:$0xff]  ;;  %v547_v18 = vld [vmem:[%s12903_s17 + $0xd8] sm:$0xff]  ;;  %v553_v19 = vld [vmem:[%s12903_s17 + $0x108] sm:$0xff]  ;;  %v10634_v21 = vpack.c.bf16 %v545_v15, %v538_v14 }
  0x33   : > { %10625 = vmatprep.subr.bf16.mxu1 %v10624_v60  ;;  %v560_v20 = vld [vmem:[%s12903_s17 + $0x140] sm:$0xff]  ;;  %v10652_v22 = vpack.c.bf16 %v547_v18, %v540_v16  ;;  %v559_v25 = vld [vmem:[%s12903_s17 + $0x138] sm:$0xff]  ;;  %v554_v26 = vld [vmem:[%s12903_s17 + $0x110] sm:$0xff] }
  0x34   : > { %v10636_v23 = vpack.c.bf16 %v560_v20, %v553_v19  ;;  %v552_v24 = vld [vmem:[%s12903_s17 + $0x100] sm:$0xff]  ;;  %v561_v27 = vld [vmem:[%s12903_s17 + $0x148] sm:$0xff]  ;;  %v567_v28 = vld [vmem:[%s12903_s17 + $0x178] sm:$0xff] }
  0x35   : > { %10607 = vmatpush1.bf16.msra.mxu0 %v10606_v1  ;;  %v574_v29 = vld [vmem:[%s12903_s17 + $0x1b0] sm:$0xff]  ;;  %v10638_v30 = vpack.c.bf16 %v559_v25, %v552_v24  ;;  %v10655_v31 = vpack.c.bf16 %v561_v27, %v554_v26  ;;  %v573_v34 = vld [vmem:[%s12903_s17 + $0x1a8] sm:$0xff]  ;;  %v568_v35 = vld [vmem:[%s12903_s17 + $0x180] sm:$0xff] }
  0x36   : > { %10627 = vmatpush1.bf16.msra.mxu1 %v10626_v2  ;;  %10629 = vmatprep.subr.bf16.mxu0 %v10628_v3  ;;  %v10640_v32 = vpack.c.bf16 %v574_v29, %v567_v28  ;;  %v566_v33 = vld [vmem:[%s12903_s17 + $0x170] sm:$0xff]  ;;  %v575_v36 = vld [vmem:[%s12903_s17 + $0x1b8] sm:$0xff]  ;;  %v581_v37 = vld [vmem:[%s12903_s17 + $0x1e8] sm:$0xff] }
  0x37   : > { %10648 = vmatprep.subr.bf16.mxu1 %v12752_v17  ;;  %v588_v38 = vld [vmem:[%s12903_s17 + $0x220] sm:$0xff]  ;;  %v10642_v39 = vpack.c.bf16 %v573_v34, %v566_v33  ;;  %v10658_v40 = vpack.c.bf16 %v575_v36, %v568_v35  ;;  %v587_v43 = vld [vmem:[%s12903_s17 + $0x218] sm:$0xff]  ;;  %v891_v44 = vld [vmem:[%s18562_s3 + $0x8] sm:$0xff] }
  0x38   : > { %8645 = vmatmul.mubr.msk.f32.vlgmr.msra.gmra.mrb[0].mxu0 %vm596_vm0, %v12956_v10  ;;  %v10644_v41 = vpack.c.bf16 %v588_v38, %v581_v37  ;;  %v580_v42 = vld [vmem:[%s12903_s17 + $0x1e0] sm:$0xff]  ;;  %v582_v45 = vld [vmem:[%s12903_s17 + $0x1f0] sm:$0xff]  ;;  %v589_v46 = vld [vmem:[%s12903_s17 + $0x228] sm:$0xff]  ;;  %s513_s17 = scalar_lea.vmem [#allocation2], %s512_s29 }
  0x39   : > { %8646 = vmatmul.mubr.msk.f32.vlgmr.msra.gmra.mrb[0].mxu1 %vm596_vm0, %v12956_v10  ;;  %10631 = vmatpush1.bf16.msra.mxu0 %v10630_v11  ;;  %v893_v47 = vld [vmem:[%s18562_s3 + $0x18] sm:$0xff]  ;;  %v8651_v48 = vld [vmem:[%s18562_s3 + $0x628] sm:$0xff]  ;;  %v10646_v50 = vpack.c.bf16 %v587_v43, %v580_v42  ;;  %v10661_v51 = vpack.c.bf16 %v589_v46, %v582_v45  ;;  %v890_v53 = vld [vmem:[%s18562_s3] sm:$0xff]  ;;  %s8585_s30 = sshll.u32 %s513_s17, 4  ;;  %s18519_s30 = int_to_ptr.vmem [resolvable:$true] %s8585_s30 }
  0x3a   : > { %10650 = vmatpush3.bf16.msra.mxu1 %v10649_v12  ;;  %10633 = vmatprep.subr.bf16.mxu0 %v10632_v13  ;;  %v8653_v49 = vld [vmem:[%s18562_s3 + $0x638] sm:$0xff]  ;;  %v10663_v52 = vpack.c.bf16 %v893_v47, %v891_v44  ;;  %v892_v54 = vld [vmem:[%s18562_s3 + $0x10] sm:$0xff]  ;;  %v8650_v55 = vld [vmem:[%s18562_s3 + $0x620] sm:$0xff]  ;;  %s12686_s2 = scalar_lea.vmem %s18519_s30, 16  ;;  %p12693_p0 = scmp.lt.s32.totalorder %s18519_s30, %s12691_s28 }
  0x3b   : > { %10651 = vmatprep.subr.bf16.mxu1 %v12752_v17  ;;  %806 = vmatprep.mubr.f32.mxu0 %v12750_v0  ;;  %v10859_v56 = vpack.c.bf16 %v8653_v49, %v8651_v48  ;;  %v8652_v57 = vld [vmem:[%s18562_s3 + $0x630] sm:$0xff]  ;;  %v895_v58 = vld [vmem:[%s18562_s3 + $0x28] sm:$0xff]  ;;  %v897_v59 = vld [vmem:[%s18562_s3 + $0x38] sm:$0xff]  ;;  %v10665_v62 = vpack.c.bf16 %v892_v54, %v890_v53  ;;  %p12687_p11 = scmp.ne.s32.totalorder %s18519_s30, %s12686_s2  ;;  %p12694_p1 = scmp.lt.s32.totalorder %s12692_s1, %s12686_s2 }
  0x3c   : > { %10286 = vmatprep.mubr.msk.f32.mxu1 %vm12753_vm1, %v12750_v0  ;;  %v8655_v60 = vld [vmem:[%s18562_s3 + $0x648] sm:$0xff]  ;;  %v8657_v61 = vld [vmem:[%s18562_s3 + $0x658] sm:$0xff]  ;;  %v10861_v63 = vpack.c.bf16 %v8652_v57, %v8650_v55  ;;  %v10667_v1 = vpack.c.bf16 %v897_v59, %v895_v58  ;;  %v894_v2 = vld [vmem:[%s18562_s3 + $0x20] sm:$0xff] }
  0x3d   : > { %10635 = vmatpush1.bf16.msra.mxu0 %v10634_v21  ;;  %v896_v3 = vld [vmem:[%s18562_s3 + $0x30] sm:$0xff]  ;;  %v8654_v4 = vld [vmem:[%s18562_s3 + $0x640] sm:$0xff]  ;;  %v10863_v5 = vpack.c.bf16 %v8657_v61, %v8655_v60  ;;  %v899_v7 = vld [vmem:[%s18562_s3 + $0x48] sm:$0xff]  ;;  %p12688_p12 = pnand %p12687_p11, %p12880_p5  ;;  %p12695_p2 = por %p12694_p1, %p12693_p0 }
  0x3e   : > { %10653 = vmatpush3.bf16.msra.mxu1 %v10652_v22  ;;  %10637 = vmatprep.subr.bf16.mxu0 %v10636_v23  ;;  %v8656_v6 = vld [vmem:[%s18562_s3 + $0x650] sm:$0xff]  ;;  %v901_v8 = vld [vmem:[%s18562_s3 + $0x58] sm:$0xff]  ;;  %v8659_v9 = vld [vmem:[%s18562_s3 + $0x668] sm:$0xff]  ;;  %v10669_v12 = vpack.c.bf16 %v896_v3, %v894_v2 }
  0x3f   : > { %10654 = vmatprep.subr.bf16.mxu1 %v12752_v17  ;;  %v8661_v11 = vld [vmem:[%s18562_s3 + $0x678] sm:$0xff]  ;;  %v10865_v13 = vpack.c.bf16 %v8656_v6, %v8654_v4  ;;  %v10671_v14 = vpack.c.bf16 %v901_v8, %v899_v7  ;;  %v898_v15 = vld [vmem:[%s18562_s3 + $0x40] sm:$0xff]  ;;  %v900_v16 = vld [vmem:[%s18562_s3 + $0x50] sm:$0xff]  ;;  %p12689_p13 = pneg %p12688_p12 }
  0x40   : > { %v8658_v18 = vld [vmem:[%s18562_s3 + $0x660] sm:$0xff]  ;;  %v8660_v19 = vld [vmem:[%s18562_s3 + $0x670] sm:$0xff]  ;;  %v903_v20 = vld [vmem:[%s18562_s3 + $0x68] sm:$0xff]  ;;  %v10673_v24 = vpack.c.bf16 %v900_v16, %v898_v15 }
  0x41   : > { %10639 = vmatpush1.bf16.msra.mxu0 %v10638_v30  ;;  %v905_v21 = vld [vmem:[%s18562_s3 + $0x78] sm:$0xff]  ;;  %v8663_v22 = vld [vmem:[%s18562_s3 + $0x688] sm:$0xff]  ;;  %v10869_v25 = vpack.c.bf16 %v8660_v19, %v8658_v18  ;;  %v902_v27 = vld [vmem:[%s18562_s3 + $0x60] sm:$0xff]  ;;  %p12696_p3 = pnand %p12695_p2, %p12689_p13 }
  0x42   : > { %10656 = vmatpush3.bf16.msra.mxu1 %v10655_v31  ;;  %10641 = vmatprep.subr.bf16.mxu0 %v10640_v32  ;;  %v8665_v23 = vld [vmem:[%s18562_s3 + $0x698] sm:$0xff]  ;;  %v10675_v26 = vpack.c.bf16 %v905_v21, %v903_v20  ;;  %v904_v28 = vld [vmem:[%s18562_s3 + $0x70] sm:$0xff]  ;;  %v8662_v29 = vld [vmem:[%s18562_s3 + $0x680] sm:$0xff] }
  0x43   : > { %10657 = vmatprep.subr.bf16.mxu1 %v12752_v17  ;;  %v10871_v30 = vpack.c.bf16 %v8665_v23, %v8663_v22  ;;  %v8664_v31 = vld [vmem:[%s18562_s3 + $0x690] sm:$0xff]  ;;  %v907_v32 = vld [vmem:[%s18562_s3 + $0x88] sm:$0xff]  ;;  %v909_v33 = vld [vmem:[%s18562_s3 + $0x98] sm:$0xff]  ;;  %v10677_v36 = vpack.c.bf16 %v904_v28, %v902_v27 }
  0x44   : > { %v8667_v34 = vld [vmem:[%s18562_s3 + $0x6a8] sm:$0xff]  ;;  %v8669_v35 = vld [vmem:[%s18562_s3 + $0x6b8] sm:$0xff]  ;;  %v10873_v37 = vpack.c.bf16 %v8664_v31, %v8662_v29  ;;  %v10679_v38 = vpack.c.bf16 %v909_v33, %v907_v32  ;;  %v8668_v43 = vld [vmem:[%s18562_s3 + $0x6b0] sm:$0xff] }
  0x45   : > { %10643 = vmatpush1.bf16.msra.mxu0 %v10642_v39  ;;  %v906_v39 = vld [vmem:[%s18562_s3 + $0x80] sm:$0xff]  ;;  %v10875_v42 = vpack.c.bf16 %v8669_v35, %v8667_v34  ;;  %v911_v44 = vld [vmem:[%s18562_s3 + $0xa8] sm:$0xff]  ;;  %v913_v45 = vld [vmem:[%s18562_s3 + $0xb8] sm:$0xff] }
  0x46   : > { %10659 = vmatpush3.bf16.msra.mxu1 %v10658_v40  ;;  %10645 = vmatprep.subr.bf16.mxu0 %v10644_v41  ;;  %v908_v40 = vld [vmem:[%s18562_s3 + $0x90] sm:$0xff]  ;;  %v8666_v41 = vld [vmem:[%s18562_s3 + $0x6a0] sm:$0xff]  ;;  %v8671_v46 = vld [vmem:[%s18562_s3 + $0x6c8] sm:$0xff] }
  0x47   : > { %10660 = vmatprep.subr.bf16.mxu1 %v12752_v17  ;;  %v8673_v47 = vld [vmem:[%s18562_s3 + $0x6d8] sm:$0xff]  ;;  %v10681_v48 = vpack.c.bf16 %v908_v40, %v906_v39  ;;  %v10877_v49 = vpack.c.bf16 %v8668_v43, %v8666_v41  ;;  %v8670_v53 = vld [vmem:[%s18562_s3 + $0x6c0] sm:$0xff]  ;;  %v8672_v55 = vld [vmem:[%s18562_s3 + $0x6d0] sm:$0xff] }
  0x48   : > { %v10879_v54 = vpack.c.bf16 %v8673_v47, %v8671_v46  ;;  %v917_v57 = vld [vmem:[%s18562_s3 + $0xd8] sm:$0xff]  ;;  %v8675_v58 = vld [vmem:[%s18562_s3 + $0x6e8] sm:$0xff]  ;;  %v10881_v61 = vpack.c.bf16 %v8672_v55, %v8670_v53  ;;  %v8674_v2 = vld [vmem:[%s18562_s3 + $0x6e0] sm:$0xff] }
  0x49   : > { %10647 = vmatpush1.bf16.msra.mxu0 %v10646_v50  ;;  %v10683_v50 = vpack.c.bf16 %v913_v45, %v911_v44  ;;  %v8677_v59 = vld [vmem:[%s18562_s3 + $0x6f8] sm:$0xff]  ;;  %v8676_v4 = vld [vmem:[%s18562_s3 + $0x6f0] sm:$0xff]  ;;  %v8679_v7 = vld [vmem:[%s18562_s3 + $0x708] sm:$0xff] }
  0x4a   : > { %10662 = vmatpush3.bf16.msra.mxu1 %v10661_v51  ;;  %10664 = vmatprep.subr.bf16.mxu0 %v10663_v52  ;;  %v910_v51 = vld [vmem:[%s18562_s3 + $0xa0] sm:$0xff]  ;;  %v912_v52 = vld [vmem:[%s18562_s3 + $0xb0] sm:$0xff]  ;;  %v10883_v3 = vpack.c.bf16 %v8677_v59, %v8675_v58  ;;  %v921_v6 = vld [vmem:[%s18562_s3 + $0xf8] sm:$0xff] }
  0x4b   : > { %10860 = vmatprep.subr.bf16.mxu1 %v10859_v56  ;;  %v915_v56 = vld [vmem:[%s18562_s3 + $0xc8] sm:$0xff]  ;;  %v10685_v60 = vpack.c.bf16 %v912_v52, %v910_v51  ;;  %v8681_v8 = vld [vmem:[%s18562_s3 + $0x718] sm:$0xff]  ;;  %v8678_v15 = vld [vmem:[%s18562_s3 + $0x700] sm:$0xff] }
  0x4c   : > { %8647 = vmatmul.mubr.msk.f32.vlgmr.msra.gmra.mrb[2].mxu0 %vm596_vm0, %v12956_v10  ;;  %v10887_v16 = vpack.c.bf16 %v8681_v8, %v8679_v7  ;;  %v8680_v18 = vld [vmem:[%s18562_s3 + $0x710] sm:$0xff]  ;;  %v925_v19 = vld [vmem:[%s18562_s3 + $0x118] sm:$0xff]  ;;  %v8683_v20 = vld [vmem:[%s18562_s3 + $0x728] sm:$0xff] }
  0x4d   : > { %10287 = vmatmul.mubr.msk.f32.vlgmr.msra.gmra.mrb[2].mxu1 %vm596_vm0, %v12956_v10  ;;  %10666 = vmatpush1.bf16.msra.mxu0 %v10665_v62  ;;  %v10867_v10 = vpack.c.bf16 %v8661_v11, %v8659_v9  ;;  %v10687_v62 = vpack.c.bf16 %v917_v57, %v915_v56  ;;  %v10885_v11 = vpack.c.bf16 %v8676_v4, %v8674_v2  ;;  %v8685_v21 = vld [vmem:[%s18562_s3 + $0x738] sm:$0xff]  ;;  %v8682_v27 = vld [vmem:[%s18562_s3 + $0x720] sm:$0xff]  ;;  %v8684_v29 = vld [vmem:[%s18562_s3 + $0x730] sm:$0xff] }
  0x4e   : > { %10862 = vmatpush1.bf16.msra.mxu1 %v10861_v63  ;;  %10668 = vmatprep.subr.bf16.mxu0 %v10667_v1  ;;  %v914_v63 = vld [vmem:[%s18562_s3 + $0xc0] sm:$0xff]  ;;  %v916_v1 = vld [vmem:[%s18562_s3 + $0xd0] sm:$0xff]  ;;  %v10889_v23 = vpack.c.bf16 %v8680_v18, %v8678_v15  ;;  %v10891_v28 = vpack.c.bf16 %v8685_v21, %v8683_v20  ;;  %v929_v31 = vld [vmem:[%s18562_s3 + $0x138] sm:$0xff]  ;;  %v10893_v35 = vpack.c.bf16 %v8684_v29, %v8682_v27 }
  0x4f   : > { %10864 = vmatprep.subr.bf16.mxu1 %v10863_v5  ;;  %v919_v5 = vld [vmem:[%s18562_s3 + $0xe8] sm:$0xff]  ;;  %v10689_v9 = vpack.c.bf16 %v916_v1, %v914_v63  ;;  %v8689_v33 = vld [vmem:[%s18562_s3 + $0x758] sm:$0xff]  ;;  %v8686_v39 = vld [vmem:[%s18562_s3 + $0x740] sm:$0xff] }
  0x50   : > { %v8687_v32 = vld [vmem:[%s18562_s3 + $0x748] sm:$0xff]  ;;  %v8688_v41 = vld [vmem:[%s18562_s3 + $0x750] sm:$0xff]  ;;  %v933_v43 = vld [vmem:[%s18562_s3 + $0x158] sm:$0xff] }
  0x51   : > { %10670 = vmatpush1.bf16.msra.mxu0 %v10669_v12  ;;  %v10691_v12 = vpack.c.bf16 %v921_v6, %v919_v5  ;;  %v10895_v40 = vpack.c.bf16 %v8689_v33, %v8687_v32  ;;  %v8691_v44 = vld [vmem:[%s18562_s3 + $0x768] sm:$0xff]  ;;  %v8693_v45 = vld [vmem:[%s18562_s3 + $0x778] sm:$0xff]  ;;  %v10897_v47 = vpack.c.bf16 %v8688_v41, %v8686_v39  ;;  %v8690_v51 = vld [vmem:[%s18562_s3 + $0x760] sm:$0xff] }
  0x52   : > { %10866 = vmatpush1.bf16.msra.mxu1 %v10865_v13  ;;  %10672 = vmatprep.subr.bf16.mxu0 %v10671_v14  ;;  %v918_v13 = vld [vmem:[%s18562_s3 + $0xe0] sm:$0xff]  ;;  %v920_v14 = vld [vmem:[%s18562_s3 + $0xf0] sm:$0xff]  ;;  %v10899_v52 = vpack.c.bf16 %v8693_v45, %v8691_v44  ;;  %v937_v55 = vld [vmem:[%s18562_s3 + $0x178] sm:$0xff] }
  0x53   : > { %10868 = vmatprep.subr.bf16.mxu1 %v10867_v10  ;;  %v923_v10 = vld [vmem:[%s18562_s3 + $0x108] sm:$0xff]  ;;  %v10693_v22 = vpack.c.bf16 %v920_v14, %v918_v13  ;;  %v8692_v53 = vld [vmem:[%s18562_s3 + $0x770] sm:$0xff]  ;;  %v8697_v57 = vld [vmem:[%s18562_s3 + $0x798] sm:$0xff] }
  0x54   : > { %v8695_v56 = vld [vmem:[%s18562_s3 + $0x788] sm:$0xff]  ;;  %v10901_v59 = vpack.c.bf16 %v8692_v53, %v8690_v51  ;;  %v8694_v63 = vld [vmem:[%s18562_s3 + $0x780] sm:$0xff]  ;;  %v8696_v2 = vld [vmem:[%s18562_s3 + $0x790] sm:$0xff] }
  0x55   : > { %10674 = vmatpush1.bf16.msra.mxu0 %v10673_v24  ;;  %v10695_v24 = vpack.c.bf16 %v925_v19, %v923_v10  ;;  %v10903_v1 = vpack.c.bf16 %v8697_v57, %v8695_v56  ;;  %v941_v4 = vld [vmem:[%s18562_s3 + $0x198] sm:$0xff]  ;;  %v8699_v5 = vld [vmem:[%s18562_s3 + $0x7a8] sm:$0xff]  ;;  %v10905_v8 = vpack.c.bf16 %v8696_v2, %v8694_v63  ;;  %v8698_v13 = vld [vmem:[%s18562_s3 + $0x7a0] sm:$0xff] }
  0x56   : > { %10870 = vmatpush1.bf16.msra.mxu1 %v10869_v25  ;;  %10676 = vmatprep.subr.bf16.mxu0 %v10675_v26  ;;  %v922_v25 = vld [vmem:[%s18562_s3 + $0x100] sm:$0xff]  ;;  %v924_v26 = vld [vmem:[%s18562_s3 + $0x110] sm:$0xff]  ;;  %v8701_v6 = vld [vmem:[%s18562_s3 + $0x7b8] sm:$0xff] }
  0x57   : > { %10872 = vmatprep.subr.bf16.mxu1 %v10871_v30  ;;  %v927_v30 = vld [vmem:[%s18562_s3 + $0x128] sm:$0xff]  ;;  %v10697_v34 = vpack.c.bf16 %v924_v26, %v922_v25  ;;  %v10907_v14 = vpack.c.bf16 %v8701_v6, %v8699_v5  ;;  %v8700_v15 = vld [vmem:[%s18562_s3 + $0x7b0] sm:$0xff]  ;;  %v945_v18 = vld [vmem:[%s18562_s3 + $0x1b8] sm:$0xff] }
  0x58   : > { %v8703_v10 = vld [vmem:[%s18562_s3 + $0x7c8] sm:$0xff]  ;;  %v8705_v19 = vld [vmem:[%s18562_s3 + $0x7d8] sm:$0xff]  ;;  %v10909_v21 = vpack.c.bf16 %v8700_v15, %v8698_v13  ;;  %v8702_v25 = vld [vmem:[%s18562_s3 + $0x7c0] sm:$0xff] }
  0x59   : > { %10678 = vmatpush1.bf16.msra.mxu0 %v10677_v36  ;;  %v10699_v36 = vpack.c.bf16 %v929_v31, %v927_v30  ;;  %v10911_v26 = vpack.c.bf16 %v8705_v19, %v8703_v10  ;;  %v8704_v27 = vld [vmem:[%s18562_s3 + $0x7d0] sm:$0xff]  ;;  %v949_v29 = vld [vmem:[%s18562_s3 + $0x1d8] sm:$0xff]  ;;  %v8707_v30 = vld [vmem:[%s18562_s3 + $0x7e8] sm:$0xff] }
  0x5a   : > { %10874 = vmatpush1.bf16.msra.mxu1 %v10873_v37  ;;  %10680 = vmatprep.subr.bf16.mxu0 %v10679_v38  ;;  %v926_v37 = vld [vmem:[%s18562_s3 + $0x120] sm:$0xff]  ;;  %v928_v38 = vld [vmem:[%s18562_s3 + $0x130] sm:$0xff]  ;;  %v8709_v31 = vld [vmem:[%s18562_s3 + $0x7f8] sm:$0xff]  ;;  %v10913_v33 = vpack.c.bf16 %v8704_v27, %v8702_v25 }
  0x5b   : > { %10876 = vmatprep.subr.bf16.mxu1 %v10875_v42  ;;  %v931_v42 = vld [vmem:[%s18562_s3 + $0x148] sm:$0xff]  ;;  %v10701_v46 = vpack.c.bf16 %v928_v38, %v926_v37  ;;  %v10915_v37 = vpack.c.bf16 %v8709_v31, %v8707_v30  ;;  %v8706_v38 = vld [vmem:[%s18562_s3 + $0x7e0] sm:$0xff]  ;;  %v8708_v39 = vld [vmem:[%s18562_s3 + $0x7f0] sm:$0xff] }
  0x5c   : > { %v10917_v41 = vpack.c.bf16 %v8708_v39, %v8706_v38  ;;  %v8711_v44 = vld [vmem:[%s18562_s3 + $0x808] sm:$0xff]  ;;  %v8710_v51 = vld [vmem:[%s18562_s3 + $0x800] sm:$0xff]  ;;  %v8716_v5 = vld [vmem:[%s18562_s3 + $0x830] sm:$0xff] }
  0x5d   : > { %10682 = vmatpush1.bf16.msra.mxu0 %v10681_v48  ;;  %v10703_v48 = vpack.c.bf16 %v933_v43, %v931_v42  ;;  %v951_v42 = vld [vmem:[%s18562_s3 + $0x1e8] sm:$0xff]  ;;  %v953_v43 = vld [vmem:[%s18562_s3 + $0x1f8] sm:$0xff]  ;;  %v960_v10 = vld [vmem:[%s18562_s3 + $0x230] sm:$0xff] }
  0x5e   : > { %10878 = vmatpush1.bf16.msra.mxu1 %v10877_v49  ;;  %10684 = vmatprep.subr.bf16.mxu0 %v10683_v50  ;;  %v930_v49 = vld [vmem:[%s18562_s3 + $0x140] sm:$0xff]  ;;  %v932_v50 = vld [vmem:[%s18562_s3 + $0x150] sm:$0xff]  ;;  %v10723_v45 = vpack.c.bf16 %v953_v43, %v951_v42  ;;  %v8715_v56 = vld [vmem:[%s18562_s3 + $0x828] sm:$0xff] }
  0x5f   : > { %10880 = vmatprep.subr.bf16.mxu1 %v10879_v54  ;;  %v935_v54 = vld [vmem:[%s18562_s3 + $0x168] sm:$0xff]  ;;  %v10705_v58 = vpack.c.bf16 %v932_v50, %v930_v49  ;;  %v8721_v13 = vld [vmem:[%s18562_s3 + $0x858] sm:$0xff]  ;;  %v962_v31 = vld [vmem:[%s18562_s3 + $0x240] sm:$0xff] }
  0x60   : > { %v965_v25 = vld [vmem:[%s18562_s3 + $0x258] sm:$0xff]  ;;  %v8727_v39 = vld [vmem:[%s18562_s3 + $0x888] sm:$0xff]  ;;  %v966_v43 = vld [vmem:[%s18562_s3 + $0x260] sm:$0xff] }
  0x61   : > { %10686 = vmatpush1.bf16.msra.mxu0 %v10685_v60  ;;  %v10707_v60 = vpack.c.bf16 %v937_v55, %v935_v54  ;;  %v955_v54 = vld [vmem:[%s18562_s3 + $0x208] sm:$0xff]  ;;  %v957_v55 = vld [vmem:[%s18562_s3 + $0x218] sm:$0xff] }
  0x62   : > { %10882 = vmatpush1.bf16.msra.mxu1 %v10881_v61  ;;  %10688 = vmatprep.subr.bf16.mxu0 %v10687_v62  ;;  %v934_v61 = vld [vmem:[%s18562_s3 + $0x160] sm:$0xff]  ;;  %v936_v62 = vld [vmem:[%s18562_s3 + $0x170] sm:$0xff]  ;;  %v10727_v57 = vpack.c.bf16 %v957_v55, %v955_v54  ;;  %v8725_v27 = vld [vmem:[%s18562_s3 + $0x878] sm:$0xff] }
  0x63   : > { %10884 = vmatprep.subr.bf16.mxu1 %v10883_v3  ;;  %v939_v3 = vld [vmem:[%s18562_s3 + $0x188] sm:$0xff]  ;;  %v10709_v7 = vpack.c.bf16 %v936_v62, %v934_v61  ;;  %v954_v62 = vld [vmem:[%s18562_s3 + $0x200] sm:$0xff]  ;;  %v969_v38 = vld [vmem:[%s18562_s3 + $0x278] sm:$0xff] }
  0x64   : > { %v970_v55 = vld [vmem:[%s18562_s3 + $0x280] sm:$0xff] }
  0x65   : > { %10690 = vmatpush1.bf16.msra.mxu0 %v10689_v9  ;;  %v10711_v9 = vpack.c.bf16 %v941_v4, %v939_v3  ;;  %v956_v3 = vld [vmem:[%s18562_s3 + $0x210] sm:$0xff]  ;;  %v8714_v4 = vld [vmem:[%s18562_s3 + $0x820] sm:$0xff] }
  0x66   : > { %10886 = vmatpush1.bf16.msra.mxu1 %v10885_v11  ;;  %10692 = vmatprep.subr.bf16.mxu0 %v10691_v12  ;;  %v938_v11 = vld [vmem:[%s18562_s3 + $0x180] sm:$0xff]  ;;  %v940_v12 = vld [vmem:[%s18562_s3 + $0x190] sm:$0xff]  ;;  %v10729_v15 = vpack.c.bf16 %v956_v3, %v954_v62  ;;  %v975_v62 = vld [vmem:[%s18562_s3 + $0x2a8] sm:$0xff] }
  0x67   : > { %10888 = vmatprep.subr.bf16.mxu1 %v10887_v16  ;;  %v943_v16 = vld [vmem:[%s18562_s3 + $0x1a8] sm:$0xff]  ;;  %v10713_v20 = vpack.c.bf16 %v940_v12, %v938_v11  ;;  %v961_v11 = vld [vmem:[%s18562_s3 + $0x238] sm:$0xff] }
  0x68   : > { %v8719_v12 = vld [vmem:[%s18562_s3 + $0x848] sm:$0xff]  ;;  %v8737_v3 = vld [vmem:[%s18562_s3 + $0x8d8] sm:$0xff] }
  0x69   : > { %10694 = vmatpush1.bf16.msra.mxu0 %v10693_v22  ;;  %v10715_v22 = vpack.c.bf16 %v945_v18, %v943_v16  ;;  %v10925_v16 = vpack.c.bf16 %v8716_v5, %v8714_v4  ;;  %v958_v18 = vld [vmem:[%s18562_s3 + $0x220] sm:$0xff] }
  0x6a   : > { %10890 = vmatpush1.bf16.msra.mxu1 %v10889_v23  ;;  %10696 = vmatprep.subr.bf16.mxu0 %v10695_v24  ;;  %v942_v23 = vld [vmem:[%s18562_s3 + $0x1a0] sm:$0xff]  ;;  %v944_v24 = vld [vmem:[%s18562_s3 + $0x1b0] sm:$0xff] }
  0x6b   : > { %10892 = vmatprep.subr.bf16.mxu1 %v10891_v28  ;;  %v947_v28 = vld [vmem:[%s18562_s3 + $0x1c8] sm:$0xff]  ;;  %v10717_v32 = vpack.c.bf16 %v944_v24, %v942_v23  ;;  %v10927_v24 = vpack.c.bf16 %v8721_v13, %v8719_v12 }
  0x6d   : > { %10698 = vmatpush1.bf16.msra.mxu0 %v10697_v34  ;;  %v10719_v34 = vpack.c.bf16 %v949_v29, %v947_v28  ;;  %v10733_v29 = vpack.c.bf16 %v960_v10, %v958_v18  ;;  %v979_v18 = vld [vmem:[%s18562_s3 + $0x2c8] sm:$0xff]  ;;  %v981_v10 = vld [vmem:[%s18562_s3 + $0x2d8] sm:$0xff] }
  0x6e   : > { %10894 = vmatpush1.bf16.msra.mxu1 %v10893_v35  ;;  %10700 = vmatprep.subr.bf16.mxu0 %v10699_v36  ;;  %v946_v35 = vld [vmem:[%s18562_s3 + $0x1c0] sm:$0xff]  ;;  %v948_v36 = vld [vmem:[%s18562_s3 + $0x1d0] sm:$0xff] }
  0x6f   : > { %10896 = vmatprep.subr.bf16.mxu1 %v10895_v40  ;;  %v10721_v40 = vpack.c.bf16 %v948_v36, %v946_v35  ;;  %v8722_v35 = vld [vmem:[%s18562_s3 + $0x860] sm:$0xff]  ;;  %v8724_v36 = vld [vmem:[%s18562_s3 + $0x870] sm:$0xff] }
  0x70   : > { %v10933_v42 = vpack.c.bf16 %v8724_v36, %v8722_v35  ;;  %v8745_v35 = vld [vmem:[%s18562_s3 + $0x918] sm:$0xff] }
  0x71   : > { %10702 = vmatpush1.bf16.msra.mxu0 %v10701_v46  ;;  %v8713_v46 = vld [vmem:[%s18562_s3 + $0x818] sm:$0xff] }
  0x72   : > { %10898 = vmatpush1.bf16.msra.mxu1 %v10897_v47  ;;  %10704 = vmatprep.subr.bf16.mxu0 %v10703_v48  ;;  %v950_v47 = vld [vmem:[%s18562_s3 + $0x1e0] sm:$0xff]  ;;  %v952_v48 = vld [vmem:[%s18562_s3 + $0x1f0] sm:$0xff]  ;;  %v10919_v49 = vpack.c.bf16 %v8713_v46, %v8711_v44 }
  0x73   : > { %10900 = vmatprep.subr.bf16.mxu1 %v10899_v52  ;;  %v10725_v50 = vpack.c.bf16 %v952_v48, %v950_v47  ;;  %v8712_v52 = vld [vmem:[%s18562_s3 + $0x810] sm:$0xff]  ;;  %v8726_v47 = vld [vmem:[%s18562_s3 + $0x880] sm:$0xff] }
  0x74   : > { %v10921_v53 = vpack.c.bf16 %v8712_v52, %v8710_v51  ;;  %v968_v44 = vld [vmem:[%s18562_s3 + $0x270] sm:$0xff]  ;;  %v8731_v51 = vld [vmem:[%s18562_s3 + $0x8a8] sm:$0xff]  ;;  %v8733_v52 = vld [vmem:[%s18562_s3 + $0x8b8] sm:$0xff] }
  0x75   : > { %10706 = vmatpush1.bf16.msra.mxu0 %v10705_v58  ;;  %v8717_v58 = vld [vmem:[%s18562_s3 + $0x838] sm:$0xff]  ;;  %v8728_v48 = vld [vmem:[%s18562_s3 + $0x890] sm:$0xff] }
  0x76   : > { %10902 = vmatpush1.bf16.msra.mxu1 %v10901_v59  ;;  %10708 = vmatprep.subr.bf16.mxu0 %v10707_v60  ;;  %v10923_v59 = vpack.c.bf16 %v8717_v58, %v8715_v56  ;;  %v10937_v54 = vpack.c.bf16 %v8728_v48, %v8726_v47  ;;  %v972_v56 = vld [vmem:[%s18562_s3 + $0x290] sm:$0xff]  ;;  %v10939_v58 = vpack.c.bf16 %v8733_v52, %v8731_v51  ;;  %v8749_v47 = vld [vmem:[%s18562_s3 + $0x938] sm:$0xff] }
  0x77   : > { %10904 = vmatprep.subr.bf16.mxu1 %v10903_v1  ;;  %v10745_v5 = vpack.c.bf16 %v972_v56, %v970_v55  ;;  %v988_v51 = vld [vmem:[%s18562_s3 + $0x310] sm:$0xff]  ;;  %v991_v56 = vld [vmem:[%s18562_s3 + $0x328] sm:$0xff] }
  0x78   : > { %v8748_v55 = vld [vmem:[%s18562_s3 + $0x930] sm:$0xff] }
  0x79   : > { %10710 = vmatpush1.bf16.msra.mxu0 %v10709_v7 }
  0x7a   : > { %10906 = vmatpush1.bf16.msra.mxu1 %v10905_v8  ;;  %10712 = vmatprep.subr.bf16.mxu0 %v10711_v9  ;;  %v959_v8 = vld [vmem:[%s18562_s3 + $0x228] sm:$0xff] }
  0x7b   : > { %10908 = vmatprep.subr.bf16.mxu1 %v10907_v14  ;;  %v10731_v23 = vpack.c.bf16 %v961_v11, %v959_v8  ;;  %v976_v8 = vld [vmem:[%s18562_s3 + $0x2b0] sm:$0xff] }
  0x7d   : > { %10714 = vmatpush1.bf16.msra.mxu0 %v10713_v20  ;;  %v8718_v20 = vld [vmem:[%s18562_s3 + $0x840] sm:$0xff] }
  0x7e   : > { %10910 = vmatpush1.bf16.msra.mxu1 %v10909_v21  ;;  %10716 = vmatprep.subr.bf16.mxu0 %v10715_v22  ;;  %v8720_v21 = vld [vmem:[%s18562_s3 + $0x850] sm:$0xff]  ;;  %v963_v22 = vld [vmem:[%s18562_s3 + $0x248] sm:$0xff] }
  0x7f   : > { %10912 = vmatprep.subr.bf16.mxu1 %v10911_v26  ;;  %v8723_v26 = vld [vmem:[%s18562_s3 + $0x868] sm:$0xff]  ;;  %v10929_v30 = vpack.c.bf16 %v8720_v21, %v8718_v20  ;;  %v8741_v21 = vld [vmem:[%s18562_s3 + $0x8f8] sm:$0xff] }
  0x80   : > { %v8739_v20 = vld [vmem:[%s18562_s3 + $0x8e8] sm:$0xff] }
  0x81   : > { %10718 = vmatpush1.bf16.msra.mxu0 %v10717_v32  ;;  %v964_v32 = vld [vmem:[%s18562_s3 + $0x250] sm:$0xff] }
  0x82   : > { %10914 = vmatpush1.bf16.msra.mxu1 %v10913_v33  ;;  %10720 = vmatprep.subr.bf16.mxu0 %v10719_v34  ;;  %v10735_v33 = vpack.c.bf16 %v965_v25, %v963_v22  ;;  %v10931_v34 = vpack.c.bf16 %v8725_v27, %v8723_v26  ;;  %v978_v25 = vld [vmem:[%s18562_s3 + $0x2c0] sm:$0xff]  ;;  %v980_v26 = vld [vmem:[%s18562_s3 + $0x2d0] sm:$0xff]  ;;  %v10751_v27 = vpack.c.bf16 %v981_v10, %v979_v18 }
  0x83   : > { %10916 = vmatprep.subr.bf16.mxu1 %v10915_v37  ;;  %v967_v37 = vld [vmem:[%s18562_s3 + $0x268] sm:$0xff]  ;;  %v10753_v36 = vpack.c.bf16 %v980_v26, %v978_v25  ;;  %v994_v10 = vld [vmem:[%s18562_s3 + $0x340] sm:$0xff]  ;;  %v1001_v26 = vld [vmem:[%s18562_s3 + $0x378] sm:$0xff] }
  0x84   : > { %v999_v25 = vld [vmem:[%s18562_s3 + $0x368] sm:$0xff] }
  0x85   : > { %10722 = vmatpush1.bf16.msra.mxu0 %v10721_v40  ;;  %v8729_v40 = vld [vmem:[%s18562_s3 + $0x898] sm:$0xff] }
  0x86   : > { %10918 = vmatpush1.bf16.msra.mxu1 %v10917_v41  ;;  %10724 = vmatprep.subr.bf16.mxu0 %v10723_v45  ;;  %v10737_v41 = vpack.c.bf16 %v964_v32, %v962_v31  ;;  %v10739_v45 = vpack.c.bf16 %v969_v38, %v967_v37  ;;  %v10935_v46 = vpack.c.bf16 %v8729_v40, %v8727_v39  ;;  %v8740_v31 = vld [vmem:[%s18562_s3 + $0x8f0] sm:$0xff]  ;;  %v983_v32 = vld [vmem:[%s18562_s3 + $0x2e8] sm:$0xff]  ;;  %v982_v38 = vld [vmem:[%s18562_s3 + $0x2e0] sm:$0xff] }
  0x87   : > { %10920 = vmatprep.subr.bf16.mxu1 %v10919_v49  ;;  %v971_v49 = vld [vmem:[%s18562_s3 + $0x288] sm:$0xff]  ;;  %v984_v39 = vld [vmem:[%s18562_s3 + $0x2f0] sm:$0xff] }
  0x88   : > { %v10757_v48 = vpack.c.bf16 %v984_v39, %v982_v38  ;;  %v1003_v38 = vld [vmem:[%s18562_s3 + $0x388] sm:$0xff]  ;;  %v1005_v39 = vld [vmem:[%s18562_s3 + $0x398] sm:$0xff] }
  0x89   : > { %10726 = vmatpush1.bf16.msra.mxu0 %v10725_v50  ;;  %v973_v50 = vld [vmem:[%s18562_s3 + $0x298] sm:$0xff] }
  0x8a   : > { %10922 = vmatpush1.bf16.msra.mxu1 %v10921_v53  ;;  %10728 = vmatprep.subr.bf16.mxu0 %v10727_v57  ;;  %v10741_v53 = vpack.c.bf16 %v968_v44, %v966_v43  ;;  %v10743_v57 = vpack.c.bf16 %v973_v50, %v971_v49  ;;  %v8744_v43 = vld [vmem:[%s18562_s3 + $0x910] sm:$0xff]  ;;  %v987_v44 = vld [vmem:[%s18562_s3 + $0x308] sm:$0xff]  ;;  %v986_v50 = vld [vmem:[%s18562_s3 + $0x300] sm:$0xff] }
  0x8b   : > { %10924 = vmatprep.subr.bf16.mxu1 %v10923_v59  ;;  %v8730_v59 = vld [vmem:[%s18562_s3 + $0x8a0] sm:$0xff] }
  0x9a   : > { %v13392_v60 = vpop.permute.xlu0 %593 }
 0x10b   : > { %v666_v61 = vpop.f32.mrb[0].mxu0 }
 0x10c   : > { %v667_v63 = vadd.f32 %v666_v61, %v13392_v60  ;;  %v13398_v1 = vpop.f32.mrb[0].mxu1  ;;  %v668_v2 = vpop.f32.mrb[1].mxu0  ;;  %v8732_v61 = vld [vmem:[%s18562_s3 + $0x8b0] sm:$0xff] }
 0x10d   : > { %v669_v6 = vadd.f32 %v668_v2, %v13392_v60  ;;  %v739_v7 = vpop.f32.mrb[1].mxu1  ;;  %v8735_v2 = vld [vmem:[%s18562_s3 + $0x8c8] sm:$0xff] }
 0x10e   : > { %v740_v9 = vadd.f32 %v739_v7, %v13392_v60  ;;  %v13431_v19 = vmax.f32 %v667_v63, 0.0  ;;  %v977_v63 = vld [vmem:[%s18562_s3 + $0x2b8] sm:$0xff]  ;;  %v974_v7 = vld [vmem:[%s18562_s3 + $0x2a0] sm:$0xff]  ;;  %v10943_v13 = vpack.c.bf16 %v8737_v3, %v8735_v2  ;;  %v992_v2 = vld [vmem:[%s18562_s3 + $0x330] sm:$0xff] }
 0x10f   : > { %v13423_v14 = vmax.f32 %v669_v6, 0.0  ;;  %v10941_v6 = vpack.c.bf16 %v8732_v61, %v8730_v59  ;;  %v10747_v12 = vpack.c.bf16 %v977_v63, %v975_v62  ;;  %v8753_v59 = vld [vmem:[%s18562_s3 + $0x958] sm:$0xff]  ;;  %v10761_v61 = vpack.c.bf16 %v988_v51, %v986_v50  ;;  %v990_v63 = vld [vmem:[%s18562_s3 + $0x320] sm:$0xff]  ;;  %v1007_v50 = vld [vmem:[%s18562_s3 + $0x3a8] sm:$0xff] }
 0x110   : > { %v13453_v28 = vmax.f32 %v740_v9, 0.0  ;;  %v1009_v51 = vld [vmem:[%s18562_s3 + $0x3b8] sm:$0xff] }
 0x111   : > { %1154 = vmatprep.mubr.f32.mxu0 %v13423_v14  ;;  %1635 = vmatprep.mubr.f32.mxu1 %v13423_v14 }
 0x112   : > { %1155 = vmatmul.mubr.f32.vlgmr.msra.gmra.mrb[4].mxu0 %v13431_v19  ;;  %1636 = vmatmul.mubr.f32.vlgmr.msra.gmra.mrb[4].mxu1 %v13431_v19 }
 0x113   : > { %10730 = vmatpush1.bf16.msra.mxu0 %v10729_v15  ;;  %10926 = vmatpush1.bf16.msra.mxu1 %v10925_v16  ;;  %v8734_v15 = vld [vmem:[%s18562_s3 + $0x8c0] sm:$0xff]  ;;  %v8736_v16 = vld [vmem:[%s18562_s3 + $0x8d0] sm:$0xff] }
 0x114   : > { %1225 = vmatprep.mubr.f32.mxu0 %v13453_v28  ;;  %1706 = vmatprep.mubr.f32.mxu1 %v13453_v28 }
 0x115   : > { %10732 = vmatprep.subr.bf16.mxu0 %v10731_v23  ;;  %10928 = vmatprep.subr.bf16.mxu1 %v10927_v24  ;;  %v10749_v23 = vpack.c.bf16 %v976_v8, %v974_v7  ;;  %v10945_v24 = vpack.c.bf16 %v8736_v16, %v8734_v15  ;;  %v8752_v7 = vld [vmem:[%s18562_s3 + $0x950] sm:$0xff]  ;;  %v995_v8 = vld [vmem:[%s18562_s3 + $0x348] sm:$0xff]  ;;  %v8757_v15 = vld [vmem:[%s18562_s3 + $0x978] sm:$0xff]  ;;  %v10765_v16 = vpack.c.bf16 %v992_v2, %v990_v63 }
 0x116   : > { %v1011_v63 = vld [vmem:[%s18562_s3 + $0x3c8] sm:$0xff]  ;;  %v1013_v2 = vld [vmem:[%s18562_s3 + $0x3d8] sm:$0xff] }
 0x117   : > { %10734 = vmatpush1.bf16.msra.mxu0 %v10733_v29  ;;  %10930 = vmatpush1.bf16.msra.mxu1 %v10929_v30  ;;  %v10947_v29 = vpack.c.bf16 %v8741_v21, %v8739_v20  ;;  %v8738_v30 = vld [vmem:[%s18562_s3 + $0x8e0] sm:$0xff]  ;;  %v996_v20 = vld [vmem:[%s18562_s3 + $0x350] sm:$0xff] }
 0x118   : > { %10736 = vmatprep.subr.bf16.mxu0 %v10735_v33  ;;  %10932 = vmatprep.subr.bf16.mxu1 %v10931_v34  ;;  %v985_v33 = vld [vmem:[%s18562_s3 + $0x2f8] sm:$0xff]  ;;  %v8743_v34 = vld [vmem:[%s18562_s3 + $0x908] sm:$0xff]  ;;  %v10949_v37 = vpack.c.bf16 %v8740_v31, %v8738_v30  ;;  %v10769_v30 = vpack.c.bf16 %v996_v20, %v994_v10 }
 0x119   : > { %v10755_v40 = vpack.c.bf16 %v985_v33, %v983_v32  ;;  %v998_v32 = vld [vmem:[%s18562_s3 + $0x360] sm:$0xff]  ;;  %v1000_v33 = vld [vmem:[%s18562_s3 + $0x370] sm:$0xff]  ;;  %v1015_v10 = vld [vmem:[%s18562_s3 + $0x3e8] sm:$0xff] }
 0x11a   : > { %v1017_v20 = vld [vmem:[%s18562_s3 + $0x3f8] sm:$0xff] }
 0x11b   : > { %10738 = vmatpush1.bf16.msra.mxu0 %v10737_v41  ;;  %10934 = vmatpush1.bf16.msra.mxu1 %v10933_v42  ;;  %v10951_v41 = vpack.c.bf16 %v8745_v35, %v8743_v34  ;;  %v8742_v42 = vld [vmem:[%s18562_s3 + $0x900] sm:$0xff]  ;;  %v10771_v34 = vpack.c.bf16 %v1001_v26, %v999_v25  ;;  %v1016_v26 = vld [vmem:[%s18562_s3 + $0x3f0] sm:$0xff] }
 0x11c   : > { %10740 = vmatprep.subr.bf16.mxu0 %v10739_v45  ;;  %10936 = vmatprep.subr.bf16.mxu1 %v10935_v46  ;;  %v989_v45 = vld [vmem:[%s18562_s3 + $0x318] sm:$0xff]  ;;  %v8747_v46 = vld [vmem:[%s18562_s3 + $0x928] sm:$0xff]  ;;  %v10953_v49 = vpack.c.bf16 %v8744_v43, %v8742_v42  ;;  %v10773_v42 = vpack.c.bf16 %v1000_v33, %v998_v32  ;;  %v1014_v25 = vld [vmem:[%s18562_s3 + $0x3e0] sm:$0xff] }
 0x11d   : > { %v10759_v52 = vpack.c.bf16 %v989_v45, %v987_v44  ;;  %v1002_v44 = vld [vmem:[%s18562_s3 + $0x380] sm:$0xff]  ;;  %v1004_v45 = vld [vmem:[%s18562_s3 + $0x390] sm:$0xff]  ;;  %v1019_v32 = vld [vmem:[%s18562_s3 + $0x408] sm:$0xff] }
 0x11e   : > { %v1021_v33 = vld [vmem:[%s18562_s3 + $0x418] sm:$0xff] }
 0x11f   : > { %10742 = vmatpush1.bf16.msra.mxu0 %v10741_v53  ;;  %10938 = vmatpush1.bf16.msra.mxu1 %v10937_v54  ;;  %v13531_v4 = vpop.f32.mrb[2].mxu0  ;;  %v10955_v53 = vpack.c.bf16 %v8749_v47, %v8747_v46  ;;  %v8746_v54 = vld [vmem:[%s18562_s3 + $0x920] sm:$0xff]  ;;  %v10775_v46 = vpack.c.bf16 %v1005_v39, %v1003_v38  ;;  %v738_v38 = vadd.f32 %v13398_v1, %v13392_v60  ;;  %v8780_v1 = vld [vmem:[%s18562_s3 + $0xa30] sm:$0xff] }
 0x120   : > { %v13539_v9 = vpop.f32.mrb[2].mxu1  ;;  %v13541_v11 = vpop.f32.mrb[3].mxu0  ;;  %10744 = vmatprep.subr.bf16.mxu0 %v10743_v57  ;;  %10940 = vmatprep.subr.bf16.mxu1 %v10939_v58  ;;  %v993_v57 = vld [vmem:[%s18562_s3 + $0x338] sm:$0xff]  ;;  %v8751_v58 = vld [vmem:[%s18562_s3 + $0x948] sm:$0xff]  ;;  %v10957_v62 = vpack.c.bf16 %v8748_v55, %v8746_v54  ;;  %v10777_v54 = vpack.c.bf16 %v1004_v45, %v1002_v44  ;;  %v10791_v39 = vpack.c.bf16 %v1021_v33, %v1019_v32  ;;  %v8778_v44 = vld [vmem:[%s18562_s3 + $0xa20] sm:$0xff] }
 0x121   : > { %v10288_v22 = vpop.f32.mrb[3].mxu1  ;;  %v10763_v3 = vpack.c.bf16 %v993_v57, %v991_v56  ;;  %v1006_v56 = vld [vmem:[%s18562_s3 + $0x3a0] sm:$0xff]  ;;  %v1008_v57 = vld [vmem:[%s18562_s3 + $0x3b0] sm:$0xff]  ;;  %v1023_v45 = vld [vmem:[%s18562_s3 + $0x428] sm:$0xff] }
 0x123   : > { %10746 = vmatpush1.bf16.msra.mxu0 %v10745_v5  ;;  %10942 = vmatpush1.bf16.msra.mxu1 %v10941_v6  ;;  %v10959_v5 = vpack.c.bf16 %v8753_v59, %v8751_v58  ;;  %v8750_v6 = vld [vmem:[%s18562_s3 + $0x940] sm:$0xff]  ;;  %v10779_v58 = vpack.c.bf16 %v1009_v51, %v1007_v50  ;;  %v10989_v50 = vpack.c.bf16 %v8780_v1, %v8778_v44 }
 0x124   : > { %10748 = vmatprep.subr.bf16.mxu0 %v10747_v12  ;;  %10944 = vmatprep.subr.bf16.mxu1 %v10943_v13  ;;  %v997_v12 = vld [vmem:[%s18562_s3 + $0x358] sm:$0xff]  ;;  %v8755_v13 = vld [vmem:[%s18562_s3 + $0x968] sm:$0xff]  ;;  %v10961_v18 = vpack.c.bf16 %v8752_v7, %v8750_v6  ;;  %v10781_v6 = vpack.c.bf16 %v1008_v57, %v1006_v56  ;;  %v1022_v51 = vld [vmem:[%s18562_s3 + $0x420] sm:$0xff] }
 0x125   : > { %v10767_v21 = vpack.c.bf16 %v997_v12, %v995_v8  ;;  %v10963_v22 = vpack.c.bf16 %v8757_v15, %v8755_v13  ;;  %v1010_v8 = vld [vmem:[%s18562_s3 + $0x3c0] sm:$0xff]  ;;  %v1012_v12 = vld [vmem:[%s18562_s3 + $0x3d0] sm:$0xff]  ;;  %v10783_v13 = vpack.c.bf16 %v1013_v2, %v1011_v63 }
 0x126   : > { %v8784_v57 = vld [vmem:[%s18562_s3 + $0xa50] sm:$0xff] }
 0x127   : > { %10750 = vmatpush1.bf16.msra.mxu0 %v10749_v23  ;;  %10946 = vmatpush1.bf16.msra.mxu1 %v10945_v24  ;;  %v8754_v23 = vld [vmem:[%s18562_s3 + $0x960] sm:$0xff]  ;;  %v8756_v24 = vld [vmem:[%s18562_s3 + $0x970] sm:$0xff] }
 0x128   : > { %10752 = vmatprep.subr.bf16.mxu0 %v10751_v27  ;;  %10948 = vmatprep.subr.bf16.mxu1 %v10947_v29  ;;  %v8759_v27 = vld [vmem:[%s18562_s3 + $0x988] sm:$0xff]  ;;  %v8761_v29 = vld [vmem:[%s18562_s3 + $0x998] sm:$0xff]  ;;  %v10965_v31 = vpack.c.bf16 %v8756_v24, %v8754_v23  ;;  %v10785_v23 = vpack.c.bf16 %v1012_v12, %v1010_v8  ;;  %v8788_v12 = vld [vmem:[%s18562_s3 + $0xa70] sm:$0xff] }
 0x129   : > { %v10967_v35 = vpack.c.bf16 %v8761_v29, %v8759_v27  ;;  %v10787_v27 = vpack.c.bf16 %v1017_v20, %v1015_v10 }
 0x12b   : > { %10754 = vmatpush1.bf16.msra.mxu0 %v10753_v36  ;;  %10950 = vmatpush1.bf16.msra.mxu1 %v10949_v37  ;;  %v8758_v36 = vld [vmem:[%s18562_s3 + $0x980] sm:$0xff]  ;;  %v8760_v37 = vld [vmem:[%s18562_s3 + $0x990] sm:$0xff] }
 0x12c   : > { %10756 = vmatprep.subr.bf16.mxu0 %v10755_v40  ;;  %10952 = vmatprep.subr.bf16.mxu1 %v10951_v41  ;;  %v8763_v40 = vld [vmem:[%s18562_s3 + $0x9a8] sm:$0xff]  ;;  %v8765_v41 = vld [vmem:[%s18562_s3 + $0x9b8] sm:$0xff]  ;;  %v10969_v43 = vpack.c.bf16 %v8760_v37, %v8758_v36  ;;  %v10789_v36 = vpack.c.bf16 %v1016_v26, %v1014_v25  ;;  %v8792_v26 = vld [vmem:[%s18562_s3 + $0xa90] sm:$0xff] }
 0x12d   : > { %v10971_v47 = vpack.c.bf16 %v8765_v41, %v8763_v40  ;;  %v1018_v41 = vld [vmem:[%s18562_s3 + $0x400] sm:$0xff] }
 0x12f   : > { %10758 = vmatpush1.bf16.msra.mxu0 %v10757_v48  ;;  %10954 = vmatpush1.bf16.msra.mxu1 %v10953_v49  ;;  %v8762_v48 = vld [vmem:[%s18562_s3 + $0x9a0] sm:$0xff]  ;;  %v8764_v49 = vld [vmem:[%s18562_s3 + $0x9b0] sm:$0xff] }
 0x130   : > { %10760 = vmatprep.subr.bf16.mxu0 %v10759_v52  ;;  %10956 = vmatprep.subr.bf16.mxu1 %v10955_v53  ;;  %v8767_v52 = vld [vmem:[%s18562_s3 + $0x9c8] sm:$0xff]  ;;  %v8769_v53 = vld [vmem:[%s18562_s3 + $0x9d8] sm:$0xff]  ;;  %v10973_v55 = vpack.c.bf16 %v8764_v49, %v8762_v48  ;;  %v13829_v49 = vmax.f32 %v738_v38, 0.0 }
 0x131   : > { %v10975_v59 = vpack.c.bf16 %v8769_v53, %v8767_v52  ;;  %v1024_v52 = vld [vmem:[%s18562_s3 + $0x430] sm:$0xff]  ;;  %v8782_v53 = vld [vmem:[%s18562_s3 + $0xa40] sm:$0xff] }
 0x132   : > { %v10797_v63 = vpack.c.bf16 %v1024_v52, %v1022_v51  ;;  %v10993_v2 = vpack.c.bf16 %v8784_v57, %v8782_v53  ;;  %v1043_v51 = vld [vmem:[%s18562_s3 + $0x4c8] sm:$0xff]  ;;  %v1045_v52 = vld [vmem:[%s18562_s3 + $0x4d8] sm:$0xff] }
 0x133   : > { %10762 = vmatpush1.bf16.msra.mxu0 %v10761_v61  ;;  %10958 = vmatpush1.bf16.msra.mxu1 %v10957_v62  ;;  %v8766_v61 = vld [vmem:[%s18562_s3 + $0x9c0] sm:$0xff]  ;;  %v8768_v62 = vld [vmem:[%s18562_s3 + $0x9d0] sm:$0xff]  ;;  %v8803_v53 = vld [vmem:[%s18562_s3 + $0xae8] sm:$0xff] }
 0x134   : > { %10764 = vmatprep.subr.bf16.mxu0 %v10763_v3  ;;  %10960 = vmatprep.subr.bf16.mxu1 %v10959_v5  ;;  %v8771_v3 = vld [vmem:[%s18562_s3 + $0x9e8] sm:$0xff]  ;;  %v8773_v5 = vld [vmem:[%s18562_s3 + $0x9f8] sm:$0xff]  ;;  %v10977_v7 = vpack.c.bf16 %v8768_v62, %v8766_v61 }
 0x135   : > { %v10979_v15 = vpack.c.bf16 %v8773_v5, %v8771_v3  ;;  %v8787_v61 = vld [vmem:[%s18562_s3 + $0xa68] sm:$0xff]  ;;  %v8789_v62 = vld [vmem:[%s18562_s3 + $0xa78] sm:$0xff]  ;;  %v1026_v5 = vld [vmem:[%s18562_s3 + $0x440] sm:$0xff] }
 0x136   : > { %v10995_v8 = vpack.c.bf16 %v8789_v62, %v8787_v61  ;;  %v1044_v61 = vld [vmem:[%s18562_s3 + $0x4d0] sm:$0xff]  ;;  %v8802_v62 = vld [vmem:[%s18562_s3 + $0xae0] sm:$0xff] }
 0x137   : > { %10766 = vmatpush1.bf16.msra.mxu0 %v10765_v16  ;;  %10962 = vmatpush1.bf16.msra.mxu1 %v10961_v18  ;;  %v8770_v16 = vld [vmem:[%s18562_s3 + $0x9e0] sm:$0xff]  ;;  %v8772_v18 = vld [vmem:[%s18562_s3 + $0x9f0] sm:$0xff] }
 0x138   : > { %10768 = vmatprep.subr.bf16.mxu0 %v10767_v21  ;;  %10964 = vmatprep.subr.bf16.mxu1 %v10963_v22  ;;  %v8775_v21 = vld [vmem:[%s18562_s3 + $0xa08] sm:$0xff]  ;;  %v8777_v22 = vld [vmem:[%s18562_s3 + $0xa18] sm:$0xff]  ;;  %v10981_v24 = vpack.c.bf16 %v8772_v18, %v8770_v16 }
 0x139   : > { %v10983_v29 = vpack.c.bf16 %v8777_v22, %v8775_v21  ;;  %v8791_v16 = vld [vmem:[%s18562_s3 + $0xa88] sm:$0xff]  ;;  %v8793_v18 = vld [vmem:[%s18562_s3 + $0xa98] sm:$0xff]  ;;  %v1030_v22 = vld [vmem:[%s18562_s3 + $0x460] sm:$0xff] }
 0x13a   : > { %v10999_v25 = vpack.c.bf16 %v8793_v18, %v8791_v16  ;;  %v1048_v16 = vld [vmem:[%s18562_s3 + $0x4f0] sm:$0xff]  ;;  %v8806_v18 = vld [vmem:[%s18562_s3 + $0xb00] sm:$0xff] }
 0x13b   : > { %10770 = vmatpush1.bf16.msra.mxu0 %v10769_v30  ;;  %10966 = vmatpush1.bf16.msra.mxu1 %v10965_v31  ;;  %v8774_v30 = vld [vmem:[%s18562_s3 + $0xa00] sm:$0xff]  ;;  %v8776_v31 = vld [vmem:[%s18562_s3 + $0xa10] sm:$0xff] }
 0x13c   : > { %10772 = vmatprep.subr.bf16.mxu0 %v10771_v34  ;;  %10968 = vmatprep.subr.bf16.mxu1 %v10967_v35  ;;  %v8779_v34 = vld [vmem:[%s18562_s3 + $0xa28] sm:$0xff]  ;;  %v8781_v35 = vld [vmem:[%s18562_s3 + $0xa38] sm:$0xff]  ;;  %v10985_v37 = vpack.c.bf16 %v8776_v31, %v8774_v30 }
 0x13d   : > { %v10987_v40 = vpack.c.bf16 %v8781_v35, %v8779_v34  ;;  %v8795_v30 = vld [vmem:[%s18562_s3 + $0xaa8] sm:$0xff]  ;;  %v8797_v31 = vld [vmem:[%s18562_s3 + $0xab8] sm:$0xff]  ;;  %v1034_v35 = vld [vmem:[%s18562_s3 + $0x480] sm:$0xff] }
 0x13e   : > { %v11003_v38 = vpack.c.bf16 %v8797_v31, %v8795_v30  ;;  %v1052_v30 = vld [vmem:[%s18562_s3 + $0x510] sm:$0xff]  ;;  %v8810_v31 = vld [vmem:[%s18562_s3 + $0xb20] sm:$0xff] }
 0x13f   : > { %10774 = vmatpush1.bf16.msra.mxu0 %v10773_v42  ;;  %10970 = vmatpush1.bf16.msra.mxu1 %v10969_v43  ;;  %v1020_v42 = vld [vmem:[%s18562_s3 + $0x410] sm:$0xff]  ;;  %v811_v43 = vadd.f32 %v13541_v11, %v13392_v60  ;;  %v8783_v11 = vld [vmem:[%s18562_s3 + $0xa48] sm:$0xff] }
 0x140   : > { %10776 = vmatprep.subr.bf16.mxu0 %v10775_v46  ;;  %10972 = vmatprep.subr.bf16.mxu1 %v10971_v47  ;;  %v1025_v46 = vld [vmem:[%s18562_s3 + $0x438] sm:$0xff]  ;;  %v10793_v48 = vpack.c.bf16 %v1020_v42, %v1018_v41  ;;  %v8799_v42 = vld [vmem:[%s18562_s3 + $0xac8] sm:$0xff] }
 0x141   : > { %v8785_v47 = vld [vmem:[%s18562_s3 + $0xa58] sm:$0xff] }
 0x142   : > { %v10991_v56 = vpack.c.bf16 %v8785_v47, %v8783_v11  ;;  %v1041_v41 = vld [vmem:[%s18562_s3 + $0x4b8] sm:$0xff]  ;;  %v1040_v11 = vld [vmem:[%s18562_s3 + $0x4b0] sm:$0xff]  ;;  %v8798_v47 = vld [vmem:[%s18562_s3 + $0xac0] sm:$0xff] }
 0x143   : > { %10778 = vmatpush1.bf16.msra.mxu0 %v10777_v54  ;;  %10974 = vmatpush1.bf16.msra.mxu1 %v10973_v55  ;;  %v13840_v54 = vmax.f32 %v811_v43, 0.0  ;;  %v10795_v55 = vpack.c.bf16 %v1025_v46, %v1023_v45  ;;  %v8801_v43 = vld [vmem:[%s18562_s3 + $0xad8] sm:$0xff]  ;;  %v1038_v46 = vld [vmem:[%s18562_s3 + $0x4a0] sm:$0xff] }
 0x144   : > { %10780 = vmatprep.subr.bf16.mxu0 %v10779_v58  ;;  %10976 = vmatprep.subr.bf16.mxu1 %v10975_v59  ;;  %v1027_v58 = vld [vmem:[%s18562_s3 + $0x448] sm:$0xff]  ;;  %v1029_v59 = vld [vmem:[%s18562_s3 + $0x458] sm:$0xff] }
 0x145   : > { %v10799_v3 = vpack.c.bf16 %v1029_v59, %v1027_v58  ;;  %v10815_v58 = vpack.c.bf16 %v1045_v52, %v1043_v51  ;;  %v1042_v59 = vld [vmem:[%s18562_s3 + $0x4c0] sm:$0xff] }
 0x146   : > { %v1058_v52 = vld [vmem:[%s18562_s3 + $0x540] sm:$0xff] }
 0x147   : > { %10782 = vmatpush1.bf16.msra.mxu0 %v10781_v6  ;;  %10978 = vmatpush1.bf16.msra.mxu1 %v10977_v7  ;;  %v1028_v6 = vld [vmem:[%s18562_s3 + $0x450] sm:$0xff]  ;;  %v8786_v7 = vld [vmem:[%s18562_s3 + $0xa60] sm:$0xff] }
 0x148   : > { %10784 = vmatprep.subr.bf16.mxu0 %v10783_v13  ;;  %10980 = vmatprep.subr.bf16.mxu1 %v10979_v15  ;;  %v1031_v13 = vld [vmem:[%s18562_s3 + $0x468] sm:$0xff]  ;;  %v1033_v15 = vld [vmem:[%s18562_s3 + $0x478] sm:$0xff]  ;;  %v10801_v10 = vpack.c.bf16 %v1028_v6, %v1026_v5  ;;  %v10997_v20 = vpack.c.bf16 %v8788_v12, %v8786_v7 }
 0x149   : > { %v10803_v21 = vpack.c.bf16 %v1033_v15, %v1031_v13  ;;  %v1049_v5 = vld [vmem:[%s18562_s3 + $0x4f8] sm:$0xff]  ;;  %v8807_v6 = vld [vmem:[%s18562_s3 + $0xb08] sm:$0xff]  ;;  %v1046_v15 = vld [vmem:[%s18562_s3 + $0x4e0] sm:$0xff] }
 0x14a   : > { %v8809_v7 = vld [vmem:[%s18562_s3 + $0xb18] sm:$0xff] }
 0x14b   : > { %10786 = vmatpush1.bf16.msra.mxu0 %v10785_v23  ;;  %10982 = vmatpush1.bf16.msra.mxu1 %v10981_v24  ;;  %v1032_v23 = vld [vmem:[%s18562_s3 + $0x470] sm:$0xff]  ;;  %v8790_v24 = vld [vmem:[%s18562_s3 + $0xa80] sm:$0xff] }
 0x14c   : > { %10788 = vmatprep.subr.bf16.mxu0 %v10787_v27  ;;  %10984 = vmatprep.subr.bf16.mxu1 %v10983_v29  ;;  %v1035_v27 = vld [vmem:[%s18562_s3 + $0x488] sm:$0xff]  ;;  %v1037_v29 = vld [vmem:[%s18562_s3 + $0x498] sm:$0xff]  ;;  %v10805_v32 = vpack.c.bf16 %v1032_v23, %v1030_v22  ;;  %v11001_v33 = vpack.c.bf16 %v8792_v26, %v8790_v24 }
 0x14d   : > { %v10807_v34 = vpack.c.bf16 %v1037_v29, %v1035_v27  ;;  %v1053_v22 = vld [vmem:[%s18562_s3 + $0x518] sm:$0xff]  ;;  %v8811_v23 = vld [vmem:[%s18562_s3 + $0xb28] sm:$0xff]  ;;  %v1050_v29 = vld [vmem:[%s18562_s3 + $0x500] sm:$0xff] }
 0x14e   : > { %v8813_v24 = vld [vmem:[%s18562_s3 + $0xb38] sm:$0xff] }
 0x14f   : > { %10790 = vmatpush1.bf16.msra.mxu0 %v10789_v36  ;;  %10986 = vmatpush1.bf16.msra.mxu1 %v10985_v37  ;;  %v1036_v36 = vld [vmem:[%s18562_s3 + $0x490] sm:$0xff]  ;;  %v8794_v37 = vld [vmem:[%s18562_s3 + $0xaa0] sm:$0xff] }
 0x150   : > { %10792 = vmatprep.subr.bf16.mxu0 %v10791_v39  ;;  %10988 = vmatprep.subr.bf16.mxu1 %v10987_v40  ;;  %v8796_v39 = vld [vmem:[%s18562_s3 + $0xab0] sm:$0xff]  ;;  %v1039_v40 = vld [vmem:[%s18562_s3 + $0x4a8] sm:$0xff]  ;;  %v10809_v44 = vpack.c.bf16 %v1036_v36, %v1034_v35  ;;  %v1057_v35 = vld [vmem:[%s18562_s3 + $0x538] sm:$0xff] }
 0x151   : > { %v11005_v1 = vpack.c.bf16 %v8796_v39, %v8794_v37  ;;  %v10811_v45 = vpack.c.bf16 %v1041_v41, %v1039_v40  ;;  %v8815_v36 = vld [vmem:[%s18562_s3 + $0xb48] sm:$0xff]  ;;  %v8817_v37 = vld [vmem:[%s18562_s3 + $0xb58] sm:$0xff]  ;;  %v1054_v41 = vld [vmem:[%s18562_s3 + $0x520] sm:$0xff] }
 0x152   : > { %1226 = vmatmul.mubr.f32.vlgmr.msra.gmra.mrb[4].mxu0 %v13829_v49  ;;  %1707 = vmatmul.mubr.f32.vlgmr.msra.gmra.mrb[4].mxu1 %v13829_v49 }
 0x153   : > { %10794 = vmatpush1.bf16.msra.mxu0 %v10793_v48  ;;  %1296 = vmatprep.mubr.f32.mxu0 %v13840_v54  ;;  %v11007_v48 = vpack.c.bf16 %v8801_v43, %v8799_v42  ;;  %v1056_v42 = vld [vmem:[%s18562_s3 + $0x530] sm:$0xff]  ;;  %v8814_v43 = vld [vmem:[%s18562_s3 + $0xb40] sm:$0xff] }
 0x154   : > { %10990 = vmatpush1.bf16.msra.mxu1 %v10989_v50  ;;  %1777 = vmatprep.mubr.f32.mxu1 %v13840_v54  ;;  %v8800_v50 = vld [vmem:[%s18562_s3 + $0xad0] sm:$0xff] }
 0x155   : > { %10796 = vmatprep.subr.bf16.mxu0 %v10795_v55  ;;  %10992 = vmatprep.subr.bf16.mxu1 %v10991_v56  ;;  %v8805_v55 = vld [vmem:[%s18562_s3 + $0xaf8] sm:$0xff]  ;;  %v10813_v56 = vpack.c.bf16 %v1040_v11, %v1038_v46  ;;  %v11009_v57 = vpack.c.bf16 %v8800_v50, %v8798_v47  ;;  %v8819_v11 = vld [vmem:[%s18562_s3 + $0xb68] sm:$0xff] }
 0x156   : > { %v1061_v46 = vld [vmem:[%s18562_s3 + $0x558] sm:$0xff] }
 0x157   : > { %10798 = vmatpush1.bf16.msra.mxu0 %v10797_v63  ;;  %v11011_v63 = vpack.c.bf16 %v8805_v55, %v8803_v53  ;;  %v8821_v47 = vld [vmem:[%s18562_s3 + $0xb78] sm:$0xff]  ;;  %v1060_v53 = vld [vmem:[%s18562_s3 + $0x550] sm:$0xff]  ;;  %v8818_v55 = vld [vmem:[%s18562_s3 + $0xb60] sm:$0xff] }
 0x158   : > { %10994 = vmatpush1.bf16.msra.mxu1 %v10993_v2  ;;  %10800 = vmatprep.subr.bf16.mxu0 %v10799_v3  ;;  %v8804_v2 = vld [vmem:[%s18562_s3 + $0xaf0] sm:$0xff]  ;;  %v1047_v3 = vld [vmem:[%s18562_s3 + $0x4e8] sm:$0xff] }
 0x159   : > { %10996 = vmatprep.subr.bf16.mxu1 %v10995_v8  ;;  %v10817_v8 = vpack.c.bf16 %v1044_v61, %v1042_v59  ;;  %v11013_v12 = vpack.c.bf16 %v8804_v2, %v8802_v62  ;;  %v10819_v13 = vpack.c.bf16 %v1049_v5, %v1047_v3  ;;  %v1065_v59 = vld [vmem:[%s18562_s3 + $0x578] sm:$0xff]  ;;  %v8823_v61 = vld [vmem:[%s18562_s3 + $0xb88] sm:$0xff]  ;;  %v1062_v5 = vld [vmem:[%s18562_s3 + $0x560] sm:$0xff] }
 0x15a   : > { %v8825_v62 = vld [vmem:[%s18562_s3 + $0xb98] sm:$0xff] }
 0x15b   : > { %10802 = vmatpush1.bf16.msra.mxu0 %v10801_v10  ;;  %v11015_v10 = vpack.c.bf16 %v8809_v7, %v8807_v6  ;;  %v1064_v6 = vld [vmem:[%s18562_s3 + $0x570] sm:$0xff]  ;;  %v8822_v7 = vld [vmem:[%s18562_s3 + $0xb80] sm:$0xff] }
 0x15c   : > { %10998 = vmatpush1.bf16.msra.mxu1 %v10997_v20  ;;  %10804 = vmatprep.subr.bf16.mxu0 %v10803_v21  ;;  %v8808_v20 = vld [vmem:[%s18562_s3 + $0xb10] sm:$0xff]  ;;  %v1051_v21 = vld [vmem:[%s18562_s3 + $0x508] sm:$0xff] }
 0x15d   : > { %11000 = vmatprep.subr.bf16.mxu1 %v10999_v25  ;;  %v10821_v25 = vpack.c.bf16 %v1048_v16, %v1046_v15  ;;  %v11017_v26 = vpack.c.bf16 %v8808_v20, %v8806_v18  ;;  %v10823_v27 = vpack.c.bf16 %v1053_v22, %v1051_v21  ;;  %v1069_v15 = vld [vmem:[%s18562_s3 + $0x598] sm:$0xff]  ;;  %v8827_v16 = vld [vmem:[%s18562_s3 + $0xba8] sm:$0xff]  ;;  %v1066_v22 = vld [vmem:[%s18562_s3 + $0x580] sm:$0xff] }
 0x15e   : > { %v8829_v18 = vld [vmem:[%s18562_s3 + $0xbb8] sm:$0xff] }
 0x15f   : > { %10806 = vmatpush1.bf16.msra.mxu0 %v10805_v32  ;;  %v11019_v32 = vpack.c.bf16 %v8813_v24, %v8811_v23  ;;  %v1068_v23 = vld [vmem:[%s18562_s3 + $0x590] sm:$0xff]  ;;  %v8826_v24 = vld [vmem:[%s18562_s3 + $0xba0] sm:$0xff] }
 0x160   : > { %11002 = vmatpush1.bf16.msra.mxu1 %v11001_v33  ;;  %10808 = vmatprep.subr.bf16.mxu0 %v10807_v34  ;;  %v8812_v33 = vld [vmem:[%s18562_s3 + $0xb30] sm:$0xff]  ;;  %v1055_v34 = vld [vmem:[%s18562_s3 + $0x528] sm:$0xff] }
 0x161   : > { %11004 = vmatprep.subr.bf16.mxu1 %v11003_v38  ;;  %v10825_v38 = vpack.c.bf16 %v1052_v30, %v1050_v29  ;;  %v11021_v39 = vpack.c.bf16 %v8812_v33, %v8810_v31  ;;  %v10827_v40 = vpack.c.bf16 %v1057_v35, %v1055_v34  ;;  %v1073_v29 = vld [vmem:[%s18562_s3 + $0x5b8] sm:$0xff]  ;;  %v8831_v30 = vld [vmem:[%s18562_s3 + $0xbc8] sm:$0xff]  ;;  %v1070_v35 = vld [vmem:[%s18562_s3 + $0x5a0] sm:$0xff] }
 0x162   : > { %v8833_v31 = vld [vmem:[%s18562_s3 + $0xbd8] sm:$0xff] }
 0x163   : > { %10810 = vmatpush1.bf16.msra.mxu0 %v10809_v44  ;;  %v11023_v44 = vpack.c.bf16 %v8817_v37, %v8815_v36  ;;  %v1072_v36 = vld [vmem:[%s18562_s3 + $0x5b0] sm:$0xff]  ;;  %v8830_v37 = vld [vmem:[%s18562_s3 + $0xbc0] sm:$0xff] }
 0x164   : > { %11006 = vmatpush1.bf16.msra.mxu1 %v11005_v1  ;;  %10812 = vmatprep.subr.bf16.mxu0 %v10811_v45  ;;  %v8816_v1 = vld [vmem:[%s18562_s3 + $0xb50] sm:$0xff]  ;;  %v1059_v45 = vld [vmem:[%s18562_s3 + $0x548] sm:$0xff] }
 0x165   : > { %11008 = vmatprep.subr.bf16.mxu1 %v11007_v48  ;;  %v10829_v48 = vpack.c.bf16 %v1056_v42, %v1054_v41  ;;  %v11025_v50 = vpack.c.bf16 %v8816_v1, %v8814_v43  ;;  %v10831_v51 = vpack.c.bf16 %v1061_v46, %v1059_v45  ;;  %v1077_v41 = vld [vmem:[%s18562_s3 + $0x5d8] sm:$0xff]  ;;  %v8835_v42 = vld [vmem:[%s18562_s3 + $0xbe8] sm:$0xff]  ;;  %v1074_v46 = vld [vmem:[%s18562_s3 + $0x5c0] sm:$0xff] }
 0x166   : > { %v8837_v43 = vld [vmem:[%s18562_s3 + $0xbf8] sm:$0xff] }
 0x167   : > { %10814 = vmatpush1.bf16.msra.mxu0 %v10813_v56  ;;  %v11027_v56 = vpack.c.bf16 %v8821_v47, %v8819_v11  ;;  %v1076_v11 = vld [vmem:[%s18562_s3 + $0x5d0] sm:$0xff]  ;;  %v8834_v47 = vld [vmem:[%s18562_s3 + $0xbe0] sm:$0xff] }
 0x168   : > { %11010 = vmatpush1.bf16.msra.mxu1 %v11009_v57  ;;  %10816 = vmatprep.subr.bf16.mxu0 %v10815_v58  ;;  %v8820_v57 = vld [vmem:[%s18562_s3 + $0xb70] sm:$0xff]  ;;  %v1063_v58 = vld [vmem:[%s18562_s3 + $0x568] sm:$0xff] }
 0x169   : > { %11012 = vmatprep.subr.bf16.mxu1 %v11011_v63  ;;  %v10833_v63 = vpack.c.bf16 %v1060_v53, %v1058_v52  ;;  %v11029_v2 = vpack.c.bf16 %v8820_v57, %v8818_v55  ;;  %v10835_v3 = vpack.c.bf16 %v1065_v59, %v1063_v58  ;;  %v1081_v52 = vld [vmem:[%s18562_s3 + $0x5f8] sm:$0xff]  ;;  %v8839_v53 = vld [vmem:[%s18562_s3 + $0xc08] sm:$0xff]  ;;  %v1078_v59 = vld [vmem:[%s18562_s3 + $0x5e0] sm:$0xff] }
 0x16a   : > { %v8841_v55 = vld [vmem:[%s18562_s3 + $0xc18] sm:$0xff] }
 0x16b   : > { %10818 = vmatpush1.bf16.msra.mxu0 %v10817_v8  ;;  %v11031_v8 = vpack.c.bf16 %v8825_v62, %v8823_v61  ;;  %v1080_v61 = vld [vmem:[%s18562_s3 + $0x5f0] sm:$0xff]  ;;  %v8838_v62 = vld [vmem:[%s18562_s3 + $0xc00] sm:$0xff] }
 0x16c   : > { %11014 = vmatpush1.bf16.msra.mxu1 %v11013_v12  ;;  %10820 = vmatprep.subr.bf16.mxu0 %v10819_v13  ;;  %v8824_v12 = vld [vmem:[%s18562_s3 + $0xb90] sm:$0xff]  ;;  %v1067_v13 = vld [vmem:[%s18562_s3 + $0x588] sm:$0xff] }
 0x16d   : > { %11016 = vmatprep.subr.bf16.mxu1 %v11015_v10  ;;  %v10837_v10 = vpack.c.bf16 %v1064_v6, %v1062_v5  ;;  %v11033_v20 = vpack.c.bf16 %v8824_v12, %v8822_v7  ;;  %v10839_v21 = vpack.c.bf16 %v1069_v15, %v1067_v13  ;;  %v1085_v5 = vld [vmem:[%s18562_s3 + $0x618] sm:$0xff]  ;;  %v8843_v6 = vld [vmem:[%s18562_s3 + $0xc28] sm:$0xff]  ;;  %v809_v12 = vadd.f32 %v13531_v4, %v13392_v60  ;;  %v8844_v4 = vld [vmem:[%s18562_s3 + $0xc30] sm:$0xff] }
 0x16e   : > { %v8845_v7 = vld [vmem:[%s18562_s3 + $0xc38] sm:$0xff] }
 0x16f   : > { %10822 = vmatpush1.bf16.msra.mxu0 %v10821_v25  ;;  %v11035_v25 = vpack.c.bf16 %v8829_v18, %v8827_v16  ;;  %v1082_v16 = vld [vmem:[%s18562_s3 + $0x600] sm:$0xff]  ;;  %v1084_v18 = vld [vmem:[%s18562_s3 + $0x610] sm:$0xff] }
 0x170   : > { %11018 = vmatpush1.bf16.msra.mxu1 %v11017_v26  ;;  %10824 = vmatprep.subr.bf16.mxu0 %v10823_v27  ;;  %v8828_v26 = vld [vmem:[%s18562_s3 + $0xbb0] sm:$0xff]  ;;  %v1071_v27 = vld [vmem:[%s18562_s3 + $0x5a8] sm:$0xff] }
 0x171   : > { %11020 = vmatprep.subr.bf16.mxu1 %v11019_v32  ;;  %v10841_v32 = vpack.c.bf16 %v1068_v23, %v1066_v22  ;;  %v11037_v33 = vpack.c.bf16 %v8828_v26, %v8826_v24  ;;  %v10843_v34 = vpack.c.bf16 %v1073_v29, %v1071_v27  ;;  %v8850_v22 = vld [vmem:[%s18562_s3 + $0xc58] sm:$0xff]  ;;  %v10857_v23 = vpack.c.bf16 %v1084_v18, %v1082_v16  ;;  %v9045_v24 = vld [vmem:[%s18562_s3 + $0x1268] sm:$0xff] }
 0x172   : > { %v14223_v26 = vmax.f32 %v809_v12, 0.0  ;;  %v9058_v12 = vld [vmem:[%s18562_s3 + $0x12d0] sm:$0xff]  ;;  %v9061_v16 = vld [vmem:[%s18562_s3 + $0x12e8] sm:$0xff]  ;;  %v9063_v18 = vld [vmem:[%s18562_s3 + $0x12f8] sm:$0xff] }
 0x173   : > { %10826 = vmatpush1.bf16.msra.mxu0 %v10825_v38  ;;  %v11039_v38 = vpack.c.bf16 %v8833_v31, %v8831_v30  ;;  %v880_v31 = vadd.f32 %v13539_v9, %v13392_v60  ;;  %v9046_v60 = vld [vmem:[%s18562_s3 + $0x1270] sm:$0xff]  ;;  %v8852_v9 = vld [vmem:[%s18562_s3 + $0xc68] sm:$0xff] }
 0x174   : > { %11022 = vmatpush1.bf16.msra.mxu1 %v11021_v39  ;;  %10828 = vmatprep.subr.bf16.mxu0 %v10827_v40  ;;  %v8832_v39 = vld [vmem:[%s18562_s3 + $0xbd0] sm:$0xff]  ;;  %v1075_v40 = vld [vmem:[%s18562_s3 + $0x5c8] sm:$0xff] }
 0x175   : > { %11024 = vmatprep.subr.bf16.mxu1 %v11023_v44  ;;  %v10845_v44 = vpack.c.bf16 %v1072_v36, %v1070_v35  ;;  %v11041_v1 = vpack.c.bf16 %v8832_v39, %v8830_v37  ;;  %v10847_v45 = vpack.c.bf16 %v1077_v41, %v1075_v40  ;;  %v8854_v35 = vld [vmem:[%s18562_s3 + $0xc78] sm:$0xff]  ;;  %v9049_v37 = vld [vmem:[%s18562_s3 + $0x1288] sm:$0xff]  ;;  %v14255_v39 = vmax.f32 %v880_v31, 0.0  ;;  %v8851_v41 = vld [vmem:[%s18562_s3 + $0xc60] sm:$0xff] }
 0x176   : > { %v9067_v31 = vld [vmem:[%s18562_s3 + $0x1318] sm:$0xff] }
 0x177   : > { %10830 = vmatpush1.bf16.msra.mxu0 %v10829_v48  ;;  %v11043_v48 = vpack.c.bf16 %v8837_v43, %v8835_v42  ;;  %v8853_v42 = vld [vmem:[%s18562_s3 + $0xc70] sm:$0xff]  ;;  %v9048_v43 = vld [vmem:[%s18562_s3 + $0x1280] sm:$0xff] }
 0x178   : > { %11026 = vmatpush1.bf16.msra.mxu1 %v11025_v50  ;;  %10832 = vmatprep.subr.bf16.mxu0 %v10831_v51  ;;  %v8836_v50 = vld [vmem:[%s18562_s3 + $0xbf0] sm:$0xff]  ;;  %v1079_v51 = vld [vmem:[%s18562_s3 + $0x5e8] sm:$0xff] }
 0x179   : > { %11028 = vmatprep.subr.bf16.mxu1 %v11027_v56  ;;  %v10849_v56 = vpack.c.bf16 %v1076_v11, %v1074_v46  ;;  %v11045_v57 = vpack.c.bf16 %v8836_v50, %v8834_v47  ;;  %v10851_v58 = vpack.c.bf16 %v1081_v52, %v1079_v51  ;;  %v8858_v46 = vld [vmem:[%s18562_s3 + $0xc98] sm:$0xff]  ;;  %v9053_v47 = vld [vmem:[%s18562_s3 + $0x12a8] sm:$0xff]  ;;  %v11061_v50 = vpack.c.bf16 %v8853_v42, %v8851_v41 }
 0x17a   : > { %v9069_v41 = vld [vmem:[%s18562_s3 + $0x1328] sm:$0xff]  ;;  %v9071_v42 = vld [vmem:[%s18562_s3 + $0x1338] sm:$0xff] }
 0x17b   : > { %10834 = vmatpush1.bf16.msra.mxu0 %v10833_v63  ;;  %v11047_v63 = vpack.c.bf16 %v8841_v55, %v8839_v53  ;;  %v8855_v53 = vld [vmem:[%s18562_s3 + $0xc80] sm:$0xff]  ;;  %v8857_v55 = vld [vmem:[%s18562_s3 + $0xc90] sm:$0xff] }
 0x17c   : > { %11030 = vmatpush1.bf16.msra.mxu1 %v11029_v2  ;;  %10836 = vmatprep.subr.bf16.mxu0 %v10835_v3  ;;  %v8840_v2 = vld [vmem:[%s18562_s3 + $0xc10] sm:$0xff]  ;;  %v1083_v3 = vld [vmem:[%s18562_s3 + $0x608] sm:$0xff] }
 0x17d   : > { %11032 = vmatprep.subr.bf16.mxu1 %v11031_v8  ;;  %v10853_v8 = vpack.c.bf16 %v1080_v61, %v1078_v59  ;;  %v11049_v13 = vpack.c.bf16 %v8840_v2, %v8838_v62  ;;  %v10855_v15 = vpack.c.bf16 %v1085_v5, %v1083_v3  ;;  %v8860_v59 = vld [vmem:[%s18562_s3 + $0xca8] sm:$0xff]  ;;  %v8862_v61 = vld [vmem:[%s18562_s3 + $0xcb8] sm:$0xff]  ;;  %v8859_v5 = vld [vmem:[%s18562_s3 + $0xca0] sm:$0xff] }
 0x17e   : > { %v9057_v62 = vld [vmem:[%s18562_s3 + $0x12c8] sm:$0xff]  ;;  %v11067_v3 = vpack.c.bf16 %v8862_v61, %v8860_v59  ;;  %v8877_v59 = vld [vmem:[%s18562_s3 + $0xd30] sm:$0xff]  ;;  %v9072_v61 = vld [vmem:[%s18562_s3 + $0x1340] sm:$0xff] }
 0x17f   : > { %10838 = vmatpush1.bf16.msra.mxu0 %v10837_v10  ;;  %v11051_v10 = vpack.c.bf16 %v8845_v7, %v8843_v6  ;;  %v8861_v6 = vld [vmem:[%s18562_s3 + $0xcb0] sm:$0xff]  ;;  %v9056_v7 = vld [vmem:[%s18562_s3 + $0x12c0] sm:$0xff] }
 0x180   : > { %11034 = vmatpush1.bf16.msra.mxu1 %v11033_v20  ;;  %10840 = vmatprep.subr.bf16.mxu0 %v10839_v21  ;;  %v8842_v20 = vld [vmem:[%s18562_s3 + $0xc20] sm:$0xff]  ;;  %v8848_v21 = vld [vmem:[%s18562_s3 + $0xc48] sm:$0xff] }
 0x181   : > { %11036 = vmatprep.subr.bf16.mxu1 %v11035_v25  ;;  %v9047_v25 = vld [vmem:[%s18562_s3 + $0x1278] sm:$0xff]  ;;  %v11053_v27 = vpack.c.bf16 %v8844_v4, %v8842_v20  ;;  %v11055_v29 = vpack.c.bf16 %v8850_v22, %v8848_v21  ;;  %v11265_v20 = vpack.c.bf16 %v9058_v12, %v9056_v7  ;;  %v8863_v21 = vld [vmem:[%s18562_s3 + $0xcc0] sm:$0xff]  ;;  %v8865_v22 = vld [vmem:[%s18562_s3 + $0xcd0] sm:$0xff] }
 0x182   : > { %v11251_v30 = vpack.c.bf16 %v9047_v25, %v9045_v24  ;;  %v11267_v24 = vpack.c.bf16 %v9063_v18, %v9061_v16  ;;  %v9062_v25 = vld [vmem:[%s18562_s3 + $0x12f0] sm:$0xff]  ;;  %v8879_v12 = vld [vmem:[%s18562_s3 + $0xd40] sm:$0xff] }
 0x183   : > { %10842 = vmatpush1.bf16.msra.mxu0 %v10841_v32  ;;  %v8847_v32 = vld [vmem:[%s18562_s3 + $0xc40] sm:$0xff]  ;;  %v9078_v18 = vld [vmem:[%s18562_s3 + $0x1370] sm:$0xff] }
 0x184   : > { %11038 = vmatpush1.bf16.msra.mxu1 %v11037_v33  ;;  %10844 = vmatprep.subr.bf16.mxu0 %v10843_v34  ;;  %v8849_v33 = vld [vmem:[%s18562_s3 + $0xc50] sm:$0xff]  ;;  %v9044_v34 = vld [vmem:[%s18562_s3 + $0x1260] sm:$0xff] }
 0x185   : > { %11040 = vmatprep.subr.bf16.mxu1 %v11039_v38  ;;  %v11057_v36 = vpack.c.bf16 %v8849_v33, %v8847_v32  ;;  %v9051_v38 = vld [vmem:[%s18562_s3 + $0x1298] sm:$0xff]  ;;  %v11253_v40 = vpack.c.bf16 %v9046_v60, %v9044_v34  ;;  %v11073_v32 = vpack.c.bf16 %v8865_v22, %v8863_v21  ;;  %v8867_v60 = vld [vmem:[%s18562_s3 + $0xce0] sm:$0xff] }
 0x186   : > { %v11255_v11 = vpack.c.bf16 %v9051_v38, %v9049_v37  ;;  %v9066_v37 = vld [vmem:[%s18562_s3 + $0x1310] sm:$0xff]  ;;  %v8872_v38 = vld [vmem:[%s18562_s3 + $0xd08] sm:$0xff]  ;;  %v9083_v21 = vld [vmem:[%s18562_s3 + $0x1398] sm:$0xff] }
 0x187   : > { %10846 = vmatpush1.bf16.msra.mxu0 %v10845_v44  ;;  %v11059_v44 = vpack.c.bf16 %v8854_v35, %v8852_v9  ;;  %v8869_v9 = vld [vmem:[%s18562_s3 + $0xcf0] sm:$0xff]  ;;  %v9064_v35 = vld [vmem:[%s18562_s3 + $0x1300] sm:$0xff] }
 0x188   : > { %11042 = vmatpush1.bf16.msra.mxu1 %v11041_v1  ;;  %10848 = vmatprep.subr.bf16.mxu0 %v10847_v45  ;;  %v9050_v1 = vld [vmem:[%s18562_s3 + $0x1290] sm:$0xff]  ;;  %v8856_v45 = vld [vmem:[%s18562_s3 + $0xc88] sm:$0xff] }
 0x189   : > { %11044 = vmatprep.subr.bf16.mxu1 %v11043_v48  ;;  %v9055_v48 = vld [vmem:[%s18562_s3 + $0x12b8] sm:$0xff]  ;;  %v11257_v51 = vpack.c.bf16 %v9050_v1, %v9048_v43  ;;  %v11063_v52 = vpack.c.bf16 %v8858_v46, %v8856_v45  ;;  %v11077_v43 = vpack.c.bf16 %v8869_v9, %v8867_v60  ;;  %v8871_v45 = vld [vmem:[%s18562_s3 + $0xd00] sm:$0xff]  ;;  %v8873_v46 = vld [vmem:[%s18562_s3 + $0xd10] sm:$0xff] }
 0x18a   : > { %v9087_v60 = vld [vmem:[%s18562_s3 + $0x13b8] sm:$0xff] }
 0x18b   : > { %10850 = vmatpush1.bf16.msra.mxu0 %v10849_v56  ;;  %v9052_v56 = vld [vmem:[%s18562_s3 + $0x12a0] sm:$0xff] }
 0x18c   : > { %11046 = vmatpush1.bf16.msra.mxu1 %v11045_v57  ;;  %10852 = vmatprep.subr.bf16.mxu0 %v10851_v58  ;;  %v11259_v57 = vpack.c.bf16 %v9055_v48, %v9053_v47  ;;  %v9054_v58 = vld [vmem:[%s18562_s3 + $0x12b0] sm:$0xff]  ;;  %v11275_v47 = vpack.c.bf16 %v9071_v42, %v9069_v41 }
 0x18d   : > { %11048 = vmatprep.subr.bf16.mxu1 %v11047_v63  ;;  %v11065_v63 = vpack.c.bf16 %v8857_v55, %v8855_v53  ;;  %v11261_v2 = vpack.c.bf16 %v9054_v58, %v9052_v56  ;;  %v9070_v48 = vld [vmem:[%s18562_s3 + $0x1330] sm:$0xff]  ;;  %v9075_v53 = vld [vmem:[%s18562_s3 + $0x1358] sm:$0xff]  ;;  %v11081_v55 = vpack.c.bf16 %v8873_v46, %v8871_v45  ;;  %v8875_v58 = vld [vmem:[%s18562_s3 + $0xd20] sm:$0xff] }
 0x18e   : > { %v9086_v42 = vld [vmem:[%s18562_s3 + $0x13b0] sm:$0xff]  ;;  %v9091_v45 = vld [vmem:[%s18562_s3 + $0x13d8] sm:$0xff] }
 0x18f   : > { %10854 = vmatpush1.bf16.msra.mxu0 %v10853_v8 }
 0x190   : > { %11050 = vmatpush1.bf16.msra.mxu1 %v11049_v13  ;;  %10856 = vmatprep.subr.bf16.mxu0 %v10855_v15  ;;  %v8864_v13 = vld [vmem:[%s18562_s3 + $0xcc8] sm:$0xff]  ;;  %v8866_v15 = vld [vmem:[%s18562_s3 + $0xcd8] sm:$0xff] }
 0x191   : > { %11052 = vmatprep.subr.bf16.mxu1 %v11051_v10  ;;  %v11069_v10 = vpack.c.bf16 %v8861_v6, %v8859_v5  ;;  %v11071_v4 = vpack.c.bf16 %v8866_v15, %v8864_v13  ;;  %v9079_v5 = vld [vmem:[%s18562_s3 + $0x1378] sm:$0xff]  ;;  %v11085_v6 = vpack.c.bf16 %v8877_v59, %v8875_v58  ;;  %v8881_v13 = vld [vmem:[%s18562_s3 + $0xd50] sm:$0xff]  ;;  %v9076_v15 = vld [vmem:[%s18562_s3 + $0x1360] sm:$0xff] }
 0x192   : > { %1297 = vmatmul.mubr.f32.vlgmr.msra.gmra.mrb[4].mxu0 %v14223_v26  ;;  %v11089_v22 = vpack.c.bf16 %v8881_v13, %v8879_v12  ;;  %v9095_v58 = vld [vmem:[%s18562_s3 + $0x13f8] sm:$0xff] }
 0x193   : > { %1778 = vmatmul.mubr.f32.vlgmr.msra.gmra.mrb[4].mxu1 %v14223_v26  ;;  %10858 = vmatpush1.bf16.msra.mxu0 %v10857_v23  ;;  %v9060_v23 = vld [vmem:[%s18562_s3 + $0x12e0] sm:$0xff]  ;;  %v9099_v12 = vld [vmem:[%s18562_s3 + $0x1418] sm:$0xff] }
 0x194   : > { %11054 = vmatpush1.bf16.msra.mxu1 %v11053_v27  ;;  %1367 = vmatprep.mubr.f32.mxu0 %v12750_v0  ;;  %v8868_v27 = vld [vmem:[%s18562_s3 + $0xce8] sm:$0xff]  ;;  %v11269_v33 = vpack.c.bf16 %v9062_v25, %v9060_v23  ;;  %v11285_v23 = vpack.c.bf16 %v9078_v18, %v9076_v15  ;;  %v8883_v25 = vld [vmem:[%s18562_s3 + $0xd60] sm:$0xff] }
 0x195   : > { %1848 = vmatprep.mubr.f32.mxu1 %v12750_v0  ;;  %11056 = vmatprep.subr.bf16.mxu0 %v11055_v29  ;;  %v8870_v29 = vld [vmem:[%s18562_s3 + $0xcf8] sm:$0xff]  ;;  %v8899_v18 = vld [vmem:[%s18562_s3 + $0xde0] sm:$0xff] }
 0x196   : > { %11252 = vmatprep.subr.bf16.mxu1 %v11251_v30  ;;  %v9065_v30 = vld [vmem:[%s18562_s3 + $0x1308] sm:$0xff]  ;;  %v11075_v34 = vpack.c.bf16 %v8870_v29, %v8868_v27  ;;  %v8885_v27 = vld [vmem:[%s18562_s3 + $0xd70] sm:$0xff]  ;;  %v9080_v29 = vld [vmem:[%s18562_s3 + $0x1380] sm:$0xff] }
 0x197   : > { %v11093_v9 = vpack.c.bf16 %v8885_v27, %v8883_v25  ;;  %v9103_v25 = vld [vmem:[%s18562_s3 + $0x1438] sm:$0xff] }
 0x19a   : > { %8649 = vmatmul.mubr.msk.f32.vlgmr.msra.gmra.mrb[4].mxu0 %vm1086_vm2, %v14255_v39 }
 0x19b   : > { %8846 = vmatmul.mubr.msk.f32.vlgmr.msra.gmra.mrb[4].mxu1 %vm1086_vm2, %v14255_v39  ;;  %11058 = vmatpush1.bf16.msra.mxu0 %v11057_v36  ;;  %v11271_v36 = vpack.c.bf16 %v9067_v31, %v9065_v30  ;;  %v9082_v31 = vld [vmem:[%s18562_s3 + $0x1390] sm:$0xff] }
 0x19c   : > { %11254 = vmatpush1.bf16.msra.mxu1 %v11253_v40  ;;  %2118 = vmatprep.mubr.f32.mxu0 %v13423_v14  ;;  %v8874_v40 = vld [vmem:[%s18562_s3 + $0xd18] sm:$0xff] }
 0x19d   : > { %2599 = vmatprep.mubr.f32.mxu1 %v13423_v14  ;;  %11060 = vmatprep.subr.bf16.mxu0 %v11059_v44  ;;  %v9059_v14 = vld [vmem:[%s18562_s3 + $0x12d8] sm:$0xff]  ;;  %v11273_v44 = vpack.c.bf16 %v9066_v37, %v9064_v35  ;;  %v11079_v1 = vpack.c.bf16 %v8874_v40, %v8872_v38  ;;  %v11289_v35 = vpack.c.bf16 %v9082_v31, %v9080_v29  ;;  %v8887_v37 = vld [vmem:[%s18562_s3 + $0xd80] sm:$0xff]  ;;  %v8889_v38 = vld [vmem:[%s18562_s3 + $0xd90] sm:$0xff] }
 0x19e   : > { %11256 = vmatprep.subr.bf16.mxu1 %v11255_v11  ;;  %v11263_v8 = vpack.c.bf16 %v9059_v14, %v9057_v62  ;;  %v9068_v11 = vld [vmem:[%s18562_s3 + $0x1320] sm:$0xff]  ;;  %v9074_v14 = vld [vmem:[%s18562_s3 + $0x1350] sm:$0xff]  ;;  %v11097_v46 = vpack.c.bf16 %v8889_v38, %v8887_v37  ;;  %v9107_v37 = vld [vmem:[%s18562_s3 + $0x1458] sm:$0xff] }
 0x19f   : > { %11062 = vmatpush1.bf16.msra.mxu0 %v11061_v50  ;;  %v8876_v50 = vld [vmem:[%s18562_s3 + $0xd28] sm:$0xff]  ;;  %v11277_v56 = vpack.c.bf16 %v9070_v48, %v9068_v11  ;;  %v11281_v7 = vpack.c.bf16 %v9074_v14, %v9072_v61  ;;  %v9084_v40 = vld [vmem:[%s18562_s3 + $0x13a0] sm:$0xff] }
 0x1a0   : > { %11258 = vmatpush1.bf16.msra.mxu1 %v11257_v51  ;;  %11064 = vmatprep.subr.bf16.mxu0 %v11063_v52  ;;  %v8878_v51 = vld [vmem:[%s18562_s3 + $0xd38] sm:$0xff]  ;;  %v9073_v52 = vld [vmem:[%s18562_s3 + $0x1348] sm:$0xff]  ;;  %v11293_v11 = vpack.c.bf16 %v9086_v42, %v9084_v40  ;;  %v8891_v48 = vld [vmem:[%s18562_s3 + $0xda0] sm:$0xff] }
 0x1a1   : > { %11260 = vmatprep.subr.bf16.mxu1 %v11259_v57  ;;  %v11083_v57 = vpack.c.bf16 %v8878_v51, %v8876_v50  ;;  %v11279_v62 = vpack.c.bf16 %v9075_v53, %v9073_v52  ;;  %v8893_v50 = vld [vmem:[%s18562_s3 + $0xdb0] sm:$0xff]  ;;  %v9088_v51 = vld [vmem:[%s18562_s3 + $0x13c0] sm:$0xff] }
 0x1a2   : > { %v9090_v53 = vld [vmem:[%s18562_s3 + $0x13d0] sm:$0xff]  ;;  %v11101_v59 = vpack.c.bf16 %v8893_v50, %v8891_v48  ;;  %v8895_v14 = vld [vmem:[%s18562_s3 + $0xdc0] sm:$0xff]  ;;  %v9111_v48 = vld [vmem:[%s18562_s3 + $0x1478] sm:$0xff] }
 0x1a3   : > { %11066 = vmatpush1.bf16.msra.mxu0 %v11065_v63  ;;  %v8880_v63 = vld [vmem:[%s18562_s3 + $0xd48] sm:$0xff]  ;;  %v11297_v61 = vpack.c.bf16 %v9090_v53, %v9088_v51  ;;  %v8903_v31 = vld [vmem:[%s18562_s3 + $0xe00] sm:$0xff] }
 0x1a4   : > { %11262 = vmatpush1.bf16.msra.mxu1 %v11261_v2  ;;  %11068 = vmatprep.subr.bf16.mxu0 %v11067_v3  ;;  %v8882_v2 = vld [vmem:[%s18562_s3 + $0xd58] sm:$0xff]  ;;  %v9077_v3 = vld [vmem:[%s18562_s3 + $0x1368] sm:$0xff]  ;;  %v8907_v42 = vld [vmem:[%s18562_s3 + $0xe20] sm:$0xff] }
 0x1a5   : > { %11264 = vmatprep.subr.bf16.mxu1 %v11263_v8  ;;  %v11087_v8 = vpack.c.bf16 %v8882_v2, %v8880_v63  ;;  %v11283_v16 = vpack.c.bf16 %v9079_v5, %v9077_v3  ;;  %v8897_v63 = vld [vmem:[%s18562_s3 + $0xdd0] sm:$0xff]  ;;  %v9092_v2 = vld [vmem:[%s18562_s3 + $0x13e0] sm:$0xff] }
 0x1a6   : > { %v9094_v5 = vld [vmem:[%s18562_s3 + $0x13f0] sm:$0xff]  ;;  %v11105_v13 = vpack.c.bf16 %v8897_v63, %v8895_v14  ;;  %v8911_v53 = vld [vmem:[%s18562_s3 + $0xe40] sm:$0xff]  ;;  %v9113_v14 = vld [vmem:[%s18562_s3 + $0x1488] sm:$0xff] }
 0x1a7   : > { %11070 = vmatpush1.bf16.msra.mxu0 %v11069_v10  ;;  %v8884_v10 = vld [vmem:[%s18562_s3 + $0xd68] sm:$0xff]  ;;  %v11301_v15 = vpack.c.bf16 %v9094_v5, %v9092_v2  ;;  %v9115_v63 = vld [vmem:[%s18562_s3 + $0x1498] sm:$0xff]  ;;  %v8917_v5 = vld [vmem:[%s18562_s3 + $0xe70] sm:$0xff] }
 0x1a8   : > { %11266 = vmatpush1.bf16.msra.mxu1 %v11265_v20  ;;  %11072 = vmatprep.subr.bf16.mxu0 %v11071_v4  ;;  %v8886_v20 = vld [vmem:[%s18562_s3 + $0xd78] sm:$0xff]  ;;  %v9081_v4 = vld [vmem:[%s18562_s3 + $0x1388] sm:$0xff] }
 0x1a9   : > { %11268 = vmatprep.subr.bf16.mxu1 %v11267_v24  ;;  %v11091_v24 = vpack.c.bf16 %v8886_v20, %v8884_v10  ;;  %v11287_v30 = vpack.c.bf16 %v9083_v21, %v9081_v4  ;;  %v8901_v10 = vld [vmem:[%s18562_s3 + $0xdf0] sm:$0xff]  ;;  %v9096_v20 = vld [vmem:[%s18562_s3 + $0x1400] sm:$0xff] }
 0x1aa   : > { %v9098_v21 = vld [vmem:[%s18562_s3 + $0x1410] sm:$0xff]  ;;  %v11109_v27 = vpack.c.bf16 %v8901_v10, %v8899_v18  ;;  %v9119_v18 = vld [vmem:[%s18562_s3 + $0x14b8] sm:$0xff] }
 0x1ab   : > { %11074 = vmatpush1.bf16.msra.mxu0 %v11073_v32  ;;  %v8888_v32 = vld [vmem:[%s18562_s3 + $0xd88] sm:$0xff]  ;;  %v11305_v29 = vpack.c.bf16 %v9098_v21, %v9096_v20  ;;  %v8919_v21 = vld [vmem:[%s18562_s3 + $0xe80] sm:$0xff] }
 0x1ac   : > { %11270 = vmatpush1.bf16.msra.mxu1 %v11269_v33  ;;  %11076 = vmatprep.subr.bf16.mxu0 %v11075_v34  ;;  %v8890_v33 = vld [vmem:[%s18562_s3 + $0xd98] sm:$0xff]  ;;  %v9085_v34 = vld [vmem:[%s18562_s3 + $0x13a8] sm:$0xff] }
 0x1ad   : > { %11272 = vmatprep.subr.bf16.mxu1 %v11271_v36  ;;  %v11095_v36 = vpack.c.bf16 %v8890_v33, %v8888_v32  ;;  %v11291_v41 = vpack.c.bf16 %v9087_v60, %v9085_v34  ;;  %v8905_v32 = vld [vmem:[%s18562_s3 + $0xe10] sm:$0xff]  ;;  %v9100_v33 = vld [vmem:[%s18562_s3 + $0x1420] sm:$0xff] }
 0x1ae   : > { %v9102_v60 = vld [vmem:[%s18562_s3 + $0x1430] sm:$0xff]  ;;  %v11113_v38 = vpack.c.bf16 %v8905_v32, %v8903_v31 }
 0x1af   : > { %11078 = vmatpush1.bf16.msra.mxu0 %v11077_v43  ;;  %v8892_v43 = vld [vmem:[%s18562_s3 + $0xda8] sm:$0xff]  ;;  %v11309_v40 = vpack.c.bf16 %v9102_v60, %v9100_v33  ;;  %v8923_v33 = vld [vmem:[%s18562_s3 + $0xea0] sm:$0xff] }
 0x1b0   : > { %11274 = vmatpush1.bf16.msra.mxu1 %v11273_v44  ;;  %11080 = vmatprep.subr.bf16.mxu0 %v11079_v1  ;;  %v8894_v44 = vld [vmem:[%s18562_s3 + $0xdb8] sm:$0xff]  ;;  %v9089_v1 = vld [vmem:[%s18562_s3 + $0x13c8] sm:$0xff]  ;;  %v9120_v60 = vld [vmem:[%s18562_s3 + $0x14c0] sm:$0xff] }
 0x1b1   : > { %11276 = vmatprep.subr.bf16.mxu1 %v11275_v47  ;;  %v11099_v47 = vpack.c.bf16 %v8894_v44, %v8892_v43  ;;  %v11295_v52 = vpack.c.bf16 %v9091_v45, %v9089_v1  ;;  %v8909_v43 = vld [vmem:[%s18562_s3 + $0xe30] sm:$0xff]  ;;  %v9104_v44 = vld [vmem:[%s18562_s3 + $0x1440] sm:$0xff] }
 0x1b2   : > { %v9106_v45 = vld [vmem:[%s18562_s3 + $0x1450] sm:$0xff]  ;;  %v11117_v50 = vpack.c.bf16 %v8909_v43, %v8907_v42 }
 0x1b3   : > { %11082 = vmatpush1.bf16.msra.mxu0 %v11081_v55  ;;  %v8896_v55 = vld [vmem:[%s18562_s3 + $0xdc8] sm:$0xff]  ;;  %v11313_v51 = vpack.c.bf16 %v9106_v45, %v9104_v44  ;;  %v8927_v44 = vld [vmem:[%s18562_s3 + $0xec0] sm:$0xff] }
 0x1b4   : > { %11278 = vmatpush1.bf16.msra.mxu1 %v11277_v56  ;;  %11084 = vmatprep.subr.bf16.mxu0 %v11083_v57  ;;  %v8898_v56 = vld [vmem:[%s18562_s3 + $0xdd8] sm:$0xff]  ;;  %v9093_v57 = vld [vmem:[%s18562_s3 + $0x13e8] sm:$0xff]  ;;  %v9124_v45 = vld [vmem:[%s18562_s3 + $0x14e0] sm:$0xff] }
 0x1b5   : > { %11280 = vmatprep.subr.bf16.mxu1 %v11279_v62  ;;  %v11103_v62 = vpack.c.bf16 %v8898_v56, %v8896_v55  ;;  %v11299_v3 = vpack.c.bf16 %v9095_v58, %v9093_v57  ;;  %v8913_v55 = vld [vmem:[%s18562_s3 + $0xe50] sm:$0xff]  ;;  %v9108_v57 = vld [vmem:[%s18562_s3 + $0x1460] sm:$0xff] }
 0x1b6   : > { %v9110_v58 = vld [vmem:[%s18562_s3 + $0x1470] sm:$0xff] }
 0x1b7   : > { %11086 = vmatpush1.bf16.msra.mxu0 %v11085_v6  ;;  %v8900_v6 = vld [vmem:[%s18562_s3 + $0xde8] sm:$0xff]  ;;  %v11317_v2 = vpack.c.bf16 %v9110_v58, %v9108_v57  ;;  %v8933_v57 = vld [vmem:[%s18562_s3 + $0xef0] sm:$0xff]  ;;  %v9128_v58 = vld [vmem:[%s18562_s3 + $0x1500] sm:$0xff] }
 0x1b8   : > { %11282 = vmatpush1.bf16.msra.mxu1 %v11281_v7  ;;  %11088 = vmatprep.subr.bf16.mxu0 %v11087_v8  ;;  %v8902_v7 = vld [vmem:[%s18562_s3 + $0xdf8] sm:$0xff]  ;;  %v9097_v8 = vld [vmem:[%s18562_s3 + $0x1408] sm:$0xff] }
 0x1b9   : > { %11284 = vmatprep.subr.bf16.mxu1 %v11283_v16  ;;  %v11107_v16 = vpack.c.bf16 %v8902_v7, %v8900_v6  ;;  %v11303_v4 = vpack.c.bf16 %v9099_v12, %v9097_v8  ;;  %v9112_v6 = vld [vmem:[%s18562_s3 + $0x1480] sm:$0xff]  ;;  %v9114_v8 = vld [vmem:[%s18562_s3 + $0x1490] sm:$0xff]  ;;  %v8920_v12 = vld [vmem:[%s18562_s3 + $0xe88] sm:$0xff] }
 0x1ba   : > { %v11321_v20 = vpack.c.bf16 %v9114_v8, %v9112_v6  ;;  %v8937_v8 = vld [vmem:[%s18562_s3 + $0xf10] sm:$0xff] }
 0x1bb   : > { %11090 = vmatpush1.bf16.msra.mxu0 %v11089_v22  ;;  %v8904_v22 = vld [vmem:[%s18562_s3 + $0xe08] sm:$0xff] }
 0x1bc   : > { %11286 = vmatpush1.bf16.msra.mxu1 %v11285_v23  ;;  %11092 = vmatprep.subr.bf16.mxu0 %v11091_v24  ;;  %v8906_v23 = vld [vmem:[%s18562_s3 + $0xe18] sm:$0xff]  ;;  %v9101_v24 = vld [vmem:[%s18562_s3 + $0x1428] sm:$0xff] }
 0x1bd   : > { %11288 = vmatprep.subr.bf16.mxu1 %v11287_v30  ;;  %v11111_v30 = vpack.c.bf16 %v8906_v23, %v8904_v22  ;;  %v11307_v34 = vpack.c.bf16 %v9103_v25, %v9101_v24  ;;  %v8921_v22 = vld [vmem:[%s18562_s3 + $0xe90] sm:$0xff]  ;;  %v9116_v23 = vld [vmem:[%s18562_s3 + $0x14a0] sm:$0xff]  ;;  %v8924_v25 = vld [vmem:[%s18562_s3 + $0xea8] sm:$0xff] }
 0x1be   : > { %v9118_v24 = vld [vmem:[%s18562_s3 + $0x14b0] sm:$0xff] }
 0x1bf   : > { %11094 = vmatpush1.bf16.msra.mxu0 %v11093_v9  ;;  %v8908_v9 = vld [vmem:[%s18562_s3 + $0xe28] sm:$0xff]  ;;  %v11325_v31 = vpack.c.bf16 %v9118_v24, %v9116_v23  ;;  %v8939_v23 = vld [vmem:[%s18562_s3 + $0xf20] sm:$0xff] }
 0x1c0   : > { %11290 = vmatpush1.bf16.msra.mxu1 %v11289_v35  ;;  %11096 = vmatprep.subr.bf16.mxu0 %v11095_v36  ;;  %v8910_v35 = vld [vmem:[%s18562_s3 + $0xe38] sm:$0xff]  ;;  %v9105_v36 = vld [vmem:[%s18562_s3 + $0x1448] sm:$0xff]  ;;  %v9136_v24 = vld [vmem:[%s18562_s3 + $0x1540] sm:$0xff] }
 0x1c1   : > { %11292 = vmatprep.subr.bf16.mxu1 %v11291_v41  ;;  %v11115_v41 = vpack.c.bf16 %v8910_v35, %v8908_v9  ;;  %v11311_v1 = vpack.c.bf16 %v9107_v37, %v9105_v36  ;;  %v9122_v35 = vld [vmem:[%s18562_s3 + $0x14d0] sm:$0xff]  ;;  %v8928_v36 = vld [vmem:[%s18562_s3 + $0xec8] sm:$0xff]  ;;  %v8930_v37 = vld [vmem:[%s18562_s3 + $0xed8] sm:$0xff] }
 0x1c2   : > { %v11329_v42 = vpack.c.bf16 %v9122_v35, %v9120_v60  ;;  %v11135_v43 = vpack.c.bf16 %v8930_v37, %v8928_v36  ;;  %v8943_v60 = vld [vmem:[%s18562_s3 + $0xf40] sm:$0xff]  ;;  %v9142_v37 = vld [vmem:[%s18562_s3 + $0x1570] sm:$0xff] }
 0x1c3   : > { %11098 = vmatpush1.bf16.msra.mxu0 %v11097_v46  ;;  %v8912_v46 = vld [vmem:[%s18562_s3 + $0xe48] sm:$0xff]  ;;  %v9140_v35 = vld [vmem:[%s18562_s3 + $0x1560] sm:$0xff] }
 0x1c4   : > { %11294 = vmatpush1.bf16.msra.mxu1 %v11293_v11  ;;  %11100 = vmatprep.subr.bf16.mxu0 %v11099_v47  ;;  %v8914_v11 = vld [vmem:[%s18562_s3 + $0xe58] sm:$0xff]  ;;  %v9109_v47 = vld [vmem:[%s18562_s3 + $0x1468] sm:$0xff] }
 0x1c5   : > { %11296 = vmatprep.subr.bf16.mxu1 %v11295_v52  ;;  %v11119_v52 = vpack.c.bf16 %v8914_v11, %v8912_v46  ;;  %v11315_v56 = vpack.c.bf16 %v9111_v48, %v9109_v47  ;;  %v9126_v11 = vld [vmem:[%s18562_s3 + $0x14f0] sm:$0xff]  ;;  %v8932_v47 = vld [vmem:[%s18562_s3 + $0xee8] sm:$0xff]  ;;  %v8934_v48 = vld [vmem:[%s18562_s3 + $0xef8] sm:$0xff] }
 0x1c7   : > { %11102 = vmatpush1.bf16.msra.mxu0 %v11101_v59  ;;  %v8916_v59 = vld [vmem:[%s18562_s3 + $0xe68] sm:$0xff] }
 0x1c8   : > { %11298 = vmatpush1.bf16.msra.mxu1 %v11297_v61  ;;  %11104 = vmatprep.subr.bf16.mxu0 %v11103_v62  ;;  %v8918_v61 = vld [vmem:[%s18562_s3 + $0xe78] sm:$0xff]  ;;  %v11121_v62 = vpack.c.bf16 %v8913_v55, %v8911_v53  ;;  %v11333_v53 = vpack.c.bf16 %v9126_v11, %v9124_v45  ;;  %v11139_v55 = vpack.c.bf16 %v8934_v48, %v8932_v47  ;;  %v8947_v45 = vld [vmem:[%s18562_s3 + $0xf60] sm:$0xff]  ;;  %v9146_v48 = vld [vmem:[%s18562_s3 + $0x1590] sm:$0xff] }
 0x1c9   : > { %11300 = vmatprep.subr.bf16.mxu1 %v11299_v3  ;;  %v8915_v3 = vld [vmem:[%s18562_s3 + $0xe60] sm:$0xff]  ;;  %v11123_v7 = vpack.c.bf16 %v8918_v61, %v8916_v59  ;;  %v9130_v61 = vld [vmem:[%s18562_s3 + $0x1510] sm:$0xff] }
 0x1ca   : > { %v11125_v10 = vpack.c.bf16 %v8917_v5, %v8915_v3  ;;  %v11337_v5 = vpack.c.bf16 %v9130_v61, %v9128_v58  ;;  %v9144_v11 = vld [vmem:[%s18562_s3 + $0x1580] sm:$0xff] }
 0x1cb   : > { %11106 = vmatpush1.bf16.msra.mxu0 %v11105_v13  ;;  %v8922_v13 = vld [vmem:[%s18562_s3 + $0xe98] sm:$0xff]  ;;  %v8951_v58 = vld [vmem:[%s18562_s3 + $0xf80] sm:$0xff] }
 0x1cc   : > { %11302 = vmatpush1.bf16.msra.mxu1 %v11301_v15  ;;  %11108 = vmatprep.subr.bf16.mxu0 %v11107_v16  ;;  %v11319_v15 = vpack.c.bf16 %v9115_v63, %v9113_v14  ;;  %v9117_v16 = vld [vmem:[%s18562_s3 + $0x14a8] sm:$0xff]  ;;  %v8938_v14 = vld [vmem:[%s18562_s3 + $0xf18] sm:$0xff]  ;;  %v9148_v61 = vld [vmem:[%s18562_s3 + $0x15a0] sm:$0xff] }
 0x1cd   : > { %11304 = vmatprep.subr.bf16.mxu1 %v11303_v4  ;;  %v11127_v4 = vpack.c.bf16 %v8922_v13, %v8920_v12  ;;  %v9133_v63 = vld [vmem:[%s18562_s3 + $0x1528] sm:$0xff]  ;;  %v9132_v12 = vld [vmem:[%s18562_s3 + $0x1520] sm:$0xff] }
 0x1cf   : > { %11110 = vmatpush1.bf16.msra.mxu0 %v11109_v27  ;;  %v8926_v27 = vld [vmem:[%s18562_s3 + $0xeb8] sm:$0xff] }
 0x1d0   : > { %11306 = vmatpush1.bf16.msra.mxu1 %v11305_v29  ;;  %11112 = vmatprep.subr.bf16.mxu0 %v11111_v30  ;;  %v9121_v29 = vld [vmem:[%s18562_s3 + $0x14c8] sm:$0xff]  ;;  %v11129_v30 = vpack.c.bf16 %v8921_v22, %v8919_v21  ;;  %v11131_v32 = vpack.c.bf16 %v8926_v27, %v8924_v25  ;;  %v9138_v27 = vld [vmem:[%s18562_s3 + $0x1550] sm:$0xff] }
 0x1d1   : > { %11308 = vmatprep.subr.bf16.mxu1 %v11307_v34  ;;  %v8925_v34 = vld [vmem:[%s18562_s3 + $0xeb0] sm:$0xff] }
 0x1d3   : > { %11114 = vmatpush1.bf16.msra.mxu0 %v11113_v38  ;;  %v9125_v38 = vld [vmem:[%s18562_s3 + $0x14e8] sm:$0xff] }
 0x1d4   : > { %11310 = vmatpush1.bf16.msra.mxu1 %v11309_v40  ;;  %11116 = vmatprep.subr.bf16.mxu0 %v11115_v41  ;;  %v9127_v40 = vld [vmem:[%s18562_s3 + $0x14f8] sm:$0xff]  ;;  %v11133_v41 = vpack.c.bf16 %v8925_v34, %v8923_v33  ;;  %v11345_v33 = vpack.c.bf16 %v9138_v27, %v9136_v24  ;;  %v8959_v24 = vld [vmem:[%s18562_s3 + $0xfc0] sm:$0xff] }
 0x1d5   : > { %11312 = vmatprep.subr.bf16.mxu1 %v11311_v1  ;;  %v8929_v1 = vld [vmem:[%s18562_s3 + $0xed0] sm:$0xff]  ;;  %v11331_v46 = vpack.c.bf16 %v9127_v40, %v9125_v38  ;;  %v8948_v38 = vld [vmem:[%s18562_s3 + $0xf68] sm:$0xff]  ;;  %v8950_v40 = vld [vmem:[%s18562_s3 + $0xf78] sm:$0xff] }
 0x1d6   : > { %v9156_v27 = vld [vmem:[%s18562_s3 + $0x15e0] sm:$0xff] }
 0x1d7   : > { %11118 = vmatpush1.bf16.msra.mxu0 %v11117_v50  ;;  %v9129_v50 = vld [vmem:[%s18562_s3 + $0x1508] sm:$0xff] }
 0x1d8   : > { %11314 = vmatpush1.bf16.msra.mxu1 %v11313_v51  ;;  %11120 = vmatprep.subr.bf16.mxu0 %v11119_v52  ;;  %v9131_v51 = vld [vmem:[%s18562_s3 + $0x1518] sm:$0xff]  ;;  %v11137_v52 = vpack.c.bf16 %v8929_v1, %v8927_v44  ;;  %v11349_v44 = vpack.c.bf16 %v9142_v37, %v9140_v35  ;;  %v11155_v1 = vpack.c.bf16 %v8950_v40, %v8948_v38  ;;  %v8963_v35 = vld [vmem:[%s18562_s3 + $0xfe0] sm:$0xff]  ;;  %v9162_v40 = vld [vmem:[%s18562_s3 + $0x1610] sm:$0xff] }
 0x1d9   : > { %11316 = vmatprep.subr.bf16.mxu1 %v11315_v56  ;;  %v8931_v56 = vld [vmem:[%s18562_s3 + $0xee0] sm:$0xff]  ;;  %v11335_v59 = vpack.c.bf16 %v9131_v51, %v9129_v50  ;;  %v8952_v50 = vld [vmem:[%s18562_s3 + $0xf88] sm:$0xff]  ;;  %v8954_v51 = vld [vmem:[%s18562_s3 + $0xf98] sm:$0xff] }
 0x1da   : > { %2119 = vmatmul.mubr.f32.vlgmr.msra.gmra.mrb[6].mxu0 %v13431_v19  ;;  %v11141_v3 = vpack.c.bf16 %v8933_v57, %v8931_v56  ;;  %v11353_v56 = vpack.c.bf16 %v9146_v48, %v9144_v11  ;;  %v11159_v57 = vpack.c.bf16 %v8954_v51, %v8952_v50  ;;  %v9160_v37 = vld [vmem:[%s18562_s3 + $0x1600] sm:$0xff]  ;;  %v9166_v51 = vld [vmem:[%s18562_s3 + $0x1630] sm:$0xff] }
 0x1db   : > { %2600 = vmatmul.mubr.f32.vlgmr.msra.gmra.mrb[6].mxu1 %v13431_v19  ;;  %11122 = vmatpush1.bf16.msra.mxu0 %v11121_v62  ;;  %v11323_v19 = vpack.c.bf16 %v9119_v18, %v9117_v16  ;;  %v8936_v62 = vld [vmem:[%s18562_s3 + $0xf08] sm:$0xff]  ;;  %v8942_v18 = vld [vmem:[%s18562_s3 + $0xf38] sm:$0xff]  ;;  %v8967_v11 = vld [vmem:[%s18562_s3 + $0x1000] sm:$0xff] }
 0x1dc   : > { %2189 = vmatprep.mubr.f32.mxu0 %v13453_v28  ;;  %11318 = vmatpush1.bf16.msra.mxu1 %v11317_v2  ;;  %v9135_v2 = vld [vmem:[%s18562_s3 + $0x1538] sm:$0xff]  ;;  %v11143_v6 = vpack.c.bf16 %v8938_v14, %v8936_v62  ;;  %v8940_v16 = vld [vmem:[%s18562_s3 + $0xf28] sm:$0xff]  ;;  %v9150_v14 = vld [vmem:[%s18562_s3 + $0x15b0] sm:$0xff] }
 0x1dd   : > { %2670 = vmatprep.mubr.f32.mxu1 %v13453_v28  ;;  %11124 = vmatprep.subr.bf16.mxu0 %v11123_v7  ;;  %v9123_v28 = vld [vmem:[%s18562_s3 + $0x14d8] sm:$0xff]  ;;  %v8935_v7 = vld [vmem:[%s18562_s3 + $0xf00] sm:$0xff]  ;;  %v11339_v13 = vpack.c.bf16 %v9135_v2, %v9133_v63  ;;  %v11147_v22 = vpack.c.bf16 %v8942_v18, %v8940_v16  ;;  %v8956_v63 = vld [vmem:[%s18562_s3 + $0xfa8] sm:$0xff] }
 0x1de   : > { %11320 = vmatprep.subr.bf16.mxu1 %v11319_v15  ;;  %v11327_v9 = vpack.c.bf16 %v9123_v28, %v9121_v29  ;;  %v9134_v15 = vld [vmem:[%s18562_s3 + $0x1530] sm:$0xff]  ;;  %v8944_v29 = vld [vmem:[%s18562_s3 + $0xf48] sm:$0xff]  ;;  %v8946_v28 = vld [vmem:[%s18562_s3 + $0xf58] sm:$0xff] }
 0x1df   : > { %11126 = vmatpush1.bf16.msra.mxu0 %v11125_v10  ;;  %v9137_v10 = vld [vmem:[%s18562_s3 + $0x1548] sm:$0xff]  ;;  %v11341_v21 = vpack.c.bf16 %v9134_v15, %v9132_v12  ;;  %v11151_v34 = vpack.c.bf16 %v8946_v28, %v8944_v29  ;;  %v8958_v2 = vld [vmem:[%s18562_s3 + $0xfb8] sm:$0xff]  ;;  %v8955_v12 = vld [vmem:[%s18562_s3 + $0xfa0] sm:$0xff] }
 0x1e0   : > { %11322 = vmatpush1.bf16.msra.mxu1 %v11321_v20  ;;  %11128 = vmatprep.subr.bf16.mxu0 %v11127_v4  ;;  %v9139_v20 = vld [vmem:[%s18562_s3 + $0x1558] sm:$0xff]  ;;  %v11145_v4 = vpack.c.bf16 %v8937_v8, %v8935_v7  ;;  %v11357_v7 = vpack.c.bf16 %v9150_v14, %v9148_v61  ;;  %v11163_v8 = vpack.c.bf16 %v8958_v2, %v8956_v63  ;;  %v9152_v15 = vld [vmem:[%s18562_s3 + $0x15c0] sm:$0xff]  ;;  %v9154_v18 = vld [vmem:[%s18562_s3 + $0x15d0] sm:$0xff] }
 0x1e1   : > { %11324 = vmatprep.subr.bf16.mxu1 %v11323_v19  ;;  %v8941_v19 = vld [vmem:[%s18562_s3 + $0xf30] sm:$0xff]  ;;  %v11343_v25 = vpack.c.bf16 %v9139_v20, %v9137_v10  ;;  %v8960_v10 = vld [vmem:[%s18562_s3 + $0xfc8] sm:$0xff]  ;;  %v8962_v20 = vld [vmem:[%s18562_s3 + $0xfd8] sm:$0xff] }
 0x1e2   : > { %v9158_v28 = vld [vmem:[%s18562_s3 + $0x15f0] sm:$0xff]  ;;  %v9164_v48 = vld [vmem:[%s18562_s3 + $0x1620] sm:$0xff] }
 0x1e3   : > { %11130 = vmatpush1.bf16.msra.mxu0 %v11129_v30  ;;  %v9141_v30 = vld [vmem:[%s18562_s3 + $0x1568] sm:$0xff]  ;;  %v8971_v61 = vld [vmem:[%s18562_s3 + $0x1020] sm:$0xff]  ;;  %v9170_v2 = vld [vmem:[%s18562_s3 + $0x1650] sm:$0xff] }
 0x1e4   : > { %11326 = vmatpush1.bf16.msra.mxu1 %v11325_v31  ;;  %11132 = vmatprep.subr.bf16.mxu0 %v11131_v32  ;;  %v9143_v31 = vld [vmem:[%s18562_s3 + $0x1578] sm:$0xff]  ;;  %v11149_v32 = vpack.c.bf16 %v8941_v19, %v8939_v23  ;;  %v11361_v23 = vpack.c.bf16 %v9154_v18, %v9152_v15  ;;  %v11167_v19 = vpack.c.bf16 %v8962_v20, %v8960_v10  ;;  %v9168_v14 = vld [vmem:[%s18562_s3 + $0x1640] sm:$0xff]  ;;  %v9174_v20 = vld [vmem:[%s18562_s3 + $0x1670] sm:$0xff] }
 0x1e5   : > { %11328 = vmatprep.subr.bf16.mxu1 %v11327_v9  ;;  %v8945_v9 = vld [vmem:[%s18562_s3 + $0xf50] sm:$0xff]  ;;  %v11347_v36 = vpack.c.bf16 %v9143_v31, %v9141_v30  ;;  %v8964_v30 = vld [vmem:[%s18562_s3 + $0xfe8] sm:$0xff]  ;;  %v8966_v31 = vld [vmem:[%s18562_s3 + $0xff8] sm:$0xff] }
 0x1e6   : > { %v8975_v15 = vld [vmem:[%s18562_s3 + $0x1040] sm:$0xff] }
 0x1e7   : > { %11134 = vmatpush1.bf16.msra.mxu0 %v11133_v41  ;;  %v9145_v41 = vld [vmem:[%s18562_s3 + $0x1588] sm:$0xff]  ;;  %v9172_v10 = vld [vmem:[%s18562_s3 + $0x1660] sm:$0xff] }
 0x1e8   : > { %11330 = vmatpush1.bf16.msra.mxu1 %v11329_v42  ;;  %11136 = vmatprep.subr.bf16.mxu0 %v11135_v43  ;;  %v9147_v42 = vld [vmem:[%s18562_s3 + $0x1598] sm:$0xff]  ;;  %v11153_v43 = vpack.c.bf16 %v8945_v9, %v8943_v60  ;;  %v11365_v60 = vpack.c.bf16 %v9158_v28, %v9156_v27  ;;  %v11171_v9 = vpack.c.bf16 %v8966_v31, %v8964_v30  ;;  %v8981_v27 = vld [vmem:[%s18562_s3 + $0x1070] sm:$0xff]  ;;  %v8984_v31 = vld [vmem:[%s18562_s3 + $0x1088] sm:$0xff] }
 0x1e9   : > { %11332 = vmatprep.subr.bf16.mxu1 %v11331_v46  ;;  %v8949_v46 = vld [vmem:[%s18562_s3 + $0xf70] sm:$0xff]  ;;  %v11351_v47 = vpack.c.bf16 %v9147_v42, %v9145_v41  ;;  %v8968_v41 = vld [vmem:[%s18562_s3 + $0x1008] sm:$0xff]  ;;  %v8970_v42 = vld [vmem:[%s18562_s3 + $0x1018] sm:$0xff] }
 0x1ea   : > { %v9178_v30 = vld [vmem:[%s18562_s3 + $0x1690] sm:$0xff] }
 0x1eb   : > { %11138 = vmatpush1.bf16.msra.mxu0 %v11137_v52  ;;  %v9149_v52 = vld [vmem:[%s18562_s3 + $0x15a8] sm:$0xff] }
 0x1ec   : > { %11334 = vmatpush1.bf16.msra.mxu1 %v11333_v53  ;;  %11140 = vmatprep.subr.bf16.mxu0 %v11139_v55  ;;  %v9151_v53 = vld [vmem:[%s18562_s3 + $0x15b8] sm:$0xff]  ;;  %v11157_v55 = vpack.c.bf16 %v8949_v46, %v8947_v45  ;;  %v11369_v45 = vpack.c.bf16 %v9162_v40, %v9160_v37  ;;  %v11175_v46 = vpack.c.bf16 %v8970_v42, %v8968_v41  ;;  %v8983_v37 = vld [vmem:[%s18562_s3 + $0x1080] sm:$0xff]  ;;  %v9182_v41 = vld [vmem:[%s18562_s3 + $0x16b0] sm:$0xff] }
 0x1ed   : > { %11336 = vmatprep.subr.bf16.mxu1 %v11335_v59  ;;  %v8953_v59 = vld [vmem:[%s18562_s3 + $0xf90] sm:$0xff]  ;;  %v11355_v62 = vpack.c.bf16 %v9151_v53, %v9149_v52  ;;  %v8972_v52 = vld [vmem:[%s18562_s3 + $0x1028] sm:$0xff]  ;;  %v8974_v53 = vld [vmem:[%s18562_s3 + $0x1038] sm:$0xff] }
 0x1ee   : > { %v9180_v40 = vld [vmem:[%s18562_s3 + $0x16a0] sm:$0xff]  ;;  %v8988_v42 = vld [vmem:[%s18562_s3 + $0x10a8] sm:$0xff] }
 0x1ef   : > { %11142 = vmatpush1.bf16.msra.mxu0 %v11141_v3  ;;  %v9153_v3 = vld [vmem:[%s18562_s3 + $0x15c8] sm:$0xff] }
 0x1f0   : > { %11338 = vmatpush1.bf16.msra.mxu1 %v11337_v5  ;;  %11144 = vmatprep.subr.bf16.mxu0 %v11143_v6  ;;  %v9155_v5 = vld [vmem:[%s18562_s3 + $0x15d8] sm:$0xff]  ;;  %v11161_v6 = vpack.c.bf16 %v8953_v59, %v8951_v58  ;;  %v11373_v58 = vpack.c.bf16 %v9166_v51, %v9164_v48  ;;  %v11179_v59 = vpack.c.bf16 %v8974_v53, %v8972_v52  ;;  %v9184_v48 = vld [vmem:[%s18562_s3 + $0x16c0] sm:$0xff]  ;;  %v9186_v51 = vld [vmem:[%s18562_s3 + $0x16d0] sm:$0xff] }
 0x1f1   : > { %11340 = vmatprep.subr.bf16.mxu1 %v11339_v13  ;;  %v8957_v13 = vld [vmem:[%s18562_s3 + $0xfb0] sm:$0xff]  ;;  %v11359_v16 = vpack.c.bf16 %v9155_v5, %v9153_v3  ;;  %v8976_v3 = vld [vmem:[%s18562_s3 + $0x1048] sm:$0xff]  ;;  %v8978_v5 = vld [vmem:[%s18562_s3 + $0x1058] sm:$0xff] }
 0x1f2   : > { %v8992_v52 = vld [vmem:[%s18562_s3 + $0x10c8] sm:$0xff]  ;;  %v8994_v53 = vld [vmem:[%s18562_s3 + $0x10d8] sm:$0xff] }
 0x1f3   : > { %11146 = vmatpush1.bf16.msra.mxu0 %v11145_v4  ;;  %v9157_v4 = vld [vmem:[%s18562_s3 + $0x15e8] sm:$0xff] }
 0x1f4   : > { %11342 = vmatpush1.bf16.msra.mxu1 %v11341_v21  ;;  %11148 = vmatprep.subr.bf16.mxu0 %v11147_v22  ;;  %v9159_v21 = vld [vmem:[%s18562_s3 + $0x15f8] sm:$0xff]  ;;  %v11165_v22 = vpack.c.bf16 %v8957_v13, %v8955_v12  ;;  %v11377_v12 = vpack.c.bf16 %v9170_v2, %v9168_v14  ;;  %v11183_v13 = vpack.c.bf16 %v8978_v5, %v8976_v3  ;;  %v9188_v14 = vld [vmem:[%s18562_s3 + $0x16e0] sm:$0xff]  ;;  %v9190_v2 = vld [vmem:[%s18562_s3 + $0x16f0] sm:$0xff] }
 0x1f5   : > { %11344 = vmatprep.subr.bf16.mxu1 %v11343_v25  ;;  %v8961_v25 = vld [vmem:[%s18562_s3 + $0xfd0] sm:$0xff]  ;;  %v11363_v29 = vpack.c.bf16 %v9159_v21, %v9157_v4  ;;  %v8980_v4 = vld [vmem:[%s18562_s3 + $0x1068] sm:$0xff]  ;;  %v8982_v21 = vld [vmem:[%s18562_s3 + $0x1078] sm:$0xff] }
 0x1f6   : > { %v11187_v28 = vpack.c.bf16 %v8982_v21, %v8980_v4  ;;  %v8996_v3 = vld [vmem:[%s18562_s3 + $0x10e8] sm:$0xff]  ;;  %v8998_v5 = vld [vmem:[%s18562_s3 + $0x10f8] sm:$0xff] }
 0x1f7   : > { %11150 = vmatpush1.bf16.msra.mxu0 %v11149_v32  ;;  %v9161_v32 = vld [vmem:[%s18562_s3 + $0x1608] sm:$0xff]  ;;  %v9002_v21 = vld [vmem:[%s18562_s3 + $0x1118] sm:$0xff] }
 0x1f8   : > { %11346 = vmatpush1.bf16.msra.mxu1 %v11345_v33  ;;  %11152 = vmatprep.subr.bf16.mxu0 %v11151_v34  ;;  %v9163_v33 = vld [vmem:[%s18562_s3 + $0x1618] sm:$0xff]  ;;  %v11169_v34 = vpack.c.bf16 %v8961_v25, %v8959_v24  ;;  %v11381_v24 = vpack.c.bf16 %v9174_v20, %v9172_v10  ;;  %v8979_v25 = vld [vmem:[%s18562_s3 + $0x1060] sm:$0xff]  ;;  %v9194_v20 = vld [vmem:[%s18562_s3 + $0x1710] sm:$0xff] }
 0x1f9   : > { %11348 = vmatprep.subr.bf16.mxu1 %v11347_v36  ;;  %v8965_v36 = vld [vmem:[%s18562_s3 + $0xff0] sm:$0xff]  ;;  %v11367_v38 = vpack.c.bf16 %v9163_v33, %v9161_v32  ;;  %v8986_v32 = vld [vmem:[%s18562_s3 + $0x1098] sm:$0xff]  ;;  %v9000_v4 = vld [vmem:[%s18562_s3 + $0x1108] sm:$0xff] }
 0x1fb   : > { %11154 = vmatpush1.bf16.msra.mxu0 %v11153_v43  ;;  %v9165_v43 = vld [vmem:[%s18562_s3 + $0x1628] sm:$0xff] }
 0x1fc   : > { %11350 = vmatpush1.bf16.msra.mxu1 %v11349_v44  ;;  %11156 = vmatprep.subr.bf16.mxu0 %v11155_v1  ;;  %v9167_v44 = vld [vmem:[%s18562_s3 + $0x1638] sm:$0xff]  ;;  %v11173_v1 = vpack.c.bf16 %v8965_v36, %v8963_v35  ;;  %v11191_v36 = vpack.c.bf16 %v8986_v32, %v8984_v31  ;;  %v9198_v31 = vld [vmem:[%s18562_s3 + $0x1730] sm:$0xff]  ;;  %v9004_v32 = vld [vmem:[%s18562_s3 + $0x1128] sm:$0xff] }
 0x1fd   : > { %11352 = vmatprep.subr.bf16.mxu1 %v11351_v47  ;;  %v8969_v47 = vld [vmem:[%s18562_s3 + $0x1010] sm:$0xff]  ;;  %v11371_v50 = vpack.c.bf16 %v9167_v44, %v9165_v43  ;;  %v8990_v43 = vld [vmem:[%s18562_s3 + $0x10b8] sm:$0xff]  ;;  %v9185_v44 = vld [vmem:[%s18562_s3 + $0x16c8] sm:$0xff] }
 0x1ff   : > { %11158 = vmatpush1.bf16.msra.mxu0 %v11157_v55  ;;  %v9169_v55 = vld [vmem:[%s18562_s3 + $0x1648] sm:$0xff] }
 0x200   : > { %11354 = vmatpush1.bf16.msra.mxu1 %v11353_v56  ;;  %11160 = vmatprep.subr.bf16.mxu0 %v11159_v57  ;;  %v9171_v56 = vld [vmem:[%s18562_s3 + $0x1658] sm:$0xff]  ;;  %v11177_v57 = vpack.c.bf16 %v8969_v47, %v8967_v11  ;;  %v8987_v11 = vld [vmem:[%s18562_s3 + $0x10a0] sm:$0xff]  ;;  %v8989_v47 = vld [vmem:[%s18562_s3 + $0x10b0] sm:$0xff] }
 0x201   : > { %11356 = vmatprep.subr.bf16.mxu1 %v11355_v62  ;;  %v8973_v62 = vld [vmem:[%s18562_s3 + $0x1030] sm:$0xff]  ;;  %v11375_v63 = vpack.c.bf16 %v9171_v56, %v9169_v55  ;;  %v9189_v55 = vld [vmem:[%s18562_s3 + $0x16e8] sm:$0xff]  ;;  %v9191_v56 = vld [vmem:[%s18562_s3 + $0x16f8] sm:$0xff] }
 0x203   : > { %11162 = vmatpush1.bf16.msra.mxu0 %v11161_v6  ;;  %v9173_v6 = vld [vmem:[%s18562_s3 + $0x1668] sm:$0xff] }
 0x204   : > { %11358 = vmatpush1.bf16.msra.mxu1 %v11357_v7  ;;  %11164 = vmatprep.subr.bf16.mxu0 %v11163_v8  ;;  %v9175_v7 = vld [vmem:[%s18562_s3 + $0x1678] sm:$0xff]  ;;  %v11181_v8 = vpack.c.bf16 %v8973_v62, %v8971_v61  ;;  %v8991_v61 = vld [vmem:[%s18562_s3 + $0x10c0] sm:$0xff]  ;;  %v8993_v62 = vld [vmem:[%s18562_s3 + $0x10d0] sm:$0xff] }
 0x205   : > { %11360 = vmatprep.subr.bf16.mxu1 %v11359_v16  ;;  %v8977_v16 = vld [vmem:[%s18562_s3 + $0x1050] sm:$0xff]  ;;  %v11379_v18 = vpack.c.bf16 %v9175_v7, %v9173_v6  ;;  %v9193_v6 = vld [vmem:[%s18562_s3 + $0x1708] sm:$0xff]  ;;  %v9195_v7 = vld [vmem:[%s18562_s3 + $0x1718] sm:$0xff] }
 0x206   : > { %v11399_v10 = vpack.c.bf16 %v9195_v7, %v9193_v6  ;;  %v9213_v6 = vld [vmem:[%s18562_s3 + $0x17a8] sm:$0xff]  ;;  %v9215_v7 = vld [vmem:[%s18562_s3 + $0x17b8] sm:$0xff] }
 0x207   : > { %11166 = vmatpush1.bf16.msra.mxu0 %v11165_v22  ;;  %v11185_v22 = vpack.c.bf16 %v8977_v16, %v8975_v15  ;;  %v8995_v15 = vld [vmem:[%s18562_s3 + $0x10e0] sm:$0xff]  ;;  %v8997_v16 = vld [vmem:[%s18562_s3 + $0x10f0] sm:$0xff] }
 0x208   : > { %11362 = vmatpush1.bf16.msra.mxu1 %v11361_v23  ;;  %11168 = vmatprep.subr.bf16.mxu0 %v11167_v19  ;;  %v9177_v23 = vld [vmem:[%s18562_s3 + $0x1688] sm:$0xff]  ;;  %v9179_v19 = vld [vmem:[%s18562_s3 + $0x1698] sm:$0xff] }
 0x209   : > { %11364 = vmatprep.subr.bf16.mxu1 %v11363_v29  ;;  %v9176_v29 = vld [vmem:[%s18562_s3 + $0x1680] sm:$0xff]  ;;  %v11383_v33 = vpack.c.bf16 %v9179_v19, %v9177_v23  ;;  %v9199_v23 = vld [vmem:[%s18562_s3 + $0x1738] sm:$0xff]  ;;  %v11205_v19 = vpack.c.bf16 %v8997_v16, %v8995_v15  ;;  %v9017_v16 = vld [vmem:[%s18562_s3 + $0x1190] sm:$0xff] }
 0x20a   : > { %v11385_v35 = vpack.c.bf16 %v9178_v30, %v9176_v29  ;;  %v9001_v29 = vld [vmem:[%s18562_s3 + $0x1110] sm:$0xff]  ;;  %v9015_v15 = vld [vmem:[%s18562_s3 + $0x1180] sm:$0xff] }
 0x20b   : > { %11170 = vmatpush1.bf16.msra.mxu0 %v11169_v34  ;;  %v9181_v34 = vld [vmem:[%s18562_s3 + $0x16a8] sm:$0xff] }
 0x20c   : > { %11366 = vmatpush1.bf16.msra.mxu1 %v11365_v60  ;;  %11172 = vmatprep.subr.bf16.mxu0 %v11171_v9  ;;  %v9183_v60 = vld [vmem:[%s18562_s3 + $0x16b8] sm:$0xff]  ;;  %v11189_v9 = vpack.c.bf16 %v8981_v27, %v8979_v25  ;;  %v11207_v25 = vpack.c.bf16 %v9002_v21, %v9000_v4  ;;  %v8999_v27 = vld [vmem:[%s18562_s3 + $0x1100] sm:$0xff]  ;;  %v9020_v4 = vld [vmem:[%s18562_s3 + $0x11a8] sm:$0xff] }
 0x20d   : > { %11368 = vmatprep.subr.bf16.mxu1 %v11367_v38  ;;  %v8985_v38 = vld [vmem:[%s18562_s3 + $0x1090] sm:$0xff]  ;;  %v9022_v21 = vld [vmem:[%s18562_s3 + $0x11b8] sm:$0xff] }
 0x20f   : > { %11174 = vmatpush1.bf16.msra.mxu0 %v11173_v1  ;;  %v11193_v1 = vpack.c.bf16 %v8985_v38, %v8983_v37  ;;  %v9003_v37 = vld [vmem:[%s18562_s3 + $0x1120] sm:$0xff]  ;;  %v9005_v38 = vld [vmem:[%s18562_s3 + $0x1130] sm:$0xff] }
 0x210   : > { %11370 = vmatpush1.bf16.msra.mxu1 %v11369_v45  ;;  %11176 = vmatprep.subr.bf16.mxu0 %v11175_v46  ;;  %v11389_v45 = vpack.c.bf16 %v9182_v41, %v9180_v40  ;;  %v11195_v46 = vpack.c.bf16 %v8990_v43, %v8988_v42  ;;  %v9200_v40 = vld [vmem:[%s18562_s3 + $0x1740] sm:$0xff]  ;;  %v9202_v41 = vld [vmem:[%s18562_s3 + $0x1750] sm:$0xff]  ;;  %v9008_v42 = vld [vmem:[%s18562_s3 + $0x1148] sm:$0xff] }
 0x211   : > { %11372 = vmatprep.subr.bf16.mxu1 %v11371_v50  ;;  %v9010_v43 = vld [vmem:[%s18562_s3 + $0x1158] sm:$0xff] }
 0x213   : > { %11178 = vmatpush1.bf16.msra.mxu0 %v11177_v57  ;;  %v11197_v57 = vpack.c.bf16 %v8989_v47, %v8987_v11  ;;  %v9007_v11 = vld [vmem:[%s18562_s3 + $0x1140] sm:$0xff]  ;;  %v9009_v47 = vld [vmem:[%s18562_s3 + $0x1150] sm:$0xff] }
 0x214   : > { %11374 = vmatpush1.bf16.msra.mxu1 %v11373_v58  ;;  %11180 = vmatprep.subr.bf16.mxu0 %v11179_v59  ;;  %v11393_v58 = vpack.c.bf16 %v9186_v51, %v9184_v48  ;;  %v11199_v59 = vpack.c.bf16 %v8994_v53, %v8992_v52  ;;  %v9204_v48 = vld [vmem:[%s18562_s3 + $0x1760] sm:$0xff]  ;;  %v9206_v51 = vld [vmem:[%s18562_s3 + $0x1770] sm:$0xff]  ;;  %v9012_v52 = vld [vmem:[%s18562_s3 + $0x1168] sm:$0xff] }
 0x215   : > { %11376 = vmatprep.subr.bf16.mxu1 %v11375_v63  ;;  %v11395_v63 = vpack.c.bf16 %v9191_v56, %v9189_v55  ;;  %v9014_v53 = vld [vmem:[%s18562_s3 + $0x1178] sm:$0xff]  ;;  %v9209_v55 = vld [vmem:[%s18562_s3 + $0x1788] sm:$0xff] }
 0x216   : > { %v9211_v56 = vld [vmem:[%s18562_s3 + $0x1798] sm:$0xff] }
 0x217   : > { %11182 = vmatpush1.bf16.msra.mxu0 %v11181_v8  ;;  %v11201_v8 = vpack.c.bf16 %v8993_v62, %v8991_v61  ;;  %v9011_v61 = vld [vmem:[%s18562_s3 + $0x1160] sm:$0xff]  ;;  %v9013_v62 = vld [vmem:[%s18562_s3 + $0x1170] sm:$0xff] }
 0x218   : > { %11378 = vmatpush1.bf16.msra.mxu1 %v11377_v12  ;;  %11184 = vmatprep.subr.bf16.mxu0 %v11183_v13  ;;  %v11397_v12 = vpack.c.bf16 %v9190_v2, %v9188_v14  ;;  %v11203_v13 = vpack.c.bf16 %v8998_v5, %v8996_v3  ;;  %v9208_v14 = vld [vmem:[%s18562_s3 + $0x1780] sm:$0xff]  ;;  %v9210_v2 = vld [vmem:[%s18562_s3 + $0x1790] sm:$0xff]  ;;  %v9016_v3 = vld [vmem:[%s18562_s3 + $0x1188] sm:$0xff] }
 0x219   : > { %11380 = vmatprep.subr.bf16.mxu1 %v11379_v18  ;;  %v9192_v18 = vld [vmem:[%s18562_s3 + $0x1700] sm:$0xff]  ;;  %v9018_v5 = vld [vmem:[%s18562_s3 + $0x1198] sm:$0xff] }
 0x21a   : > { %2190 = vmatmul.mubr.f32.vlgmr.msra.gmra.mrb[6].mxu0 %v13829_v49 }
 0x21b   : > { %2671 = vmatmul.mubr.f32.vlgmr.msra.gmra.mrb[6].mxu1 %v13829_v49  ;;  %11186 = vmatpush1.bf16.msra.mxu0 %v11185_v22  ;;  %v11387_v49 = vpack.c.bf16 %v9183_v60, %v9181_v34  ;;  %v9197_v22 = vld [vmem:[%s18562_s3 + $0x1728] sm:$0xff]  ;;  %v9203_v60 = vld [vmem:[%s18562_s3 + $0x1758] sm:$0xff] }
 0x21c   : > { %2260 = vmatprep.mubr.f32.mxu0 %v13840_v54  ;;  %11382 = vmatpush1.bf16.msra.mxu1 %v11381_v24  ;;  %v11401_v24 = vpack.c.bf16 %v9194_v20, %v9192_v18  ;;  %v11403_v30 = vpack.c.bf16 %v9199_v23, %v9197_v22  ;;  %v9201_v34 = vld [vmem:[%s18562_s3 + $0x1748] sm:$0xff]  ;;  %v9212_v18 = vld [vmem:[%s18562_s3 + $0x17a0] sm:$0xff]  ;;  %v9214_v20 = vld [vmem:[%s18562_s3 + $0x17b0] sm:$0xff] }
 0x21d   : > { %2741 = vmatprep.mubr.f32.mxu1 %v13840_v54  ;;  %11188 = vmatprep.subr.bf16.mxu0 %v11187_v28  ;;  %v9187_v54 = vld [vmem:[%s18562_s3 + $0x16d8] sm:$0xff]  ;;  %v9196_v28 = vld [vmem:[%s18562_s3 + $0x1720] sm:$0xff]  ;;  %v9217_v22 = vld [vmem:[%s18562_s3 + $0x17c8] sm:$0xff] }
 0x21e   : > { %11384 = vmatprep.subr.bf16.mxu1 %v11383_v33  ;;  %v11391_v50 = vpack.c.bf16 %v9187_v54, %v9185_v44  ;;  %v9006_v33 = vld [vmem:[%s18562_s3 + $0x1138] sm:$0xff]  ;;  %v9205_v44 = vld [vmem:[%s18562_s3 + $0x1768] sm:$0xff] }
 0x21f   : > { %11190 = vmatpush1.bf16.msra.mxu0 %v11189_v9  ;;  %v11209_v9 = vpack.c.bf16 %v9001_v29, %v8999_v27  ;;  %v9207_v54 = vld [vmem:[%s18562_s3 + $0x1778] sm:$0xff]  ;;  %v9019_v27 = vld [vmem:[%s18562_s3 + $0x11a0] sm:$0xff]  ;;  %v9021_v29 = vld [vmem:[%s18562_s3 + $0x11b0] sm:$0xff] }
 0x220   : > { %11386 = vmatpush1.bf16.msra.mxu1 %v11385_v35  ;;  %11192 = vmatprep.subr.bf16.mxu0 %v11191_v36  ;;  %v11405_v35 = vpack.c.bf16 %v9198_v31, %v9196_v28  ;;  %v11211_v36 = vpack.c.bf16 %v9006_v33, %v9004_v32  ;;  %v9219_v23 = vld [vmem:[%s18562_s3 + $0x17d8] sm:$0xff]  ;;  %v9216_v28 = vld [vmem:[%s18562_s3 + $0x17c0] sm:$0xff]  ;;  %v9218_v31 = vld [vmem:[%s18562_s3 + $0x17d0] sm:$0xff] }
 0x221   : > { %11388 = vmatprep.subr.bf16.mxu1 %v11387_v49  ;;  %v11407_v49 = vpack.c.bf16 %v9203_v60, %v9201_v34  ;;  %v9024_v32 = vld [vmem:[%s18562_s3 + $0x11c8] sm:$0xff]  ;;  %v9026_v33 = vld [vmem:[%s18562_s3 + $0x11d8] sm:$0xff] }
 0x222   : > { %v9221_v34 = vld [vmem:[%s18562_s3 + $0x17e8] sm:$0xff]  ;;  %v9223_v60 = vld [vmem:[%s18562_s3 + $0x17f8] sm:$0xff] }
 0x223   : > { %11194 = vmatpush1.bf16.msra.mxu0 %v11193_v1  ;;  %v11213_v1 = vpack.c.bf16 %v9005_v38, %v9003_v37  ;;  %v9023_v37 = vld [vmem:[%s18562_s3 + $0x11c0] sm:$0xff]  ;;  %v9025_v38 = vld [vmem:[%s18562_s3 + $0x11d0] sm:$0xff] }
 0x224   : > { %11390 = vmatpush1.bf16.msra.mxu1 %v11389_v45  ;;  %11196 = vmatprep.subr.bf16.mxu0 %v11195_v46  ;;  %v11409_v45 = vpack.c.bf16 %v9202_v41, %v9200_v40  ;;  %v11215_v46 = vpack.c.bf16 %v9010_v43, %v9008_v42  ;;  %v9220_v40 = vld [vmem:[%s18562_s3 + $0x17e0] sm:$0xff]  ;;  %v9222_v41 = vld [vmem:[%s18562_s3 + $0x17f0] sm:$0xff]  ;;  %v9028_v42 = vld [vmem:[%s18562_s3 + $0x11e8] sm:$0xff] }
 0x225   : > { %11392 = vmatprep.subr.bf16.mxu1 %v11391_v50  ;;  %v11411_v50 = vpack.c.bf16 %v9207_v54, %v9205_v44  ;;  %v9030_v43 = vld [vmem:[%s18562_s3 + $0x11f8] sm:$0xff]  ;;  %v9225_v44 = vld [vmem:[%s18562_s3 + $0x1808] sm:$0xff] }
 0x226   : > { %v9227_v54 = vld [vmem:[%s18562_s3 + $0x1818] sm:$0xff] }
 0x227   : > { %11198 = vmatpush1.bf16.msra.mxu0 %v11197_v57  ;;  %v11217_v57 = vpack.c.bf16 %v9009_v47, %v9007_v11  ;;  %v9027_v11 = vld [vmem:[%s18562_s3 + $0x11e0] sm:$0xff]  ;;  %v9029_v47 = vld [vmem:[%s18562_s3 + $0x11f0] sm:$0xff] }
 0x228   : > { %11394 = vmatpush1.bf16.msra.mxu1 %v11393_v58  ;;  %11200 = vmatprep.subr.bf16.mxu0 %v11199_v59  ;;  %v11413_v58 = vpack.c.bf16 %v9206_v51, %v9204_v48  ;;  %v11219_v59 = vpack.c.bf16 %v9014_v53, %v9012_v52  ;;  %v9224_v48 = vld [vmem:[%s18562_s3 + $0x1800] sm:$0xff]  ;;  %v9226_v51 = vld [vmem:[%s18562_s3 + $0x1810] sm:$0xff]  ;;  %v9032_v52 = vld [vmem:[%s18562_s3 + $0x1208] sm:$0xff] }
 0x229   : > { %11396 = vmatprep.subr.bf16.mxu1 %v11395_v63  ;;  %v11415_v63 = vpack.c.bf16 %v9211_v56, %v9209_v55  ;;  %v9034_v53 = vld [vmem:[%s18562_s3 + $0x1218] sm:$0xff]  ;;  %v9229_v55 = vld [vmem:[%s18562_s3 + $0x1828] sm:$0xff] }
 0x22a   : > { %v9231_v56 = vld [vmem:[%s18562_s3 + $0x1838] sm:$0xff] }
 0x22b   : > { %11202 = vmatpush1.bf16.msra.mxu0 %v11201_v8  ;;  %v11221_v8 = vpack.c.bf16 %v9013_v62, %v9011_v61  ;;  %v9031_v61 = vld [vmem:[%s18562_s3 + $0x1200] sm:$0xff]  ;;  %v9033_v62 = vld [vmem:[%s18562_s3 + $0x1210] sm:$0xff] }
 0x22c   : > { %11398 = vmatpush1.bf16.msra.mxu1 %v11397_v12  ;;  %11204 = vmatprep.subr.bf16.mxu0 %v11203_v13  ;;  %v11417_v12 = vpack.c.bf16 %v9210_v2, %v9208_v14  ;;  %v11223_v13 = vpack.c.bf16 %v9018_v5, %v9016_v3  ;;  %v9228_v14 = vld [vmem:[%s18562_s3 + $0x1820] sm:$0xff]  ;;  %v9230_v2 = vld [vmem:[%s18562_s3 + $0x1830] sm:$0xff]  ;;  %v9036_v3 = vld [vmem:[%s18562_s3 + $0x1228] sm:$0xff] }
 0x22d   : > { %11400 = vmatprep.subr.bf16.mxu1 %v11399_v10  ;;  %v11419_v10 = vpack.c.bf16 %v9215_v7, %v9213_v6  ;;  %v9038_v5 = vld [vmem:[%s18562_s3 + $0x1238] sm:$0xff]  ;;  %v9233_v6 = vld [vmem:[%s18562_s3 + $0x1848] sm:$0xff] }
 0x22e   : > { %v9235_v7 = vld [vmem:[%s18562_s3 + $0x1858] sm:$0xff] }
 0x22f   : > { %11206 = vmatpush1.bf16.msra.mxu0 %v11205_v19  ;;  %v11225_v19 = vpack.c.bf16 %v9017_v16, %v9015_v15  ;;  %v9035_v15 = vld [vmem:[%s18562_s3 + $0x1220] sm:$0xff]  ;;  %v9037_v16 = vld [vmem:[%s18562_s3 + $0x1230] sm:$0xff] }
 0x230   : > { %11402 = vmatpush1.bf16.msra.mxu1 %v11401_v24  ;;  %11208 = vmatprep.subr.bf16.mxu0 %v11207_v25  ;;  %v11421_v24 = vpack.c.bf16 %v9214_v20, %v9212_v18  ;;  %v11227_v25 = vpack.c.bf16 %v9022_v21, %v9020_v4  ;;  %v9232_v18 = vld [vmem:[%s18562_s3 + $0x1840] sm:$0xff]  ;;  %v9234_v20 = vld [vmem:[%s18562_s3 + $0x1850] sm:$0xff]  ;;  %v9040_v4 = vld [vmem:[%s18562_s3 + $0x1248] sm:$0xff] }
 0x231   : > { %11404 = vmatprep.subr.bf16.mxu1 %v11403_v30  ;;  %v11423_v30 = vpack.c.bf16 %v9219_v23, %v9217_v22  ;;  %v9042_v21 = vld [vmem:[%s18562_s3 + $0x1258] sm:$0xff]  ;;  %v9237_v22 = vld [vmem:[%s18562_s3 + $0x1868] sm:$0xff] }
 0x232   : > { %v9239_v23 = vld [vmem:[%s18562_s3 + $0x1878] sm:$0xff] }
 0x233   : > { %11210 = vmatpush1.bf16.msra.mxu0 %v11209_v9  ;;  %v11229_v9 = vpack.c.bf16 %v9021_v29, %v9019_v27  ;;  %v9039_v27 = vld [vmem:[%s18562_s3 + $0x1240] sm:$0xff]  ;;  %v9041_v29 = vld [vmem:[%s18562_s3 + $0x1250] sm:$0xff] }
 0x234   : > { %11406 = vmatpush1.bf16.msra.mxu1 %v11405_v35  ;;  %11212 = vmatprep.subr.bf16.mxu0 %v11211_v36  ;;  %v11425_v35 = vpack.c.bf16 %v9218_v31, %v9216_v28  ;;  %v11231_v36 = vpack.c.bf16 %v9026_v33, %v9024_v32  ;;  %v11443_v28 = vpack.c.bf16 %v9239_v23, %v9237_v22  ;;  %v9238_v31 = vld [vmem:[%s18562_s3 + $0x1870] sm:$0xff]  ;;  %v9257_v22 = vld [vmem:[%s18563_s4 + $0x138] sm:$0xff]  ;;  %v9258_v23 = vld [vmem:[%s18563_s4 + $0x140] sm:$0xff] }
 0x235   : > { %11408 = vmatprep.subr.bf16.mxu1 %v11407_v49  ;;  %v11427_v49 = vpack.c.bf16 %v9223_v60, %v9221_v34  ;;  %v11249_v32 = vpack.c.bf16 %v9041_v29, %v9039_v27  ;;  %v2823_v34 = vld [vmem:[%s18563_s4] sm:$0xff]  ;;  %v2824_v60 = vld [vmem:[%s18563_s4 + $0x8] sm:$0xff] }
 0x236   : > { %v2840_v27 = vld [vmem:[%s18563_s4 + $0x88] sm:$0xff] }
 0x237   : > { %11214 = vmatpush1.bf16.msra.mxu0 %v11213_v1  ;;  %v11233_v1 = vpack.c.bf16 %v9025_v38, %v9023_v37  ;;  %v2825_v37 = vld [vmem:[%s18563_s4 + $0x10] sm:$0xff]  ;;  %v2826_v38 = vld [vmem:[%s18563_s4 + $0x18] sm:$0xff]  ;;  %v9259_v29 = vld [vmem:[%s18563_s4 + $0x148] sm:$0xff] }
 0x238   : > { %11410 = vmatpush1.bf16.msra.mxu1 %v11409_v45  ;;  %11216 = vmatprep.subr.bf16.mxu0 %v11215_v46  ;;  %v11429_v45 = vpack.c.bf16 %v9222_v41, %v9220_v40  ;;  %v11235_v46 = vpack.c.bf16 %v9030_v43, %v9028_v42  ;;  %v9245_v40 = vld [vmem:[%s18563_s4 + $0xd8] sm:$0xff]  ;;  %v11451_v41 = vpack.c.bf16 %v2826_v38, %v2825_v37  ;;  %v2827_v43 = vld [vmem:[%s18563_s4 + $0x20] sm:$0xff]  ;;  %v9263_v37 = vld [vmem:[%s18563_s4 + $0x168] sm:$0xff] }
 0x239   : > { %11412 = vmatprep.subr.bf16.mxu1 %v11411_v50  ;;  %v11431_v50 = vpack.c.bf16 %v9227_v54, %v9225_v44  ;;  %v2828_v44 = vld [vmem:[%s18563_s4 + $0x28] sm:$0xff]  ;;  %v9248_v54 = vld [vmem:[%s18563_s4 + $0xf0] sm:$0xff] }
 0x23a   : > { %v9264_v38 = vld [vmem:[%s18563_s4 + $0x170] sm:$0xff] }
 0x23b   : > { %11218 = vmatpush1.bf16.msra.mxu0 %v11217_v57  ;;  %v11237_v57 = vpack.c.bf16 %v9029_v47, %v9027_v11  ;;  %v2830_v11 = vld [vmem:[%s18563_s4 + $0x38] sm:$0xff] }
 0x23c   : > { %11414 = vmatpush1.bf16.msra.mxu1 %v11413_v58  ;;  %11220 = vmatprep.subr.bf16.mxu0 %v11219_v59  ;;  %v11433_v58 = vpack.c.bf16 %v9226_v51, %v9224_v48  ;;  %v11239_v59 = vpack.c.bf16 %v9034_v53, %v9032_v52  ;;  %v9249_v47 = vld [vmem:[%s18563_s4 + $0xf8] sm:$0xff]  ;;  %v9250_v48 = vld [vmem:[%s18563_s4 + $0x100] sm:$0xff]  ;;  %v2832_v53 = vld [vmem:[%s18563_s4 + $0x48] sm:$0xff] }
 0x23d   : > { %11416 = vmatprep.subr.bf16.mxu1 %v11415_v63  ;;  %v11435_v63 = vpack.c.bf16 %v9231_v56, %v9229_v55  ;;  %v11493_v51 = vpack.c.bf16 %v9250_v48, %v9249_v47  ;;  %v2831_v52 = vld [vmem:[%s18563_s4 + $0x40] sm:$0xff]  ;;  %v9251_v56 = vld [vmem:[%s18563_s4 + $0x108] sm:$0xff] }
 0x23f   : > { %11222 = vmatpush1.bf16.msra.mxu0 %v11221_v8  ;;  %v11241_v8 = vpack.c.bf16 %v9033_v62, %v9031_v61 }
 0x240   : > { %11418 = vmatpush1.bf16.msra.mxu1 %v11417_v12  ;;  %11224 = vmatprep.subr.bf16.mxu0 %v11223_v13  ;;  %v11437_v12 = vpack.c.bf16 %v9230_v2, %v9228_v14  ;;  %v11243_v13 = vpack.c.bf16 %v9038_v5, %v9036_v3  ;;  %v11460_v14 = vpack.c.bf16 %v2832_v53, %v2831_v52  ;;  %v2833_v3 = vld [vmem:[%s18563_s4 + $0x50] sm:$0xff]  ;;  %v2834_v5 = vld [vmem:[%s18563_s4 + $0x58] sm:$0xff] }
 0x241   : > { %11420 = vmatprep.subr.bf16.mxu1 %v11419_v10  ;;  %v11439_v10 = vpack.c.bf16 %v9235_v7, %v9233_v6  ;;  %v9253_v6 = vld [vmem:[%s18563_s4 + $0x118] sm:$0xff]  ;;  %v9254_v7 = vld [vmem:[%s18563_s4 + $0x120] sm:$0xff] }
 0x242   : > { %v9277_v52 = vld [vmem:[%s18563_s4 + $0x198] sm:$0xff] }
 0x243   : > { %11226 = vmatpush1.bf16.msra.mxu0 %v11225_v19  ;;  %v11245_v19 = vpack.c.bf16 %v9037_v16, %v9035_v15  ;;  %v2836_v15 = vld [vmem:[%s18563_s4 + $0x68] sm:$0xff] }
 0x244   : > { %11422 = vmatpush1.bf16.msra.mxu1 %v11421_v24  ;;  %11228 = vmatprep.subr.bf16.mxu0 %v11227_v25  ;;  %v11441_v24 = vpack.c.bf16 %v9234_v20, %v9232_v18  ;;  %v11247_v25 = vpack.c.bf16 %v9042_v21, %v9040_v4  ;;  %v9255_v16 = vld [vmem:[%s18563_s4 + $0x128] sm:$0xff]  ;;  %v9256_v18 = vld [vmem:[%s18563_s4 + $0x130] sm:$0xff]  ;;  %v2838_v21 = vld [vmem:[%s18563_s4 + $0x78] sm:$0xff] }
 0x245   : > { %11424 = vmatprep.subr.bf16.mxu1 %v11423_v30  ;;  %v9236_v30 = vld [vmem:[%s18562_s3 + $0x1860] sm:$0xff]  ;;  %v11502_v20 = vpack.c.bf16 %v9256_v18, %v9255_v16  ;;  %v2837_v4 = vld [vmem:[%s18563_s4 + $0x70] sm:$0xff]  ;;  %v9289_v18 = vld [vmem:[%s18563_s4 + $0x1f8] sm:$0xff] }
 0x246   : > { %v11445_v33 = vpack.c.bf16 %v9238_v31, %v9236_v30  ;;  %v9288_v16 = vld [vmem:[%s18563_s4 + $0x1f0] sm:$0xff] }
 0x247   : > { %11230 = vmatpush1.bf16.msra.mxu0 %v11229_v9  ;;  %v9244_v9 = vld [vmem:[%s18563_s4 + $0xd0] sm:$0xff] }
 0x248   : > { %11426 = vmatpush1.bf16.msra.mxu1 %v11425_v35  ;;  %11232 = vmatprep.subr.bf16.mxu0 %v11231_v36  ;;  %v11448_v35 = vpack.c.bf16 %v2824_v60, %v2823_v34  ;;  %v9261_v34 = vld [vmem:[%s18563_s4 + $0x158] sm:$0xff]  ;;  %v9262_v60 = vld [vmem:[%s18563_s4 + $0x160] sm:$0xff] }
 0x249   : > { %11428 = vmatprep.subr.bf16.mxu1 %v11427_v49  ;;  %v9246_v49 = vld [vmem:[%s18563_s4 + $0xe0] sm:$0xff] }
 0x24a   : > { %v11487_v42 = vpack.c.bf16 %v9246_v49, %v9245_v40  ;;  %v11514_v49 = vpack.c.bf16 %v9264_v38, %v9263_v37  ;;  %v9342_v38 = vld [vmem:[%s18563_s4 + $0x340] sm:$0xff] }
 0x24b   : > { %11234 = vmatpush1.bf16.msra.mxu0 %v11233_v1  ;;  %v11454_v1 = vpack.c.bf16 %v2828_v44, %v2827_v43  ;;  %v2845_v44 = vld [vmem:[%s18563_s4 + $0xb0] sm:$0xff] }
 0x24c   : > { %11430 = vmatpush1.bf16.msra.mxu1 %v11429_v45  ;;  %11236 = vmatprep.subr.bf16.mxu0 %v11235_v46  ;;  %v2829_v46 = vld [vmem:[%s18563_s4 + $0x30] sm:$0xff] }
 0x24d   : > { %11432 = vmatprep.subr.bf16.mxu1 %v11431_v50  ;;  %v11457_v50 = vpack.c.bf16 %v2830_v11, %v2829_v46 }
 0x24f   : > { %11238 = vmatpush1.bf16.msra.mxu0 %v11237_v57  ;;  %v9252_v57 = vld [vmem:[%s18563_s4 + $0x110] sm:$0xff] }
 0x250   : > { %11434 = vmatpush1.bf16.msra.mxu1 %v11433_v58  ;;  %11240 = vmatprep.subr.bf16.mxu0 %v11239_v59  ;;  %v11496_v2 = vpack.c.bf16 %v9252_v57, %v9251_v56 }
 0x251   : > { %11436 = vmatprep.subr.bf16.mxu1 %v11435_v63 }
 0x253   : > { %11242 = vmatpush1.bf16.msra.mxu0 %v11241_v8  ;;  %v11463_v8 = vpack.c.bf16 %v2834_v5, %v2833_v3  ;;  %v9279_v3 = vld [vmem:[%s18563_s4 + $0x1a8] sm:$0xff] }
 0x254   : > { %11438 = vmatpush1.bf16.msra.mxu1 %v11437_v12  ;;  %11244 = vmatprep.subr.bf16.mxu0 %v11243_v13  ;;  %v11499_v12 = vpack.c.bf16 %v9254_v7, %v9253_v6  ;;  %v2835_v13 = vld [vmem:[%s18563_s4 + $0x60] sm:$0xff]  ;;  %v9284_v6 = vld [vmem:[%s18563_s4 + $0x1d0] sm:$0xff]  ;;  %v9285_v7 = vld [vmem:[%s18563_s4 + $0x1d8] sm:$0xff] }
 0x255   : > { %11440 = vmatprep.subr.bf16.mxu1 %v11439_v10  ;;  %v11466_v10 = vpack.c.bf16 %v2836_v15, %v2835_v13  ;;  %v9287_v13 = vld [vmem:[%s18563_s4 + $0x1e8] sm:$0xff] }
 0x257   : > { %11246 = vmatpush1.bf16.msra.mxu0 %v11245_v19  ;;  %v11469_v19 = vpack.c.bf16 %v2838_v21, %v2837_v4  ;;  %v9291_v4 = vld [vmem:[%s18563_s4 + $0x208] sm:$0xff] }
 0x258   : > { %11442 = vmatpush1.bf16.msra.mxu1 %v11441_v24  ;;  %11248 = vmatprep.subr.bf16.mxu0 %v11247_v25  ;;  %v11505_v24 = vpack.c.bf16 %v9258_v23, %v9257_v22  ;;  %v2839_v25 = vld [vmem:[%s18563_s4 + $0x80] sm:$0xff]  ;;  %v9292_v22 = vld [vmem:[%s18563_s4 + $0x210] sm:$0xff]  ;;  %v9293_v23 = vld [vmem:[%s18563_s4 + $0x218] sm:$0xff] }
 0x259   : > { %11444 = vmatprep.subr.bf16.mxu1 %v11443_v28  ;;  %v9260_v28 = vld [vmem:[%s18563_s4 + $0x150] sm:$0xff]  ;;  %v11472_v30 = vpack.c.bf16 %v2840_v27, %v2839_v25  ;;  %v9295_v25 = vld [vmem:[%s18563_s4 + $0x228] sm:$0xff] }
 0x25a   : > { %2261 = vmatmul.mubr.f32.vlgmr.msra.gmra.mrb[6].mxu0 %v14223_v26  ;;  %v11508_v31 = vpack.c.bf16 %v9260_v28, %v9259_v29  ;;  %v9296_v29 = vld [vmem:[%s18563_s4 + $0x230] sm:$0xff]  ;;  %v9297_v28 = vld [vmem:[%s18563_s4 + $0x238] sm:$0xff] }
 0x25b   : > { %2742 = vmatmul.mubr.f32.vlgmr.msra.gmra.mrb[6].mxu1 %v14223_v26  ;;  %11250 = vmatpush1.bf16.msra.mxu0 %v11249_v32  ;;  %v9243_v26 = vld [vmem:[%s18563_s4 + $0xc8] sm:$0xff]  ;;  %v2841_v32 = vld [vmem:[%s18563_s4 + $0x90] sm:$0xff] }
 0x25c   : > { %11446 = vmatpush1.bf16.msra.mxu1 %v11445_v33  ;;  %2331 = vmatprep.mubr.f32.mxu0 %v12750_v0  ;;  %v11484_v36 = vpack.c.bf16 %v9244_v9, %v9243_v26  ;;  %v2842_v33 = vld [vmem:[%s18563_s4 + $0x98] sm:$0xff]  ;;  %v11511_v9 = vpack.c.bf16 %v9262_v60, %v9261_v34  ;;  %v9338_v34 = vld [vmem:[%s18563_s4 + $0x320] sm:$0xff]  ;;  %v9339_v60 = vld [vmem:[%s18563_s4 + $0x328] sm:$0xff] }
 0x25d   : > { %2812 = vmatprep.mubr.f32.mxu1 %v12750_v0  ;;  %11483 = vmatprep.subr.bf16.mxu1 %v12752_v17  ;;  %v11475_v26 = vpack.c.bf16 %v2842_v33, %v2841_v32  ;;  %v9299_v32 = vld [vmem:[%s18563_s4 + $0x248] sm:$0xff] }
 0x25e   : > { %11447 = vmatprep.subr.bf16.mxu0 %v12752_v17 }
 0x262   : > { %9043 = vmatmul.mubr.msk.f32.vlgmr.msra.gmra.mrb[6].mxu0 %vm1086_vm2, %v14255_v39 }
 0x263   : > { %9240 = vmatmul.mubr.msk.f32.vlgmr.msra.gmra.mrb[6].mxu1 %vm1086_vm2, %v14255_v39  ;;  %11449 = vmatpush1.bf16.msra.mxu0 %v11448_v35  ;;  %v9247_v39 = vld [vmem:[%s18563_s4 + $0xe8] sm:$0xff]  ;;  %v2843_v35 = vld [vmem:[%s18563_s4 + $0xa0] sm:$0xff] }
 0x264   : > { %11485 = vmatpush1.bf16.msra.mxu1 %v11484_v36  ;;  %11450 = vmatprep.subr.bf16.mxu0 %v12752_v17  ;;  %v11490_v45 = vpack.c.bf16 %v9248_v54, %v9247_v39  ;;  %v2844_v36 = vld [vmem:[%s18563_s4 + $0xa8] sm:$0xff]  ;;  %v2846_v39 = vld [vmem:[%s18563_s4 + $0xb8] sm:$0xff] }
 0x265   : > { %11486 = vmatprep.subr.bf16.mxu1 %v12752_v17  ;;  %v11478_v40 = vpack.c.bf16 %v2844_v36, %v2843_v35  ;;  %v11481_v54 = vpack.c.bf16 %v2846_v39, %v2845_v44  ;;  %v9340_v35 = vld [vmem:[%s18563_s4 + $0x330] sm:$0xff]  ;;  %v9341_v36 = vld [vmem:[%s18563_s4 + $0x338] sm:$0xff]  ;;  %v9346_v44 = vld [vmem:[%s18563_s4 + $0x360] sm:$0xff] }
 0x266   : > { %v11595_v37 = vpack.c.bf16 %v9341_v36, %v9340_v35  ;;  %v9347_v39 = vld [vmem:[%s18563_s4 + $0x368] sm:$0xff]  ;;  %v9417_v35 = vld [vmem:[%s18563_s4 + $0x538] sm:$0xff] }
 0x267   : > { %11452 = vmatpush1.bf16.msra.mxu0 %v11451_v41  ;;  %v9265_v41 = vld [vmem:[%s18563_s4 + $0x178] sm:$0xff] }
 0x268   : > { %11488 = vmatpush1.bf16.msra.mxu1 %v11487_v42  ;;  %11453 = vmatprep.subr.bf16.mxu0 %v12752_v17  ;;  %v9266_v42 = vld [vmem:[%s18563_s4 + $0x180] sm:$0xff] }
 0x269   : > { %11489 = vmatprep.subr.bf16.mxu1 %v12752_v17  ;;  %v11517_v43 = vpack.c.bf16 %v9266_v42, %v9265_v41  ;;  %v9344_v41 = vld [vmem:[%s18563_s4 + $0x350] sm:$0xff]  ;;  %v9345_v42 = vld [vmem:[%s18563_s4 + $0x358] sm:$0xff] }
 0x26b   : > { %11455 = vmatpush1.bf16.msra.mxu0 %v11454_v1  ;;  %v9267_v1 = vld [vmem:[%s18563_s4 + $0x188] sm:$0xf] }
 0x26c   : > { %11491 = vmatpush1.bf16.msra.mxu1 %v11490_v45  ;;  %11456 = vmatprep.subr.bf16.mxu0 %v12752_v17  ;;  %v2847_v45 = vld [vmem:[%s18563_s4 + $0xc0] sm:$0xf] }
 0x26d   : > { %v15480_v55 = vpop.f32.mrb[4].mxu0  ;;  %11492 = vmatprep.subr.bf16.mxu1 %v12752_v17 }
 0x26e   : > { %v15489_v58 = vpop.f32.mrb[4].mxu1  ;;  %v15491_v59 = vpop.f32.mrb[5].mxu0 }
 0x26f   : > { %v1855_v61 = vmax.f32 %v15480_v55, %v15489_v58  ;;  %v15495_v62 = vpop.f32.mrb[5].mxu1  ;;  %11458 = vmatpush1.bf16.msra.mxu0 %v11457_v50  ;;  %v9280_v58 = vld [vmem:[%s18563_s4 + $0x1b0] sm:$0xff] }
 0x270   : > { %v1856_v63 = vmax.f32 %v15491_v59, %v15495_v62  ;;  %11494 = vmatpush1.bf16.msra.mxu1 %v11493_v51  ;;  %11459 = vmatprep.subr.bf16.mxu0 %v12752_v17  ;;  %v9276_v51 = vld [vmem:[%s18563_s4 + $0x190] sm:$0xff]  ;;  %v9281_v59 = vld [vmem:[%s18563_s4 + $0x1b8] sm:$0xff]  ;;  %v9282_v62 = vld [vmem:[%s18563_s4 + $0x1c0] sm:$0xff] }
 0x271   : > { %11495 = vmatprep.subr.bf16.mxu1 %v12752_v17 }
 0x273   : > { %11461 = vmatpush1.bf16.msra.mxu0 %v11460_v14  ;;  %v11520_v14 = vpack.c.bf16 %v9277_v52, %v9276_v51  ;;  %v9353_v51 = vld [vmem:[%s18563_s4 + $0x398] sm:$0xff] }
 0x274   : > { %11497 = vmatpush1.bf16.msra.mxu1 %v11496_v2  ;;  %11462 = vmatprep.subr.bf16.mxu0 %v12752_v17  ;;  %v9278_v2 = vld [vmem:[%s18563_s4 + $0x1a0] sm:$0xff] }
 0x275   : > { %11498 = vmatprep.subr.bf16.mxu1 %v12752_v17  ;;  %v11523_v55 = vpack.c.bf16 %v9279_v3, %v9278_v2  ;;  %v9356_v3 = vld [vmem:[%s18563_s4 + $0x3b0] sm:$0xff] }
 0x277   : > { %11464 = vmatpush1.bf16.msra.mxu0 %v11463_v8  ;;  %v11532_v8 = vpack.c.bf16 %v9285_v7, %v9284_v6  ;;  %v9361_v6 = vld [vmem:[%s18563_s4 + $0x3d8] sm:$0xff] }
 0x278   : > { %11500 = vmatpush1.bf16.msra.mxu1 %v11499_v12  ;;  %11465 = vmatprep.subr.bf16.mxu0 %v12752_v17  ;;  %v9286_v12 = vld [vmem:[%s18563_s4 + $0x1e0] sm:$0xff] }
 0x279   : > { %11501 = vmatprep.subr.bf16.mxu1 %v12752_v17  ;;  %v11535_v15 = vpack.c.bf16 %v9287_v13, %v9286_v12  ;;  %v9401_v12 = vld [vmem:[%s18563_s4 + $0x4b8] sm:$0xff]  ;;  %v9362_v13 = vld [vmem:[%s18563_s4 + $0x3e0] sm:$0xf] }
 0x27b   : > { %11467 = vmatpush1.bf16.msra.mxu0 %v11466_v10  ;;  %v11538_v10 = vpack.c.bf16 %v9289_v18, %v9288_v16  ;;  %v9402_v16 = vld [vmem:[%s18563_s4 + $0x4c0] sm:$0xff]  ;;  %v9403_v18 = vld [vmem:[%s18563_s4 + $0x4c8] sm:$0xff] }
 0x27c   : > { %11503 = vmatpush1.bf16.msra.mxu1 %v11502_v20  ;;  %11468 = vmatprep.subr.bf16.mxu0 %v12752_v17  ;;  %v9290_v20 = vld [vmem:[%s18563_s4 + $0x200] sm:$0xff] }
 0x27d   : > { %11504 = vmatprep.subr.bf16.mxu1 %v12752_v17  ;;  %v11541_v21 = vpack.c.bf16 %v9291_v4, %v9290_v20  ;;  %v9404_v20 = vld [vmem:[%s18563_s4 + $0x4d0] sm:$0xff]  ;;  %v9405_v4 = vld [vmem:[%s18563_s4 + $0x4d8] sm:$0xff] }
 0x27f   : > { %11470 = vmatpush1.bf16.msra.mxu0 %v11469_v19  ;;  %v11544_v19 = vpack.c.bf16 %v9293_v23, %v9292_v22  ;;  %v9406_v22 = vld [vmem:[%s18563_s4 + $0x4e0] sm:$0xff]  ;;  %v9407_v23 = vld [vmem:[%s18563_s4 + $0x4e8] sm:$0xff] }
 0x280   : > { %11506 = vmatpush1.bf16.msra.mxu1 %v11505_v24  ;;  %11471 = vmatprep.subr.bf16.mxu0 %v12752_v17  ;;  %v9294_v24 = vld [vmem:[%s18563_s4 + $0x220] sm:$0xff] }
 0x281   : > { %11507 = vmatprep.subr.bf16.mxu1 %v12752_v17  ;;  %v11547_v27 = vpack.c.bf16 %v9295_v25, %v9294_v24  ;;  %v9408_v24 = vld [vmem:[%s18563_s4 + $0x4f0] sm:$0xff]  ;;  %v9409_v25 = vld [vmem:[%s18563_s4 + $0x4f8] sm:$0xff] }
 0x283   : > { %11473 = vmatpush1.bf16.msra.mxu0 %v11472_v30  ;;  %v11550_v30 = vpack.c.bf16 %v9297_v28, %v9296_v29  ;;  %v9410_v29 = vld [vmem:[%s18563_s4 + $0x500] sm:$0xff]  ;;  %v9411_v28 = vld [vmem:[%s18563_s4 + $0x508] sm:$0xff] }
 0x284   : > { %11509 = vmatpush1.bf16.msra.mxu1 %v11508_v31  ;;  %11474 = vmatprep.subr.bf16.mxu0 %v12752_v17  ;;  %v9298_v31 = vld [vmem:[%s18563_s4 + $0x240] sm:$0xff] }
 0x285   : > { %11510 = vmatprep.subr.bf16.mxu1 %v12752_v17  ;;  %v11553_v33 = vpack.c.bf16 %v9299_v32, %v9298_v31  ;;  %v9412_v31 = vld [vmem:[%s18563_s4 + $0x510] sm:$0xff]  ;;  %v9413_v32 = vld [vmem:[%s18563_s4 + $0x518] sm:$0xff] }
 0x287   : > { %11476 = vmatpush1.bf16.msra.mxu0 %v11475_v26  ;;  %v9300_v26 = vld [vmem:[%s18563_s4 + $0x250] sm:$0xf] }
 0x288   : > { %11512 = vmatpush1.bf16.msra.mxu1 %v11511_v9  ;;  %11477 = vmatprep.subr.bf16.mxu0 %v12752_v17  ;;  %v11592_v9 = vpack.c.bf16 %v9339_v60, %v9338_v34  ;;  %v9414_v34 = vld [vmem:[%s18563_s4 + $0x520] sm:$0xff]  ;;  %v9415_v60 = vld [vmem:[%s18563_s4 + $0x528] sm:$0xff] }
 0x289   : > { %11513 = vmatprep.subr.bf16.mxu1 %v12752_v17 }
 0x28b   : > { %11479 = vmatpush1.bf16.msra.mxu0 %v11478_v40  ;;  %v9343_v40 = vld [vmem:[%s18563_s4 + $0x348] sm:$0xff] }
 0x28c   : > { %11515 = vmatpush1.bf16.msra.mxu1 %v11514_v49  ;;  %11480 = vmatprep.subr.bf16.mxu0 %v12752_v17  ;;  %v11598_v49 = vpack.c.bf16 %v9343_v40, %v9342_v38  ;;  %v9419_v38 = vld [vmem:[%s18563_s4 + $0x548] sm:$0xff] }
 0x28d   : > { %11516 = vmatprep.subr.bf16.mxu1 %v12752_v17 }
 0x28f   : > { %11482 = vmatpush1.bf16.msra.mxu0 %v11481_v54  ;;  %v11604_v54 = vpack.c.bf16 %v9347_v39, %v9346_v44  ;;  %v9423_v44 = vld [vmem:[%s18563_s4 + $0x568] sm:$0xff] }
 0x290   : > { %11518 = vmatpush1.bf16.msra.mxu1 %v11517_v43  ;;  %2904 = vmatprep.subr.mxu0 %v12750_v0  ;;  %v11601_v43 = vpack.c.bf16 %v9345_v42, %v9344_v41  ;;  %v9421_v41 = vld [vmem:[%s18563_s4 + $0x558] sm:$0xff] }
 0x291   : > { %3005 = vmatprep.subr.mxu1 %v12750_v0 }
 0x293   : > { %9241 = vmatpush1.msk.msra.mxu0 %vm2852_vm3, %v2847_v45  ;;  %v9349_v45 = vld [vmem:[%s18563_s4 + $0x378] sm:$0xff] }
 0x294   : > { %9268 = vmatpush1.msk.msra.mxu1 %vm2852_vm3, %v9267_v1  ;;  %v9348_v1 = vld [vmem:[%s18563_s4 + $0x370] sm:$0xff] }
 0x295   : > { %11519 = vmatprep.subr.bf16.mxu1 %v12752_v17 }
 0x335   : > { %v2333_v46 = vpop.f32.mrb[6].mxu0 }
 0x336   : > { %v2814_v11 = vpop.f32.mrb[6].mxu1  ;;  %v2335_v47 = vpop.f32.mrb[7].mxu0 }
 0x337   : > { %v2819_v48 = vmax.f32 %v2333_v46, %v2814_v11  ;;  %v2816_v50 = vpop.f32.mrb[7].mxu1  ;;  %v11607_v46 = vpack.c.bf16 %v9349_v45, %v9348_v1  ;;  %v9350_v11 = vld [vmem:[%s18563_s4 + $0x380] sm:$0xff]  ;;  %v9463_v1 = vld [vmem:[%s18563_s4 + $0x648] sm:$0xff]  ;;  %v9424_v45 = vld [vmem:[%s18563_s4 + $0x570] sm:$0xf] }
 0x338   : > { %v2820_v53 = vmax.f32 %v2335_v47, %v2816_v50  ;;  %v9351_v47 = vld [vmem:[%s18563_s4 + $0x388] sm:$0xff]  ;;  %v9352_v50 = vld [vmem:[%s18563_s4 + $0x390] sm:$0xff] }
 0x339   : > { %v15619_v56 = vmax.f32 %v1855_v61, %v2819_v48  ;;  %v11526_v61 = vpack.c.bf16 %v9281_v59, %v9280_v58  ;;  %v11610_v48 = vpack.c.bf16 %v9351_v47, %v9350_v11  ;;  %v11613_v52 = vpack.c.bf16 %v9353_v51, %v9352_v50  ;;  %v9358_v59 = vld [vmem:[%s18563_s4 + $0x3c0] sm:$0xff]  ;;  %v9464_v11 = vld [vmem:[%s18563_s4 + $0x650] sm:$0xff]  ;;  %v9465_v47 = vld [vmem:[%s18563_s4 + $0x658] sm:$0xff] }
 0x33a   : > { %v15624_v57 = vmax.f32 %v1856_v63, %v2820_v53  ;;  %v9283_v63 = vld [vmem:[%s18563_s4 + $0x1c8] sm:$0xff]  ;;  %v9354_v53 = vld [vmem:[%s18563_s4 + $0x3a0] sm:$0xff] }
 0x33b   : > { %v11529_v5 = vpack.c.bf16 %v9283_v63, %v9282_v62  ;;  %v9270_v62 = vld [vmem:[%s18564_s5 + $0x10] sm:$0xff]  ;;  %v9466_v50 = vld [vmem:[%s18563_s4 + $0x660] sm:$0xff]  ;;  %v9467_v51 = vld [vmem:[%s18563_s4 + $0x668] sm:$0xff] }
 0x33c   : > { %9242 = vmatprep.mubr.msk.f32.mxu0 %vm2848_vm4, %v15624_v57  ;;  %9269 = vmatprep.mubr.msk.f32.mxu1 %vm2848_vm4, %v15624_v57 }
 0x33d   : > { %2921 = vmatmul.mubr.f32.vlgmr.msra.gmra.mrb[8].mxu0 %v15619_v56  ;;  %3022 = vmatmul.mubr.f32.vlgmr.msra.gmra.mrb[8].mxu1 %v15619_v56 }
 0x33e   : > { %11521 = vmatpush1.bf16.msra.mxu1 %v11520_v14  ;;  %9302 = vmatprep.mubr.msk.f32.mxu1 %vm2848_vm4, %v15624_v57  ;;  %v9355_v14 = vld [vmem:[%s18563_s4 + $0x3a8] sm:$0xff] }
 0x33f   : > { %11522 = vmatprep.subr.bf16.mxu1 %v12752_v17  ;;  %v11616_v2 = vpack.c.bf16 %v9355_v14, %v9354_v53  ;;  %10291 = vmatprep.mubr.msk.f32.mxu0 %vm3030_vm5, %v9270_v62  ;;  %v9468_v53 = vld [vmem:[%s18563_s4 + $0x670] sm:$0xff]  ;;  %v9469_v14 = vld [vmem:[%s18563_s4 + $0x678] sm:$0xff] }
 0x342   : > { %11524 = vmatpush1.bf16.msra.mxu1 %v11523_v55  ;;  %v9357_v55 = vld [vmem:[%s18563_s4 + $0x3b8] sm:$0xff] }
 0x343   : > { %11525 = vmatprep.subr.bf16.mxu1 %v12752_v17  ;;  %v11619_v58 = vpack.c.bf16 %v9357_v55, %v9356_v3  ;;  %v9470_v3 = vld [vmem:[%s18563_s4 + $0x680] sm:$0xff]  ;;  %v9471_v55 = vld [vmem:[%s18563_s4 + $0x688] sm:$0xff] }
 0x346   : > { %11527 = vmatpush1.bf16.msra.mxu1 %v11526_v61  ;;  %v9359_v61 = vld [vmem:[%s18563_s4 + $0x3c8] sm:$0xff] }
 0x347   : > { %11528 = vmatprep.subr.bf16.mxu1 %v12752_v17  ;;  %v11622_v63 = vpack.c.bf16 %v9359_v61, %v9358_v59  ;;  %v9472_v59 = vld [vmem:[%s18563_s4 + $0x690] sm:$0xff]  ;;  %v9473_v61 = vld [vmem:[%s18563_s4 + $0x698] sm:$0xff] }
 0x348   : > { %v11751_v62 = vpack.c.bf16 %v9473_v61, %v9472_v59  ;;  %v9544_v59 = vld [vmem:[%s18563_s4 + $0x870] sm:$0xff]  ;;  %v9545_v61 = vld [vmem:[%s18563_s4 + $0x878] sm:$0xff] }
 0x34a   : > { %11530 = vmatpush1.bf16.msra.mxu1 %v11529_v5  ;;  %v9360_v5 = vld [vmem:[%s18563_s4 + $0x3d0] sm:$0xff] }
 0x34b   : > { %11531 = vmatprep.subr.bf16.mxu1 %v12752_v17  ;;  %v11625_v7 = vpack.c.bf16 %v9361_v6, %v9360_v5  ;;  %v9475_v5 = vld [vmem:[%s18563_s4 + $0x6a8] sm:$0xff] }
 0x34e   : > { %11533 = vmatpush1.bf16.msra.mxu1 %v11532_v8  ;;  %v9400_v8 = vld [vmem:[%s18563_s4 + $0x4b0] sm:$0xff] }
 0x34f   : > { %11534 = vmatprep.subr.bf16.mxu1 %v12752_v17 }
 0x352   : > { %11536 = vmatpush1.bf16.msra.mxu1 %v11535_v15  ;;  %v11664_v15 = vpack.c.bf16 %v9401_v12, %v9400_v8  ;;  %v9477_v8 = vld [vmem:[%s18563_s4 + $0x6b8] sm:$0xff] }
 0x353   : > { %11537 = vmatprep.subr.bf16.mxu1 %v12752_v17 }
 0x356   : > { %11539 = vmatpush1.bf16.msra.mxu1 %v11538_v10  ;;  %v11667_v10 = vpack.c.bf16 %v9403_v18, %v9402_v16  ;;  %v9480_v18 = vld [vmem:[%s18563_s4 + $0x6d0] sm:$0xff] }
 0x357   : > { %11540 = vmatprep.subr.bf16.mxu1 %v12752_v17 }
 0x35a   : > { %11542 = vmatpush1.bf16.msra.mxu1 %v11541_v21  ;;  %v11670_v21 = vpack.c.bf16 %v9405_v4, %v9404_v20  ;;  %v9482_v4 = vld [vmem:[%s18563_s4 + $0x6e0] sm:$0xff] }
 0x35b   : > { %11543 = vmatprep.subr.bf16.mxu1 %v12752_v17 }
 0x35e   : > { %11545 = vmatpush1.bf16.msra.mxu1 %v11544_v19  ;;  %v11673_v19 = vpack.c.bf16 %v9407_v23, %v9406_v22  ;;  %v9484_v23 = vld [vmem:[%s18563_s4 + $0x6f0] sm:$0xff] }
 0x35f   : > { %11546 = vmatprep.subr.bf16.mxu1 %v12752_v17 }
 0x362   : > { %11548 = vmatpush1.bf16.msra.mxu1 %v11547_v27  ;;  %v11676_v27 = vpack.c.bf16 %v9409_v25, %v9408_v24  ;;  %v9524_v25 = vld [vmem:[%s18563_s4 + $0x7d0] sm:$0xff] }
 0x363   : > { %11549 = vmatprep.subr.bf16.mxu1 %v12752_v17 }
 0x366   : > { %11551 = vmatpush1.bf16.msra.mxu1 %v11550_v30  ;;  %v11679_v30 = vpack.c.bf16 %v9411_v28, %v9410_v29  ;;  %v9486_v29 = vld [vmem:[%s18563_s4 + $0x700] sm:$0xf] }
 0x367   : > { %11552 = vmatprep.subr.bf16.mxu1 %v12752_v17 }
 0x36a   : > { %11554 = vmatpush1.bf16.msra.mxu1 %v11553_v33  ;;  %v11682_v33 = vpack.c.bf16 %v9413_v32, %v9412_v31  ;;  %v9527_v31 = vld [vmem:[%s18563_s4 + $0x7e8] sm:$0xff] }
 0x36b   : > { %3270 = vmatprep.subr.mxu1 %v12750_v0 }
 0x36e   : > { %9301 = vmatpush1.msk.msra.mxu1 %vm2852_vm3, %v9300_v26  ;;  %v11685_v26 = vpack.c.bf16 %v9415_v60, %v9414_v34  ;;  %v9529_v34 = vld [vmem:[%s18563_s4 + $0x7f8] sm:$0xff] }
 0x36f   : > { %3287 = vmatmul.mubr.f32.vlgmr.msra.gmra.mrb[10].mxu1 %v15619_v56  ;;  %11591 = vmatprep.subr.bf16.mxu1 %v12752_v17 }
 0x370   : > { %11593 = vmatpush1.bf16.msra.mxu1 %v11592_v9  ;;  %9364 = vmatprep.mubr.msk.f32.mxu1 %vm2848_vm4, %v15624_v57  ;;  %v9416_v9 = vld [vmem:[%s18563_s4 + $0x530] sm:$0xff] }
 0x371   : > { %11594 = vmatprep.subr.bf16.mxu1 %v12752_v17  ;;  %v11688_v36 = vpack.c.bf16 %v9417_v35, %v9416_v9  ;;  %v9531_v9 = vld [vmem:[%s18563_s4 + $0x808] sm:$0xff] }
 0x374   : > { %11596 = vmatpush1.bf16.msra.mxu1 %v11595_v37  ;;  %v9418_v37 = vld [vmem:[%s18563_s4 + $0x540] sm:$0xff] }
 0x375   : > { %11597 = vmatprep.subr.bf16.mxu1 %v12752_v17  ;;  %v11691_v40 = vpack.c.bf16 %v9419_v38, %v9418_v37  ;;  %v9533_v37 = vld [vmem:[%s18563_s4 + $0x818] sm:$0xff] }
 0x378   : > { %11599 = vmatpush1.bf16.msra.mxu1 %v11598_v49  ;;  %v9420_v49 = vld [vmem:[%s18563_s4 + $0x550] sm:$0xff] }
 0x379   : > { %11600 = vmatprep.subr.bf16.mxu1 %v12752_v17  ;;  %v11694_v42 = vpack.c.bf16 %v9421_v41, %v9420_v49  ;;  %v9271_v49 = vld [vmem:[%s18564_s5 + $0x18] sm:$0xff] }
 0x37c   : > { %11602 = vmatpush1.bf16.msra.mxu1 %v11601_v43  ;;  %v9422_v43 = vld [vmem:[%s18563_s4 + $0x560] sm:$0xff] }
 0x37d   : > { %11603 = vmatprep.subr.bf16.mxu1 %v12752_v17  ;;  %v11697_v39 = vpack.c.bf16 %v9423_v44, %v9422_v43  ;;  %v2926_v44 = vld [vmem:[%s18564_s5] sm:$0xff] }
 0x380   : > { %11605 = vmatpush1.bf16.msra.mxu1 %v11604_v54  ;;  %v9462_v54 = vld [vmem:[%s18563_s4 + $0x640] sm:$0xff] }
 0x381   : > { %11606 = vmatprep.subr.bf16.mxu1 %v12752_v17 }
 0x384   : > { %11608 = vmatpush1.bf16.msra.mxu1 %v11607_v46  ;;  %v11736_v46 = vpack.c.bf16 %v9463_v1, %v9462_v54  ;;  %v9535_v54 = vld [vmem:[%s18563_s4 + $0x828] sm:$0xff] }
 0x385   : > { %11609 = vmatprep.subr.bf16.mxu1 %v12752_v17 }
 0x388   : > { %11611 = vmatpush1.bf16.msra.mxu1 %v11610_v48  ;;  %v11739_v48 = vpack.c.bf16 %v9465_v47, %v9464_v11  ;;  %v2927_v11 = vld [vmem:[%s18564_s5 + $0x8] sm:$0xff]  ;;  %v9303_v47 = vld [vmem:[%s18564_s5 + $0x20] sm:$0xff] }
 0x389   : > { %11612 = vmatprep.subr.bf16.mxu1 %v12752_v17 }
 0x38c   : > { %11614 = vmatpush1.bf16.msra.mxu1 %v11613_v52  ;;  %v11742_v52 = vpack.c.bf16 %v9467_v51, %v9466_v50  ;;  %v9538_v50 = vld [vmem:[%s18563_s4 + $0x840] sm:$0xff]  ;;  %v9539_v51 = vld [vmem:[%s18563_s4 + $0x848] sm:$0xff] }
 0x38d   : > { %11615 = vmatprep.subr.bf16.mxu1 %v12752_v17 }
 0x390   : > { %11617 = vmatpush1.bf16.msra.mxu1 %v11616_v2  ;;  %v11745_v2 = vpack.c.bf16 %v9469_v14, %v9468_v53  ;;  %v9540_v53 = vld [vmem:[%s18563_s4 + $0x850] sm:$0xff]  ;;  %v9541_v14 = vld [vmem:[%s18563_s4 + $0x858] sm:$0xff] }
 0x391   : > { %11618 = vmatprep.subr.bf16.mxu1 %v12752_v17 }
 0x394   : > { %11620 = vmatpush1.bf16.msra.mxu1 %v11619_v58  ;;  %v11748_v58 = vpack.c.bf16 %v9471_v55, %v9470_v3  ;;  %v9542_v3 = vld [vmem:[%s18563_s4 + $0x860] sm:$0xff]  ;;  %v9543_v55 = vld [vmem:[%s18563_s4 + $0x868] sm:$0xff] }
 0x395   : > { %11621 = vmatprep.subr.bf16.mxu1 %v12752_v17 }
 0x398   : > { %11623 = vmatpush1.bf16.msra.mxu1 %v11622_v63  ;;  %v9474_v63 = vld [vmem:[%s18563_s4 + $0x6a0] sm:$0xff] }
 0x399   : > { %11624 = vmatprep.subr.bf16.mxu1 %v12752_v17  ;;  %v11754_v6 = vpack.c.bf16 %v9475_v5, %v9474_v63  ;;  %v9546_v63 = vld [vmem:[%s18563_s4 + $0x880] sm:$0xff]  ;;  %v9547_v5 = vld [vmem:[%s18563_s4 + $0x888] sm:$0xff] }
 0x39c   : > { %11626 = vmatpush1.bf16.msra.mxu1 %v11625_v7  ;;  %v9476_v7 = vld [vmem:[%s18563_s4 + $0x6b0] sm:$0xff] }
 0x39d   : > { %3640 = vmatprep.subr.mxu1 %v12750_v0  ;;  %v11757_v12 = vpack.c.bf16 %v9477_v8, %v9476_v7  ;;  %v9586_v7 = vld [vmem:[%s18563_s4 + $0x960] sm:$0xff]  ;;  %v9587_v8 = vld [vmem:[%s18563_s4 + $0x968] sm:$0xff] }
 0x3a0   : > { %9363 = vmatpush1.msk.msra.mxu1 %vm2852_vm3, %v9362_v13  ;;  %v9478_v13 = vld [vmem:[%s18563_s4 + $0x6c0] sm:$0xff] }
 0x3a1   : > { %3657 = vmatmul.mubr.f32.vlgmr.msra.gmra.mrb[12].mxu1 %v15619_v56  ;;  %11663 = vmatprep.subr.bf16.mxu1 %v12752_v17 }
 0x3a2   : > { %11665 = vmatpush1.bf16.msra.mxu1 %v11664_v15  ;;  %9426 = vmatprep.mubr.msk.f32.mxu1 %vm2848_vm4, %v15624_v57  ;;  %v9479_v15 = vld [vmem:[%s18563_s4 + $0x6c8] sm:$0xff] }
 0x3a3   : > { %11666 = vmatprep.subr.bf16.mxu1 %v12752_v17  ;;  %v11760_v16 = vpack.c.bf16 %v9479_v15, %v9478_v13  ;;  %v11880_v13 = vpack.c.bf16 %v9587_v8, %v9586_v7  ;;  %v9588_v15 = vld [vmem:[%s18563_s4 + $0x970] sm:$0xff]  ;;  %v9609_v8 = vld [vmem:[%s18563_s4 + $0xa18] sm:$0xff] }
 0x3a4   : > { %v9608_v7 = vld [vmem:[%s18563_s4 + $0xa10] sm:$0xff] }
 0x3a6   : > { %11668 = vmatpush1.bf16.msra.mxu1 %v11667_v10  ;;  %v9481_v10 = vld [vmem:[%s18563_s4 + $0x6d8] sm:$0xff] }
 0x3a7   : > { %11669 = vmatprep.subr.bf16.mxu1 %v12752_v17  ;;  %v11763_v20 = vpack.c.bf16 %v9481_v10, %v9480_v18  ;;  %v9590_v10 = vld [vmem:[%s18563_s4 + $0x980] sm:$0xff] }
 0x3aa   : > { %11671 = vmatpush1.bf16.msra.mxu1 %v11670_v21  ;;  %v9483_v21 = vld [vmem:[%s18563_s4 + $0x6e8] sm:$0xff] }
 0x3ab   : > { %11672 = vmatprep.subr.bf16.mxu1 %v12752_v17  ;;  %v11766_v22 = vpack.c.bf16 %v9483_v21, %v9482_v4  ;;  %v9592_v21 = vld [vmem:[%s18563_s4 + $0x990] sm:$0xff] }
 0x3ae   : > { %11674 = vmatpush1.bf16.msra.mxu1 %v11673_v19  ;;  %v9485_v19 = vld [vmem:[%s18563_s4 + $0x6f8] sm:$0xff] }
 0x3af   : > { %11675 = vmatprep.subr.bf16.mxu1 %v12752_v17  ;;  %v11769_v24 = vpack.c.bf16 %v9485_v19, %v9484_v23  ;;  %v9307_v23 = vld [vmem:[%s18563_s4 + $0x258] sm:$0xff]  ;;  %v9308_v19 = vld [vmem:[%s18563_s4 + $0x260] sm:$0xff] }
 0x3b2   : > { %11677 = vmatpush1.bf16.msra.mxu1 %v11676_v27  ;;  %v9525_v27 = vld [vmem:[%s18563_s4 + $0x7d8] sm:$0xff] }
 0x3b3   : > { %11678 = vmatprep.subr.bf16.mxu1 %v12752_v17  ;;  %v11808_v28 = vpack.c.bf16 %v9525_v27, %v9524_v25  ;;  %v9594_v25 = vld [vmem:[%s18563_s4 + $0x9a0] sm:$0xff]  ;;  %v9595_v27 = vld [vmem:[%s18563_s4 + $0x9a8] sm:$0xff] }
 0x3b6   : > { %11680 = vmatpush1.bf16.msra.mxu1 %v11679_v30  ;;  %v9526_v30 = vld [vmem:[%s18563_s4 + $0x7e0] sm:$0xff] }
 0x3b7   : > { %11681 = vmatprep.subr.bf16.mxu1 %v12752_v17  ;;  %v11811_v32 = vpack.c.bf16 %v9527_v31, %v9526_v30  ;;  %v11556_v30 = vpack.c.bf16 %v9308_v19, %v9307_v23 }
 0x3ba   : > { %11683 = vmatpush1.bf16.msra.mxu1 %v11682_v33  ;;  %v9528_v33 = vld [vmem:[%s18563_s4 + $0x7f0] sm:$0xff] }
 0x3bb   : > { %11684 = vmatprep.subr.bf16.mxu1 %v12752_v17  ;;  %v11814_v60 = vpack.c.bf16 %v9529_v34, %v9528_v33  ;;  %v9310_v33 = vld [vmem:[%s18563_s4 + $0x270] sm:$0xff]  ;;  %v11892_v34 = vpack.c.bf16 %v9595_v27, %v9594_v25  ;;  %v9328_v25 = vld [vmem:[%s18563_s4 + $0x300] sm:$0xff]  ;;  %v9619_v27 = vld [vmem:[%s18563_s4 + $0xa38] sm:$0xff] }
 0x3be   : > { %11686 = vmatpush1.bf16.msra.mxu1 %v11685_v26  ;;  %v9530_v26 = vld [vmem:[%s18563_s4 + $0x800] sm:$0xff] }
 0x3bf   : > { %11687 = vmatprep.subr.bf16.mxu1 %v12752_v17  ;;  %v11817_v35 = vpack.c.bf16 %v9531_v9, %v9530_v26  ;;  %v9597_v26 = vld [vmem:[%s18563_s4 + $0x9b8] sm:$0xff] }
 0x3c2   : > { %11689 = vmatpush1.bf16.msra.mxu1 %v11688_v36  ;;  %v9532_v36 = vld [vmem:[%s18563_s4 + $0x810] sm:$0xff] }
 0x3c3   : > { %11690 = vmatprep.subr.bf16.mxu1 %v12752_v17  ;;  %v11820_v43 = vpack.c.bf16 %v9533_v37, %v9532_v36  ;;  %v9312_v36 = vld [vmem:[%s18563_s4 + $0x280] sm:$0xff] }
 0x3c6   : > { %11692 = vmatpush1.bf16.msra.mxu1 %v11691_v40 }
 0x3c7   : > { %11693 = vmatprep.subr.bf16.mxu1 %v12752_v17 }
 0x3ca   : > { %11695 = vmatpush1.bf16.msra.mxu1 %v11694_v42 }
 0x3cb   : > { %11696 = vmatprep.subr.bf16.mxu1 %v12752_v17 }
 0x3ce   : > { %11698 = vmatpush1.bf16.msra.mxu1 %v11697_v39  ;;  %v9534_v39 = vld [vmem:[%s18563_s4 + $0x820] sm:$0xff] }
 0x3cf   : > { %4010 = vmatprep.subr.mxu1 %v12750_v0  ;;  %v11823_v1 = vpack.c.bf16 %v9535_v54, %v9534_v39  ;;  %v9601_v39 = vld [vmem:[%s18563_s4 + $0x9d8] sm:$0xff] }
 0x3d2   : > { %9425 = vmatpush1.msk.msra.mxu1 %vm2852_vm3, %v9424_v45  ;;  %v9536_v45 = vld [vmem:[%s18563_s4 + $0x830] sm:$0xff] }
 0x3d3   : > { %4027 = vmatmul.mubr.f32.vlgmr.msra.gmra.mrb[14].mxu1 %v15619_v56  ;;  %11735 = vmatprep.subr.bf16.mxu1 %v12752_v17 }
 0x3d4   : > { %11737 = vmatpush1.bf16.msra.mxu1 %v11736_v46  ;;  %9488 = vmatprep.mubr.msk.f32.mxu1 %vm2848_vm4, %v15624_v57  ;;  %v9537_v46 = vld [vmem:[%s18563_s4 + $0x838] sm:$0xff] }
 0x3d5   : > { %11738 = vmatprep.subr.bf16.mxu1 %v12752_v17 }
 0x3d8   : > { %11740 = vmatpush1.bf16.msra.mxu1 %v11739_v48  ;;  %v11826_v48 = vpack.c.bf16 %v9537_v46, %v9536_v45  ;;  %v9316_v45 = vld [vmem:[%s18563_s4 + $0x2a0] sm:$0xff] }
 0x3d9   : > { %11741 = vmatprep.subr.bf16.mxu1 %v12752_v17 }
 0x3dc   : > { %11743 = vmatpush1.bf16.msra.mxu1 %v11742_v52  ;;  %v11829_v52 = vpack.c.bf16 %v9539_v51, %v9538_v50  ;;  %v9317_v50 = vld [vmem:[%s18563_s4 + $0x2a8] sm:$0xff]  ;;  %v9318_v51 = vld [vmem:[%s18563_s4 + $0x2b0] sm:$0xff] }
 0x3dd   : > { %11744 = vmatprep.subr.bf16.mxu1 %v12752_v17 }
 0x3e0   : > { %11746 = vmatpush1.bf16.msra.mxu1 %v11745_v2  ;;  %v11832_v2 = vpack.c.bf16 %v9541_v14, %v9540_v53  ;;  %v9604_v53 = vld [vmem:[%s18563_s4 + $0x9f0] sm:$0xff]  ;;  %v9605_v14 = vld [vmem:[%s18563_s4 + $0x9f8] sm:$0xff] }
 0x3e1   : > { %11747 = vmatprep.subr.bf16.mxu1 %v12752_v17 }
 0x3e4   : > { %11749 = vmatpush1.bf16.msra.mxu1 %v11748_v58  ;;  %v11835_v58 = vpack.c.bf16 %v9543_v55, %v9542_v3  ;;  %v9319_v3 = vld [vmem:[%s18563_s4 + $0x2b8] sm:$0xff]  ;;  %v9320_v55 = vld [vmem:[%s18563_s4 + $0x2c0] sm:$0xff] }
 0x3e5   : > { %11750 = vmatprep.subr.bf16.mxu1 %v12752_v17 }
 0x3e8   : > { %11752 = vmatpush1.bf16.msra.mxu1 %v11751_v62  ;;  %v11838_v62 = vpack.c.bf16 %v9545_v61, %v9544_v59  ;;  %v9606_v59 = vld [vmem:[%s18563_s4 + $0xa00] sm:$0xff]  ;;  %v9607_v61 = vld [vmem:[%s18563_s4 + $0xa08] sm:$0xff] }
 0x3e9   : > { %11753 = vmatprep.subr.bf16.mxu1 %v12752_v17 }
 0x3ec   : > { %11755 = vmatpush1.bf16.msra.mxu1 %v11754_v6  ;;  %v11841_v6 = vpack.c.bf16 %v9547_v5, %v9546_v63  ;;  %v9321_v63 = vld [vmem:[%s18563_s4 + $0x2c8] sm:$0xff]  ;;  %v9322_v5 = vld [vmem:[%s18563_s4 + $0x2d0] sm:$0xff] }
 0x3ed   : > { %11756 = vmatprep.subr.bf16.mxu1 %v12752_v17 }
 0x3f0   : > { %11758 = vmatpush1.bf16.msra.mxu1 %v11757_v12  ;;  %v9548_v12 = vld [vmem:[%s18563_s4 + $0x890] sm:$0xf] }
 0x3f1   : > { %11759 = vmatprep.subr.bf16.mxu1 %v12752_v17 }
 0x3f4   : > { %11761 = vmatpush1.bf16.msra.mxu1 %v11760_v16  ;;  %v9589_v16 = vld [vmem:[%s18563_s4 + $0x978] sm:$0xff] }
 0x3f5   : > { %11762 = vmatprep.subr.bf16.mxu1 %v12752_v17  ;;  %v11883_v18 = vpack.c.bf16 %v9589_v16, %v9588_v15  ;;  %v9324_v15 = vld [vmem:[%s18563_s4 + $0x2e0] sm:$0xff]  ;;  %v11913_v16 = vpack.c.bf16 %v9609_v8, %v9608_v7  ;;  %v9681_v7 = vld [vmem:[%s18563_s4 + $0xbc8] sm:$0xff]  ;;  %v9682_v8 = vld [vmem:[%s18563_s4 + $0xbd0] sm:$0xff] }
 0x3f8   : > { %11764 = vmatpush1.bf16.msra.mxu1 %v11763_v20  ;;  %v9591_v20 = vld [vmem:[%s18563_s4 + $0x988] sm:$0xff] }
 0x3f9   : > { %11765 = vmatprep.subr.bf16.mxu1 %v12752_v17  ;;  %v11886_v4 = vpack.c.bf16 %v9591_v20, %v9590_v10  ;;  %v9325_v10 = vld [vmem:[%s18563_s4 + $0x2e8] sm:$0xff]  ;;  %v9326_v20 = vld [vmem:[%s18563_s4 + $0x2f0] sm:$0xff] }
 0x3fa   : > { %v11583_v23 = vpack.c.bf16 %v9326_v20, %v9325_v10  ;;  %v9686_v10 = vld [vmem:[%s18563_s4 + $0xbf0] sm:$0xff] }
 0x3fc   : > { %11767 = vmatpush1.bf16.msra.mxu1 %v11766_v22  ;;  %v9593_v22 = vld [vmem:[%s18563_s4 + $0x998] sm:$0xff] }
 0x3fd   : > { %11768 = vmatprep.subr.bf16.mxu1 %v12752_v17 }
 0x400   : > { %11770 = vmatpush1.bf16.msra.mxu1 %v11769_v24  ;;  %v11889_v24 = vpack.c.bf16 %v9593_v22, %v9592_v21  ;;  %v9618_v21 = vld [vmem:[%s18563_s4 + $0xa30] sm:$0xff]  ;;  %v9610_v22 = vld [vmem:[%s18563_s4 + $0xa20] sm:$0xf] }
 0x401   : > { %4380 = vmatprep.subr.mxu1 %v12750_v0 }
 0x404   : > { %9487 = vmatpush1.msk.msra.mxu1 %vm2852_vm3, %v9486_v29 }
 0x405   : > { %4397 = vmatmul.mubr.f32.vlgmr.msra.gmra.mrb[16].mxu1 %v15619_v56  ;;  %11807 = vmatprep.subr.bf16.mxu1 %v12752_v17 }
 0x406   : > { %11809 = vmatpush1.bf16.msra.mxu1 %v11808_v28  ;;  %9550 = vmatprep.mubr.msk.f32.mxu1 %vm2848_vm4, %v15624_v57  ;;  %v9304_v28 = vld [vmem:[%s18564_s5 + $0x28] sm:$0xff] }
 0x407   : > { %11810 = vmatprep.subr.bf16.mxu1 %v12752_v17 }
 0x40a   : > { %11812 = vmatpush1.bf16.msra.mxu1 %v11811_v32  ;;  %v9309_v32 = vld [vmem:[%s18563_s4 + $0x268] sm:$0xff] }
 0x40b   : > { %11813 = vmatprep.subr.bf16.mxu1 %v12752_v17  ;;  %v11559_v9 = vpack.c.bf16 %v9310_v33, %v9309_v32  ;;  %v9330_v32 = vld [vmem:[%s18563_s4 + $0x310] sm:$0xff]  ;;  %v9621_v33 = vld [vmem:[%s18563_s4 + $0xa48] sm:$0xff] }
 0x40e   : > { %11815 = vmatpush1.bf16.msra.mxu1 %v11814_v60  ;;  %v9596_v60 = vld [vmem:[%s18563_s4 + $0x9b0] sm:$0xff] }
 0x40f   : > { %11816 = vmatprep.subr.bf16.mxu1 %v12752_v17  ;;  %v11895_v37 = vpack.c.bf16 %v9597_v26, %v9596_v60 }
 0x410   : > { %v2922_v38 = vpop.f32.mrb[8].mxu0  ;;  %v3023_v40 = vpop.f32.mrb[8].mxu1 }
 0x411   : > { %v2924_v41 = vpop.f32.mrb[9].mxu0  ;;  %v3025_v42 = vpop.f32.mrb[9].mxu1  ;;  %10289 = vmatprep.subr.mxu0 %v3023_v40 }
 0x412   : > { %11818 = vmatpush1.bf16.msra.mxu1 %v11817_v35  ;;  %10290 = vmatpush3.msra.mxu0 %v3023_v40  ;;  %v9311_v35 = vld [vmem:[%s18563_s4 + $0x278] sm:$0xff]  ;;  %v9599_v40 = vld [vmem:[%s18563_s4 + $0x9c8] sm:$0xff]  ;;  %v9314_v42 = vld [vmem:[%s18563_s4 + $0x290] sm:$0xff] }
 0x413   : > { %10294 = vmatprep.subr.mxu0 %v2922_v38  ;;  %10292 = vmatmul.mubr.msk.f32.vlgmr.msra.gmra.mrb[10].mxu0 %vm3030_vm5, %v9271_v49  ;;  %v11562_v49 = vpack.c.bf16 %v9312_v36, %v9311_v35  ;;  %v9313_v41 = vld [vmem:[%s18563_s4 + $0x288] sm:$0xff]  ;;  %v9624_v35 = vld [vmem:[%s18563_s4 + $0xa60] sm:$0xff] }
 0x414   : > { %10295 = vmatpush3.msra.mxu0 %v2922_v38  ;;  %11819 = vmatprep.subr.bf16.mxu1 %v12752_v17  ;;  %v9598_v38 = vld [vmem:[%s18563_s4 + $0x9c0] sm:$0xff]  ;;  %v11565_v54 = vpack.c.bf16 %v9314_v42, %v9313_v41 }
 0x415   : > { %10296 = vmatprep.mubr.msk.f32.mxu0 %vm3030_vm5, %v2926_v44  ;;  %v9600_v44 = vld [vmem:[%s18563_s4 + $0x9d0] sm:$0xff] }
 0x416   : > { %11821 = vmatpush1.bf16.msra.mxu1 %v11820_v43  ;;  %v11898_v43 = vpack.c.bf16 %v9599_v40, %v9598_v38  ;;  %v11901_v46 = vpack.c.bf16 %v9601_v39, %v9600_v44  ;;  %v9625_v38 = vld [vmem:[%s18563_s4 + $0xa68] sm:$0xff]  ;;  %v9626_v40 = vld [vmem:[%s18563_s4 + $0xa70] sm:$0xff]  ;;  %v9628_v44 = vld [vmem:[%s18563_s4 + $0xa80] sm:$0xff] }
 0x417   : > { %11822 = vmatprep.subr.bf16.mxu1 %v12752_v17  ;;  %v11928_v42 = vpack.c.bf16 %v9626_v40, %v9625_v38  ;;  %v9700_v38 = vld [vmem:[%s18563_s4 + $0xc60] sm:$0xff] }
 0x41a   : > { %11824 = vmatpush1.bf16.msra.mxu1 %v11823_v1  ;;  %v9315_v1 = vld [vmem:[%s18563_s4 + $0x298] sm:$0xff] }
 0x41b   : > { %11825 = vmatprep.subr.bf16.mxu1 %v12752_v17  ;;  %10297 = vmatmul.mubr.msk.f32.vlgmr.msra.gmra.mrb[10].mxu0 %vm3030_vm5, %v2927_v11  ;;  %v9602_v11 = vld [vmem:[%s18563_s4 + $0x9e0] sm:$0xff] }
 0x41c   : > { %10301 = vmatprep.mubr.msk.f32.mxu0 %vm3030_vm5, %v9303_v47  ;;  %v9603_v47 = vld [vmem:[%s18563_s4 + $0x9e8] sm:$0xff] }
 0x41e   : > { %11827 = vmatpush1.bf16.msra.mxu1 %v11826_v48  ;;  %v11568_v48 = vpack.c.bf16 %v9316_v45, %v9315_v1  ;;  %v9630_v1 = vld [vmem:[%s18563_s4 + $0xa90] sm:$0xff] }
 0x41f   : > { %11828 = vmatprep.subr.bf16.mxu1 %v12752_v17 }
 0x422   : > { %11830 = vmatpush1.bf16.msra.mxu1 %v11829_v52  ;;  %v11904_v52 = vpack.c.bf16 %v9603_v47, %v9602_v11  ;;  %v9632_v11 = vld [vmem:[%s18563_s4 + $0xaa0] sm:$0xff] }
 0x423   : > { %11831 = vmatprep.subr.bf16.mxu1 %v12752_v17 }
 0x426   : > { %11833 = vmatpush1.bf16.msra.mxu1 %v11832_v2  ;;  %v11571_v2 = vpack.c.bf16 %v9318_v51, %v9317_v50  ;;  %v9634_v50 = vld [vmem:[%s18563_s4 + $0xab0] sm:$0xff] }
 0x427   : > { %11834 = vmatprep.subr.bf16.mxu1 %v12752_v17 }
 0x42a   : > { %11836 = vmatpush1.bf16.msra.mxu1 %v11835_v58  ;;  %v11907_v58 = vpack.c.bf16 %v9605_v14, %v9604_v53  ;;  %v9636_v53 = vld [vmem:[%s18563_s4 + $0xac0] sm:$0xff] }
 0x42b   : > { %11837 = vmatprep.subr.bf16.mxu1 %v12752_v17 }
 0x42e   : > { %11839 = vmatpush1.bf16.msra.mxu1 %v11838_v62  ;;  %v11574_v62 = vpack.c.bf16 %v9320_v55, %v9319_v3  ;;  %v9638_v3 = vld [vmem:[%s18563_s4 + $0xad0] sm:$0xff] }
 0x42f   : > { %11840 = vmatprep.subr.bf16.mxu1 %v12752_v17 }
 0x432   : > { %11842 = vmatpush1.bf16.msra.mxu1 %v11841_v6  ;;  %v11910_v6 = vpack.c.bf16 %v9607_v61, %v9606_v59  ;;  %v9640_v59 = vld [vmem:[%s18563_s4 + $0xae0] sm:$0xff] }
 0x433   : > { %4750 = vmatprep.subr.mxu1 %v12750_v0 }
 0x436   : > { %9549 = vmatpush1.msk.msra.mxu1 %vm2852_vm3, %v9548_v12  ;;  %v11577_v12 = vpack.c.bf16 %v9322_v5, %v9321_v63  ;;  %v9680_v63 = vld [vmem:[%s18563_s4 + $0xbc0] sm:$0xff]  ;;  %v9641_v5 = vld [vmem:[%s18563_s4 + $0xae8] sm:$0xf] }
 0x437   : > { %4767 = vmatmul.mubr.f32.vlgmr.msra.gmra.mrb[18].mxu1 %v15619_v56  ;;  %11879 = vmatprep.subr.bf16.mxu1 %v12752_v17 }
 0x438   : > { %11881 = vmatpush1.bf16.msra.mxu1 %v11880_v13  ;;  %9612 = vmatprep.mubr.msk.f32.mxu1 %vm2848_vm4, %v15624_v57  ;;  %v9323_v13 = vld [vmem:[%s18563_s4 + $0x2d8] sm:$0xff] }
 0x439   : > { %11882 = vmatprep.subr.bf16.mxu1 %v12752_v17 }
 0x43c   : > { %11884 = vmatpush1.bf16.msra.mxu1 %v11883_v18  ;;  %v11580_v18 = vpack.c.bf16 %v9324_v15, %v9323_v13  ;;  %v9683_v13 = vld [vmem:[%s18563_s4 + $0xbd8] sm:$0xff]  ;;  %v9684_v15 = vld [vmem:[%s18563_s4 + $0xbe0] sm:$0xff] }
 0x43d   : > { %11885 = vmatprep.subr.bf16.mxu1 %v12752_v17 }
 0x440   : > { %11887 = vmatpush1.bf16.msra.mxu1 %v11886_v4  ;;  %v9617_v4 = vld [vmem:[%s18563_s4 + $0xa28] sm:$0xff] }
 0x441   : > { %11888 = vmatprep.subr.bf16.mxu1 %v12752_v17  ;;  %v11916_v19 = vpack.c.bf16 %v9618_v21, %v9617_v4  ;;  %v9687_v4 = vld [vmem:[%s18563_s4 + $0xbf8] sm:$0xff]  ;;  %v9688_v21 = vld [vmem:[%s18563_s4 + $0xc00] sm:$0xff] }
 0x442   : > { %v3288_v29 = vpop.f32.mrb[10].mxu1 }
 0x443   : > { %v3290_v31 = vpop.f32.mrb[11].mxu1  ;;  %10299 = vmatprep.subr.mxu0 %v3288_v29 }
 0x444   : > { %10300 = vmatpush3.msra.mxu0 %v3288_v29  ;;  %11890 = vmatpush1.bf16.msra.mxu1 %v11889_v24  ;;  %v9327_v24 = vld [vmem:[%s18563_s4 + $0x2f8] sm:$0xff]  ;;  %v9620_v29 = vld [vmem:[%s18563_s4 + $0xa40] sm:$0xff]  ;;  %v9329_v31 = vld [vmem:[%s18563_s4 + $0x308] sm:$0xff] }
 0x445   : > { %10302 = vmatmul.mubr.msk.f32.vlgmr.msra.gmra.mrb[10].mxu0 %vm3030_vm5, %v9304_v28  ;;  %11555 = vmatprep.subr.bf16.mxu0 %v12752_v17  ;;  %v11586_v28 = vpack.c.bf16 %v9328_v25, %v9327_v24  ;;  %v11589_v60 = vpack.c.bf16 %v9330_v32, %v9329_v31  ;;  %v9689_v24 = vld [vmem:[%s18563_s4 + $0xc08] sm:$0xff]  ;;  %v9690_v25 = vld [vmem:[%s18563_s4 + $0xc10] sm:$0xff] }
 0x446   : > { %11557 = vmatpush1.bf16.msra.mxu0 %v11556_v30  ;;  %9333 = vmatprep.mubr.msk.f32.mxu0 %vm2848_vm4, %v15624_v57  ;;  %v11919_v30 = vpack.c.bf16 %v9620_v29, %v9619_v27  ;;  %v12003_v27 = vpack.c.bf16 %v9690_v25, %v9689_v24  ;;  %v9691_v29 = vld [vmem:[%s18563_s4 + $0xc18] sm:$0xff]  ;;  %v9693_v31 = vld [vmem:[%s18563_s4 + $0xc28] sm:$0xff]  ;;  %v9694_v32 = vld [vmem:[%s18563_s4 + $0xc30] sm:$0xff] }
 0x447   : > { %11891 = vmatprep.subr.bf16.mxu1 %v12752_v17  ;;  %11558 = vmatprep.subr.bf16.mxu0 %v12752_v17  ;;  %v9763_v24 = vld [vmem:[%s18563_s4 + $0xdf8] sm:$0xff]  ;;  %v9764_v25 = vld [vmem:[%s18563_s4 + $0xe00] sm:$0xff] }
 0x448   : > { %11893 = vmatpush1.bf16.msra.mxu1 %v11892_v34  ;;  %v9622_v34 = vld [vmem:[%s18563_s4 + $0xa50] sm:$0xff] }
 0x449   : > { %11894 = vmatprep.subr.bf16.mxu1 %v12752_v17  ;;  %v11922_v26 = vpack.c.bf16 %v9622_v34, %v9621_v33  ;;  %v12009_v33 = vpack.c.bf16 %v9694_v32, %v9693_v31  ;;  %v9695_v34 = vld [vmem:[%s18563_s4 + $0xc38] sm:$0xff]  ;;  %v9805_v32 = vld [vmem:[%s18563_s4 + $0xee8] sm:$0xff] }
 0x44a   : > { %11560 = vmatpush1.bf16.msra.mxu0 %v11559_v9  ;;  %v9623_v9 = vld [vmem:[%s18563_s4 + $0xa58] sm:$0xff] }
 0x44b   : > { %11561 = vmatprep.subr.bf16.mxu0 %v12752_v17  ;;  %v11925_v36 = vpack.c.bf16 %v9624_v35, %v9623_v9  ;;  %v9697_v9 = vld [vmem:[%s18563_s4 + $0xc48] sm:$0xff]  ;;  %v9698_v35 = vld [vmem:[%s18563_s4 + $0xc50] sm:$0xff] }
 0x44c   : > { %11896 = vmatpush1.bf16.msra.mxu1 %v11895_v37  ;;  %v9331_v37 = vld [vmem:[%s18563_s4 + $0x318] sm:$0xf] }
 0x44d   : > { %11897 = vmatprep.subr.bf16.mxu1 %v12752_v17 }
 0x44e   : > { %11563 = vmatpush1.bf16.msra.mxu0 %v11562_v49 }
 0x44f   : > { %11564 = vmatprep.subr.bf16.mxu0 %v12752_v17 }
 0x450   : > { %11899 = vmatpush1.bf16.msra.mxu1 %v11898_v43  ;;  %v9627_v43 = vld [vmem:[%s18563_s4 + $0xa78] sm:$0xff] }
 0x451   : > { %11900 = vmatprep.subr.bf16.mxu1 %v12752_v17  ;;  %v11931_v39 = vpack.c.bf16 %v9628_v44, %v9627_v43  ;;  %v9741_v44 = vld [vmem:[%s18563_s4 + $0xd48] sm:$0xff] }
 0x452   : > { %11566 = vmatpush1.bf16.msra.mxu0 %v11565_v54  ;;  %v9629_v54 = vld [vmem:[%s18563_s4 + $0xa88] sm:$0xff] }
 0x453   : > { %11567 = vmatprep.subr.bf16.mxu0 %v12752_v17  ;;  %v11934_v45 = vpack.c.bf16 %v9630_v1, %v9629_v54  ;;  %v9703_v54 = vld [vmem:[%s18563_s4 + $0xc78] sm:$0xf] }
 0x454   : > { %11902 = vmatpush1.bf16.msra.mxu1 %v11901_v46  ;;  %v9631_v46 = vld [vmem:[%s18563_s4 + $0xa98] sm:$0xff] }
 0x455   : > { %11903 = vmatprep.subr.bf16.mxu1 %v12752_v17  ;;  %v11937_v47 = vpack.c.bf16 %v9632_v11, %v9631_v46  ;;  %v9744_v46 = vld [vmem:[%s18563_s4 + $0xd60] sm:$0xff]  ;;  %v9334_v11 = vld [vmem:[%s18564_s5 + $0x30] sm:$0xff] }
 0x456   : > { %11569 = vmatpush1.bf16.msra.mxu0 %v11568_v48  ;;  %v9633_v48 = vld [vmem:[%s18563_s4 + $0xaa8] sm:$0xff] }
 0x457   : > { %11570 = vmatprep.subr.bf16.mxu0 %v12752_v17  ;;  %v11940_v51 = vpack.c.bf16 %v9634_v50, %v9633_v48  ;;  %v9745_v48 = vld [vmem:[%s18563_s4 + $0xd68] sm:$0xff]  ;;  %v9746_v50 = vld [vmem:[%s18563_s4 + $0xd70] sm:$0xff] }
 0x458   : > { %11905 = vmatpush1.bf16.msra.mxu1 %v11904_v52  ;;  %v9635_v52 = vld [vmem:[%s18563_s4 + $0xab8] sm:$0xff] }
 0x459   : > { %11906 = vmatprep.subr.bf16.mxu1 %v12752_v17  ;;  %v11943_v14 = vpack.c.bf16 %v9636_v53, %v9635_v52  ;;  %v9747_v52 = vld [vmem:[%s18563_s4 + $0xd78] sm:$0xff]  ;;  %v9748_v53 = vld [vmem:[%s18563_s4 + $0xd80] sm:$0xff] }
 0x45a   : > { %11572 = vmatpush1.bf16.msra.mxu0 %v11571_v2  ;;  %v9637_v2 = vld [vmem:[%s18563_s4 + $0xac8] sm:$0xff] }
 0x45b   : > { %11573 = vmatprep.subr.bf16.mxu0 %v12752_v17  ;;  %v11946_v55 = vpack.c.bf16 %v9638_v3, %v9637_v2  ;;  %v9749_v2 = vld [vmem:[%s18563_s4 + $0xd88] sm:$0xff]  ;;  %v9750_v3 = vld [vmem:[%s18563_s4 + $0xd90] sm:$0xff] }
 0x45c   : > { %11908 = vmatpush1.bf16.msra.mxu1 %v11907_v58  ;;  %v9639_v58 = vld [vmem:[%s18563_s4 + $0xad8] sm:$0xff] }
 0x45d   : > { %11909 = vmatprep.subr.bf16.mxu1 %v12752_v17  ;;  %v11949_v61 = vpack.c.bf16 %v9640_v59, %v9639_v58  ;;  %v12072_v59 = vpack.c.bf16 %v9750_v3, %v9749_v2  ;;  %v9823_v3 = vld [vmem:[%s18563_s4 + $0xf78] sm:$0xff] }
 0x45e   : > { %11575 = vmatpush1.bf16.msra.mxu0 %v11574_v62  ;;  %v9679_v62 = vld [vmem:[%s18563_s4 + $0xbb8] sm:$0xff] }
 0x45f   : > { %11576 = vmatprep.subr.bf16.mxu0 %v12752_v17 }
 0x460   : > { %11911 = vmatpush1.bf16.msra.mxu1 %v11910_v6  ;;  %v11988_v6 = vpack.c.bf16 %v9680_v63, %v9679_v62  ;;  %v9752_v62 = vld [vmem:[%s18563_s4 + $0xda0] sm:$0xff] }
 0x461   : > { %11912 = vmatprep.subr.bf16.mxu1 %v12752_v17 }
 0x462   : > { %11578 = vmatpush1.bf16.msra.mxu0 %v11577_v12  ;;  %v11991_v12 = vpack.c.bf16 %v9682_v8, %v9681_v7  ;;  %v9755_v8 = vld [vmem:[%s18563_s4 + $0xdb8] sm:$0xff] }
 0x463   : > { %11579 = vmatprep.subr.bf16.mxu0 %v12752_v17 }
 0x464   : > { %11914 = vmatpush1.bf16.msra.mxu1 %v11913_v16  ;;  %v11994_v16 = vpack.c.bf16 %v9684_v15, %v9683_v13  ;;  %v9757_v15 = vld [vmem:[%s18563_s4 + $0xdc8] sm:$0xff] }
 0x465   : > { %5120 = vmatprep.subr.mxu1 %v12750_v0 }
 0x466   : > { %11581 = vmatpush1.bf16.msra.mxu0 %v11580_v18  ;;  %v9685_v18 = vld [vmem:[%s18563_s4 + $0xbe8] sm:$0xff] }
 0x467   : > { %11582 = vmatprep.subr.bf16.mxu0 %v12752_v17  ;;  %v11997_v20 = vpack.c.bf16 %v9686_v10, %v9685_v18  ;;  %v9759_v10 = vld [vmem:[%s18563_s4 + $0xdd8] sm:$0xff] }
 0x468   : > { %9611 = vmatpush1.msk.msra.mxu1 %vm2852_vm3, %v9610_v22 }
 0x469   : > { %5137 = vmatmul.mubr.f32.vlgmr.msra.gmra.mrb[20].mxu1 %v15619_v56  ;;  %11915 = vmatprep.subr.bf16.mxu1 %v12752_v17 }
 0x46a   : > { %11584 = vmatpush1.bf16.msra.mxu0 %v11583_v23  ;;  %11917 = vmatpush1.bf16.msra.mxu1 %v11916_v19  ;;  %v12000_v19 = vpack.c.bf16 %v9688_v21, %v9687_v4  ;;  %v9761_v21 = vld [vmem:[%s18563_s4 + $0xde8] sm:$0xff] }
 0x46b   : > { %9643 = vmatprep.mubr.msk.f32.mxu1 %vm2848_vm4, %v15624_v57  ;;  %11585 = vmatprep.subr.bf16.mxu0 %v12752_v17 }
 0x46c   : > { %11918 = vmatprep.subr.bf16.mxu1 %v12752_v17 }
 0x46e   : > { %11587 = vmatpush1.bf16.msra.mxu0 %v11586_v28  ;;  %11920 = vmatpush1.bf16.msra.mxu1 %v11919_v30  ;;  %v9692_v28 = vld [vmem:[%s18563_s4 + $0xc20] sm:$0xff] }
 0x46f   : > { %11588 = vmatprep.subr.bf16.mxu0 %v12752_v17  ;;  %11921 = vmatprep.subr.bf16.mxu1 %v12752_v17  ;;  %v12006_v30 = vpack.c.bf16 %v9692_v28, %v9691_v29  ;;  %v9803_v29 = vld [vmem:[%s18563_s4 + $0xed8] sm:$0xff]  ;;  %v9804_v28 = vld [vmem:[%s18563_s4 + $0xee0] sm:$0xff] }
 0x470   : > { %v12132_v31 = vpack.c.bf16 %v9804_v28, %v9803_v29  ;;  %v9875_v29 = vld [vmem:[%s18563_s4 + $0x10b8] sm:$0xff]  ;;  %v9876_v28 = vld [vmem:[%s18563_s4 + $0x10c0] sm:$0xff] }
 0x472   : > { %11590 = vmatpush1.bf16.msra.mxu0 %v11589_v60  ;;  %11923 = vmatpush1.bf16.msra.mxu1 %v11922_v26  ;;  %v9696_v60 = vld [vmem:[%s18563_s4 + $0xc40] sm:$0xff] }
 0x473   : > { %3455 = vmatprep.subr.mxu0 %v12750_v0  ;;  %11924 = vmatprep.subr.bf16.mxu1 %v12752_v17  ;;  %v12012_v26 = vpack.c.bf16 %v9696_v60, %v9695_v34  ;;  %v9807_v60 = vld [vmem:[%s18563_s4 + $0xef8] sm:$0xff] }
 0x474   : > { %v16327_v49 = vpop.f32.mrb[12].mxu1 }
 0x475   : > { %v3660_v41 = vpop.f32.mrb[13].mxu1 }
 0x476   : > { %9332 = vmatpush1.msk.msra.mxu0 %vm2852_vm3, %v9331_v37  ;;  %11926 = vmatpush1.bf16.msra.mxu1 %v11925_v36  ;;  %v12015_v36 = vpack.c.bf16 %v9698_v35, %v9697_v9  ;;  %v9699_v37 = vld [vmem:[%s18563_s4 + $0xc58] sm:$0xff]  ;;  %v9701_v41 = vld [vmem:[%s18563_s4 + $0xc68] sm:$0xff] }
 0x477   : > { %3472 = vmatmul.mubr.f32.vlgmr.msra.gmra.mrb[12].mxu0 %v15619_v56  ;;  %11927 = vmatprep.subr.bf16.mxu1 %v12752_v17  ;;  %v12018_v40 = vpack.c.bf16 %v9700_v38, %v9699_v37  ;;  %v9809_v35 = vld [vmem:[%s18563_s4 + $0xf08] sm:$0xff]  ;;  %v9811_v38 = vld [vmem:[%s18563_s4 + $0xf18] sm:$0xff] }
 0x478   : > { %10306 = vmatprep.mubr.msk.f32.mxu0 %vm3030_vm5, %v9334_v11  ;;  %v9817_v11 = vld [vmem:[%s18563_s4 + $0xf48] sm:$0xff] }
 0x47a   : > { %11929 = vmatpush1.bf16.msra.mxu1 %v11928_v42  ;;  %v9702_v42 = vld [vmem:[%s18563_s4 + $0xc70] sm:$0xff] }
 0x47b   : > { %11930 = vmatprep.subr.bf16.mxu1 %v12752_v17  ;;  %v12021_v43 = vpack.c.bf16 %v9702_v42, %v9701_v41 }
 0x47e   : > { %11932 = vmatpush1.bf16.msra.mxu1 %v11931_v39  ;;  %v9742_v39 = vld [vmem:[%s18563_s4 + $0xd50] sm:$0xff] }
 0x47f   : > { %11933 = vmatprep.subr.bf16.mxu1 %v12752_v17  ;;  %v12060_v1 = vpack.c.bf16 %v9742_v39, %v9741_v44  ;;  %v9813_v44 = vld [vmem:[%s18563_s4 + $0xf28] sm:$0xff]  ;;  %v9814_v39 = vld [vmem:[%s18563_s4 + $0xf30] sm:$0xff] }
 0x482   : > { %11935 = vmatpush1.bf16.msra.mxu1 %v11934_v45  ;;  %v9743_v45 = vld [vmem:[%s18563_s4 + $0xd58] sm:$0xff] }
 0x483   : > { %11936 = vmatprep.subr.bf16.mxu1 %v12752_v17 }
 0x486   : > { %11938 = vmatpush1.bf16.msra.mxu1 %v11937_v47  ;;  %v12063_v47 = vpack.c.bf16 %v9744_v46, %v9743_v45  ;;  %v9816_v45 = vld [vmem:[%s18563_s4 + $0xf40] sm:$0xff] }
 0x487   : > { %11939 = vmatprep.subr.bf16.mxu1 %v12752_v17 }
 0x48a   : > { %11941 = vmatpush1.bf16.msra.mxu1 %v11940_v51  ;;  %v12066_v51 = vpack.c.bf16 %v9746_v50, %v9745_v48  ;;  %v9819_v50 = vld [vmem:[%s18563_s4 + $0xf58] sm:$0xff] }
 0x48b   : > { %11942 = vmatprep.subr.bf16.mxu1 %v12752_v17 }
 0x48e   : > { %11944 = vmatpush1.bf16.msra.mxu1 %v11943_v14  ;;  %v12069_v14 = vpack.c.bf16 %v9748_v53, %v9747_v52  ;;  %v9821_v53 = vld [vmem:[%s18563_s4 + $0xf68] sm:$0xff] }
 0x48f   : > { %11945 = vmatprep.subr.bf16.mxu1 %v12752_v17 }
 0x492   : > { %11947 = vmatpush1.bf16.msra.mxu1 %v11946_v55 }
 0x493   : > { %11948 = vmatprep.subr.bf16.mxu1 %v12752_v17 }
 0x496   : > { %11950 = vmatpush1.bf16.msra.mxu1 %v11949_v61  ;;  %v9751_v61 = vld [vmem:[%s18563_s4 + $0xd98] sm:$0xff] }
 0x497   : > { %5305 = vmatprep.subr.mxu1 %v12750_v0  ;;  %v12075_v63 = vpack.c.bf16 %v9752_v62, %v9751_v61  ;;  %v9825_v61 = vld [vmem:[%s18563_s4 + $0xf88] sm:$0xff]  ;;  %v9826_v62 = vld [vmem:[%s18563_s4 + $0xf90] sm:$0xff] }
 0x49a   : > { %9642 = vmatpush1.msk.msra.mxu1 %vm2852_vm3, %v9641_v5  ;;  %v9753_v5 = vld [vmem:[%s18563_s4 + $0xda8] sm:$0xff] }
 0x49b   : > { %5322 = vmatmul.mubr.f32.vlgmr.msra.gmra.mrb[22].mxu1 %v15619_v56  ;;  %11987 = vmatprep.subr.bf16.mxu1 %v12752_v17 }
 0x49c   : > { %11989 = vmatpush1.bf16.msra.mxu1 %v11988_v6  ;;  %9705 = vmatprep.mubr.msk.f32.mxu1 %vm2848_vm4, %v15624_v57  ;;  %v9754_v6 = vld [vmem:[%s18563_s4 + $0xdb0] sm:$0xff] }
 0x49d   : > { %11990 = vmatprep.subr.bf16.mxu1 %v12752_v17  ;;  %v12078_v7 = vpack.c.bf16 %v9754_v6, %v9753_v5  ;;  %v9865_v5 = vld [vmem:[%s18563_s4 + $0x1068] sm:$0xff]  ;;  %v9866_v6 = vld [vmem:[%s18563_s4 + $0x1070] sm:$0xff] }
 0x4a0   : > { %11992 = vmatpush1.bf16.msra.mxu1 %v11991_v12  ;;  %v9756_v12 = vld [vmem:[%s18563_s4 + $0xdc0] sm:$0xff] }
 0x4a1   : > { %11993 = vmatprep.subr.bf16.mxu1 %v12752_v17  ;;  %v12081_v13 = vpack.c.bf16 %v9756_v12, %v9755_v8  ;;  %v12204_v8 = vpack.c.bf16 %v9866_v6, %v9865_v5  ;;  %v9867_v12 = vld [vmem:[%s18563_s4 + $0x1078] sm:$0xff]  ;;  %v9928_v5 = vld [vmem:[%s18563_s4 + $0x1200] sm:$0xff]  ;;  %v9377_v6 = vld [vmem:[%s18563_s4 + $0x428] sm:$0xff] }
 0x4a4   : > { %11995 = vmatpush1.bf16.msra.mxu1 %v11994_v16  ;;  %v9758_v16 = vld [vmem:[%s18563_s4 + $0xdd0] sm:$0xff] }
 0x4a5   : > { %11996 = vmatprep.subr.bf16.mxu1 %v12752_v17  ;;  %v12084_v18 = vpack.c.bf16 %v9758_v16, %v9757_v15  ;;  %v9869_v16 = vld [vmem:[%s18563_s4 + $0x1088] sm:$0xff] }
 0x4a6   : > { %v16423_v22 = vpop.f32.mrb[14].mxu1 }
 0x4a7   : > { %v4030_v23 = vpop.f32.mrb[15].mxu1 }
 0x4a8   : > { %11998 = vmatpush1.bf16.msra.mxu1 %v11997_v20  ;;  %v9760_v20 = vld [vmem:[%s18563_s4 + $0xde0] sm:$0xff]  ;;  %v9762_v23 = vld [vmem:[%s18563_s4 + $0xdf0] sm:$0xff] }
 0x4a9   : > { %11999 = vmatprep.subr.bf16.mxu1 %v12752_v17  ;;  %v12087_v4 = vpack.c.bf16 %v9760_v20, %v9759_v10  ;;  %v9871_v20 = vld [vmem:[%s18563_s4 + $0x1098] sm:$0xff] }
 0x4ac   : > { %12001 = vmatpush1.bf16.msra.mxu1 %v12000_v19  ;;  %v12090_v19 = vpack.c.bf16 %v9762_v23, %v9761_v21  ;;  %v9873_v23 = vld [vmem:[%s18563_s4 + $0x10a8] sm:$0xff] }
 0x4ad   : > { %12002 = vmatprep.subr.bf16.mxu1 %v12752_v17 }
 0x4b0   : > { %12004 = vmatpush1.bf16.msra.mxu1 %v12003_v27  ;;  %v12093_v27 = vpack.c.bf16 %v9764_v25, %v9763_v24 }
 0x4b1   : > { %12005 = vmatprep.subr.bf16.mxu1 %v12752_v17 }
 0x4b4   : > { %12007 = vmatpush1.bf16.msra.mxu1 %v12006_v30  ;;  %v9765_v30 = vld [vmem:[%s18563_s4 + $0xe08] sm:$0xf] }
 0x4b5   : > { %12008 = vmatprep.subr.bf16.mxu1 %v12752_v17 }
 0x4b8   : > { %12010 = vmatpush1.bf16.msra.mxu1 %v12009_v33  ;;  %v9806_v33 = vld [vmem:[%s18563_s4 + $0xef0] sm:$0xff] }
 0x4b9   : > { %12011 = vmatprep.subr.bf16.mxu1 %v12752_v17  ;;  %v12135_v34 = vpack.c.bf16 %v9806_v33, %v9805_v32  ;;  %v9878_v32 = vld [vmem:[%s18563_s4 + $0x10d0] sm:$0xff] }
 0x4bc   : > { %12013 = vmatpush1.bf16.msra.mxu1 %v12012_v26  ;;  %v9808_v26 = vld [vmem:[%s18563_s4 + $0xf00] sm:$0xff] }
 0x4bd   : > { %12014 = vmatprep.subr.bf16.mxu1 %v12752_v17  ;;  %v12138_v9 = vpack.c.bf16 %v9808_v26, %v9807_v60  ;;  %v9880_v60 = vld [vmem:[%s18563_s4 + $0x10e0] sm:$0xff] }
 0x4c0   : > { %12016 = vmatpush1.bf16.msra.mxu1 %v12015_v36  ;;  %v9810_v36 = vld [vmem:[%s18563_s4 + $0xf10] sm:$0xff] }
 0x4c1   : > { %12017 = vmatprep.subr.bf16.mxu1 %v12752_v17  ;;  %v12141_v37 = vpack.c.bf16 %v9810_v36, %v9809_v35 }
 0x4c4   : > { %12019 = vmatpush1.bf16.msra.mxu1 %v12018_v40  ;;  %v9812_v40 = vld [vmem:[%s18563_s4 + $0xf20] sm:$0xff] }
 0x4c5   : > { %12020 = vmatprep.subr.bf16.mxu1 %v12752_v17 }
 0x4c8   : > { %12022 = vmatpush1.bf16.msra.mxu1 %v12021_v43  ;;  %v12144_v43 = vpack.c.bf16 %v9812_v40, %v9811_v38  ;;  %v9882_v38 = vld [vmem:[%s18563_s4 + $0x10f0] sm:$0xff]  ;;  %v9365_v40 = vld [vmem:[%s18564_s5 + $0x40] sm:$0xff] }
 0x4c9   : > { %5675 = vmatprep.subr.mxu1 %v12750_v0 }
 0x4cc   : > { %9704 = vmatpush1.msk.msra.mxu1 %vm2852_vm3, %v9703_v54  ;;  %v12147_v54 = vpack.c.bf16 %v9814_v39, %v9813_v44  ;;  %v9370_v44 = vld [vmem:[%s18563_s4 + $0x3f0] sm:$0xff]  ;;  %v9884_v39 = vld [vmem:[%s18563_s4 + $0x1100] sm:$0xff] }
 0x4cd   : > { %5692 = vmatmul.mubr.f32.vlgmr.msra.gmra.mrb[24].mxu1 %v15619_v56  ;;  %12059 = vmatprep.subr.bf16.mxu1 %v12752_v17 }
 0x4ce   : > { %12061 = vmatpush1.bf16.msra.mxu1 %v12060_v1  ;;  %9767 = vmatprep.mubr.msk.f32.mxu1 %vm2848_vm4, %v15624_v57  ;;  %v9815_v1 = vld [vmem:[%s18563_s4 + $0xf38] sm:$0xff] }
 0x4cf   : > { %12062 = vmatprep.subr.bf16.mxu1 %v12752_v17  ;;  %v12150_v46 = vpack.c.bf16 %v9816_v45, %v9815_v1 }
 0x4d2   : > { %12064 = vmatpush1.bf16.msra.mxu1 %v12063_v47  ;;  %v9818_v47 = vld [vmem:[%s18563_s4 + $0xf50] sm:$0xff] }
 0x4d3   : > { %12065 = vmatprep.subr.bf16.mxu1 %v12752_v17  ;;  %v12153_v48 = vpack.c.bf16 %v9818_v47, %v9817_v11  ;;  %v9372_v11 = vld [vmem:[%s18563_s4 + $0x400] sm:$0xff]  ;;  %v9885_v47 = vld [vmem:[%s18563_s4 + $0x1108] sm:$0xff] }
 0x4d6   : > { %12067 = vmatpush1.bf16.msra.mxu1 %v12066_v51  ;;  %v9820_v51 = vld [vmem:[%s18563_s4 + $0xf60] sm:$0xff] }
 0x4d7   : > { %12068 = vmatprep.subr.bf16.mxu1 %v12752_v17  ;;  %v12156_v52 = vpack.c.bf16 %v9820_v51, %v9819_v50 }
 0x4d8   : > { %v16521_v55 = vpop.f32.mrb[16].mxu1 }
 0x4d9   : > { %v4400_v58 = vpop.f32.mrb[17].mxu1 }
 0x4da   : > { %12070 = vmatpush1.bf16.msra.mxu1 %v12069_v14  ;;  %v9822_v14 = vld [vmem:[%s18563_s4 + $0xf70] sm:$0xff]  ;;  %v9824_v58 = vld [vmem:[%s18563_s4 + $0xf80] sm:$0xff] }
 0x4db   : > { %12071 = vmatprep.subr.bf16.mxu1 %v12752_v17  ;;  %v12159_v2 = vpack.c.bf16 %v9822_v14, %v9821_v53  ;;  %v9374_v53 = vld [vmem:[%s18563_s4 + $0x410] sm:$0xff]  ;;  %v9887_v14 = vld [vmem:[%s18563_s4 + $0x1118] sm:$0xff] }
 0x4de   : > { %12073 = vmatpush1.bf16.msra.mxu1 %v12072_v59  ;;  %v12162_v59 = vpack.c.bf16 %v9824_v58, %v9823_v3 }
 0x4df   : > { %12074 = vmatprep.subr.bf16.mxu1 %v12752_v17 }
 0x4e2   : > { %12076 = vmatpush1.bf16.msra.mxu1 %v12075_v63  ;;  %v12165_v63 = vpack.c.bf16 %v9826_v62, %v9825_v61  ;;  %v9376_v61 = vld [vmem:[%s18563_s4 + $0x420] sm:$0xff] }
 0x4e3   : > { %12077 = vmatprep.subr.bf16.mxu1 %v12752_v17 }
 0x4e6   : > { %12079 = vmatpush1.bf16.msra.mxu1 %v12078_v7  ;;  %v9827_v7 = vld [vmem:[%s18563_s4 + $0xf98] sm:$0xf] }
 0x4e7   : > { %12080 = vmatprep.subr.bf16.mxu1 %v12752_v17 }
 0x4ea   : > { %12082 = vmatpush1.bf16.msra.mxu1 %v12081_v13  ;;  %v9868_v13 = vld [vmem:[%s18563_s4 + $0x1080] sm:$0xff] }
 0x4eb   : > { %12083 = vmatprep.subr.bf16.mxu1 %v12752_v17  ;;  %v12207_v15 = vpack.c.bf16 %v9868_v13, %v9867_v12 }
 0x4ee   : > { %12085 = vmatpush1.bf16.msra.mxu1 %v12084_v18  ;;  %v9870_v18 = vld [vmem:[%s18563_s4 + $0x1090] sm:$0xff] }
 0x4ef   : > { %12086 = vmatprep.subr.bf16.mxu1 %v12752_v17  ;;  %v12210_v10 = vpack.c.bf16 %v9870_v18, %v9869_v16  ;;  %v9930_v16 = vld [vmem:[%s18563_s4 + $0x1210] sm:$0xff]  ;;  %v9379_v18 = vld [vmem:[%s18563_s4 + $0x438] sm:$0xff] }
 0x4f2   : > { %12088 = vmatpush1.bf16.msra.mxu1 %v12087_v4  ;;  %v9872_v4 = vld [vmem:[%s18563_s4 + $0x10a0] sm:$0xff] }
 0x4f3   : > { %12089 = vmatprep.subr.bf16.mxu1 %v12752_v17  ;;  %v12213_v21 = vpack.c.bf16 %v9872_v4, %v9871_v20 }
 0x4f6   : > { %12091 = vmatpush1.bf16.msra.mxu1 %v12090_v19  ;;  %v9874_v19 = vld [vmem:[%s18563_s4 + $0x10b0] sm:$0xff] }
 0x4f7   : > { %12092 = vmatprep.subr.bf16.mxu1 %v12752_v17 }
 0x4fa   : > { %12094 = vmatpush1.bf16.msra.mxu1 %v12093_v27  ;;  %v12216_v27 = vpack.c.bf16 %v9874_v19, %v9873_v23  ;;  %v9932_v23 = vld [vmem:[%s18563_s4 + $0x1220] sm:$0xff]  ;;  %v9381_v19 = vld [vmem:[%s18563_s4 + $0x448] sm:$0xff] }
 0x4fb   : > { %6045 = vmatprep.subr.mxu1 %v12750_v0 }
 0x4fe   : > { %9766 = vmatpush1.msk.msra.mxu1 %vm2852_vm3, %v9765_v30  ;;  %v12219_v30 = vpack.c.bf16 %v9876_v28, %v9875_v29  ;;  %v9933_v28 = vld [vmem:[%s18563_s4 + $0x1228] sm:$0xff] }
 0x4ff   : > { %6062 = vmatmul.mubr.f32.vlgmr.msra.gmra.mrb[26].mxu1 %v15619_v56  ;;  %12131 = vmatprep.subr.bf16.mxu1 %v12752_v17 }
 0x500   : > { %12133 = vmatpush1.bf16.msra.mxu1 %v12132_v31  ;;  %9829 = vmatprep.mubr.msk.f32.mxu1 %vm2848_vm4, %v15624_v57  ;;  %v9877_v31 = vld [vmem:[%s18563_s4 + $0x10c8] sm:$0xff] }
 0x501   : > { %12134 = vmatprep.subr.bf16.mxu1 %v12752_v17  ;;  %v12222_v33 = vpack.c.bf16 %v9878_v32, %v9877_v31  ;;  %v9383_v31 = vld [vmem:[%s18563_s4 + $0x458] sm:$0xff]  ;;  %v9384_v32 = vld [vmem:[%s18563_s4 + $0x460] sm:$0xff] }
 0x504   : > { %12136 = vmatpush1.bf16.msra.mxu1 %v12135_v34  ;;  %v9879_v34 = vld [vmem:[%s18563_s4 + $0x10d8] sm:$0xff] }
 0x505   : > { %12137 = vmatprep.subr.bf16.mxu1 %v12752_v17  ;;  %v12225_v35 = vpack.c.bf16 %v9880_v60, %v9879_v34  ;;  %v11649_v60 = vpack.c.bf16 %v9384_v32, %v9383_v31  ;;  %v9427_v31 = vld [vmem:[%s18564_s5 + $0x60] sm:$0xff]  ;;  %v9431_v32 = vld [vmem:[%s18563_s4 + $0x578] sm:$0xff] }
 0x508   : > { %12139 = vmatpush1.bf16.msra.mxu1 %v12138_v9  ;;  %v9335_v9 = vld [vmem:[%s18564_s5 + $0x38] sm:$0xff] }
 0x509   : > { %12140 = vmatprep.subr.bf16.mxu1 %v12752_v17 }
 0x50a   : > { %v16615_v41 = vpop.f32.mrb[18].mxu1 }
 0x50b   : > { %v4770_v42 = vpop.f32.mrb[19].mxu1 }
 0x50c   : > { %12142 = vmatpush1.bf16.msra.mxu1 %v12141_v37  ;;  %v9881_v37 = vld [vmem:[%s18563_s4 + $0x10e8] sm:$0xff] }
 0x50d   : > { %12143 = vmatprep.subr.bf16.mxu1 %v12752_v17  ;;  %v12228_v42 = vpack.c.bf16 %v9882_v38, %v9881_v37  ;;  %v9386_v37 = vld [vmem:[%s18563_s4 + $0x470] sm:$0xff] }
 0x510   : > { %12145 = vmatpush1.bf16.msra.mxu1 %v12144_v43  ;;  %v9369_v43 = vld [vmem:[%s18563_s4 + $0x3e8] sm:$0xff] }
 0x511   : > { %12146 = vmatprep.subr.bf16.mxu1 %v12752_v17  ;;  %v11628_v1 = vpack.c.bf16 %v9370_v44, %v9369_v43  ;;  %v9938_v43 = vld [vmem:[%s18563_s4 + $0x1250] sm:$0xff]  ;;  %v9387_v44 = vld [vmem:[%s18563_s4 + $0x478] sm:$0xff] }
 0x514   : > { %12148 = vmatpush1.bf16.msra.mxu1 %v12147_v54  ;;  %v9366_v54 = vld [vmem:[%s18564_s5 + $0x48] sm:$0xff] }
 0x515   : > { %12149 = vmatprep.subr.bf16.mxu1 %v12752_v17 }
 0x518   : > { %12151 = vmatpush1.bf16.msra.mxu1 %v12150_v46  ;;  %v9371_v46 = vld [vmem:[%s18563_s4 + $0x3f8] sm:$0xff] }
 0x519   : > { %12152 = vmatprep.subr.bf16.mxu1 %v12752_v17  ;;  %v11631_v50 = vpack.c.bf16 %v9372_v11, %v9371_v46  ;;  %v9389_v46 = vld [vmem:[%s18563_s4 + $0x488] sm:$0xff]  ;;  %v9390_v11 = vld [vmem:[%s18563_s4 + $0x490] sm:$0xff] }
 0x51c   : > { %12154 = vmatpush1.bf16.msra.mxu1 %v12153_v48  ;;  %v9886_v48 = vld [vmem:[%s18563_s4 + $0x1110] sm:$0xff] }
 0x51d   : > { %12155 = vmatprep.subr.bf16.mxu1 %v12752_v17  ;;  %v12234_v51 = vpack.c.bf16 %v9886_v48, %v9885_v47  ;;  %v11658_v48 = vpack.c.bf16 %v9390_v11, %v9389_v46  ;;  %v9442_v46 = vld [vmem:[%s18563_s4 + $0x5d0] sm:$0xff] }
 0x520   : > { %12157 = vmatpush1.bf16.msra.mxu1 %v12156_v52  ;;  %v9373_v52 = vld [vmem:[%s18563_s4 + $0x408] sm:$0xff] }
 0x521   : > { %12158 = vmatprep.subr.bf16.mxu1 %v12752_v17  ;;  %v11634_v3 = vpack.c.bf16 %v9374_v53, %v9373_v52  ;;  %v9391_v52 = vld [vmem:[%s18563_s4 + $0x498] sm:$0xff]  ;;  %v9392_v53 = vld [vmem:[%s18563_s4 + $0x4a0] sm:$0xff] }
 0x524   : > { %12160 = vmatpush1.bf16.msra.mxu1 %v12159_v2  ;;  %v9888_v2 = vld [vmem:[%s18563_s4 + $0x1120] sm:$0xff] }
 0x525   : > { %12161 = vmatprep.subr.bf16.mxu1 %v12752_v17  ;;  %v12237_v58 = vpack.c.bf16 %v9888_v2, %v9887_v14  ;;  %v11661_v2 = vpack.c.bf16 %v9392_v53, %v9391_v52  ;;  %v9446_v52 = vld [vmem:[%s18563_s4 + $0x5f0] sm:$0xff] }
 0x528   : > { %12163 = vmatpush1.bf16.msra.mxu1 %v12162_v59  ;;  %v9375_v59 = vld [vmem:[%s18563_s4 + $0x418] sm:$0xff] }
 0x529   : > { %12164 = vmatprep.subr.bf16.mxu1 %v12752_v17  ;;  %v11637_v62 = vpack.c.bf16 %v9376_v61, %v9375_v59  ;;  %v9945_v61 = vld [vmem:[%s18563_s4 + $0x1288] sm:$0xff] }
 0x52c   : > { %12166 = vmatpush1.bf16.msra.mxu1 %v12165_v63  ;;  %v9927_v63 = vld [vmem:[%s18563_s4 + $0x11f8] sm:$0xff] }
 0x52d   : > { %6415 = vmatprep.subr.mxu1 %v12750_v0  ;;  %v12276_v12 = vpack.c.bf16 %v9928_v5, %v9927_v63  ;;  %v9393_v63 = vld [vmem:[%s18563_s4 + $0x4a8] sm:$0xf] }
 0x530   : > { %9828 = vmatpush1.msk.msra.mxu1 %vm2852_vm3, %v9827_v7  ;;  %v9378_v7 = vld [vmem:[%s18563_s4 + $0x430] sm:$0xff] }
 0x531   : > { %6432 = vmatmul.mubr.f32.vlgmr.msra.gmra.mrb[28].mxu1 %v15619_v56  ;;  %12203 = vmatprep.subr.bf16.mxu1 %v12752_v17  ;;  %v11640_v13 = vpack.c.bf16 %v9378_v7, %v9377_v6  ;;  %v9947_v6 = vld [vmem:[%s18563_s4 + $0x1298] sm:$0xff]  ;;  %v9948_v7 = vld [vmem:[%s18563_s4 + $0x12a0] sm:$0xff] }
 0x532   : > { %12205 = vmatpush1.bf16.msra.mxu1 %v12204_v8  ;;  %9891 = vmatprep.mubr.msk.f32.mxu1 %vm2848_vm4, %v15624_v57  ;;  %v9889_v8 = vld [vmem:[%s18563_s4 + $0x1128] sm:$0xf] }
 0x533   : > { %12206 = vmatprep.subr.bf16.mxu1 %v12752_v17 }
 0x536   : > { %12208 = vmatpush1.bf16.msra.mxu1 %v12207_v15  ;;  %v9929_v15 = vld [vmem:[%s18563_s4 + $0x1208] sm:$0xff] }
 0x537   : > { %12209 = vmatprep.subr.bf16.mxu1 %v12752_v17  ;;  %v12279_v20 = vpack.c.bf16 %v9930_v16, %v9929_v15  ;;  %v9951_v16 = vld [vmem:[%s18563_s4 + $0x12b8] sm:$0xf] }
 0x53a   : > { %12211 = vmatpush1.bf16.msra.mxu1 %v12210_v10  ;;  %v9380_v10 = vld [vmem:[%s18563_s4 + $0x440] sm:$0xff] }
 0x53b   : > { %12212 = vmatprep.subr.bf16.mxu1 %v12752_v17  ;;  %v11643_v4 = vpack.c.bf16 %v9380_v10, %v9379_v18 }
 0x53c   : > { %v16709_v24 = vpop.f32.mrb[20].mxu1 }
 0x53d   : > { %v5140_v25 = vpop.f32.mrb[21].mxu1 }
 0x53e   : > { %12214 = vmatpush1.bf16.msra.mxu1 %v12213_v21  ;;  %v9931_v21 = vld [vmem:[%s18563_s4 + $0x1218] sm:$0xff]  ;;  %v9382_v25 = vld [vmem:[%s18563_s4 + $0x450] sm:$0xff] }
 0x53f   : > { %12215 = vmatprep.subr.bf16.mxu1 %v12752_v17  ;;  %v11646_v29 = vpack.c.bf16 %v9382_v25, %v9381_v19 }
 0x542   : > { %12217 = vmatpush1.bf16.msra.mxu1 %v12216_v27  ;;  %v12282_v27 = vpack.c.bf16 %v9932_v23, %v9931_v21  ;;  %v9396_v21 = vld [vmem:[%s18564_s5 + $0x50] sm:$0xff] }
 0x543   : > { %12218 = vmatprep.subr.bf16.mxu1 %v12752_v17 }
 0x546   : > { %12220 = vmatpush1.bf16.msra.mxu1 %v12219_v30  ;;  %v9934_v30 = vld [vmem:[%s18563_s4 + $0x1230] sm:$0xff] }
 0x547   : > { %12221 = vmatprep.subr.bf16.mxu1 %v12752_v17 }
 0x54a   : > { %v3473_v26 = vpop.f32.mrb[12].mxu0  ;;  %12223 = vmatpush1.bf16.msra.mxu1 %v12222_v33  ;;  %v12285_v33 = vpack.c.bf16 %v9934_v30, %v9933_v28  ;;  %v9397_v28 = vld [vmem:[%s18564_s5 + $0x58] sm:$0xff] }
 0x54b   : > { %v3475_v36 = vpop.f32.mrb[13].mxu0  ;;  %10304 = vmatprep.subr.mxu0 %v3473_v26  ;;  %12224 = vmatprep.subr.bf16.mxu1 %v12752_v17 }
 0x54c   : > { %10305 = vmatpush3.msra.mxu0 %v3473_v26  ;;  %v9935_v26 = vld [vmem:[%s18563_s4 + $0x1238] sm:$0xff]  ;;  %v9385_v36 = vld [vmem:[%s18563_s4 + $0x468] sm:$0xff] }
 0x54d   : > { %10307 = vmatmul.mubr.msk.f32.vlgmr.msra.gmra.mrb[10].mxu0 %vm3030_vm5, %v9335_v9  ;;  %10309 = vmatprep.subr.mxu0 %v16327_v49  ;;  %v9936_v9 = vld [vmem:[%s18563_s4 + $0x1240] sm:$0xff] }
 0x54e   : > { %10310 = vmatpush3.msra.mxu0 %v16327_v49  ;;  %12226 = vmatpush1.bf16.msra.mxu1 %v12225_v35  ;;  %v9883_v49 = vld [vmem:[%s18563_s4 + $0x10f8] sm:$0xff]  ;;  %v12288_v38 = vpack.c.bf16 %v9936_v9, %v9935_v26  ;;  %v9434_v9 = vld [vmem:[%s18563_s4 + $0x590] sm:$0xff] }
 0x54f   : > { %12227 = vmatprep.subr.bf16.mxu1 %v12752_v17  ;;  %10311 = vmatprep.mubr.msk.f32.mxu0 %vm3030_vm5, %v9365_v40  ;;  %v12231_v45 = vpack.c.bf16 %v9884_v39, %v9883_v49  ;;  %v11652_v40 = vpack.c.bf16 %v9386_v37, %v9385_v36  ;;  %v9388_v49 = vld [vmem:[%s18563_s4 + $0x480] sm:$0xff]  ;;  %v9435_v36 = vld [vmem:[%s18563_s4 + $0x598] sm:$0xff] }
 0x550   : > { %11627 = vmatprep.subr.bf16.mxu0 %v12752_v17  ;;  %v9436_v37 = vld [vmem:[%s18563_s4 + $0x5a0] sm:$0xff] }
 0x552   : > { %12229 = vmatpush1.bf16.msra.mxu1 %v12228_v42  ;;  %v9937_v42 = vld [vmem:[%s18563_s4 + $0x1248] sm:$0xff] }
 0x553   : > { %12230 = vmatprep.subr.bf16.mxu1 %v12752_v17  ;;  %v12291_v39 = vpack.c.bf16 %v9938_v43, %v9937_v42  ;;  %v11706_v42 = vpack.c.bf16 %v9436_v37, %v9435_v36  ;;  %v9437_v43 = vld [vmem:[%s18563_s4 + $0x5a8] sm:$0xff]  ;;  %v9503_v37 = vld [vmem:[%s18563_s4 + $0x758] sm:$0xff] }
 0x555   : > { %10312 = vmatmul.mubr.msk.f32.vlgmr.msra.gmra.mrb[10].mxu0 %vm3030_vm5, %v9366_v54  ;;  %v11655_v54 = vpack.c.bf16 %v9388_v49, %v9387_v44  ;;  %v9438_v44 = vld [vmem:[%s18563_s4 + $0x5b0] sm:$0xff] }
 0x556   : > { %11629 = vmatpush1.bf16.msra.mxu0 %v11628_v1  ;;  %9395 = vmatprep.mubr.msk.f32.mxu0 %vm2848_vm4, %v15624_v57  ;;  %v9939_v1 = vld [vmem:[%s18563_s4 + $0x1258] sm:$0xff]  ;;  %v11709_v49 = vpack.c.bf16 %v9438_v44, %v9437_v43  ;;  %v9505_v43 = vld [vmem:[%s18563_s4 + $0x768] sm:$0xff]  ;;  %v9506_v44 = vld [vmem:[%s18563_s4 + $0x770] sm:$0xff] }
 0x557   : > { %12232 = vmatpush1.bf16.msra.mxu1 %v12231_v45  ;;  %11630 = vmatprep.subr.bf16.mxu0 %v12752_v17  ;;  %v9940_v45 = vld [vmem:[%s18563_s4 + $0x1260] sm:$0xff] }
 0x558   : > { %12233 = vmatprep.subr.bf16.mxu1 %v12752_v17  ;;  %v12294_v47 = vpack.c.bf16 %v9940_v45, %v9939_v1  ;;  %v9441_v45 = vld [vmem:[%s18563_s4 + $0x5c8] sm:$0xff] }
 0x559   : > { %v11715_v11 = vpack.c.bf16 %v9442_v46, %v9441_v45  ;;  %v9509_v45 = vld [vmem:[%s18563_s4 + $0x788] sm:$0xff]  ;;  %v9510_v46 = vld [vmem:[%s18563_s4 + $0x790] sm:$0xff] }
 0x55a   : > { %11632 = vmatpush1.bf16.msra.mxu0 %v11631_v50  ;;  %v9941_v50 = vld [vmem:[%s18563_s4 + $0x1268] sm:$0xff] }
 0x55b   : > { %12235 = vmatpush1.bf16.msra.mxu1 %v12234_v51  ;;  %11633 = vmatprep.subr.bf16.mxu0 %v12752_v17  ;;  %v9942_v51 = vld [vmem:[%s18563_s4 + $0x1270] sm:$0xff] }
 0x55c   : > { %12236 = vmatprep.subr.bf16.mxu1 %v12752_v17  ;;  %v12297_v14 = vpack.c.bf16 %v9942_v51, %v9941_v50  ;;  %v9445_v51 = vld [vmem:[%s18563_s4 + $0x5e8] sm:$0xff] }
 0x55d   : > { %v11721_v53 = vpack.c.bf16 %v9446_v52, %v9445_v51  ;;  %v9513_v51 = vld [vmem:[%s18563_s4 + $0x7a8] sm:$0xff]  ;;  %v9514_v52 = vld [vmem:[%s18563_s4 + $0x7b0] sm:$0xff] }
 0x55e   : > { %11635 = vmatpush1.bf16.msra.mxu0 %v11634_v3  ;;  %v9943_v3 = vld [vmem:[%s18563_s4 + $0x1278] sm:$0xff] }
 0x55f   : > { %12238 = vmatpush1.bf16.msra.mxu1 %v12237_v58  ;;  %11636 = vmatprep.subr.bf16.mxu0 %v12752_v17  ;;  %v9944_v58 = vld [vmem:[%s18563_s4 + $0x1280] sm:$0xff] }
 0x560   : > { %6785 = vmatprep.subr.mxu1 %v12750_v0  ;;  %v12300_v59 = vpack.c.bf16 %v9944_v58, %v9943_v3  ;;  %v9449_v58 = vld [vmem:[%s18563_s4 + $0x608] sm:$0xff] }
 0x562   : > { %11638 = vmatpush1.bf16.msra.mxu0 %v11637_v62  ;;  %v9946_v62 = vld [vmem:[%s18563_s4 + $0x1290] sm:$0xff] }
 0x563   : > { %9890 = vmatpush1.msk.msra.mxu1 %vm2852_vm3, %v9889_v8  ;;  %11639 = vmatprep.subr.bf16.mxu0 %v12752_v17  ;;  %v12303_v5 = vpack.c.bf16 %v9946_v62, %v9945_v61  ;;  %v12306_v8 = vpack.c.bf16 %v9948_v7, %v9947_v6  ;;  %v9451_v62 = vld [vmem:[%s18563_s4 + $0x618] sm:$0xff]  ;;  %v9453_v6 = vld [vmem:[%s18563_s4 + $0x628] sm:$0xff]  ;;  %v9454_v7 = vld [vmem:[%s18563_s4 + $0x630] sm:$0xff] }
 0x564   : > { %6802 = vmatmul.mubr.f32.vlgmr.msra.gmra.mrb[30].mxu1 %v15619_v56  ;;  %12275 = vmatprep.subr.bf16.mxu1 %v12752_v17 }
 0x565   : > { %12277 = vmatpush1.bf16.msra.mxu1 %v12276_v12  ;;  %9953 = vmatprep.mubr.msk.f32.mxu1 %vm2848_vm4, %v15624_v57  ;;  %v9949_v12 = vld [vmem:[%s18563_s4 + $0x12a8] sm:$0xff] }
 0x566   : > { %11641 = vmatpush1.bf16.msra.mxu0 %v11640_v13  ;;  %12278 = vmatprep.subr.bf16.mxu1 %v12752_v17  ;;  %v9950_v13 = vld [vmem:[%s18563_s4 + $0x12b0] sm:$0xff] }
 0x567   : > { %11642 = vmatprep.subr.bf16.mxu0 %v12752_v17  ;;  %v12309_v15 = vpack.c.bf16 %v9950_v13, %v9949_v12  ;;  %v9455_v12 = vld [vmem:[%s18563_s4 + $0x638] sm:$0xf]  ;;  %v9458_v13 = vld [vmem:[%s18564_s5 + $0x70] sm:$0xff] }
 0x569   : > { %12280 = vmatpush1.bf16.msra.mxu1 %v12279_v20 }
 0x56a   : > { %11644 = vmatpush1.bf16.msra.mxu0 %v11643_v4  ;;  %12281 = vmatprep.subr.bf16.mxu1 %v12752_v17 }
 0x56b   : > { %11645 = vmatprep.subr.bf16.mxu0 %v12752_v17 }
 0x56d   : > { %12283 = vmatpush1.bf16.msra.mxu1 %v12282_v27 }
 0x56e   : > { %11647 = vmatpush1.bf16.msra.mxu0 %v11646_v29  ;;  %v16867_v34 = vpop.f32.mrb[22].mxu1  ;;  %12284 = vmatprep.subr.bf16.mxu1 %v12752_v17 }
 0x56f   : > { %v5325_v35 = vpop.f32.mrb[23].mxu1  ;;  %11648 = vmatprep.subr.bf16.mxu0 %v12752_v17 }
 0x571   : > { %12286 = vmatpush1.bf16.msra.mxu1 %v12285_v33  ;;  %v9432_v33 = vld [vmem:[%s18563_s4 + $0x580] sm:$0xff] }
 0x572   : > { %11650 = vmatpush1.bf16.msra.mxu0 %v11649_v60  ;;  %12287 = vmatprep.subr.bf16.mxu1 %v12752_v17  ;;  %v9428_v60 = vld [vmem:[%s18564_s5 + $0x68] sm:$0xff]  ;;  %v11700_v26 = vpack.c.bf16 %v9432_v33, %v9431_v32  ;;  %v9498_v32 = vld [vmem:[%s18563_s4 + $0x730] sm:$0xff] }
 0x573   : > { %11651 = vmatprep.subr.bf16.mxu0 %v12752_v17 }
 0x575   : > { %12289 = vmatpush1.bf16.msra.mxu1 %v12288_v38 }
 0x576   : > { %11653 = vmatpush1.bf16.msra.mxu0 %v11652_v40  ;;  %12290 = vmatprep.subr.bf16.mxu1 %v12752_v17 }
 0x577   : > { %11654 = vmatprep.subr.bf16.mxu0 %v12752_v17 }
 0x579   : > { %12292 = vmatpush1.bf16.msra.mxu1 %v12291_v39  ;;  %v9439_v39 = vld [vmem:[%s18563_s4 + $0x5b8] sm:$0xff] }
 0x57a   : > { %11656 = vmatpush1.bf16.msra.mxu0 %v11655_v54  ;;  %12293 = vmatprep.subr.bf16.mxu1 %v12752_v17  ;;  %v9440_v54 = vld [vmem:[%s18563_s4 + $0x5c0] sm:$0xff] }
 0x57b   : > { %11657 = vmatprep.subr.bf16.mxu0 %v12752_v17  ;;  %v11712_v1 = vpack.c.bf16 %v9440_v54, %v9439_v39  ;;  %v9507_v39 = vld [vmem:[%s18563_s4 + $0x778] sm:$0xff]  ;;  %v9508_v54 = vld [vmem:[%s18563_s4 + $0x780] sm:$0xff] }
 0x57d   : > { %12295 = vmatpush1.bf16.msra.mxu1 %v12294_v47  ;;  %v9443_v47 = vld [vmem:[%s18563_s4 + $0x5d8] sm:$0xff] }
 0x57e   : > { %11659 = vmatpush1.bf16.msra.mxu0 %v11658_v48  ;;  %12296 = vmatprep.subr.bf16.mxu1 %v12752_v17  ;;  %v9444_v48 = vld [vmem:[%s18563_s4 + $0x5e0] sm:$0xff] }
 0x57f   : > { %11660 = vmatprep.subr.bf16.mxu0 %v12752_v17  ;;  %v11718_v50 = vpack.c.bf16 %v9444_v48, %v9443_v47  ;;  %v9511_v47 = vld [vmem:[%s18563_s4 + $0x798] sm:$0xff]  ;;  %v9512_v48 = vld [vmem:[%s18563_s4 + $0x7a0] sm:$0xff] }
 0x581   : > { %12298 = vmatpush1.bf16.msra.mxu1 %v12297_v14  ;;  %v9447_v14 = vld [vmem:[%s18563_s4 + $0x5f8] sm:$0xff] }
 0x582   : > { %11662 = vmatpush1.bf16.msra.mxu0 %v11661_v2  ;;  %12299 = vmatprep.subr.bf16.mxu1 %v12752_v17  ;;  %v9448_v2 = vld [vmem:[%s18563_s4 + $0x600] sm:$0xff] }
 0x583   : > { %3825 = vmatprep.subr.mxu0 %v12750_v0  ;;  %v11724_v3 = vpack.c.bf16 %v9448_v2, %v9447_v14  ;;  %v9515_v14 = vld [vmem:[%s18563_s4 + $0x7b8] sm:$0xff]  ;;  %v9516_v2 = vld [vmem:[%s18563_s4 + $0x7c0] sm:$0xff] }
 0x585   : > { %12301 = vmatpush1.bf16.msra.mxu1 %v12300_v59  ;;  %v9450_v59 = vld [vmem:[%s18563_s4 + $0x610] sm:$0xff] }
 0x586   : > { %9394 = vmatpush1.msk.msra.mxu0 %vm2852_vm3, %v9393_v63  ;;  %12302 = vmatprep.subr.bf16.mxu1 %v12752_v17  ;;  %v11727_v61 = vpack.c.bf16 %v9450_v59, %v9449_v58  ;;  %v9452_v63 = vld [vmem:[%s18563_s4 + $0x620] sm:$0xff]  ;;  %v9517_v58 = vld [vmem:[%s18563_s4 + $0x7c8] sm:$0xf]  ;;  %v9520_v59 = vld [vmem:[%s18564_s5 + $0x90] sm:$0xff] }
 0x587   : > { %3842 = vmatmul.mubr.f32.vlgmr.msra.gmra.mrb[14].mxu0 %v15619_v56 }
 0x588   : > { %10316 = vmatprep.mubr.msk.f32.mxu0 %vm3030_vm5, %v9396_v21  ;;  %v9493_v21 = vld [vmem:[%s18563_s4 + $0x708] sm:$0xff] }
 0x589   : > { %12304 = vmatpush1.bf16.msra.mxu1 %v12303_v5  ;;  %v11730_v5 = vpack.c.bf16 %v9452_v63, %v9451_v62  ;;  %v9521_v62 = vld [vmem:[%s18564_s5 + $0x98] sm:$0xff] }
 0x58a   : > { %12305 = vmatprep.subr.bf16.mxu1 %v12752_v17 }
 0x58d   : > { %12307 = vmatpush1.bf16.msra.mxu1 %v12306_v8  ;;  %v11733_v8 = vpack.c.bf16 %v9454_v7, %v9453_v6  ;;  %v9555_v6 = vld [vmem:[%s18563_s4 + $0x898] sm:$0xff]  ;;  %v9556_v7 = vld [vmem:[%s18563_s4 + $0x8a0] sm:$0xff] }
 0x58e   : > { %12308 = vmatprep.subr.bf16.mxu1 %v12752_v17 }
 0x591   : > { %12310 = vmatpush1.bf16.msra.mxu1 %v12309_v15 }
 0x592   : > { %7155 = vmatprep.subr.mxu1 %v12750_v0 }
 0x595   : > { %9952 = vmatpush1.msk.msra.mxu1 %vm2852_vm3, %v9951_v16  ;;  %v9459_v16 = vld [vmem:[%s18564_s5 + $0x78] sm:$0xff] }
 0x596   : > { %7172 = vmatmul.mubr.f32.vlgmr.msra.gmra.mrb[32].mxu1 %v15619_v56 }
 0x5a0   : > { %v16967_v18 = vpop.f32.mrb[24].mxu1 }
 0x5a1   : > { %v5695_v10 = vpop.f32.mrb[25].mxu1 }
 0x5d2   : > { %v16969_v20 = vpop.f32.mrb[26].mxu1 }
 0x5d3   : > { %v6065_v4 = vpop.f32.mrb[27].mxu1 }
 0x5d4   : > { %v9489_v4 = vld [vmem:[%s18564_s5 + $0x80] sm:$0xff] }
 0x604   : > { %v16975_v23 = vpop.f32.mrb[28].mxu1 }
 0x605   : > { %v6435_v19 = vpop.f32.mrb[29].mxu1 }
 0x606   : > { %v9494_v19 = vld [vmem:[%s18563_s4 + $0x710] sm:$0xff] }
 0x637   : > { %v16977_v25 = vpop.f32.mrb[30].mxu1 }
 0x638   : > { %v6805_v27 = vpop.f32.mrb[31].mxu1 }
 0x639   : > { %v9490_v27 = vld [vmem:[%s18564_s5 + $0x88] sm:$0xff] }
 0x65a   : > { %v3843_v29 = vpop.f32.mrb[14].mxu0 }
 0x65b   : > { %v3845_v30 = vpop.f32.mrb[15].mxu0  ;;  %10314 = vmatprep.subr.mxu0 %v3843_v29 }
 0x65c   : > { %10315 = vmatpush3.msra.mxu0 %v3843_v29  ;;  %v11772_v29 = vpack.c.bf16 %v9494_v19, %v9493_v21  ;;  %v9561_v21 = vld [vmem:[%s18563_s4 + $0x8c8] sm:$0xff]  ;;  %v9562_v19 = vld [vmem:[%s18563_s4 + $0x8d0] sm:$0xff] }
 0x65d   : > { %10317 = vmatmul.mubr.msk.f32.vlgmr.msra.gmra.mrb[10].mxu0 %vm3030_vm5, %v9397_v28  ;;  %10319 = vmatprep.subr.mxu0 %v16423_v22  ;;  %v9496_v28 = vld [vmem:[%s18563_s4 + $0x720] sm:$0xff] }
 0x65e   : > { %10320 = vmatpush3.msra.mxu0 %v16423_v22  ;;  %10321 = vmatprep.mubr.msk.f32.mxu0 %vm3030_vm5, %v9427_v31  ;;  %v9433_v22 = vld [vmem:[%s18563_s4 + $0x588] sm:$0xff] }
 0x65f   : > { %11699 = vmatprep.subr.bf16.mxu0 %v12752_v17  ;;  %v11703_v35 = vpack.c.bf16 %v9434_v9, %v9433_v22  ;;  %v9497_v31 = vld [vmem:[%s18563_s4 + $0x728] sm:$0xff] }
 0x660   : > { %v11778_v33 = vpack.c.bf16 %v9498_v32, %v9497_v31  ;;  %v9501_v9 = vld [vmem:[%s18563_s4 + $0x748] sm:$0xff]  ;;  %v9566_v31 = vld [vmem:[%s18563_s4 + $0x8f0] sm:$0xff] }
 0x665   : > { %10322 = vmatmul.mubr.msk.f32.vlgmr.msra.gmra.mrb[10].mxu0 %vm3030_vm5, %v9428_v60  ;;  %v9499_v60 = vld [vmem:[%s18563_s4 + $0x738] sm:$0xff] }
 0x666   : > { %11701 = vmatpush1.bf16.msra.mxu0 %v11700_v26  ;;  %9457 = vmatprep.mubr.msk.f32.mxu0 %vm2848_vm4, %v15624_v57  ;;  %v9500_v26 = vld [vmem:[%s18563_s4 + $0x740] sm:$0xff] }
 0x667   : > { %11702 = vmatprep.subr.bf16.mxu0 %v12752_v17  ;;  %v11781_v22 = vpack.c.bf16 %v9500_v26, %v9499_v60  ;;  %v9568_v60 = vld [vmem:[%s18563_s4 + $0x900] sm:$0xff] }
 0x669   : > { %v17015_v38 = vpop.f32.mrb[32].mxu1 }
 0x66a   : > { %11704 = vmatpush1.bf16.msra.mxu0 %v11703_v35  ;;  %v7175_v40 = vpop.f32.mrb[33].mxu1  ;;  %v9502_v35 = vld [vmem:[%s18563_s4 + $0x750] sm:$0xff] }
 0x66b   : > { %11705 = vmatprep.subr.bf16.mxu0 %v12752_v17  ;;  %v11784_v36 = vpack.c.bf16 %v9502_v35, %v9501_v9  ;;  %v9504_v40 = vld [vmem:[%s18563_s4 + $0x760] sm:$0xff]  ;;  %v9570_v9 = vld [vmem:[%s18563_s4 + $0x910] sm:$0xff] }
 0x66e   : > { %11707 = vmatpush1.bf16.msra.mxu0 %v11706_v42  ;;  %v11787_v42 = vpack.c.bf16 %v9504_v40, %v9503_v37  ;;  %v9572_v37 = vld [vmem:[%s18563_s4 + $0x920] sm:$0xff] }
 0x66f   : > { %11708 = vmatprep.subr.bf16.mxu0 %v12752_v17 }
 0x672   : > { %11710 = vmatpush1.bf16.msra.mxu0 %v11709_v49  ;;  %v11790_v49 = vpack.c.bf16 %v9506_v44, %v9505_v43  ;;  %v9574_v43 = vld [vmem:[%s18563_s4 + $0x930] sm:$0xff] }
 0x673   : > { %11711 = vmatprep.subr.bf16.mxu0 %v12752_v17 }
 0x676   : > { %11713 = vmatpush1.bf16.msra.mxu0 %v11712_v1  ;;  %v11793_v1 = vpack.c.bf16 %v9508_v54, %v9507_v39  ;;  %v9576_v39 = vld [vmem:[%s18563_s4 + $0x940] sm:$0xff] }
 0x677   : > { %11714 = vmatprep.subr.bf16.mxu0 %v12752_v17 }
 0x67a   : > { %11716 = vmatpush1.bf16.msra.mxu0 %v11715_v11  ;;  %v11796_v11 = vpack.c.bf16 %v9510_v46, %v9509_v45  ;;  %v9578_v45 = vld [vmem:[%s18563_s4 + $0x950] sm:$0xff] }
 0x67b   : > { %11717 = vmatprep.subr.bf16.mxu0 %v12752_v17 }
 0x67e   : > { %11719 = vmatpush1.bf16.msra.mxu0 %v11718_v50  ;;  %v11799_v50 = vpack.c.bf16 %v9512_v48, %v9511_v47  ;;  %v9582_v47 = vld [vmem:[%s18564_s5 + $0xb0] sm:$0xff] }
 0x67f   : > { %11720 = vmatprep.subr.bf16.mxu0 %v12752_v17 }
 0x682   : > { %11722 = vmatpush1.bf16.msra.mxu0 %v11721_v53  ;;  %v11802_v53 = vpack.c.bf16 %v9514_v52, %v9513_v51  ;;  %v9613_v52 = vld [vmem:[%s18564_s5 + $0xc0] sm:$0xff] }
 0x683   : > { %11723 = vmatprep.subr.bf16.mxu0 %v12752_v17 }
 0x686   : > { %11725 = vmatpush1.bf16.msra.mxu0 %v11724_v3  ;;  %v11805_v3 = vpack.c.bf16 %v9516_v2, %v9515_v14  ;;  %v9644_v14 = vld [vmem:[%s18564_s5 + $0xd0] sm:$0xff]  ;;  %v9649_v2 = vld [vmem:[%s18563_s4 + $0xaf8] sm:$0xff] }
 0x687   : > { %11726 = vmatprep.subr.bf16.mxu0 %v12752_v17 }
 0x68a   : > { %11728 = vmatpush1.bf16.msra.mxu0 %v11727_v61 }
 0x68b   : > { %11729 = vmatprep.subr.bf16.mxu0 %v12752_v17 }
 0x68e   : > { %11731 = vmatpush1.bf16.msra.mxu0 %v11730_v5  ;;  %v9551_v5 = vld [vmem:[%s18564_s5 + $0xa0] sm:$0xff] }
 0x68f   : > { %11732 = vmatprep.subr.bf16.mxu0 %v12752_v17 }
 0x692   : > { %11734 = vmatpush1.bf16.msra.mxu0 %v11733_v8  ;;  %v9552_v8 = vld [vmem:[%s18564_s5 + $0xa8] sm:$0xff] }
 0x693   : > { %4195 = vmatprep.subr.mxu0 %v12750_v0 }
 0x696   : > { %9456 = vmatpush1.msk.msra.mxu0 %vm2852_vm3, %v9455_v12  ;;  %v11844_v12 = vpack.c.bf16 %v9556_v7, %v9555_v6  ;;  %v9654_v6 = vld [vmem:[%s18563_s4 + $0xb20] sm:$0xff]  ;;  %v9655_v7 = vld [vmem:[%s18563_s4 + $0xb28] sm:$0xff] }
 0x697   : > { %4212 = vmatmul.mubr.f32.vlgmr.msra.gmra.mrb[16].mxu0 %v15619_v56 }
 0x698   : > { %10326 = vmatprep.mubr.msk.f32.mxu0 %vm3030_vm5, %v9458_v13  ;;  %v9558_v13 = vld [vmem:[%s18563_s4 + $0x8b0] sm:$0xff] }
 0x76a   : > { %v4213_v15 = vpop.f32.mrb[16].mxu0 }
 0x76b   : > { %v4215_v10 = vpop.f32.mrb[17].mxu0  ;;  %10324 = vmatprep.subr.mxu0 %v4213_v15 }
 0x76c   : > { %10325 = vmatpush3.msra.mxu0 %v4213_v15  ;;  %v9560_v10 = vld [vmem:[%s18563_s4 + $0x8c0] sm:$0xff] }
 0x76d   : > { %10327 = vmatmul.mubr.msk.f32.vlgmr.msra.gmra.mrb[10].mxu0 %vm3030_vm5, %v9459_v16  ;;  %10329 = vmatprep.subr.mxu0 %v16521_v55  ;;  %v9559_v16 = vld [vmem:[%s18563_s4 + $0x8b8] sm:$0xff] }
 0x76e   : > { %10330 = vmatpush3.msra.mxu0 %v16521_v55  ;;  %10331 = vmatprep.mubr.msk.f32.mxu0 %vm3030_vm5, %v9489_v4  ;;  %v9495_v55 = vld [vmem:[%s18563_s4 + $0x718] sm:$0xff]  ;;  %v11850_v4 = vpack.c.bf16 %v9560_v10, %v9559_v16  ;;  %v9659_v16 = vld [vmem:[%s18563_s4 + $0xb48] sm:$0xff] }
 0x76f   : > { %11771 = vmatprep.subr.bf16.mxu0 %v12752_v17  ;;  %v11775_v30 = vpack.c.bf16 %v9496_v28, %v9495_v55  ;;  %v9564_v55 = vld [vmem:[%s18563_s4 + $0x8e0] sm:$0xff] }
 0x775   : > { %10332 = vmatmul.mubr.msk.f32.vlgmr.msra.gmra.mrb[10].mxu0 %vm3030_vm5, %v9490_v27  ;;  %v11853_v27 = vpack.c.bf16 %v9562_v19, %v9561_v21  ;;  %v9661_v21 = vld [vmem:[%s18563_s4 + $0xb58] sm:$0xff] }
 0x776   : > { %11773 = vmatpush1.bf16.msra.mxu0 %v11772_v29  ;;  %9519 = vmatprep.mubr.msk.f32.mxu0 %vm2848_vm4, %v15624_v57  ;;  %v9563_v29 = vld [vmem:[%s18563_s4 + $0x8d8] sm:$0xff] }
 0x777   : > { %11774 = vmatprep.subr.bf16.mxu0 %v12752_v17  ;;  %v11856_v28 = vpack.c.bf16 %v9564_v55, %v9563_v29  ;;  %v9663_v29 = vld [vmem:[%s18563_s4 + $0xb68] sm:$0xff] }
 0x77a   : > { %11776 = vmatpush1.bf16.msra.mxu0 %v11775_v30  ;;  %v9565_v30 = vld [vmem:[%s18563_s4 + $0x8e8] sm:$0xff] }
 0x77b   : > { %11777 = vmatprep.subr.bf16.mxu0 %v12752_v17  ;;  %v11859_v32 = vpack.c.bf16 %v9566_v31, %v9565_v30  ;;  %v9665_v30 = vld [vmem:[%s18563_s4 + $0xb78] sm:$0xff] }
 0x77e   : > { %11779 = vmatpush1.bf16.msra.mxu0 %v11778_v33  ;;  %v9567_v33 = vld [vmem:[%s18563_s4 + $0x8f8] sm:$0xff] }
 0x77f   : > { %11780 = vmatprep.subr.bf16.mxu0 %v12752_v17  ;;  %v11862_v26 = vpack.c.bf16 %v9568_v60, %v9567_v33  ;;  %v9667_v33 = vld [vmem:[%s18563_s4 + $0xb88] sm:$0xff] }
 0x782   : > { %11782 = vmatpush1.bf16.msra.mxu0 %v11781_v22  ;;  %v9569_v22 = vld [vmem:[%s18563_s4 + $0x908] sm:$0xff] }
 0x783   : > { %11783 = vmatprep.subr.bf16.mxu0 %v12752_v17  ;;  %v11865_v35 = vpack.c.bf16 %v9570_v9, %v9569_v22  ;;  %v9669_v22 = vld [vmem:[%s18563_s4 + $0xb98] sm:$0xff] }
 0x786   : > { %11785 = vmatpush1.bf16.msra.mxu0 %v11784_v36  ;;  %v9571_v36 = vld [vmem:[%s18563_s4 + $0x918] sm:$0xff] }
 0x787   : > { %11786 = vmatprep.subr.bf16.mxu0 %v12752_v17  ;;  %v11868_v40 = vpack.c.bf16 %v9572_v37, %v9571_v36  ;;  %v9671_v36 = vld [vmem:[%s18563_s4 + $0xba8] sm:$0xff] }
 0x78a   : > { %11788 = vmatpush1.bf16.msra.mxu0 %v11787_v42  ;;  %v9573_v42 = vld [vmem:[%s18563_s4 + $0x928] sm:$0xff] }
 0x78b   : > { %11789 = vmatprep.subr.bf16.mxu0 %v12752_v17  ;;  %v11871_v44 = vpack.c.bf16 %v9574_v43, %v9573_v42  ;;  %v9675_v42 = vld [vmem:[%s18564_s5 + $0xe0] sm:$0xff] }
 0x78e   : > { %11791 = vmatpush1.bf16.msra.mxu0 %v11790_v49  ;;  %v9575_v49 = vld [vmem:[%s18563_s4 + $0x938] sm:$0xff] }
 0x78f   : > { %11792 = vmatprep.subr.bf16.mxu0 %v12752_v17  ;;  %v11874_v54 = vpack.c.bf16 %v9576_v39, %v9575_v49  ;;  %v9706_v39 = vld [vmem:[%s18564_s5 + $0xf0] sm:$0xff] }
 0x792   : > { %11794 = vmatpush1.bf16.msra.mxu0 %v11793_v1  ;;  %v9577_v1 = vld [vmem:[%s18563_s4 + $0x948] sm:$0xff] }
 0x793   : > { %11795 = vmatprep.subr.bf16.mxu0 %v12752_v17  ;;  %v11877_v46 = vpack.c.bf16 %v9578_v45, %v9577_v1  ;;  %v9711_v1 = vld [vmem:[%s18563_s4 + $0xc88] sm:$0xff]  ;;  %v9707_v45 = vld [vmem:[%s18564_s5 + $0xf8] sm:$0xff] }
 0x796   : > { %11797 = vmatpush1.bf16.msra.mxu0 %v11796_v11  ;;  %v9579_v11 = vld [vmem:[%s18563_s4 + $0x958] sm:$0xf] }
 0x797   : > { %11798 = vmatprep.subr.bf16.mxu0 %v12752_v17 }
 0x79a   : > { %11800 = vmatpush1.bf16.msra.mxu0 %v11799_v50  ;;  %v9583_v50 = vld [vmem:[%s18564_s5 + $0xb8] sm:$0xff] }
 0x79b   : > { %11801 = vmatprep.subr.bf16.mxu0 %v12752_v17 }
 0x79e   : > { %11803 = vmatpush1.bf16.msra.mxu0 %v11802_v53  ;;  %v9614_v53 = vld [vmem:[%s18564_s5 + $0xc8] sm:$0xff] }
 0x79f   : > { %11804 = vmatprep.subr.bf16.mxu0 %v12752_v17 }
 0x7a2   : > { %11806 = vmatpush1.bf16.msra.mxu0 %v11805_v3  ;;  %v9645_v3 = vld [vmem:[%s18564_s5 + $0xd8] sm:$0xff] }
 0x7a3   : > { %4565 = vmatprep.subr.mxu0 %v12750_v0 }
 0x7a6   : > { %9518 = vmatpush1.msk.msra.mxu0 %vm2852_vm3, %v9517_v58 }
 0x7a7   : > { %4582 = vmatmul.mubr.f32.vlgmr.msra.gmra.mrb[18].mxu0 %v15619_v56 }
 0x7a8   : > { %10336 = vmatprep.mubr.msk.f32.mxu0 %vm3030_vm5, %v9520_v59  ;;  %v9651_v59 = vld [vmem:[%s18563_s4 + $0xb08] sm:$0xff] }
 0x87a   : > { %v4583_v61 = vpop.f32.mrb[18].mxu0 }
 0x87b   : > { %v4585_v63 = vpop.f32.mrb[19].mxu0  ;;  %10334 = vmatprep.subr.mxu0 %v4583_v61 }
 0x87c   : > { %10335 = vmatpush3.msra.mxu0 %v4583_v61  ;;  %v9653_v63 = vld [vmem:[%s18563_s4 + $0xb18] sm:$0xff] }
 0x87d   : > { %10337 = vmatmul.mubr.msk.f32.vlgmr.msra.gmra.mrb[10].mxu0 %vm3030_vm5, %v9521_v62  ;;  %10339 = vmatprep.subr.mxu0 %v16615_v41  ;;  %v9652_v62 = vld [vmem:[%s18563_s4 + $0xb10] sm:$0xff] }
 0x87e   : > { %10340 = vmatpush3.msra.mxu0 %v16615_v41  ;;  %10341 = vmatprep.mubr.msk.f32.mxu0 %vm3030_vm5, %v9551_v5  ;;  %v9557_v41 = vld [vmem:[%s18563_s4 + $0x8a8] sm:$0xff]  ;;  %v11958_v5 = vpack.c.bf16 %v9653_v63, %v9652_v62 }
 0x87f   : > { %11843 = vmatprep.subr.bf16.mxu0 %v12752_v17  ;;  %v11847_v15 = vpack.c.bf16 %v9558_v13, %v9557_v41  ;;  %v9657_v41 = vld [vmem:[%s18563_s4 + $0xb38] sm:$0xff]  ;;  %v9723_v62 = vld [vmem:[%s18563_s4 + $0xce8] sm:$0xff] }
 0x885   : > { %10342 = vmatmul.mubr.msk.f32.vlgmr.msra.gmra.mrb[10].mxu0 %vm3030_vm5, %v9552_v8  ;;  %v11961_v8 = vpack.c.bf16 %v9655_v7, %v9654_v6  ;;  %v9725_v6 = vld [vmem:[%s18563_s4 + $0xcf8] sm:$0xff] }
 0x886   : > { %11845 = vmatpush1.bf16.msra.mxu0 %v11844_v12  ;;  %9581 = vmatprep.mubr.msk.f32.mxu0 %vm2848_vm4, %v15624_v57  ;;  %v9656_v12 = vld [vmem:[%s18563_s4 + $0xb30] sm:$0xff] }
 0x887   : > { %11846 = vmatprep.subr.bf16.mxu0 %v12752_v17  ;;  %v11964_v13 = vpack.c.bf16 %v9657_v41, %v9656_v12  ;;  %v9727_v12 = vld [vmem:[%s18563_s4 + $0xd08] sm:$0xff] }
 0x88a   : > { %11848 = vmatpush1.bf16.msra.mxu0 %v11847_v15  ;;  %v9658_v15 = vld [vmem:[%s18563_s4 + $0xb40] sm:$0xff] }
 0x88b   : > { %11849 = vmatprep.subr.bf16.mxu0 %v12752_v17  ;;  %v11967_v10 = vpack.c.bf16 %v9659_v16, %v9658_v15  ;;  %v9729_v15 = vld [vmem:[%s18563_s4 + $0xd18] sm:$0xff] }
 0x88e   : > { %11851 = vmatpush1.bf16.msra.mxu0 %v11850_v4  ;;  %v9660_v4 = vld [vmem:[%s18563_s4 + $0xb50] sm:$0xff] }
 0x88f   : > { %11852 = vmatprep.subr.bf16.mxu0 %v12752_v17  ;;  %v11970_v19 = vpack.c.bf16 %v9661_v21, %v9660_v4  ;;  %v9731_v4 = vld [vmem:[%s18563_s4 + $0xd28] sm:$0xff] }
 0x892   : > { %11854 = vmatpush1.bf16.msra.mxu0 %v11853_v27  ;;  %v9662_v27 = vld [vmem:[%s18563_s4 + $0xb60] sm:$0xff] }
 0x893   : > { %11855 = vmatprep.subr.bf16.mxu0 %v12752_v17  ;;  %v11973_v55 = vpack.c.bf16 %v9663_v29, %v9662_v27  ;;  %v9733_v27 = vld [vmem:[%s18563_s4 + $0xd38] sm:$0xff] }
 0x896   : > { %11857 = vmatpush1.bf16.msra.mxu0 %v11856_v28  ;;  %v9664_v28 = vld [vmem:[%s18563_s4 + $0xb70] sm:$0xff] }
 0x897   : > { %11858 = vmatprep.subr.bf16.mxu0 %v12752_v17  ;;  %v11976_v31 = vpack.c.bf16 %v9665_v30, %v9664_v28  ;;  %v9737_v28 = vld [vmem:[%s18564_s5 + $0x100] sm:$0xff] }
 0x89a   : > { %11860 = vmatpush1.bf16.msra.mxu0 %v11859_v32  ;;  %v9666_v32 = vld [vmem:[%s18563_s4 + $0xb80] sm:$0xff] }
 0x89b   : > { %11861 = vmatprep.subr.bf16.mxu0 %v12752_v17  ;;  %v11979_v60 = vpack.c.bf16 %v9667_v33, %v9666_v32  ;;  %v9768_v33 = vld [vmem:[%s18564_s5 + $0x110] sm:$0xff] }
 0x89e   : > { %11863 = vmatpush1.bf16.msra.mxu0 %v11862_v26  ;;  %v9668_v26 = vld [vmem:[%s18563_s4 + $0xb90] sm:$0xff] }
 0x89f   : > { %11864 = vmatprep.subr.bf16.mxu0 %v12752_v17  ;;  %v11982_v9 = vpack.c.bf16 %v9669_v22, %v9668_v26  ;;  %v9773_v26 = vld [vmem:[%s18563_s4 + $0xe18] sm:$0xff] }
 0x8a0   : > { %v9769_v22 = vld [vmem:[%s18564_s5 + $0x118] sm:$0xff] }
 0x8a2   : > { %11866 = vmatpush1.bf16.msra.mxu0 %v11865_v35  ;;  %v9670_v35 = vld [vmem:[%s18563_s4 + $0xba0] sm:$0xff] }
 0x8a3   : > { %11867 = vmatprep.subr.bf16.mxu0 %v12752_v17  ;;  %v11985_v37 = vpack.c.bf16 %v9671_v36, %v9670_v35  ;;  %v9775_v35 = vld [vmem:[%s18563_s4 + $0xe28] sm:$0xff] }
 0x8a6   : > { %11869 = vmatpush1.bf16.msra.mxu0 %v11868_v40  ;;  %v9672_v40 = vld [vmem:[%s18563_s4 + $0xbb0] sm:$0xf] }
 0x8a7   : > { %11870 = vmatprep.subr.bf16.mxu0 %v12752_v17 }
 0x8aa   : > { %11872 = vmatpush1.bf16.msra.mxu0 %v11871_v44  ;;  %v9676_v44 = vld [vmem:[%s18564_s5 + $0xe8] sm:$0xff] }
 0x8ab   : > { %11873 = vmatprep.subr.bf16.mxu0 %v12752_v17 }
 0x8ae   : > { %11875 = vmatpush1.bf16.msra.mxu0 %v11874_v54  ;;  %v9710_v54 = vld [vmem:[%s18563_s4 + $0xc80] sm:$0xff] }
 0x8af   : > { %11876 = vmatprep.subr.bf16.mxu0 %v12752_v17 }
 0x8b2   : > { %11878 = vmatpush1.bf16.msra.mxu0 %v11877_v46  ;;  %v12024_v46 = vpack.c.bf16 %v9711_v1, %v9710_v54  ;;  %v9781_v54 = vld [vmem:[%s18563_s4 + $0xe58] sm:$0xff] }
 0x8b3   : > { %4935 = vmatprep.subr.mxu0 %v12750_v0 }
 0x8b6   : > { %9580 = vmatpush1.msk.msra.mxu0 %vm2852_vm3, %v9579_v11  ;;  %v9713_v11 = vld [vmem:[%s18563_s4 + $0xc98] sm:$0xff] }
 0x8b7   : > { %4952 = vmatmul.mubr.f32.vlgmr.msra.gmra.mrb[20].mxu0 %v15619_v56 }
 0x8b8   : > { %10346 = vmatprep.mubr.msk.f32.mxu0 %vm3030_vm5, %v9582_v47 }
 0x98a   : > { %v4953_v48 = vpop.f32.mrb[20].mxu0 }
 0x98b   : > { %v4955_v51 = vpop.f32.mrb[21].mxu0  ;;  %10344 = vmatprep.subr.mxu0 %v4953_v48 }
 0x98c   : > { %10345 = vmatpush3.msra.mxu0 %v4953_v48  ;;  %v9714_v48 = vld [vmem:[%s18563_s4 + $0xca0] sm:$0xff] }
 0x98d   : > { %10347 = vmatmul.mubr.msk.f32.vlgmr.msra.gmra.mrb[10].mxu0 %vm3030_vm5, %v9583_v50  ;;  %10349 = vmatprep.subr.mxu0 %v16709_v24  ;;  %v9715_v50 = vld [vmem:[%s18563_s4 + $0xca8] sm:$0xff] }
 0x98e   : > { %10350 = vmatpush3.msra.mxu0 %v16709_v24  ;;  %10351 = vmatprep.mubr.msk.f32.mxu0 %vm3030_vm5, %v9613_v52  ;;  %v9648_v24 = vld [vmem:[%s18563_s4 + $0xaf0] sm:$0xff]  ;;  %v12030_v51 = vpack.c.bf16 %v9715_v50, %v9714_v48  ;;  %v9786_v50 = vld [vmem:[%s18563_s4 + $0xe80] sm:$0xff] }
 0x98f   : > { %10354 = vmatprep.subr.mxu0 %v16867_v34  ;;  %v11952_v58 = vpack.c.bf16 %v9649_v2, %v9648_v24  ;;  %v9716_v52 = vld [vmem:[%s18563_s4 + $0xcb0] sm:$0xff]  ;;  %v9718_v24 = vld [vmem:[%s18563_s4 + $0xcc0] sm:$0xff]  ;;  %v9719_v2 = vld [vmem:[%s18563_s4 + $0xcc8] sm:$0xff] }
 0x995   : > { %10352 = vmatmul.mubr.msk.f32.vlgmr.msra.gmra.mrb[10].mxu0 %vm3030_vm5, %v9614_v53  ;;  %v9717_v53 = vld [vmem:[%s18563_s4 + $0xcb8] sm:$0xff] }
 0x996   : > { %10355 = vmatpush3.msra.mxu0 %v16867_v34  ;;  %10356 = vmatprep.mubr.msk.f32.mxu0 %vm3030_vm5, %v9644_v14  ;;  %v9650_v34 = vld [vmem:[%s18563_s4 + $0xb00] sm:$0xff]  ;;  %v12033_v14 = vpack.c.bf16 %v9717_v53, %v9716_v52  ;;  %v9788_v53 = vld [vmem:[%s18563_s4 + $0xe90] sm:$0xff] }
 0x997   : > { %11951 = vmatprep.subr.bf16.mxu0 %v12752_v17  ;;  %v11955_v61 = vpack.c.bf16 %v9651_v59, %v9650_v34  ;;  %v9721_v34 = vld [vmem:[%s18563_s4 + $0xcd8] sm:$0xff] }
 0x99d   : > { %10357 = vmatmul.mubr.msk.f32.vlgmr.msra.gmra.mrb[10].mxu0 %vm3030_vm5, %v9645_v3  ;;  %v12036_v3 = vpack.c.bf16 %v9719_v2, %v9718_v24  ;;  %v9790_v2 = vld [vmem:[%s18563_s4 + $0xea0] sm:$0xff] }
 0x99e   : > { %11953 = vmatpush1.bf16.msra.mxu0 %v11952_v58  ;;  %9674 = vmatprep.mubr.msk.f32.mxu0 %vm2848_vm4, %v15624_v57  ;;  %v9720_v58 = vld [vmem:[%s18563_s4 + $0xcd0] sm:$0xff] }
 0x99f   : > { %11954 = vmatprep.subr.bf16.mxu0 %v12752_v17  ;;  %v12039_v59 = vpack.c.bf16 %v9721_v34, %v9720_v58  ;;  %v9792_v34 = vld [vmem:[%s18563_s4 + $0xeb0] sm:$0xff] }
 0x9a2   : > { %11956 = vmatpush1.bf16.msra.mxu0 %v11955_v61  ;;  %v9722_v61 = vld [vmem:[%s18563_s4 + $0xce0] sm:$0xff] }
 0x9a3   : > { %11957 = vmatprep.subr.bf16.mxu0 %v12752_v17  ;;  %v12042_v63 = vpack.c.bf16 %v9723_v62, %v9722_v61  ;;  %v9794_v62 = vld [vmem:[%s18563_s4 + $0xec0] sm:$0xff] }
 0x9a6   : > { %11959 = vmatpush1.bf16.msra.mxu0 %v11958_v5  ;;  %v9724_v5 = vld [vmem:[%s18563_s4 + $0xcf0] sm:$0xff] }
 0x9a7   : > { %11960 = vmatprep.subr.bf16.mxu0 %v12752_v17  ;;  %v12045_v7 = vpack.c.bf16 %v9725_v6, %v9724_v5  ;;  %v9796_v6 = vld [vmem:[%s18563_s4 + $0xed0] sm:$0xf] }
 0x9aa   : > { %11962 = vmatpush1.bf16.msra.mxu0 %v11961_v8  ;;  %v9726_v8 = vld [vmem:[%s18563_s4 + $0xd00] sm:$0xff] }
 0x9ab   : > { %11963 = vmatprep.subr.bf16.mxu0 %v12752_v17  ;;  %v12048_v41 = vpack.c.bf16 %v9727_v12, %v9726_v8  ;;  %v9800_v12 = vld [vmem:[%s18564_s5 + $0x128] sm:$0xff] }
 0x9ae   : > { %11965 = vmatpush1.bf16.msra.mxu0 %v11964_v13  ;;  %v9728_v13 = vld [vmem:[%s18563_s4 + $0xd10] sm:$0xff] }
 0x9af   : > { %11966 = vmatprep.subr.bf16.mxu0 %v12752_v17  ;;  %v12051_v16 = vpack.c.bf16 %v9729_v15, %v9728_v13  ;;  %v9830_v13 = vld [vmem:[%s18564_s5 + $0x130] sm:$0xff]  ;;  %v9834_v15 = vld [vmem:[%s18563_s4 + $0xfa0] sm:$0xff] }
 0x9b2   : > { %11968 = vmatpush1.bf16.msra.mxu0 %v11967_v10  ;;  %v9730_v10 = vld [vmem:[%s18563_s4 + $0xd20] sm:$0xff] }
 0x9b3   : > { %11969 = vmatprep.subr.bf16.mxu0 %v12752_v17  ;;  %v12054_v21 = vpack.c.bf16 %v9731_v4, %v9730_v10  ;;  %v9831_v10 = vld [vmem:[%s18564_s5 + $0x138] sm:$0xff] }
 0x9b6   : > { %11971 = vmatpush1.bf16.msra.mxu0 %v11970_v19  ;;  %v9732_v19 = vld [vmem:[%s18563_s4 + $0xd30] sm:$0xff] }
 0x9b7   : > { %11972 = vmatprep.subr.bf16.mxu0 %v12752_v17  ;;  %v12057_v29 = vpack.c.bf16 %v9733_v27, %v9732_v19  ;;  %v9838_v27 = vld [vmem:[%s18563_s4 + $0xfc0] sm:$0xff] }
 0x9ba   : > { %11974 = vmatpush1.bf16.msra.mxu0 %v11973_v55  ;;  %v9734_v55 = vld [vmem:[%s18563_s4 + $0xd40] sm:$0xf] }
 0x9bb   : > { %11975 = vmatprep.subr.bf16.mxu0 %v12752_v17 }
 0x9be   : > { %11977 = vmatpush1.bf16.msra.mxu0 %v11976_v31  ;;  %v9738_v31 = vld [vmem:[%s18564_s5 + $0x108] sm:$0xff] }
 0x9bf   : > { %11978 = vmatprep.subr.bf16.mxu0 %v12752_v17 }
 0x9c2   : > { %11980 = vmatpush1.bf16.msra.mxu0 %v11979_v60  ;;  %v9772_v60 = vld [vmem:[%s18563_s4 + $0xe10] sm:$0xff] }
 0x9c3   : > { %11981 = vmatprep.subr.bf16.mxu0 %v12752_v17 }
 0x9c6   : > { %11983 = vmatpush1.bf16.msra.mxu0 %v11982_v9  ;;  %v12096_v9 = vpack.c.bf16 %v9773_v26, %v9772_v60  ;;  %v9844_v26 = vld [vmem:[%s18563_s4 + $0xff0] sm:$0xff] }
 0x9c7   : > { %11984 = vmatprep.subr.bf16.mxu0 %v12752_v17 }
 0x9ca   : > { %11986 = vmatpush1.bf16.msra.mxu0 %v11985_v37  ;;  %v9776_v37 = vld [vmem:[%s18563_s4 + $0xe30] sm:$0xff] }
 0x9cb   : > { %5490 = vmatprep.subr.mxu0 %v12750_v0 }
 0x9ce   : > { %9673 = vmatpush1.msk.msra.mxu0 %vm2852_vm3, %v9672_v40  ;;  %v9777_v40 = vld [vmem:[%s18563_s4 + $0xe38] sm:$0xff] }
 0x9cf   : > { %5507 = vmatmul.mubr.f32.vlgmr.msra.gmra.mrb[22].mxu0 %v15619_v56 }
 0x9d0   : > { %10361 = vmatprep.mubr.msk.f32.mxu0 %vm3030_vm5, %v9675_v42  ;;  %v12102_v42 = vpack.c.bf16 %v9777_v40, %v9776_v37  ;;  %v9848_v37 = vld [vmem:[%s18563_s4 + $0x1010] sm:$0xff]  ;;  %v9849_v40 = vld [vmem:[%s18563_s4 + $0x1018] sm:$0xff] }
 0xaa2   : > { %v5508_v43 = vpop.f32.mrb[22].mxu0 }
 0xaa3   : > { %v5510_v49 = vpop.f32.mrb[23].mxu0  ;;  %10359 = vmatprep.subr.mxu0 %v5508_v43 }
 0xaa4   : > { %10360 = vmatpush3.msra.mxu0 %v5508_v43  ;;  %v9778_v43 = vld [vmem:[%s18563_s4 + $0xe40] sm:$0xff] }
 0xaa5   : > { %10362 = vmatmul.mubr.msk.f32.vlgmr.msra.gmra.mrb[10].mxu0 %vm3030_vm5, %v9676_v44  ;;  %10364 = vmatprep.subr.mxu0 %v16967_v18  ;;  %v9779_v44 = vld [vmem:[%s18563_s4 + $0xe48] sm:$0xff] }
 0xaa6   : > { %10365 = vmatpush3.msra.mxu0 %v16967_v18  ;;  %10366 = vmatprep.mubr.msk.f32.mxu0 %vm3030_vm5, %v9706_v39  ;;  %v9712_v18 = vld [vmem:[%s18563_s4 + $0xc90] sm:$0xff]  ;;  %v12105_v49 = vpack.c.bf16 %v9779_v44, %v9778_v43  ;;  %v9850_v43 = vld [vmem:[%s18563_s4 + $0x1020] sm:$0xff]  ;;  %v9851_v44 = vld [vmem:[%s18563_s4 + $0x1028] sm:$0xff] }
 0xaa7   : > { %12023 = vmatprep.subr.bf16.mxu0 %v12752_v17  ;;  %v12027_v47 = vpack.c.bf16 %v9713_v11, %v9712_v18  ;;  %v9780_v39 = vld [vmem:[%s18563_s4 + $0xe50] sm:$0xff] }
 0xaa8   : > { %v12108_v1 = vpack.c.bf16 %v9781_v54, %v9780_v39  ;;  %v9784_v11 = vld [vmem:[%s18563_s4 + $0xe70] sm:$0xff]  ;;  %v9853_v54 = vld [vmem:[%s18563_s4 + $0x1038] sm:$0xff] }
 0xaa9   : > { %v9852_v39 = vld [vmem:[%s18563_s4 + $0x1030] sm:$0xff] }
 0xaad   : > { %10367 = vmatmul.mubr.msk.f32.vlgmr.msra.gmra.mrb[10].mxu0 %vm3030_vm5, %v9707_v45  ;;  %v9782_v45 = vld [vmem:[%s18563_s4 + $0xe60] sm:$0xff] }
 0xaae   : > { %12025 = vmatpush1.bf16.msra.mxu0 %v12024_v46  ;;  %9736 = vmatprep.mubr.msk.f32.mxu0 %vm2848_vm4, %v15624_v57  ;;  %v9783_v46 = vld [vmem:[%s18563_s4 + $0xe68] sm:$0xff] }
 0xaaf   : > { %12026 = vmatprep.subr.bf16.mxu0 %v12752_v17  ;;  %v12111_v18 = vpack.c.bf16 %v9783_v46, %v9782_v45  ;;  %v9854_v45 = vld [vmem:[%s18563_s4 + $0x1040] sm:$0xff]  ;;  %v9855_v46 = vld [vmem:[%s18563_s4 + $0x1048] sm:$0xff] }
 0xab2   : > { %12028 = vmatpush1.bf16.msra.mxu0 %v12027_v47  ;;  %v9785_v47 = vld [vmem:[%s18563_s4 + $0xe78] sm:$0xff] }
 0xab3   : > { %12029 = vmatprep.subr.bf16.mxu0 %v12752_v17  ;;  %v12114_v48 = vpack.c.bf16 %v9785_v47, %v9784_v11  ;;  %v9856_v11 = vld [vmem:[%s18563_s4 + $0x1050] sm:$0xff]  ;;  %v9857_v47 = vld [vmem:[%s18563_s4 + $0x1058] sm:$0xff] }
 0xab6   : > { %12031 = vmatpush1.bf16.msra.mxu0 %v12030_v51  ;;  %v9787_v51 = vld [vmem:[%s18563_s4 + $0xe88] sm:$0xff] }
 0xab7   : > { %12032 = vmatprep.subr.bf16.mxu0 %v12752_v17  ;;  %v12117_v52 = vpack.c.bf16 %v9787_v51, %v9786_v50  ;;  %v9858_v50 = vld [vmem:[%s18563_s4 + $0x1060] sm:$0xf] }
 0xab8   : > { %v9861_v51 = vld [vmem:[%s18564_s5 + $0x140] sm:$0xff] }
 0xaba   : > { %12034 = vmatpush1.bf16.msra.mxu0 %v12033_v14  ;;  %v9789_v14 = vld [vmem:[%s18563_s4 + $0xe98] sm:$0xff] }
 0xabb   : > { %12035 = vmatprep.subr.bf16.mxu0 %v12752_v17  ;;  %v12120_v24 = vpack.c.bf16 %v9789_v14, %v9788_v53  ;;  %v9862_v53 = vld [vmem:[%s18564_s5 + $0x148] sm:$0xff] }
 0xabe   : > { %12037 = vmatpush1.bf16.msra.mxu0 %v12036_v3  ;;  %v9791_v3 = vld [vmem:[%s18563_s4 + $0xea8] sm:$0xff] }
 0xabf   : > { %12038 = vmatprep.subr.bf16.mxu0 %v12752_v17  ;;  %v12123_v58 = vpack.c.bf16 %v9791_v3, %v9790_v2  ;;  %v9896_v2 = vld [vmem:[%s18563_s4 + $0x1130] sm:$0xff]  ;;  %v9897_v3 = vld [vmem:[%s18563_s4 + $0x1138] sm:$0xff] }
 0xac2   : > { %12040 = vmatpush1.bf16.msra.mxu0 %v12039_v59  ;;  %v9793_v59 = vld [vmem:[%s18563_s4 + $0xeb8] sm:$0xff] }
 0xac3   : > { %12041 = vmatprep.subr.bf16.mxu0 %v12752_v17  ;;  %v12126_v61 = vpack.c.bf16 %v9793_v59, %v9792_v34  ;;  %v12240_v34 = vpack.c.bf16 %v9897_v3, %v9896_v2  ;;  %v9899_v59 = vld [vmem:[%s18563_s4 + $0x1148] sm:$0xff]  ;;  %v9970_v3 = vld [vmem:[%s18563_s4 + $0x1320] sm:$0xff] }
 0xac6   : > { %12043 = vmatpush1.bf16.msra.mxu0 %v12042_v63  ;;  %v9795_v63 = vld [vmem:[%s18563_s4 + $0xec8] sm:$0xff] }
 0xac7   : > { %12044 = vmatprep.subr.bf16.mxu0 %v12752_v17  ;;  %v12129_v5 = vpack.c.bf16 %v9795_v63, %v9794_v62  ;;  %v9900_v62 = vld [vmem:[%s18563_s4 + $0x1150] sm:$0xff]  ;;  %v9901_v63 = vld [vmem:[%s18563_s4 + $0x1158] sm:$0xff] }
 0xaca   : > { %12046 = vmatpush1.bf16.msra.mxu0 %v12045_v7  ;;  %v9799_v7 = vld [vmem:[%s18564_s5 + $0x120] sm:$0xff] }
 0xacb   : > { %12047 = vmatprep.subr.bf16.mxu0 %v12752_v17 }
 0xace   : > { %12049 = vmatpush1.bf16.msra.mxu0 %v12048_v41 }
 0xacf   : > { %12050 = vmatprep.subr.bf16.mxu0 %v12752_v17 }
 0xad2   : > { %12052 = vmatpush1.bf16.msra.mxu0 %v12051_v16  ;;  %v9835_v16 = vld [vmem:[%s18563_s4 + $0xfa8] sm:$0xff] }
 0xad3   : > { %12053 = vmatprep.subr.bf16.mxu0 %v12752_v17  ;;  %v12168_v4 = vpack.c.bf16 %v9835_v16, %v9834_v15  ;;  %v9906_v15 = vld [vmem:[%s18563_s4 + $0x1180] sm:$0xff]  ;;  %v9907_v16 = vld [vmem:[%s18563_s4 + $0x1188] sm:$0xff] }
 0xad6   : > { %12055 = vmatpush1.bf16.msra.mxu0 %v12054_v21  ;;  %v9837_v21 = vld [vmem:[%s18563_s4 + $0xfb8] sm:$0xff] }
 0xad7   : > { %12056 = vmatprep.subr.bf16.mxu0 %v12752_v17 }
 0xada   : > { %12058 = vmatpush1.bf16.msra.mxu0 %v12057_v29  ;;  %v9839_v29 = vld [vmem:[%s18563_s4 + $0xfc8] sm:$0xff] }
 0xadb   : > { %5860 = vmatprep.subr.mxu0 %v12750_v0 }
 0xade   : > { %9735 = vmatpush1.msk.msra.mxu0 %vm2852_vm3, %v9734_v55  ;;  %v12174_v55 = vpack.c.bf16 %v9839_v29, %v9838_v27  ;;  %v9911_v27 = vld [vmem:[%s18563_s4 + $0x11a8] sm:$0xff] }
 0xadf   : > { %5877 = vmatmul.mubr.f32.vlgmr.msra.gmra.mrb[24].mxu0 %v15619_v56 }
 0xae0   : > { %10371 = vmatprep.mubr.msk.f32.mxu0 %vm3030_vm5, %v9737_v28  ;;  %v9840_v28 = vld [vmem:[%s18563_s4 + $0xfd0] sm:$0xff] }
 0xbb2   : > { %v5878_v30 = vpop.f32.mrb[24].mxu0 }
 0xbb3   : > { %v5880_v32 = vpop.f32.mrb[25].mxu0  ;;  %10369 = vmatprep.subr.mxu0 %v5878_v30 }
 0xbb4   : > { %10370 = vmatpush3.msra.mxu0 %v5878_v30  ;;  %v9841_v30 = vld [vmem:[%s18563_s4 + $0xfd8] sm:$0xff]  ;;  %v9842_v32 = vld [vmem:[%s18563_s4 + $0xfe0] sm:$0xff] }
 0xbb5   : > { %10372 = vmatmul.mubr.msk.f32.vlgmr.msra.gmra.mrb[10].mxu0 %vm3030_vm5, %v9738_v31  ;;  %10374 = vmatprep.subr.mxu0 %v16969_v20  ;;  %v12177_v31 = vpack.c.bf16 %v9841_v30, %v9840_v28  ;;  %v9913_v28 = vld [vmem:[%s18563_s4 + $0x11b8] sm:$0xff] }
 0xbb6   : > { %10375 = vmatpush3.msra.mxu0 %v16969_v20  ;;  %10376 = vmatprep.mubr.msk.f32.mxu0 %vm3030_vm5, %v9768_v33  ;;  %v9774_v20 = vld [vmem:[%s18563_s4 + $0xe20] sm:$0xff]  ;;  %v9843_v33 = vld [vmem:[%s18563_s4 + $0xfe8] sm:$0xff] }
 0xbb7   : > { %12095 = vmatprep.subr.bf16.mxu0 %v12752_v17  ;;  %v12099_v36 = vpack.c.bf16 %v9775_v35, %v9774_v20  ;;  %v12180_v60 = vpack.c.bf16 %v9843_v33, %v9842_v32  ;;  %v9846_v20 = vld [vmem:[%s18563_s4 + $0x1000] sm:$0xff]  ;;  %v9847_v35 = vld [vmem:[%s18563_s4 + $0x1008] sm:$0xff] }
 0xbb8   : > { %v9915_v32 = vld [vmem:[%s18563_s4 + $0x11c8] sm:$0xff] }
 0xbbd   : > { %10377 = vmatmul.mubr.msk.f32.vlgmr.msra.gmra.mrb[10].mxu0 %vm3030_vm5, %v9769_v22  ;;  %v9845_v22 = vld [vmem:[%s18563_s4 + $0xff8] sm:$0xff] }
 0xbbe   : > { %12097 = vmatpush1.bf16.msra.mxu0 %v12096_v9  ;;  %9798 = vmatprep.mubr.msk.f32.mxu0 %vm2848_vm4, %v15624_v57  ;;  %v12183_v9 = vpack.c.bf16 %v9845_v22, %v9844_v26  ;;  %v9917_v26 = vld [vmem:[%s18563_s4 + $0x11d8] sm:$0xff] }
 0xbbf   : > { %12098 = vmatprep.subr.bf16.mxu0 %v12752_v17 }
 0xbc2   : > { %12100 = vmatpush1.bf16.msra.mxu0 %v12099_v36  ;;  %v12186_v36 = vpack.c.bf16 %v9847_v35, %v9846_v20  ;;  %v9919_v20 = vld [vmem:[%s18563_s4 + $0x11e8] sm:$0xff] }
 0xbc3   : > { %12101 = vmatprep.subr.bf16.mxu0 %v12752_v17 }
 0xbc6   : > { %12103 = vmatpush1.bf16.msra.mxu0 %v12102_v42  ;;  %v12189_v42 = vpack.c.bf16 %v9849_v40, %v9848_v37  ;;  %v9923_v37 = vld [vmem:[%s18564_s5 + $0x160] sm:$0xff] }
 0xbc7   : > { %12104 = vmatprep.subr.bf16.mxu0 %v12752_v17 }
 0xbca   : > { %12106 = vmatpush1.bf16.msra.mxu0 %v12105_v49  ;;  %v12192_v49 = vpack.c.bf16 %v9851_v44, %v9850_v43  ;;  %v9954_v44 = vld [vmem:[%s18564_s5 + $0x170] sm:$0xff] }
 0xbcb   : > { %12107 = vmatprep.subr.bf16.mxu0 %v12752_v17 }
 0xbce   : > { %12109 = vmatpush1.bf16.msra.mxu0 %v12108_v1  ;;  %v12195_v1 = vpack.c.bf16 %v9853_v54, %v9852_v39  ;;  %v9959_v39 = vld [vmem:[%s18563_s4 + $0x12c8] sm:$0xff]  ;;  %v9955_v54 = vld [vmem:[%s18564_s5 + $0x178] sm:$0xff] }
 0xbcf   : > { %12110 = vmatprep.subr.bf16.mxu0 %v12752_v17 }
 0xbd2   : > { %12112 = vmatpush1.bf16.msra.mxu0 %v12111_v18  ;;  %v12198_v18 = vpack.c.bf16 %v9855_v46, %v9854_v45  ;;  %v9961_v45 = vld [vmem:[%s18563_s4 + $0x12d8] sm:$0xff] }
 0xbd3   : > { %12113 = vmatprep.subr.bf16.mxu0 %v12752_v17 }
 0xbd6   : > { %12115 = vmatpush1.bf16.msra.mxu0 %v12114_v48  ;;  %v12201_v48 = vpack.c.bf16 %v9857_v47, %v9856_v11  ;;  %v9963_v11 = vld [vmem:[%s18563_s4 + $0x12e8] sm:$0xff] }
 0xbd7   : > { %12116 = vmatprep.subr.bf16.mxu0 %v12752_v17 }
 0xbda   : > { %12118 = vmatpush1.bf16.msra.mxu0 %v12117_v52 }
 0xbdb   : > { %12119 = vmatprep.subr.bf16.mxu0 %v12752_v17 }
 0xbde   : > { %12121 = vmatpush1.bf16.msra.mxu0 %v12120_v24  ;;  %v9892_v24 = vld [vmem:[%s18564_s5 + $0x150] sm:$0xff] }
 0xbdf   : > { %12122 = vmatprep.subr.bf16.mxu0 %v12752_v17 }
 0xbe2   : > { %12124 = vmatpush1.bf16.msra.mxu0 %v12123_v58  ;;  %v9893_v58 = vld [vmem:[%s18564_s5 + $0x158] sm:$0xff] }
 0xbe3   : > { %12125 = vmatprep.subr.bf16.mxu0 %v12752_v17 }
 0xbe6   : > { %12127 = vmatpush1.bf16.msra.mxu0 %v12126_v61 }
 0xbe7   : > { %12128 = vmatprep.subr.bf16.mxu0 %v12752_v17 }
 0xbea   : > { %12130 = vmatpush1.bf16.msra.mxu0 %v12129_v5  ;;  %v12246_v5 = vpack.c.bf16 %v9901_v63, %v9900_v62  ;;  %v9974_v62 = vld [vmem:[%s18563_s4 + $0x1340] sm:$0xff]  ;;  %v9975_v63 = vld [vmem:[%s18563_s4 + $0x1348] sm:$0xff] }
 0xbeb   : > { %6230 = vmatprep.subr.mxu0 %v12750_v0 }
 0xbee   : > { %9797 = vmatpush1.msk.msra.mxu0 %vm2852_vm3, %v9796_v6  ;;  %v9902_v6 = vld [vmem:[%s18563_s4 + $0x1160] sm:$0xff] }
 0xbef   : > { %6247 = vmatmul.mubr.f32.vlgmr.msra.gmra.mrb[26].mxu0 %v15619_v56 }
 0xbf0   : > { %10381 = vmatprep.mubr.msk.f32.mxu0 %vm3030_vm5, %v9799_v7  ;;  %v9903_v7 = vld [vmem:[%s18563_s4 + $0x1168] sm:$0xff] }
 0xcc2   : > { %v6248_v8 = vpop.f32.mrb[26].mxu0 }
 0xcc3   : > { %v6250_v41 = vpop.f32.mrb[27].mxu0  ;;  %10379 = vmatprep.subr.mxu0 %v6248_v8 }
 0xcc4   : > { %10380 = vmatpush3.msra.mxu0 %v6248_v8  ;;  %v12249_v8 = vpack.c.bf16 %v9903_v7, %v9902_v6  ;;  %v9905_v41 = vld [vmem:[%s18563_s4 + $0x1178] sm:$0xff]  ;;  %v9976_v6 = vld [vmem:[%s18563_s4 + $0x1350] sm:$0xff] }
 0xcc5   : > { %10382 = vmatmul.mubr.msk.f32.vlgmr.msra.gmra.mrb[10].mxu0 %vm3030_vm5, %v9800_v12  ;;  %10384 = vmatprep.subr.mxu0 %v16975_v23  ;;  %v9904_v12 = vld [vmem:[%s18563_s4 + $0x1170] sm:$0xff]  ;;  %v9977_v7 = vld [vmem:[%s18563_s4 + $0x1358] sm:$0xff] }
 0xcc6   : > { %10385 = vmatpush3.msra.mxu0 %v16975_v23  ;;  %10386 = vmatprep.mubr.msk.f32.mxu0 %vm3030_vm5, %v9830_v13  ;;  %v9836_v23 = vld [vmem:[%s18563_s4 + $0xfb0] sm:$0xff]  ;;  %v12252_v13 = vpack.c.bf16 %v9905_v41, %v9904_v12  ;;  %v9978_v12 = vld [vmem:[%s18563_s4 + $0x1360] sm:$0xff]  ;;  %v9979_v41 = vld [vmem:[%s18563_s4 + $0x1368] sm:$0xff] }
 0xcc7   : > { %12167 = vmatprep.subr.bf16.mxu0 %v12752_v17  ;;  %v12171_v19 = vpack.c.bf16 %v9837_v21, %v9836_v23  ;;  %v9909_v23 = vld [vmem:[%s18563_s4 + $0x1198] sm:$0xff] }
 0xccd   : > { %10387 = vmatmul.mubr.msk.f32.vlgmr.msra.gmra.mrb[10].mxu0 %vm3030_vm5, %v9831_v10  ;;  %v12255_v10 = vpack.c.bf16 %v9907_v16, %v9906_v15  ;;  %v9980_v15 = vld [vmem:[%s18563_s4 + $0x1370] sm:$0xff]  ;;  %v9981_v16 = vld [vmem:[%s18563_s4 + $0x1378] sm:$0xff] }
 0xcce   : > { %12169 = vmatpush1.bf16.msra.mxu0 %v12168_v4  ;;  %9860 = vmatprep.mubr.msk.f32.mxu0 %vm2848_vm4, %v15624_v57  ;;  %v9908_v4 = vld [vmem:[%s18563_s4 + $0x1190] sm:$0xff] }
 0xccf   : > { %12170 = vmatprep.subr.bf16.mxu0 %v12752_v17  ;;  %v12258_v21 = vpack.c.bf16 %v9909_v23, %v9908_v4  ;;  %v9982_v4 = vld [vmem:[%s18563_s4 + $0x1380] sm:$0xf] }
 0xcd0   : > { %v9985_v23 = vld [vmem:[%s18564_s5 + $0x180] sm:$0xff] }
 0xcd2   : > { %12172 = vmatpush1.bf16.msra.mxu0 %v12171_v19  ;;  %v9910_v19 = vld [vmem:[%s18563_s4 + $0x11a0] sm:$0xff] }
 0xcd3   : > { %12173 = vmatprep.subr.bf16.mxu0 %v12752_v17  ;;  %v12261_v29 = vpack.c.bf16 %v9911_v27, %v9910_v19  ;;  %v7464_v19 = vld [vmem:[%s18566_s7] sm:$0xff]  ;;  %v7465_v27 = vld [vmem:[%s18566_s7 + $0x8] sm:$0xff] }
 0xcd6   : > { %12175 = vmatpush1.bf16.msra.mxu0 %v12174_v55  ;;  %v9912_v55 = vld [vmem:[%s18563_s4 + $0x11b0] sm:$0xff] }
 0xcd7   : > { %12176 = vmatprep.subr.bf16.mxu0 %v12752_v17  ;;  %v12264_v30 = vpack.c.bf16 %v9913_v28, %v9912_v55  ;;  %v7467_v55 = vld [vmem:[%s18566_s7 + $0x18] sm:$0xff] }
 0xcda   : > { %12178 = vmatpush1.bf16.msra.mxu0 %v12177_v31  ;;  %v9914_v31 = vld [vmem:[%s18563_s4 + $0x11c0] sm:$0xff] }
 0xcdb   : > { %12179 = vmatprep.subr.bf16.mxu0 %v12752_v17  ;;  %v12267_v33 = vpack.c.bf16 %v9915_v32, %v9914_v31  ;;  %v7469_v31 = vld [vmem:[%s18566_s7 + $0x28] sm:$0xff] }
 0xcde   : > { %12181 = vmatpush1.bf16.msra.mxu0 %v12180_v60  ;;  %v9916_v60 = vld [vmem:[%s18563_s4 + $0x11d0] sm:$0xff] }
 0xcdf   : > { %12182 = vmatprep.subr.bf16.mxu0 %v12752_v17  ;;  %v12270_v22 = vpack.c.bf16 %v9917_v26, %v9916_v60  ;;  %v7471_v60 = vld [vmem:[%s18566_s7 + $0x38] sm:$0xff] }
 0xce2   : > { %12184 = vmatpush1.bf16.msra.mxu0 %v12183_v9  ;;  %v9918_v9 = vld [vmem:[%s18563_s4 + $0x11e0] sm:$0xff] }
 0xce3   : > { %12185 = vmatprep.subr.bf16.mxu0 %v12752_v17  ;;  %v12273_v35 = vpack.c.bf16 %v9919_v20, %v9918_v9  ;;  %v7473_v9 = vld [vmem:[%s18566_s7 + $0x48] sm:$0xff] }
 0xce6   : > { %12187 = vmatpush1.bf16.msra.mxu0 %v12186_v36  ;;  %v9920_v36 = vld [vmem:[%s18563_s4 + $0x11f0] sm:$0xf] }
 0xce7   : > { %12188 = vmatprep.subr.bf16.mxu0 %v12752_v17 }
 0xcea   : > { %12190 = vmatpush1.bf16.msra.mxu0 %v12189_v42  ;;  %v9924_v42 = vld [vmem:[%s18564_s5 + $0x168] sm:$0xff] }
 0xceb   : > { %12191 = vmatprep.subr.bf16.mxu0 %v12752_v17 }
 0xcee   : > { %12193 = vmatpush1.bf16.msra.mxu0 %v12192_v49  ;;  %v9958_v49 = vld [vmem:[%s18563_s4 + $0x12c0] sm:$0xff] }
 0xcef   : > { %12194 = vmatprep.subr.bf16.mxu0 %v12752_v17 }
 0xcf2   : > { %12196 = vmatpush1.bf16.msra.mxu0 %v12195_v1  ;;  %v12312_v1 = vpack.c.bf16 %v9959_v39, %v9958_v49 }
 0xcf3   : > { %12197 = vmatprep.subr.bf16.mxu0 %v12752_v17 }
 0xcf6   : > { %12199 = vmatpush1.bf16.msra.mxu0 %v12198_v18  ;;  %v9962_v18 = vld [vmem:[%s18563_s4 + $0x12e0] sm:$0xff] }
 0xcf7   : > { %12200 = vmatprep.subr.bf16.mxu0 %v12752_v17  ;;  %v12318_v47 = vpack.c.bf16 %v9963_v11, %v9962_v18  ;;  %v10016_v11 = vld [vmem:[%s18566_s7 + $0x110] sm:$0xff] }
 0xcfa   : > { %12202 = vmatpush1.bf16.msra.mxu0 %v12201_v48  ;;  %v9964_v48 = vld [vmem:[%s18563_s4 + $0x12f0] sm:$0xff] }
 0xcfb   : > { %6600 = vmatprep.subr.mxu0 %v12750_v0 }
 0xcfe   : > { %9859 = vmatpush1.msk.msra.mxu0 %vm2852_vm3, %v9858_v50 }
 0xcff   : > { %6617 = vmatmul.mubr.f32.vlgmr.msra.gmra.mrb[28].mxu0 %v15619_v56 }
 0xd00   : > { %10391 = vmatprep.mubr.msk.f32.mxu0 %vm3030_vm5, %v9861_v51  ;;  %v9966_v51 = vld [vmem:[%s18563_s4 + $0x1300] sm:$0xff] }
 0xdd2   : > { %v6618_v52 = vpop.f32.mrb[28].mxu0 }
 0xdd3   : > { %v6620_v14 = vpop.f32.mrb[29].mxu0  ;;  %10389 = vmatprep.subr.mxu0 %v6618_v52 }
 0xdd4   : > { %10390 = vmatpush3.msra.mxu0 %v6618_v52  ;;  %v9967_v52 = vld [vmem:[%s18563_s4 + $0x1308] sm:$0xff]  ;;  %v9968_v14 = vld [vmem:[%s18563_s4 + $0x1310] sm:$0xff] }
 0xdd5   : > { %10392 = vmatmul.mubr.msk.f32.vlgmr.msra.gmra.mrb[10].mxu0 %vm3030_vm5, %v9862_v53  ;;  %10394 = vmatprep.subr.mxu0 %v16977_v25  ;;  %v12324_v53 = vpack.c.bf16 %v9967_v52, %v9966_v51  ;;  %v10018_v52 = vld [vmem:[%s18566_s7 + $0x120] sm:$0xff] }
 0xdd6   : > { %10395 = vmatpush3.msra.mxu0 %v16977_v25  ;;  %10396 = vmatprep.mubr.msk.f32.mxu0 %vm3030_vm5, %v9892_v24  ;;  %v9898_v25 = vld [vmem:[%s18563_s4 + $0x1140] sm:$0xff]  ;;  %v9969_v24 = vld [vmem:[%s18563_s4 + $0x1318] sm:$0xff] }
 0xdd7   : > { %12239 = vmatprep.subr.bf16.mxu0 %v12752_v17  ;;  %v12243_v61 = vpack.c.bf16 %v9899_v59, %v9898_v25  ;;  %v12327_v2 = vpack.c.bf16 %v9969_v24, %v9968_v14  ;;  %v9972_v25 = vld [vmem:[%s18563_s4 + $0x1330] sm:$0xff]  ;;  %v9973_v59 = vld [vmem:[%s18563_s4 + $0x1338] sm:$0xff]  ;;  %v7476_v24 = vld [vmem:[%s18566_s7 + $0x60] sm:$0xf] }
 0xddd   : > { %10397 = vmatmul.mubr.msk.f32.vlgmr.msra.gmra.mrb[10].mxu0 %vm3030_vm5, %v9893_v58  ;;  %v9971_v58 = vld [vmem:[%s18563_s4 + $0x1328] sm:$0xff] }
 0xdde   : > { %12241 = vmatpush1.bf16.msra.mxu0 %v12240_v34  ;;  %9922 = vmatprep.mubr.msk.f32.mxu0 %vm2848_vm4, %v15624_v57  ;;  %v12330_v34 = vpack.c.bf16 %v9971_v58, %v9970_v3  ;;  %v9993_v3 = vld [vmem:[%s18566_s7 + $0x70] sm:$0xff] }
 0xddf   : > { %12242 = vmatprep.subr.bf16.mxu0 %v12752_v17  ;;  %v10020_v58 = vld [vmem:[%s18566_s7 + $0x130] sm:$0xf] }
 0xde2   : > { %12244 = vmatpush1.bf16.msra.mxu0 %v12243_v61  ;;  %v12333_v61 = vpack.c.bf16 %v9973_v59, %v9972_v25 }
 0xde3   : > { %12245 = vmatprep.subr.bf16.mxu0 %v12752_v17 }
 0xde6   : > { %12247 = vmatpush1.bf16.msra.mxu0 %v12246_v5  ;;  %v12336_v5 = vpack.c.bf16 %v9975_v63, %v9974_v62 }
 0xde7   : > { %12248 = vmatprep.subr.bf16.mxu0 %v12752_v17 }
 0xdea   : > { %12250 = vmatpush1.bf16.msra.mxu0 %v12249_v8  ;;  %v12339_v8 = vpack.c.bf16 %v9977_v7, %v9976_v6  ;;  %v9994_v6 = vld [vmem:[%s18566_s7 + $0x78] sm:$0xff]  ;;  %v9995_v7 = vld [vmem:[%s18566_s7 + $0x80] sm:$0xff] }
 0xdeb   : > { %12251 = vmatprep.subr.bf16.mxu0 %v12752_v17 }
 0xdee   : > { %12253 = vmatpush1.bf16.msra.mxu0 %v12252_v13  ;;  %v12342_v13 = vpack.c.bf16 %v9979_v41, %v9978_v12  ;;  %v12375_v41 = vpack.c.bf16 %v9995_v7, %v9994_v6 }
 0xdef   : > { %12254 = vmatprep.subr.bf16.mxu0 %v12752_v17 }
 0xdf2   : > { %12256 = vmatpush1.bf16.msra.mxu0 %v12255_v10  ;;  %v12345_v10 = vpack.c.bf16 %v9981_v16, %v9980_v15  ;;  %v9997_v15 = vld [vmem:[%s18566_s7 + $0x90] sm:$0xff] }
 0xdf3   : > { %12257 = vmatprep.subr.bf16.mxu0 %v12752_v17 }
 0xdf6   : > { %12259 = vmatpush1.bf16.msra.mxu0 %v12258_v21  ;;  %v7449_v21 = vld [vmem:[%s18565_s6 + $0x8] sm:$0xff] }
 0xdf7   : > { %12260 = vmatprep.subr.bf16.mxu0 %v12752_v17  ;;  %7457 = vperm.xlu1 %12685, %v7449_v21   ;;  %v10000_v21 = vld [vmem:[%s18566_s7 + $0xa8] sm:$0xff] }
 0xdfa   : > { %12262 = vmatpush1.bf16.msra.mxu0 %v12261_v29  ;;  %v7466_v29 = vld [vmem:[%s18566_s7 + $0x10] sm:$0xff] }
 0xdfb   : > { %12263 = vmatprep.subr.bf16.mxu0 %v12752_v17  ;;  %v12351_v28 = vpack.c.bf16 %v7467_v55, %v7466_v29  ;;  %v10003_v29 = vld [vmem:[%s18566_s7 + $0xc0] sm:$0xff] }
 0xdfe   : > { %12265 = vmatpush1.bf16.msra.mxu0 %v12264_v30  ;;  %v7468_v30 = vld [vmem:[%s18566_s7 + $0x20] sm:$0xff] }
 0xdff   : > { %12266 = vmatprep.subr.bf16.mxu0 %v12752_v17  ;;  %v12355_v32 = vpack.c.bf16 %v7469_v31, %v7468_v30  ;;  %v10024_v30 = vld [vmem:[%s18566_s7 + $0x138] sm:$0xff]  ;;  %v10025_v31 = vld [vmem:[%s18566_s7 + $0x140] sm:$0xff] }
 0xe02   : > { %12268 = vmatpush1.bf16.msra.mxu0 %v12267_v33  ;;  %v7470_v33 = vld [vmem:[%s18566_s7 + $0x30] sm:$0xff] }
 0xe03   : > { %12269 = vmatprep.subr.bf16.mxu0 %v12752_v17  ;;  %v12359_v26 = vpack.c.bf16 %v7471_v60, %v7470_v33  ;;  %v10027_v33 = vld [vmem:[%s18566_s7 + $0x150] sm:$0xff]  ;;  %v12419_v60 = vpack.c.bf16 %v10025_v31, %v10024_v30  ;;  %v8035_v31 = vld [vmem:[%s18568_s9 + $0x8] sm:$0xff] }
 0xe06   : > { %12271 = vmatpush1.bf16.msra.mxu0 %v12270_v22  ;;  %v7472_v22 = vld [vmem:[%s18566_s7 + $0x40] sm:$0xff] }
 0xe07   : > { %12272 = vmatprep.subr.bf16.mxu0 %v12752_v17  ;;  %v12363_v20 = vpack.c.bf16 %v7473_v9, %v7472_v22  ;;  %v10028_v22 = vld [vmem:[%s18566_s7 + $0x158] sm:$0xff]  ;;  %v10029_v9 = vld [vmem:[%s18566_s7 + $0x160] sm:$0xff] }
 0xe0a   : > { %12274 = vmatpush1.bf16.msra.mxu0 %v12273_v35  ;;  %v10008_v35 = vld [vmem:[%s18566_s7 + $0xd0] sm:$0xff] }
 0xe0b   : > { %6970 = vmatprep.subr.mxu0 %v12750_v0 }
 0xe0e   : > { %9921 = vmatpush1.msk.msra.mxu0 %vm2852_vm3, %v9920_v36  ;;  %v10009_v36 = vld [vmem:[%s18566_s7 + $0xd8] sm:$0xff] }
 0xe0f   : > { %6987 = vmatmul.mubr.f32.vlgmr.msra.gmra.mrb[30].mxu0 %v15619_v56 }
 0xe10   : > { %10401 = vmatprep.mubr.msk.f32.mxu0 %vm3030_vm5, %v9923_v37  ;;  %v10010_v37 = vld [vmem:[%s18566_s7 + $0xe0] sm:$0xff] }
 0xe76   : > { %v7458_v25 = vpop.permute.xlu1 %7457 }
 0xee2   : > { %v6988_v40 = vpop.f32.mrb[30].mxu0 }
 0xee3   : > { %v6990_v43 = vpop.f32.mrb[31].mxu0  ;;  %10399 = vmatprep.subr.mxu0 %v6988_v40 }
 0xee4   : > { %10400 = vmatpush3.msra.mxu0 %v6988_v40  ;;  %v10011_v40 = vld [vmem:[%s18566_s7 + $0xe8] sm:$0xff] }
 0xee5   : > { %10402 = vmatmul.mubr.msk.f32.vlgmr.msra.gmra.mrb[10].mxu0 %vm3030_vm5, %v9924_v42  ;;  %10404 = vmatprep.subr.mxu0 %v17015_v38  ;;  %v12395_v42 = vpack.c.bf16 %v10009_v36, %v10008_v35  ;;  %v12399_v39 = vpack.c.bf16 %v10011_v40, %v10010_v37  ;;  %v10030_v35 = vld [vmem:[%s18566_s7 + $0x168] sm:$0xff]  ;;  %v10031_v36 = vld [vmem:[%s18566_s7 + $0x170] sm:$0xff]  ;;  %v10032_v40 = vld [vmem:[%s18566_s7 + $0x178] sm:$0xff] }
 0xee6   : > { %10405 = vmatpush3.msra.mxu0 %v17015_v38  ;;  %10406 = vmatprep.mubr.msk.f32.mxu0 %vm3030_vm5, %v9954_v44  ;;  %v9960_v38 = vld [vmem:[%s18563_s4 + $0x12d0] sm:$0xff]  ;;  %v9986_v44 = vld [vmem:[%s18564_s5 + $0x188] sm:$0xff]  ;;  %v12431_v37 = vpack.c.bf16 %v10031_v36, %v10030_v35 }
 0xee7   : > { %12311 = vmatprep.subr.bf16.mxu0 %v12752_v17  ;;  %v12315_v46 = vpack.c.bf16 %v9961_v45, %v9960_v38  ;;  %v10014_v45 = vld [vmem:[%s18566_s7 + $0x100] sm:$0xff] }
 0xeed   : > { %10407 = vmatmul.mubr.msk.f32.vlgmr.msra.gmra.mrb[10].mxu0 %vm3030_vm5, %v9955_v54  ;;  %v10012_v54 = vld [vmem:[%s18566_s7 + $0xf0] sm:$0xff] }
 0xeee   : > { %12313 = vmatpush1.bf16.msra.mxu0 %v12312_v1  ;;  %9984 = vmatprep.mubr.msk.f32.mxu0 %vm2848_vm4, %v15624_v57  ;;  %v9965_v57 = vld [vmem:[%s18563_s4 + $0x12f8] sm:$0xff] }
 0xeef   : > { %12314 = vmatprep.subr.bf16.mxu0 %v12752_v17  ;;  %v12321_v50 = vpack.c.bf16 %v9965_v57, %v9964_v48  ;;  %v10013_v1 = vld [vmem:[%s18566_s7 + $0xf8] sm:$0xff]  ;;  %v7474_v57 = vld [vmem:[%s18566_s7 + $0x50] sm:$0xff] }
 0xef0   : > { %v12403_v38 = vpack.c.bf16 %v10013_v1, %v10012_v54  ;;  %v10036_v54 = vld [vmem:[%s18566_s7 + $0x198] sm:$0xf]  ;;  %v7845_v1 = vld [vmem:[%s18567_s8 + $0x8] sm:$0xff] }
 0xef2   : > { %12316 = vmatpush1.bf16.msra.mxu0 %v12315_v46  ;;  %v10015_v46 = vld [vmem:[%s18566_s7 + $0x108] sm:$0xff] }
 0xef3   : > { %12317 = vmatprep.subr.bf16.mxu0 %v12752_v17  ;;  %v12407_v18 = vpack.c.bf16 %v10015_v46, %v10014_v45  ;;  %v7847_v45 = vld [vmem:[%s18567_s8 + $0x18] sm:$0xff] }
 0xef6   : > { %12319 = vmatpush1.bf16.msra.mxu0 %v12318_v47  ;;  %v10017_v47 = vld [vmem:[%s18566_s7 + $0x118] sm:$0xff] }
 0xef7   : > { %12320 = vmatprep.subr.bf16.mxu0 %v12752_v17  ;;  %v12411_v48 = vpack.c.bf16 %v10017_v47, %v10016_v11  ;;  %v7844_v11 = vld [vmem:[%s18567_s8] sm:$0xff] }
 0xef8   : > { %v7848_v47 = vld [vmem:[%s18567_s8 + $0x20] sm:$0xff] }
 0xefa   : > { %12322 = vmatpush1.bf16.msra.mxu0 %v12321_v50  ;;  %v7475_v50 = vld [vmem:[%s18566_s7 + $0x58] sm:$0xff] }
 0xefb   : > { %12323 = vmatprep.subr.bf16.mxu0 %v12752_v17  ;;  %v12367_v51 = vpack.c.bf16 %v7475_v50, %v7474_v57  ;;  %v12445_v57 = vpack.c.bf16 %v7848_v47, %v7844_v11  ;;  %v7846_v50 = vld [vmem:[%s18567_s8 + $0x10] sm:$0xff] }
 0xefe   : > { %12325 = vmatpush1.bf16.msra.mxu0 %v12324_v53  ;;  %v10019_v53 = vld [vmem:[%s18566_s7 + $0x128] sm:$0xff] }
 0xeff   : > { %12326 = vmatprep.subr.bf16.mxu0 %v12752_v17  ;;  %v12415_v14 = vpack.c.bf16 %v10019_v53, %v10018_v52  ;;  %v7853_v53 = vld [vmem:[%s18567_s8 + $0x48] sm:$0xff] }
 0xf02   : > { %12328 = vmatpush1.bf16.msra.mxu0 %v12327_v2  ;;  %v9992_v2 = vld [vmem:[%s18566_s7 + $0x68] sm:$0xff] }
 0xf03   : > { %12329 = vmatprep.subr.bf16.mxu0 %v12752_v17 }
 0xf06   : > { %12331 = vmatpush1.bf16.msra.mxu0 %v12330_v34  ;;  %v12371_v34 = vpack.c.bf16 %v9993_v3, %v9992_v2  ;;  %v7859_v3 = vld [vmem:[%s18567_s8 + $0x78] sm:$0x1] }
 0xf07   : > { %12332 = vmatprep.subr.bf16.mxu0 %v12752_v17 }
 0xf0a   : > { %12334 = vmatpush1.bf16.msra.mxu0 %v12333_v61  ;;  %v7453_v61 = vpop.permute.xlu0 %7452 }
 0xf0b   : > { %12335 = vmatprep.subr.bf16.mxu0 %v12752_v17 }
 0xf0e   : > { %12337 = vmatpush1.bf16.msra.mxu0 %v12336_v5 }
 0xf0f   : > { %12338 = vmatprep.subr.bf16.mxu0 %v12752_v17 }
 0xf12   : > { %12340 = vmatpush1.bf16.msra.mxu0 %v12339_v8 }
 0xf13   : > { %12341 = vmatprep.subr.bf16.mxu0 %v12752_v17 }
 0xf16   : > { %12343 = vmatpush1.bf16.msra.mxu0 %v12342_v13  ;;  %v9996_v13 = vld [vmem:[%s18566_s7 + $0x88] sm:$0xff] }
 0xf17   : > { %12344 = vmatprep.subr.bf16.mxu0 %v12752_v17  ;;  %v12379_v16 = vpack.c.bf16 %v9997_v15, %v9996_v13 }
 0xf1a   : > { %12346 = vmatpush1.bf16.msra.mxu0 %v12345_v10  ;;  %v9998_v10 = vld [vmem:[%s18566_s7 + $0x98] sm:$0xff] }
 0xf1b   : > { %7340 = vmatprep.subr.mxu0 %v12750_v0 }
 0xf1e   : > { %9983 = vmatpush1.msk.msra.mxu0 %vm2852_vm3, %v9982_v4  ;;  %v9999_v4 = vld [vmem:[%s18566_s7 + $0xa0] sm:$0xff] }
 0xf1f   : > { %7357 = vmatmul.mubr.f32.vlgmr.msra.gmra.mrb[32].mxu0 %v15619_v56  ;;  %v12347_v56 = vpack.c.bf16 %v7465_v27, %v7464_v19  ;;  %v10001_v19 = vld [vmem:[%s18566_s7 + $0xb0] sm:$0xff] }
 0xf20   : > { %10411 = vmatprep.mubr.msk.f32.mxu0 %vm3030_vm5, %v9985_v23  ;;  %v12383_v23 = vpack.c.bf16 %v9999_v4, %v9998_v10  ;;  %v12387_v27 = vpack.c.bf16 %v10001_v19, %v10000_v21 }
 0xf21   : > { %12348 = vmatprep.subr.bf16.mxu1 %v12347_v56 }
 0xf22   : > { %12350 = vmatpush3.bf16.msra.mxu1 %v12347_v56  ;;  %v10002_v56 = vld [vmem:[%s18566_s7 + $0xb8] sm:$0xff] }
 0xf23   : > { %12352 = vmatprep.subr.bf16.mxu1 %v12351_v28  ;;  %v12391_v55 = vpack.c.bf16 %v10003_v29, %v10002_v56  ;;  %v8034_v29 = vld [vmem:[%s18568_s9] sm:$0xff] }
 0xf26   : > { %12354 = vmatpush3.bf16.msra.mxu1 %v12351_v28  ;;  %v10004_v28 = vld [vmem:[%s18566_s7 + $0xc8] sm:$0xf] }
 0xf27   : > { %12356 = vmatprep.subr.bf16.mxu1 %v12355_v32 }
 0xf2a   : > { %12358 = vmatpush3.bf16.msra.mxu1 %v12355_v32  ;;  %v10026_v32 = vld [vmem:[%s18566_s7 + $0x148] sm:$0xff] }
 0xf2b   : > { %12360 = vmatprep.subr.bf16.mxu1 %v12359_v26 }
 0xf2e   : > { %12362 = vmatpush3.bf16.msra.mxu1 %v12359_v26  ;;  %v12423_v26 = vpack.c.bf16 %v10027_v33, %v10026_v32  ;;  %v8038_v32 = vld [vmem:[%s18568_s9 + $0x20] sm:$0xff]  ;;  %v8040_v33 = vld [vmem:[%s18568_s9 + $0x30] sm:$0xff] }
 0xf2f   : > { %12364 = vmatprep.subr.bf16.mxu1 %v12363_v20 }
 0xf32   : > { %12366 = vmatpush3.bf16.msra.mxu1 %v12363_v20  ;;  %v12427_v20 = vpack.c.bf16 %v10029_v9, %v10028_v22  ;;  %v8041_v22 = vld [vmem:[%s18568_s9 + $0x38] sm:$0xff] }
 0xf33   : > { %12368 = vmatprep.subr.bf16.mxu1 %v12367_v51 }
 0xf36   : > { %12370 = vmatpush3.bf16.msra.mxu1 %v12367_v51  ;;  %v7850_v51 = vld [vmem:[%s18567_s8 + $0x30] sm:$0xff] }
 0xf37   : > { %10438 = vmatprep.subr.msk.mxu1 %vm2852_vm3, %v7476_v24  ;;  %v12455_v52 = vpack.c.bf16 %v7850_v51, %v7846_v50  ;;  %v8227_v50 = vld [vmem:[%s18569_s10 + $0x100] sm:$0xff]  ;;  %v8228_v51 = vld [vmem:[%s18569_s10 + $0x108] sm:$0xff] }
 0xf3a   : > { %10439 = vmatpush3.msk.msra.mxu1 %vm2852_vm3, %v7476_v24  ;;  %v7855_v24 = vld [vmem:[%s18567_s8 + $0x58] sm:$0xff] }
 0xf3b   : > { %12372 = vmatprep.subr.bf16.mxu1 %v12371_v34 }
 0xff2   : > { %v7358_v43 = vpop.f32.mrb[32].mxu0 }
 0xff3   : > { %v7360_v49 = vpop.f32.mrb[33].mxu0  ;;  %10409 = vmatprep.subr.mxu0 %v7358_v43 }
 0xff4   : > { %10410 = vmatpush3.msra.mxu0 %v7358_v43  ;;  %v10035_v49 = vld [vmem:[%s18566_s7 + $0x190] sm:$0xff] }
 0xff5   : > { %10412 = vmatmul.mubr.msk.f32.vlgmr.msra.gmra.mrb[10].mxu0 %vm3030_vm5, %v9986_v44  ;;  %12396 = vmatprep.subr.bf16.mxu0 %v12395_v42  ;;  %v10034_v44 = vld [vmem:[%s18566_s7 + $0x188] sm:$0xff] }
 0xff6   : > { %12398 = vmatpush3.bf16.msra.mxu0 %v12395_v42  ;;  %v10033_v42 = vld [vmem:[%s18566_s7 + $0x180] sm:$0xff] }
 0xff7   : > { %12400 = vmatprep.subr.bf16.mxu0 %v12399_v39  ;;  %v12435_v43 = vpack.c.bf16 %v10033_v42, %v10032_v40 }
 0xffa   : > { %12402 = vmatpush3.bf16.msra.mxu0 %v12399_v39  ;;  %v12439_v39 = vpack.c.bf16 %v10035_v49, %v10034_v44  ;;  %v8211_v44 = vld [vmem:[%s18569_s10 + $0x80] sm:$0xff]  ;;  %v8212_v49 = vld [vmem:[%s18569_s10 + $0x88] sm:$0xff] }
 0xffb   : > { %12404 = vmatprep.subr.bf16.mxu0 %v12403_v38 }
 0xffe   : > { %12406 = vmatpush3.bf16.msra.mxu0 %v12403_v38  ;;  %v7849_v38 = vld [vmem:[%s18567_s8 + $0x28] sm:$0xff] }
 0xfff   : > { %12408 = vmatprep.subr.bf16.mxu0 %v12407_v18  ;;  %v12443_v46 = vpack.c.bf16 %v7849_v38, %v7845_v1 }
0x1002   : > { %12410 = vmatpush3.bf16.msra.mxu0 %v12407_v18  ;;  %v7851_v18 = vld [vmem:[%s18567_s8 + $0x38] sm:$0xff] }
0x1003   : > { %12412 = vmatprep.subr.bf16.mxu0 %v12411_v48 }
0x1006   : > { %12414 = vmatpush3.bf16.msra.mxu0 %v12411_v48  ;;  %v12453_v48 = vpack.c.bf16 %v7851_v18, %v7847_v45  ;;  %v8195_v18 = vld [vmem:[%s18569_s10] sm:$0xff] }
0x1007   : > { %12416 = vmatprep.subr.bf16.mxu0 %v12415_v14 }
0x100a   : > { %12418 = vmatpush3.bf16.msra.mxu0 %v12415_v14  ;;  %v7857_v14 = vld [vmem:[%s18567_s8 + $0x68] sm:$0x1] }
0x100b   : > { %10496 = vmatprep.subr.msk.mxu0 %vm2852_vm3, %v10020_v58  ;;  %v12447_v2 = vpack.c.bf16 %v7857_v14, %v7853_v53  ;;  %v8214_v53 = vld [vmem:[%s18569_s10 + $0x98] sm:$0xff] }
0x100e   : > { %10497 = vmatpush3.msk.msra.mxu0 %vm2852_vm3, %v10020_v58  ;;  %v7852_v58 = vld [vmem:[%s18567_s8 + $0x40] sm:$0xff] }
0x100f   : > { %12444 = vmatprep.subr.bf16.mxu0 %v12443_v46 }
0x10c8   : > { %v10413_v59 = vpop.f32.mrb[10].mxu0 }
0x10c9   : > { %v7461_v62 = vadd.f32 %v10413_v59, %v7458_v25  ;;  %v7437_v63 = vpop.f32.mrb[11].mxu0  ;;  %v12457_v25 = vpack.c.bf16 %v7859_v3, %v7855_v24  ;;  %v7856_v59 = vld [vmem:[%s18567_s8 + $0x60] sm:$0x1]  ;;  %v12504_v24 = vpack.c.bf16 %v8228_v51, %v8227_v50  ;;  %v8241_v50 = vld [vmem:[%s18569_s10 + $0x170] sm:$0xff]  ;;  %v8242_v51 = vld [vmem:[%s18569_s10 + $0x178] sm:$0xff] }
0x10ca   : > { %v7460_v5 = vadd.f32 %v7453_v61, %v7437_v63  ;;  %v7858_v61 = vld [vmem:[%s18567_s8 + $0x70] sm:$0x1] }
0x10cb   : > { %v18082_v12 = vmax.f32 %v7461_v62, 0.0  ;;  %v12450_v62 = vpack.c.bf16 %v7856_v59, %v7852_v58  ;;  %v8198_v58 = vld [vmem:[%s18569_s10 + $0x18] sm:$0xff]  ;;  %v8215_v59 = vld [vmem:[%s18569_s10 + $0xa0] sm:$0xff] }
0x10cc   : > { %v7462_v8 = vmax.f32 %v7460_v5, 0.0 }
0x10ce   : > { %10440 = vmatprep.mubr.msk.f32.mxu1 %vm7477_vm6, %v7462_v8  ;;  %10498 = vmatprep.mubr.msk.f32.mxu0 %vm7477_vm6, %v7462_v8 }
0x10cf   : > { %10441 = vmatmul.mubr.msk.f32.vlgmr.msra.gmra.mrb[34].mxu1 %vm7477_vm6, %v18082_v12  ;;  %10499 = vmatmul.mubr.msk.f32.vlgmr.msra.gmra.mrb[34].mxu0 %vm7477_vm6, %v18082_v12 }
0x10d0   : > { %12374 = vmatpush3.bf16.msra.mxu1 %v12371_v34  ;;  %10469 = vmatprep.mubr.msk.f32.mxu1 %vm7477_vm6, %v7462_v8  ;;  %v7854_v34 = vld [vmem:[%s18567_s8 + $0x50] sm:$0xff] }
0x10d1   : > { %12376 = vmatprep.subr.bf16.mxu1 %v12375_v41  ;;  %7944 = vmatprep.mubr.f32.mxu0 %v12750_v0  ;;  %v12460_v63 = vpack.c.bf16 %v7858_v61, %v7854_v34  ;;  %v8229_v34 = vld [vmem:[%s18569_s10 + $0x110] sm:$0xff]  ;;  %v8216_v61 = vld [vmem:[%s18569_s10 + $0xa8] sm:$0xff] }
0x10d2   : > { %12446 = vmatpush1.bf16.msra.mxu0 %v12445_v57  ;;  %v8196_v57 = vld [vmem:[%s18569_s10 + $0x8] sm:$0xff] }
0x10d3   : > { %12449 = vmatprep.subr.msk.bf16.mxu0 %vm12448_vm9, %v12447_v2  ;;  %v12473_v14 = vpack.c.bf16 %v8196_v57, %v8195_v18  ;;  %v8197_v2 = vld [vmem:[%s18569_s10 + $0x10] sm:$0xff] }
0x10d4   : > { %12378 = vmatpush3.bf16.msra.mxu1 %v12375_v41  ;;  %v8225_v18 = vld [vmem:[%s18569_s10 + $0xf0] sm:$0xff] }
0x10d5   : > { %12380 = vmatprep.subr.bf16.mxu1 %v12379_v16 }
0x10d6   : > { %12452 = vmatpush1.bf16.msk.msra.mxu0 %vm12448_vm9, %v12450_v62  ;;  %v12755_v62 = vmov 1.0  }
0x10d8   : > { %12382 = vmatpush3.bf16.msra.mxu1 %v12379_v16 }
0x10d9   : > { %12384 = vmatprep.subr.bf16.mxu1 %v12383_v23 }
0x10dc   : > { %12386 = vmatpush3.bf16.msra.mxu1 %v12383_v23 }
0x10dd   : > { %12388 = vmatprep.subr.bf16.mxu1 %v12387_v27 }
0x10e0   : > { %12390 = vmatpush3.bf16.msra.mxu1 %v12387_v27 }
0x10e1   : > { %12392 = vmatprep.subr.bf16.mxu1 %v12391_v55 }
0x10e4   : > { %12394 = vmatpush3.bf16.msra.mxu1 %v12391_v55  ;;  %v8036_v55 = vld [vmem:[%s18568_s9 + $0x10] sm:$0xff] }
0x10e5   : > { %10467 = vmatprep.subr.msk.mxu1 %vm2852_vm3, %v10004_v28 }
0x10e8   : > { %10468 = vmatpush3.msk.msra.mxu1 %vm2852_vm3, %v10004_v28 }
0x10e9   : > { %10470 = vmatmul.mubr.msk.f32.vlgmr.msra.gmra.mrb[36].mxu1 %vm7477_vm6, %v18082_v12  ;;  %12420 = vmatprep.subr.bf16.mxu1 %v12419_v60 }
0x10ea   : > { %12422 = vmatpush3.bf16.msra.mxu1 %v12419_v60  ;;  %10527 = vmatprep.mubr.msk.f32.mxu1 %vm7477_vm6, %v7462_v8  ;;  %v8037_v60 = vld [vmem:[%s18568_s9 + $0x18] sm:$0xff] }
0x10eb   : > { %12424 = vmatprep.subr.bf16.mxu1 %v12423_v26 }
0x10ee   : > { %12426 = vmatpush3.bf16.msra.mxu1 %v12423_v26  ;;  %v8039_v26 = vld [vmem:[%s18568_s9 + $0x28] sm:$0xff] }
0x10ef   : > { %12428 = vmatprep.subr.bf16.mxu1 %v12427_v20 }
0x10f2   : > { %12430 = vmatpush3.bf16.msra.mxu1 %v12427_v20 }
0x10f3   : > { %12432 = vmatprep.subr.bf16.mxu1 %v12431_v37 }
0x10f6   : > { %12434 = vmatpush3.bf16.msra.mxu1 %v12431_v37 }
0x10f7   : > { %12436 = vmatprep.subr.bf16.mxu1 %v12435_v43 }
0x10fa   : > { %12438 = vmatpush3.bf16.msra.mxu1 %v12435_v43 }
0x10fb   : > { %12440 = vmatprep.subr.bf16.mxu1 %v12439_v39 }
0x10fe   : > { %12442 = vmatpush3.bf16.msra.mxu1 %v12439_v39 }
0x10ff   : > { %10525 = vmatprep.subr.msk.mxu1 %vm2852_vm3, %v10036_v54 }
0x1102   : > { %10526 = vmatpush3.msk.msra.mxu1 %vm2852_vm3, %v10036_v54 }
0x1103   : > { %10528 = vmatmul.mubr.msk.f32.vlgmr.msra.gmra.mrb[38].mxu1 %vm7477_vm6, %v18082_v12  ;;  %12454 = vmatprep.subr.bf16.mxu1 %v12453_v48  ;;  %v12471_v48 = vpack.c.bf16 %v8212_v49, %v8211_v44  ;;  %v8224_v44 = vld [vmem:[%s18569_s10 + $0xe8] sm:$0xff] }
0x1104   : > { %8021 = vmatprep.mubr.f32.mxu1 %v12750_v0  ;;  %12456 = vmatpush1.bf16.msra.mxu1 %v12455_v52  ;;  %v8213_v52 = vld [vmem:[%s18569_s10 + $0x90] sm:$0xff] }
0x1105   : > { %12459 = vmatprep.subr.msk.bf16.mxu1 %vm12448_vm9, %v12457_v25  ;;  %v12475_v3 = vpack.c.bf16 %v8214_v53, %v8213_v52  ;;  %v8230_v25 = vld [vmem:[%s18569_s10 + $0x118] sm:$0xff]  ;;  %v12525_v52 = vpack.c.bf16 %v8242_v51, %v8241_v50  ;;  %v8209_v53 = vld [vmem:[%s18569_s10 + $0x70] sm:$0xff] }
0x1108   : > { %12462 = vmatpush1.bf16.msk.msra.mxu1 %vm12448_vm9, %v12460_v63  ;;  %v12477_v63 = vpack.c.bf16 %v8198_v58, %v8197_v2  ;;  %v8243_v2 = vld [vmem:[%s18569_s10 + $0x180] sm:$0xff] }
0x11a2   : > { %v10442_v5 = vpop.f32.mrb[34].mxu1  ;;  %v10500_v6 = vpop.f32.mrb[34].mxu0 }
0x11a3   : > { %v7553_v7 = vpop.f32.mrb[35].mxu1  ;;  %v7739_v8 = vpop.f32.mrb[35].mxu0 }
0x11bc   : > { %v10471_v12 = vpop.f32.mrb[36].mxu1 }
0x11bd   : > { %v7655_v41 = vmax.f32 %v10442_v5, %v10471_v12  ;;  %v7645_v13 = vpop.f32.mrb[37].mxu1  ;;  %v12507_v5 = vpack.c.bf16 %v8230_v25, %v8229_v34  ;;  %v8231_v12 = vld [vmem:[%s18569_s10 + $0x120] sm:$0xff]  ;;  %v8391_v25 = vld [vmem:[%s18571_s12 + $0x8] sm:$0xff] }
0x11be   : > { %v7654_v15 = vmax.f32 %v7553_v7, %v7645_v13  ;;  %v12479_v7 = vpack.c.bf16 %v8216_v61, %v8215_v59  ;;  %v8217_v13 = vld [vmem:[%s18569_s10 + $0xb0] sm:$0xff]  ;;  %v8390_v34 = vld [vmem:[%s18571_s12] sm:$0xff] }
0x11d6   : > { %v10529_v16 = vpop.f32.mrb[38].mxu1 }
0x11d7   : > { %v7841_v10 = vmax.f32 %v10500_v6, %v10529_v16  ;;  %v7831_v4 = vpop.f32.mrb[39].mxu1  ;;  %v8199_v6 = vld [vmem:[%s18569_s10 + $0x20] sm:$0xff] }
0x11d8   : > { %v7840_v23 = vmax.f32 %v7739_v8, %v7831_v4  ;;  %v8200_v8 = vld [vmem:[%s18569_s10 + $0x28] sm:$0xff]  ;;  %v8201_v4 = vld [vmem:[%s18569_s10 + $0x30] sm:$0xff] }
0x11d9   : > { %v7843_v21 = vmax.f32 %v7655_v41, %v7841_v10  ;;  %v8232_v41 = vld [vmem:[%s18569_s10 + $0x128] sm:$0xff]  ;;  %v12481_v16 = vpack.c.bf16 %v8200_v8, %v8199_v6  ;;  %v8392_v6 = vld [vmem:[%s18571_s12 + $0x10] sm:$0xff] }
0x11da   : > { %v7842_v19 = vmax.f32 %v7654_v15, %v7840_v23  ;;  %v8218_v15 = vld [vmem:[%s18569_s10 + $0xb8] sm:$0xff]  ;;  %v12510_v10 = vpack.c.bf16 %v8232_v41, %v8231_v12  ;;  %v8394_v12 = vld [vmem:[%s18571_s12 + $0x20] sm:$0xff]  ;;  %v8395_v41 = vld [vmem:[%s18571_s12 + $0x28] sm:$0xff] }
0x11db   : > { %v12483_v23 = vpack.c.bf16 %v8218_v15, %v8217_v13  ;;  %v12537_v13 = vpack.c.bf16 %v8395_v41, %v8394_v12  ;;  %v8396_v15 = vld [vmem:[%s18571_s12 + $0x30] sm:$0xff] }
0x11dc   : > { %10042 = vmatmul.mubr.msk.f32.vlgmr.msra.gmra.mrb[36].mxu0 %vm7860_vm10, %v7842_v19  ;;  %10046 = vmatmul.mubr.msk.f32.vlgmr.msra.gmra.mrb[40].mxu1 %vm7860_vm10, %v7842_v19  ;;  %v8233_v19 = vld [vmem:[%s18569_s10 + $0x130] sm:$0xff] }
0x11dd   : > { %7950 = vmatprep.mubr.f32.mxu0 %v12750_v0  ;;  %8027 = vmatprep.mubr.f32.mxu1 %v12750_v0 }
0x11e0   : > { %10043 = vmatmul.mubr.msk.f32.gmra.mrb[38].mxu0 %vm7860_vm10, %v7843_v21  ;;  %10047 = vmatmul.mubr.msk.f32.gmra.mrb[42].mxu1 %vm7860_vm10, %v7843_v21  ;;  %v8202_v21 = vld [vmem:[%s18569_s10 + $0x38] sm:$0xff] }
0x11e1   : > { %8117 = vmatprep.mubr.f32.mxu0 %v12750_v0  ;;  %8188 = vmatprep.mubr.f32.mxu1 %v12750_v0 }
0x12af   : > { %v7946_v27 = vpop.f32.mrb[36].mxu0  ;;  %v8023_v56 = vpop.f32.mrb[40].mxu1 }
0x12b0   : > { %v7948_v28 = vpop.f32.mrb[37].mxu0  ;;  %v8025_v30 = vpop.f32.mrb[41].mxu1  ;;  %v8042_v35 = vmul.f32 %v8034_v29, %v7946_v27  ;;  %v8044_v36 = vmul.f32 %v8036_v55, %v8023_v56  ;;  %v8234_v27 = vld [vmem:[%s18569_s10 + $0x138] sm:$0xff]  ;;  %v8219_v56 = vld [vmem:[%s18569_s10 + $0xc0] sm:$0xff]  ;;  %v8220_v29 = vld [vmem:[%s18569_s10 + $0xc8] sm:$0xff]  ;;  %v12485_v55 = vpack.c.bf16 %v8202_v21, %v8201_v4 }
0x12b1   : > { %v8043_v39 = vmul.f32 %v8035_v31, %v7948_v28  ;;  %v8045_v54 = vmul.f32 %v8037_v60, %v8025_v30  ;;  %v12513_v28 = vpack.c.bf16 %v8234_v27, %v8233_v19  ;;  %v8203_v30 = vld [vmem:[%s18569_s10 + $0x40] sm:$0xff]  ;;  %v12487_v31 = vpack.c.bf16 %v8220_v29, %v8219_v56  ;;  %v8236_v60 = vld [vmem:[%s18569_s10 + $0x148] sm:$0xff]  ;;  %v8400_v19 = vld [vmem:[%s18571_s12 + $0x50] sm:$0xff] }
0x12b2   : > { %v8398_v4 = vld [vmem:[%s18571_s12 + $0x40] sm:$0xff]  ;;  %v8401_v27 = vld [vmem:[%s18571_s12 + $0x58] sm:$0xff] }
0x12b3   : > { %v7952_v9 = vpop.f32.mrb[38].mxu0  ;;  %v8029_v20 = vpop.f32.mrb[42].mxu1  ;;  %v12546_v56 = vpack.c.bf16 %v8401_v27, %v8400_v19  ;;  %v8402_v29 = vld [vmem:[%s18571_s12 + $0x60] sm:$0xff] }
0x12b4   : > { %v8046_v37 = vmul.f32 %v8038_v32, %v7952_v9  ;;  %v8048_v40 = vmul.f32 %v8040_v33, %v8029_v20  ;;  %v7954_v42 = vpop.f32.mrb[39].mxu0  ;;  %v8031_v43 = vpop.f32.mrb[43].mxu1  ;;  %v8204_v32 = vld [vmem:[%s18569_s10 + $0x48] sm:$0xff]  ;;  %v8235_v33 = vld [vmem:[%s18569_s10 + $0x140] sm:$0xff] }
0x12b5   : > { %v8047_v1 = vmul.f32 %v8039_v26, %v7954_v42  ;;  %v8049_v38 = vmul.f32 %v8041_v22, %v8031_v43  ;;  %v8221_v26 = vld [vmem:[%s18569_s10 + $0xd0] sm:$0xff]  ;;  %v8222_v22 = vld [vmem:[%s18569_s10 + $0xd8] sm:$0xff]  ;;  %v12489_v9 = vpack.c.bf16 %v8204_v32, %v8203_v30  ;;  %v12516_v20 = vpack.c.bf16 %v8236_v60, %v8235_v33  ;;  %v8223_v43 = vld [vmem:[%s18569_s10 + $0xe0] sm:$0xff] }
0x12b6   : > { %v12465_v45 = vpack.c.bf16 %v8046_v37, %v8042_v35  ;;  %v12469_v46 = vpack.c.bf16 %v8048_v40, %v8044_v36  ;;  %v8205_v35 = vld [vmem:[%s18569_s10 + $0x50] sm:$0xff]  ;;  %v12491_v36 = vpack.c.bf16 %v8222_v22, %v8221_v26  ;;  %v8206_v37 = vld [vmem:[%s18569_s10 + $0x58] sm:$0xff]  ;;  %v8482_v32 = vld [vmem:[%s18573_s14 + $0x8] sm:$0xff] }
0x12b7   : > { %v12463_v11 = vpack.c.bf16 %v8047_v1, %v8043_v39  ;;  %v12467_v47 = vpack.c.bf16 %v8049_v38, %v8045_v54  ;;  %v8237_v40 = vld [vmem:[%s18569_s10 + $0x150] sm:$0xff]  ;;  %v8238_v42 = vld [vmem:[%s18569_s10 + $0x158] sm:$0xff]  ;;  %v12493_v49 = vpack.c.bf16 %v8206_v37, %v8205_v35  ;;  %v8207_v54 = vld [vmem:[%s18569_s10 + $0x60] sm:$0xff]  ;;  %v12495_v1 = vpack.c.bf16 %v8224_v44, %v8223_v43 }
0x12b8   : > { %v12519_v39 = vpack.c.bf16 %v8238_v42, %v8237_v40  ;;  %v8208_v38 = vld [vmem:[%s18569_s10 + $0x68] sm:$0xff]  ;;  %v8404_v30 = vld [vmem:[%s18571_s12 + $0x70] sm:$0xff]  ;;  %v8484_v26 = vld [vmem:[%s18573_s14 + $0x18] sm:$0xff] }
0x12b9   : > { %12464 = vmatprep.subr.bf16.mxu0 %v12463_v11  ;;  %12468 = vmatprep.subr.bf16.mxu1 %v12467_v47  ;;  %v8226_v11 = vld [vmem:[%s18569_s10 + $0xf8] sm:$0xff]  ;;  %v12497_v47 = vpack.c.bf16 %v8208_v38, %v8207_v54  ;;  %v8483_v33 = vld [vmem:[%s18573_s14 + $0x10] sm:$0xff] }
0x12ba   : > { %12466 = vmatpush1.bf16.msra.mxu0 %v12465_v45  ;;  %12470 = vmatpush1.bf16.msra.mxu1 %v12469_v46  ;;  %v8239_v45 = vld [vmem:[%s18569_s10 + $0x160] sm:$0xff]  ;;  %v8240_v46 = vld [vmem:[%s18569_s10 + $0x168] sm:$0xff]  ;;  %v12499_v57 = vpack.c.bf16 %v8226_v11, %v8225_v18  ;;  %v12555_v22 = vpack.c.bf16 %v8484_v26, %v8483_v33  ;;  %v8488_v37 = vld [vmem:[%s18573_s14 + $0x38] sm:$0xff] }
0x12bb   : > { %12472 = vmatprep.subr.bf16.mxu0 %v12471_v48  ;;  %12503 = vmatprep.subr.bf16.mxu1 %v12752_v17  ;;  %v12522_v48 = vpack.c.bf16 %v8240_v46, %v8239_v45  ;;  %v8489_v46 = vld [vmem:[%s18573_s14 + $0x40] sm:$0xff]  ;;  %v8491_v11 = vld [vmem:[%s18573_s14 + $0x50] sm:$0xf] }
0x12bd   : > { %10048 = vmatmul.mubr.msk.f32.vlgmr.msra.gmra.mrb[40].mxu0 %vm1086_vm2, %v12755_v62  ;;  %10049 = vmatmul.mubr.msk.f32.vlgmr.msra.gmra.mrb[44].mxu1 %vm1086_vm2, %v12755_v62  ;;  %v12531_v62 = vpack.c.bf16 %v8391_v25, %v8390_v34 }
0x12be   : > { %12474 = vmatpush3.bf16.msra.mxu0 %v12473_v14  ;;  %12505 = vmatpush1.bf16.msra.mxu1 %v12504_v24  ;;  %v8210_v14 = vld [vmem:[%s18569_s10 + $0x78] sm:$0xff] }
0x12bf   : > { %12476 = vmatprep.subr.bf16.mxu0 %v12475_v3  ;;  %12506 = vmatprep.subr.bf16.mxu1 %v12752_v17  ;;  %v12501_v24 = vpack.c.bf16 %v8210_v14, %v8209_v53  ;;  %v8244_v3 = vld [vmem:[%s18569_s10 + $0x188] sm:$0xff] }
0x12c0   : > { %v12528_v58 = vpack.c.bf16 %v8244_v3, %v8243_v2 }
0x12c2   : > { %12478 = vmatpush3.bf16.msra.mxu0 %v12477_v63  ;;  %12508 = vmatpush1.bf16.msra.mxu1 %v12507_v5 }
0x12c3   : > { %12480 = vmatprep.subr.bf16.mxu0 %v12479_v7  ;;  %12509 = vmatprep.subr.bf16.mxu1 %v12752_v17  ;;  %v8393_v7 = vld [vmem:[%s18571_s12 + $0x18] sm:$0xff] }
0x12c4   : > { %v12534_v8 = vpack.c.bf16 %v8393_v7, %v8392_v6 }
0x12c6   : > { %12482 = vmatpush3.bf16.msra.mxu0 %v12481_v16  ;;  %12511 = vmatpush1.bf16.msra.mxu1 %v12510_v10  ;;  %v8397_v16 = vld [vmem:[%s18571_s12 + $0x38] sm:$0xff] }
0x12c7   : > { %12484 = vmatprep.subr.bf16.mxu0 %v12483_v23  ;;  %12512 = vmatprep.subr.bf16.mxu1 %v12752_v17  ;;  %v12540_v10 = vpack.c.bf16 %v8397_v16, %v8396_v15  ;;  %v8399_v23 = vld [vmem:[%s18571_s12 + $0x48] sm:$0xff] }
0x12c8   : > { %v12543_v21 = vpack.c.bf16 %v8399_v23, %v8398_v4 }
0x12ca   : > { %12486 = vmatpush3.bf16.msra.mxu0 %v12485_v55  ;;  %12514 = vmatpush1.bf16.msra.mxu1 %v12513_v28  ;;  %v8403_v55 = vld [vmem:[%s18571_s12 + $0x68] sm:$0xff] }
0x12cb   : > { %12488 = vmatprep.subr.bf16.mxu0 %v12487_v31  ;;  %12515 = vmatprep.subr.bf16.mxu1 %v12752_v17  ;;  %v12549_v28 = vpack.c.bf16 %v8403_v55, %v8402_v29  ;;  %v8481_v31 = vld [vmem:[%s18573_s14] sm:$0xff] }
0x12cc   : > { %v12552_v60 = vpack.c.bf16 %v8482_v32, %v8481_v31 }
0x12ce   : > { %12490 = vmatpush3.bf16.msra.mxu0 %v12489_v9  ;;  %12517 = vmatpush1.bf16.msra.mxu1 %v12516_v20  ;;  %v8485_v9 = vld [vmem:[%s18573_s14 + $0x20] sm:$0xff]  ;;  %v8486_v20 = vld [vmem:[%s18573_s14 + $0x28] sm:$0xff] }
0x12cf   : > { %12492 = vmatprep.subr.bf16.mxu0 %v12491_v36  ;;  %12518 = vmatprep.subr.bf16.mxu1 %v12752_v17  ;;  %v12558_v35 = vpack.c.bf16 %v8486_v20, %v8485_v9  ;;  %v8487_v36 = vld [vmem:[%s18573_s14 + $0x30] sm:$0xff] }
0x12d0   : > { %v12561_v40 = vpack.c.bf16 %v8488_v37, %v8487_v36 }
0x12d2   : > { %12494 = vmatpush3.bf16.msra.mxu0 %v12493_v49  ;;  %12520 = vmatpush1.bf16.msra.mxu1 %v12519_v39  ;;  %v8245_v49 = vld [vmem:[%s18570_s11] sm:$0x1] }
0x12d3   : > { %12496 = vmatprep.subr.bf16.mxu0 %v12495_v1  ;;  %12521 = vmatprep.subr.bf16.mxu1 %v12752_v17 }
0x12d6   : > { %12498 = vmatpush3.bf16.msra.mxu0 %v12497_v47  ;;  %12523 = vmatpush1.bf16.msra.mxu1 %v12522_v48  ;;  %v8405_v47 = vld [vmem:[%s18572_s13] sm:$0x1] }
0x12d7   : > { %12500 = vmatprep.subr.bf16.mxu0 %v12499_v57  ;;  %12524 = vmatprep.subr.bf16.mxu1 %v12752_v17 }
0x12da   : > { %12526 = vmatpush1.bf16.msra.mxu1 %v12525_v52  ;;  %12502 = vmatpush3.bf16.msra.mxu0 %v12501_v24 }
0x12db   : > { %12527 = vmatprep.subr.bf16.mxu1 %v12752_v17  ;;  %12530 = vmatprep.subr.bf16.mxu0 %v12752_v17 }
0x12de   : > { %12529 = vmatpush1.bf16.msra.mxu1 %v12528_v58 }
0x12df   : > { %12551 = vmatprep.subr.bf16.mxu1 %v12752_v17 }
0x1390   : > { %v8119_v59 = vpop.f32.mrb[40].mxu0  ;;  %v8190_v61 = vpop.f32.mrb[44].mxu1 }
0x1391   : > { %v8121_v63 = vpop.f32.mrb[41].mxu0  ;;  %v8192_v5 = vpop.f32.mrb[45].mxu1 }
0x1392   : > { %8313 = vmatprep.mubr.f32.mxu0 %v8121_v63  ;;  %10050 = vmatprep.mubr.msk.f32.mxu1 %vm1086_vm2, %v8192_v5 }
0x1393   : > { %8314 = vmatmul.mubr.f32.vlgmr.msra.gmra.mrb[42].mxu0 %v8119_v59  ;;  %8384 = vmatmul.mubr.f32.vlgmr.msra.gmra.mrb[46].mxu1 %v8190_v61 }
0x1394   : > { %12532 = vmatpush3.bf16.msra.mxu0 %v12531_v62  ;;  %10560 = vmatprep.mubr.msk.f32.mxu0 %vm12753_vm1, %v12750_v0 }
0x1395   : > { %12533 = vmatprep.subr.bf16.mxu0 %v12752_v17  ;;  %10585 = vmatprep.mubr.msk.f32.mxu1 %vm12753_vm1, %v12750_v0 }
0x1396   : > { %12553 = vmatpush3.bf16.msra.mxu1 %v12552_v60 }
0x1397   : > { %12554 = vmatprep.subr.bf16.mxu1 %v12752_v17 }
0x1398   : > { %12535 = vmatpush3.bf16.msra.mxu0 %v12534_v8 }
0x1399   : > { %12536 = vmatprep.subr.bf16.mxu0 %v12752_v17 }
0x139a   : > { %12556 = vmatpush3.bf16.msra.mxu1 %v12555_v22 }
0x139b   : > { %12557 = vmatprep.subr.bf16.mxu1 %v12752_v17 }
0x139c   : > { %12538 = vmatpush3.bf16.msra.mxu0 %v12537_v13 }
0x139d   : > { %12539 = vmatprep.subr.bf16.mxu0 %v12752_v17 }
0x139e   : > { %12559 = vmatpush3.bf16.msra.mxu1 %v12558_v35 }
0x139f   : > { %12560 = vmatprep.subr.bf16.mxu1 %v12752_v17 }
0x13a0   : > { %12541 = vmatpush3.bf16.msra.mxu0 %v12540_v10 }
0x13a1   : > { %12542 = vmatprep.subr.bf16.mxu0 %v12752_v17 }
0x13a2   : > { %12562 = vmatpush3.bf16.msra.mxu1 %v12561_v40 }
0x13a3   : > { %12563 = vmatprep.subr.bf16.mxu1 %v12752_v17 }
0x13a4   : > { %12544 = vmatpush3.bf16.msra.mxu0 %v12543_v21 }
0x13a5   : > { %12545 = vmatprep.subr.bf16.mxu0 %v12752_v17 }
0x13a8   : > { %12547 = vmatpush3.bf16.msra.mxu0 %v12546_v56 }
0x13a9   : > { %12548 = vmatprep.subr.bf16.mxu0 %v12752_v17  ;;  %v8490_v17 = vld [vmem:[%s18573_s14 + $0x48] sm:$0xff] }
0x13aa   : > { %v12564_v18 = vpack.c.bf16 %v8490_v17, %v8489_v46 }
0x13ac   : > { %12550 = vmatpush3.bf16.msra.mxu0 %v12549_v28  ;;  %12565 = vmatpush3.bf16.msra.mxu1 %v12564_v18 }
0x13ad   : > { %10558 = vmatprep.subr.mxu0 %v12750_v0  ;;  %10583 = vmatprep.subr.mxu1 %v12750_v0  ;;  %v8492_v0 = vld [vmem:[%s18574_s15] sm:$0x1] }
0x13b0   : > { %10559 = vmatpush3.msra.mxu0 %v8404_v30  ;;  %10584 = vmatpush3.msk.msra.mxu1 %vm2852_vm3, %v8491_v11 }
0x1466   : > { %v10235_v42 = vpop.f32.mrb[42].mxu0  ;;  %v8385_v43 = vpop.f32.mrb[46].mxu1 }
0x1467   : > { %v10236_v44 = vpop.f32.mrb[43].mxu0  ;;  %v8387_v39 = vpop.f32.mrb[47].mxu1 }
0x1468   : > { %v10237_v54 = vadd.f32 %v10236_v44, %v10235_v42 }
0x146a   : > { %v8316_v1 = vadd.f32 %v10237_v54, %v8245_v49 }
0x146c   : > { %v8386_v38 = vadd.f32 %v8385_v43, %v8316_v1 }
0x146e   : > { %v8389_v45 = vmax.f32 %v8386_v38, 0.0 }
0x1470   : > { %10561 = vmatmul.mubr.msk.f32.vlgmr.msra.gmra.mrb[44].mxu0 %vm8406_vm11, %v8389_v45 }
0x1543   : > { %v8476_v48 = vpop.f32.mrb[44].mxu0 }
0x1544   : > { %v8477_v57 = vadd.f32 %v8476_v48, %v8405_v47  ;;  %v10562_v50 = vpop.f32.mrb[45].mxu0 }
0x1546   : > { %v8480_v51 = vmax.f32 %v8477_v57, 0.0 }
0x1548   : > { %10586 = vmatmul.mubr.msk.f32.vlgmr.msra.gmra.mrb[48].mxu1 %vm8493_vm12, %v8480_v51 }
0x161b   : > { %v8566_v52 = vpop.f32.mrb[48].mxu1 }
0x161c   : > { %v8567_v53 = vadd.f32 %v8566_v52, %v8492_v0  ;;  %v10587_v14 = vpop.f32.mrb[49].mxu1 }
0x161e   : > { %8571 = vst.msk [vmem:[%s513_s17] sm:$0x1] %vm8570_vm13, %v8567_v53 }
0x161f   : > { %12699 = shalt.err (!%p12696_p3)
}
0x1620   : > { %s12700_s29 = scalar_lea.hbm %s18517_s20, 16  ;;  %s12704_s17 = scalar_lea.hbm %s18575_s16, 32 }
0x1621   : > { %p12701_p4 = scmp.ne.s32.totalorder %s18517_s20, %s12700_s29  ;;  %p12705_p9 = scmp.lt.u32.totalorder %s18517_s20, %s18575_s16 }
0x1622   : > { %p12706_p10 = scmp.lt.u32.totalorder %s12704_s17, %s12700_s29  ;;  %p12708_p12 = scmp.lt.u32.totalorder %s12700_s29, %s18517_s20 }
0x1623   : > { %p12702_p7 = pnand %p12701_p4, %p12880_p5 }
0x1624   : > { %p12707_p11 = por %p12706_p10, %p12705_p9 }
0x1625   : > { %p12703_p8 = pneg %p12702_p7 }
0x1626   : > { %p12709_p13 = por %p12708_p12, %p12707_p11 }
0x1628   : > { %p12710_p0 = pnand %p12709_p13, %p12703_p8 }
0x162a   : > { %12713 = shalt.err (!%p12710_p0)
}
0x162b   : > { %12639 = dma.vmem_to_hbm [thread:$0]  (%p12880_p5), %s18519_s30, 16, %s18517_s20, %s8573_s26  }
0x162c PF: > { %p12645_p1 = scmp.ge.s32.totalorder %s12748_s24, 2  ;;  %s8597_s25 = sand.u32 1, %s12736_s21  }
0x162d   : > { %s8598_s28 = scalar_lea.sflag [#allocation3], %s8597_s25 }
0x162e   : > { %p12642_p2 = pnand %p12645_p1, %p12884_p6 }
0x1630   : > { %12731 = dma.done.wait (!%p12642_p2), %s8598_s28, 16  }
0x1631   : > { %12733 = vsyncadd (!%p12642_p2), %s8598_s28, 4294967280  ;;  %s18593_s24 = sld [smem:[#allocation6_spill]]  ;;  %s18594_s1 = sld [smem:[#allocation5_spill]] }
0x1632   : > { %s18595_s23 = sld [smem:[#allocation7_spill]]  ;;  %s18596_s21 = smov %s12740_s22 }
0x1637   : > { %p26_p3 = scmp.ge.s32.totalorder %s18593_s24, 4   ;;  %s18597_s22 = smov %s18594_s1 }
0x1639   :  { %28 = sbr.rel (!%p26_p3) target bundleno = 7 (0x7), region = 173 }
0x1640   :  { %8602 = vsyncpa [#allocation3], 1 }
0x1641   :  { %8604 = vsyncpa [#allocation3 + $0x1], 1 }

</bundles_post_ra>
